<compile_context>
chip_gen: v5e
topology: v5e:2x2
jax: 0.10.0
libtpu: 0.0.40
codegen_flags: <defaults>
</compile_context>

<pallas_src>
import functools

import jax
import jax.numpy as jnp
import numpy as np
from jax.experimental import pallas as pl
from jax.experimental.pallas import tpu as pltpu

K = 7    # conv kernel size
PAD = 3  # conv padding

_ROLL_SIGN = None


def _pltpu_roll_sign():
    """Probe pltpu.roll's shift convention once (cached).

    Returns +1 if pltpu.roll matches jnp.roll (positive shift moves elements
    to higher indices), -1 otherwise. Falls back to +1 on any failure.
    """
    global _ROLL_SIGN
    if _ROLL_SIGN is None:
        def probe(x_ref, o_ref):
            o_ref[...] = pltpu.roll(x_ref[...], shift=1, axis=1)
        try:
            x = jnp.arange(128, dtype=jnp.int32).reshape(1, 128)
            r = pl.pallas_call(
                probe, out_shape=jax.ShapeDtypeStruct((1, 128), jnp.int32))(x)
            _ROLL_SIGN = 1 if int(r[0, 0]) == 127 else -1
        except Exception:
            _ROLL_SIGN = 1
    return _ROLL_SIGN


def _sam_kernel(x_ref, row_ref, col_ref, w_ref, o_ref, *, H, W, roll_sign):
    # x_ref:   (Nb, C, HW) input block, lane-dense flattened spatial axis
    # row_ref: (1, HW) int32 spatial row index of each lane
    # col_ref: (1, HW) int32 spatial column index of each lane
    # w_ref:   (2*K*K,) flattened conv weights in SMEM
    # o_ref:   (Nb, C, HW) output block
    nb = x_ref.shape[0]
    c_dim = x_ref.shape[1]
    hw = x_ref.shape[2]

    row = row_ref[...]            # (1, HW)
    col = col_ref[...]            # (1, HW)

    # Border-validity masks (f32 0/1) per kernel offset.
    row_ok = []
    col_ok = []
    for kk in range(K):
        d = kk - PAD
        row_ok.append(jnp.where((row + d >= 0) & (row + d < H), 1.0, 0.0))
        col_ok.append(jnp.where((col + d >= 0) & (col + d < W), 1.0, 0.0))

    # Hoist all SMEM weight reads and fold them into per-tap coefficient
    # vectors (mask * weight), shared across the batch elements of the block.
    wts = [w_ref[i] for i in range(2 * K * K)]
    coefs = []
    for c_idx in range(2):
        for kh in range(K):
            for kw in range(K):
                w_s = wts[c_idx * K * K + kh * K + kw]
                coefs.append(row_ok[kh] * col_ok[kw] * w_s)   # (1, HW) f32

    for b in range(nb):
        xb = x_ref[b]                                          # (C, HW)

        # Channel-wise max (input dtype) and mean (f32 accumulation).
        maxp = jnp.max(xb, axis=0, keepdims=True).astype(jnp.float32)
        avgp = jnp.sum(xb, axis=0, keepdims=True,
                       dtype=jnp.float32) / c_dim               # (1, HW)

        # 7x7 conv (stride 1, pad 3, no bias) as masked roll-and-accumulate
        # on the flattened spatial axis: tap (kh, kw) reads
        # flat[i + (kh-3)*W + (kw-3)], out-of-image taps are masked to zero.
        acc = jnp.zeros((1, hw), jnp.float32)
        for c_idx, plane in enumerate((maxp, avgp)):
            for kh in range(K):
                for kw in range(K):
                    off = (kh - PAD) * W + (kw - PAD)
                    if off == 0:
                        shifted = plane
                    else:
                        shifted = pltpu.roll(
                            plane, shift=(-off * roll_sign) % hw, axis=1)
                    acc = acc + shifted * coefs[c_idx * K * K + kh * K + kw]

        att = jax.nn.sigmoid(acc)                              # (1, HW) f32
        # Final multiply in the input dtype; only the attention map is cast.
        o_ref[b] = att.astype(xb.dtype) * xb                   # (C, HW)


def sam_forward(x, w, *, block_bytes=2 * 1024 * 1024, max_batch_block=8):
    """x: (N, C, H, W), w: (1, 2, 7, 7) conv weight (bias=False)."""
    N, C, H, W = x.shape
    HW = H * W
    itemsize = x.dtype.itemsize

    x2 = x.reshape(N, C, HW)                       # lane-dense spatial axis
    w_flat = w.reshape(-1).astype(jnp.float32)     # (2*K*K,) -> SMEM

    idx = np.arange(HW, dtype=np.int32)
    row_idx = jnp.asarray((idx // W).reshape(1, HW))
    col_idx = jnp.asarray((idx % W).reshape(1, HW))

    # Pack several batch elements per grid step so each DMA block is sizeable.
    per_item = C * HW * itemsize
    nb = 1
    for d in range(1, N + 1):
        if N % d == 0 and d <= max_batch_block and d * per_item <= block_bytes:
            nb = d
    grid = (N // nb,)

    kernel = functools.partial(_sam_kernel, H=H, W=W,
                               roll_sign=_pltpu_roll_sign())

    cost = pl.CostEstimate(
        flops=int(N * HW * (3 * C + 6 * K * K)),
        transcendentals=int(N * HW),
        bytes_accessed=int(2 * N * C * HW * itemsize),
    )

    out2 = pl.pallas_call(
        kernel,
        out_shape=jax.ShapeDtypeStruct((N, C, HW), x.dtype),
        grid_spec=pltpu.PrefetchScalarGridSpec(
            num_scalar_prefetch=0,
            grid=grid,
            in_specs=[
                pl.BlockSpec((nb, C, HW), lambda n: (n, 0, 0)),
                pl.BlockSpec((1, HW), lambda n: (0, 0)),
                pl.BlockSpec((1, HW), lambda n: (0, 0)),
                pl.BlockSpec(memory_space=pltpu.MemorySpace.SMEM),
            ],
            out_specs=pl.BlockSpec((nb, C, HW), lambda n: (n, 0, 0)),
        ),
        compiler_params=pltpu.CompilerParams(
            dimension_semantics=("parallel",),
            vmem_limit_bytes=32 * 1024 * 1024,
        ),
        cost_estimate=cost,
    )(x2, row_idx, col_idx, w_flat)

    return out2.reshape(N, C, H, W)


def sam_reference(x, w):
    """Pure-JAX reference matching the PyTorch forward."""
    max_out = jnp.max(x, axis=1, keepdims=True)
    avg_out = jnp.mean(x, axis=1, keepdims=True)
    concat = jnp.concatenate([max_out, avg_out], axis=1)
    att = jax.lax.conv_general_dilated(
        concat, w, window_strides=(1, 1),
        padding=((PAD, PAD), (PAD, PAD)),
        dimension_numbers=("NCHW", "OIHW", "NCHW"))
    att = jax.nn.sigmoid(att)
    return att * x


if __name__ == "__main__":
    key = jax.random.PRNGKey(0)
    kx, kw = jax.random.split(key)

    N, C, H, W = 2, 4, 16, 16
    x = jax.random.normal(kx, (N, C, H, W), dtype=jnp.float32)

    # Deterministic conv weight init (PyTorch-style uniform bound), bias=False.
    fan_in = 2 * K * K
    bound = 1.0 / np.sqrt(fan_in)
    w = jax.random.uniform(kw, (1, 2, K, K), dtype=jnp.float32,
                           minval=-bound, maxval=bound)

    out = sam_forward(x, w)
    out = jax.block_until_ready(out)

    ref = jax.block_until_ready(sam_reference(x, w))
    np.testing.assert_allclose(np.asarray(out), np.asarray(ref),
                               rtol=1e-5, atol=1e-5)
    print("KERNEL_OK")
</pallas_src>

<mosaic_0001>
module attributes {stable_mosaic.version = 11 : i64} {
  func.func @probe(%arg0: memref<1x128xi32, #tpu.memory_space<vmem>>, %arg1: memref<1x128xi32, #tpu.memory_space<vmem>>) attributes {dimension_semantics = [], scalar_prefetch = 0 : i64, scratch_operands = 0 : i64, tpu.core_type = #tpu.core_type<tc>} {
    %c0 = arith.constant 0 : index
    %c0_0 = arith.constant 0 : index
    %0 = vector.load %arg0[%c0, %c0_0] : memref<1x128xi32, #tpu.memory_space<vmem>>, vector<1x128xi32>
    %c1_i32 = arith.constant 1 : i32
    %1 = tpu.dynamic_rotate %0 by %c1_i32 dim 1 : vector<1x128xi32>, i32 -> vector<1x128xi32>
    %c0_1 = arith.constant 0 : index
    %c0_2 = arith.constant 0 : index
    %2 = vector.load %arg1[%c0_1, %c0_2] : memref<1x128xi32, #tpu.memory_space<vmem>>, vector<1x128xi32>
    tpu.vector_store %arg1[%c0_1, %c0_2], %1 {strides = array<i32>} : memref<1x128xi32, #tpu.memory_space<vmem>>, vector<1x128xi32>,
    return
  }
}

module attributes {stable_mosaic.version = 11 : i64} {
  func.func @_sam_kernel(%arg0: i32, %arg1: memref<2x4x256xf32, #tpu.memory_space<vmem>>, %arg2: memref<1x256xi32, #tpu.memory_space<vmem>>, %arg3: memref<1x256xi32, #tpu.memory_space<vmem>>, %arg4: memref<98xf32, #tpu.memory_space<smem>>, %arg5: memref<2x4x256xf32, #tpu.memory_space<vmem>>) attributes {dimension_semantics = [#tpu.dimension_semantics<parallel>], iteration_bounds = array<i64: 1>, scalar_prefetch = 0 : i64, scratch_operands = 0 : i64, tpu.core_type = #tpu.core_type<tc>, window_params = [{transform_indices = @transform_0, window_bounds = array<i64: 2, 4, 256>}, {pipeline_mode = #tpu.pipeline_mode<synchronous>, transform_indices = @transform_1, window_bounds = array<i64: 1, 256>}, {pipeline_mode = #tpu.pipeline_mode<synchronous>, transform_indices = @transform_2, window_bounds = array<i64: 1, 256>}, {transform_indices = @transform_3, window_bounds = array<i64: 98>}, {transform_indices = @transform_4, window_bounds = array<i64: 2, 4, 256>}]} {
    %c0 = arith.constant 0 : index
    %c0_0 = arith.constant 0 : index
    %0 = vector.load %arg2[%c0, %c0_0] : memref<1x256xi32, #tpu.memory_space<vmem>>, vector<1x256xi32>
    %c0_1 = arith.constant 0 : index
    %c0_2 = arith.constant 0 : index
    %1 = vector.load %arg3[%c0_1, %c0_2] : memref<1x256xi32, #tpu.memory_space<vmem>>, vector<1x256xi32>
    %c-3_i32 = arith.constant -3 : i32
    %2 = vector.broadcast %c-3_i32 : i32 to vector<1x256xi32>
    %3 = arith.addi %0, %2 : vector<1x256xi32>
    %c0_i32 = arith.constant 0 : i32
    %4 = vector.broadcast %c0_i32 : i32 to vector<1x256xi32>
    %5 = arith.cmpi sge, %3, %4 : vector<1x256xi32>
    %c-3_i32_3 = arith.constant -3 : i32
    %6 = vector.broadcast %c-3_i32_3 : i32 to vector<1x256xi32>
    %7 = arith.addi %0, %6 : vector<1x256xi32>
    %c16_i32 = arith.constant 16 : i32
    %8 = vector.broadcast %c16_i32 : i32 to vector<1x256xi32>
    %9 = arith.cmpi slt, %7, %8 : vector<1x256xi32>
    %10 = arith.andi %5, %9 : vector<1x256xi1>
    %cst = arith.constant 1.000000e+00 : f32
    %cst_4 = arith.constant 0.000000e+00 : f32
    %11 = vector.broadcast %cst : f32 to vector<1x256xf32>
    %12 = vector.broadcast %cst_4 : f32 to vector<1x256xf32>
    %13 = arith.select %10, %11, %12 : vector<1x256xi1>, vector<1x256xf32>
    %c-3_i32_5 = arith.constant -3 : i32
    %14 = vector.broadcast %c-3_i32_5 : i32 to vector<1x256xi32>
    %15 = arith.addi %1, %14 : vector<1x256xi32>
    %c0_i32_6 = arith.constant 0 : i32
    %16 = vector.broadcast %c0_i32_6 : i32 to vector<1x256xi32>
    %17 = arith.cmpi sge, %15, %16 : vector<1x256xi32>
    %c-3_i32_7 = arith.constant -3 : i32
    %18 = vector.broadcast %c-3_i32_7 : i32 to vector<1x256xi32>
    %19 = arith.addi %1, %18 : vector<1x256xi32>
    %c16_i32_8 = arith.constant 16 : i32
    %20 = vector.broadcast %c16_i32_8 : i32 to vector<1x256xi32>
    %21 = arith.cmpi slt, %19, %20 : vector<1x256xi32>
    %22 = arith.andi %17, %21 : vector<1x256xi1>
    %cst_9 = arith.constant 1.000000e+00 : f32
    %cst_10 = arith.constant 0.000000e+00 : f32
    %23 = vector.broadcast %cst_9 : f32 to vector<1x256xf32>
    %24 = vector.broadcast %cst_10 : f32 to vector<1x256xf32>
    %25 = arith.select %22, %23, %24 : vector<1x256xi1>, vector<1x256xf32>
    %c-2_i32 = arith.constant -2 : i32
    %26 = vector.broadcast %c-2_i32 : i32 to vector<1x256xi32>
    %27 = arith.addi %0, %26 : vector<1x256xi32>
    %c0_i32_11 = arith.constant 0 : i32
    %28 = vector.broadcast %c0_i32_11 : i32 to vector<1x256xi32>
    %29 = arith.cmpi sge, %27, %28 : vector<1x256xi32>
    %c-2_i32_12 = arith.constant -2 : i32
    %30 = vector.broadcast %c-2_i32_12 : i32 to vector<1x256xi32>
    %31 = arith.addi %0, %30 : vector<1x256xi32>
    %c16_i32_13 = arith.constant 16 : i32
    %32 = vector.broadcast %c16_i32_13 : i32 to vector<1x256xi32>
    %33 = arith.cmpi slt, %31, %32 : vector<1x256xi32>
    %34 = arith.andi %29, %33 : vector<1x256xi1>
    %cst_14 = arith.constant 1.000000e+00 : f32
    %cst_15 = arith.constant 0.000000e+00 : f32
    %35 = vector.broadcast %cst_14 : f32 to vector<1x256xf32>
    %36 = vector.broadcast %cst_15 : f32 to vector<1x256xf32>
    %37 = arith.select %34, %35, %36 : vector<1x256xi1>, vector<1x256xf32>
    %c-2_i32_16 = arith.constant -2 : i32
    %38 = vector.broadcast %c-2_i32_16 : i32 to vector<1x256xi32>
    %39 = arith.addi %1, %38 : vector<1x256xi32>
    %c0_i32_17 = arith.constant 0 : i32
    %40 = vector.broadcast %c0_i32_17 : i32 to vector<1x256xi32>
    %41 = arith.cmpi sge, %39, %40 : vector<1x256xi32>
    %c-2_i32_18 = arith.constant -2 : i32
    %42 = vector.broadcast %c-2_i32_18 : i32 to vector<1x256xi32>
    %43 = arith.addi %1, %42 : vector<1x256xi32>
    %c16_i32_19 = arith.constant 16 : i32
    %44 = vector.broadcast %c16_i32_19 : i32 to vector<1x256xi32>
    %45 = arith.cmpi slt, %43, %44 : vector<1x256xi32>
    %46 = arith.andi %41, %45 : vector<1x256xi1>
    %cst_20 = arith.constant 1.000000e+00 : f32
    %cst_21 = arith.constant 0.000000e+00 : f32
    %47 = vector.broadcast %cst_20 : f32 to vector<1x256xf32>
    %48 = vector.broadcast %cst_21 : f32 to vector<1x256xf32>
    %49 = arith.select %46, %47, %48 : vector<1x256xi1>, vector<1x256xf32>
    %c-1_i32 = arith.constant -1 : i32
    %50 = vector.broadcast %c-1_i32 : i32 to vector<1x256xi32>
    %51 = arith.addi %0, %50 : vector<1x256xi32>
    %c0_i32_22 = arith.constant 0 : i32
    %52 = vector.broadcast %c0_i32_22 : i32 to vector<1x256xi32>
    %53 = arith.cmpi sge, %51, %52 : vector<1x256xi32>
    %c-1_i32_23 = arith.constant -1 : i32
    %54 = vector.broadcast %c-1_i32_23 : i32 to vector<1x256xi32>
    %55 = arith.addi %0, %54 : vector<1x256xi32>
    %c16_i32_24 = arith.constant 16 : i32
    %56 = vector.broadcast %c16_i32_24 : i32 to vector<1x256xi32>
    %57 = arith.cmpi slt, %55, %56 : vector<1x256xi32>
    %58 = arith.andi %53, %57 : vector<1x256xi1>
    %cst_25 = arith.constant 1.000000e+00 : f32
    %cst_26 = arith.constant 0.000000e+00 : f32
    %59 = vector.broadcast %cst_25 : f32 to vector<1x256xf32>
    %60 = vector.broadcast %cst_26 : f32 to vector<1x256xf32>
    %61 = arith.select %58, %59, %60 : vector<1x256xi1>, vector<1x256xf32>
    %c-1_i32_27 = arith.constant -1 : i32
    %62 = vector.broadcast %c-1_i32_27 : i32 to vector<1x256xi32>
    %63 = arith.addi %1, %62 : vector<1x256xi32>
    %c0_i32_28 = arith.constant 0 : i32
    %64 = vector.broadcast %c0_i32_28 : i32 to vector<1x256xi32>
    %65 = arith.cmpi sge, %63, %64 : vector<1x256xi32>
    %c-1_i32_29 = arith.constant -1 : i32
    %66 = vector.broadcast %c-1_i32_29 : i32 to vector<1x256xi32>
    %67 = arith.addi %1, %66 : vector<1x256xi32>
    %c16_i32_30 = arith.constant 16 : i32
    %68 = vector.broadcast %c16_i32_30 : i32 to vector<1x256xi32>
    %69 = arith.cmpi slt, %67, %68 : vector<1x256xi32>
    %70 = arith.andi %65, %69 : vector<1x256xi1>
    %cst_31 = arith.constant 1.000000e+00 : f32
    %cst_32 = arith.constant 0.000000e+00 : f32
    %71 = vector.broadcast %cst_31 : f32 to vector<1x256xf32>
    %72 = vector.broadcast %cst_32 : f32 to vector<1x256xf32>
    %73 = arith.select %70, %71, %72 : vector<1x256xi1>, vector<1x256xf32>
    %c0_i32_33 = arith.constant 0 : i32
    %74 = vector.broadcast %c0_i32_33 : i32 to vector<1x256xi32>
    %75 = arith.addi %0, %74 : vector<1x256xi32>
    %c0_i32_34 = arith.constant 0 : i32
    %76 = vector.broadcast %c0_i32_34 : i32 to vector<1x256xi32>
    %77 = arith.cmpi sge, %75, %76 : vector<1x256xi32>
    %c0_i32_35 = arith.constant 0 : i32
    %78 = vector.broadcast %c0_i32_35 : i32 to vector<1x256xi32>
    %79 = arith.addi %0, %78 : vector<1x256xi32>
    %c16_i32_36 = arith.constant 16 : i32
    %80 = vector.broadcast %c16_i32_36 : i32 to vector<1x256xi32>
    %81 = arith.cmpi slt, %79, %80 : vector<1x256xi32>
    %82 = arith.andi %77, %81 : vector<1x256xi1>
    %cst_37 = arith.constant 1.000000e+00 : f32
    %cst_38 = arith.constant 0.000000e+00 : f32
    %83 = vector.broadcast %cst_37 : f32 to vector<1x256xf32>
    %84 = vector.broadcast %cst_38 : f32 to vector<1x256xf32>
    %85 = arith.select %82, %83, %84 : vector<1x256xi1>, vector<1x256xf32>
    %c0_i32_39 = arith.constant 0 : i32
    %86 = vector.broadcast %c0_i32_39 : i32 to vector<1x256xi32>
    %87 = arith.addi %1, %86 : vector<1x256xi32>
    %c0_i32_40 = arith.constant 0 : i32
    %88 = vector.broadcast %c0_i32_40 : i32 to vector<1x256xi32>
    %89 = arith.cmpi sge, %87, %88 : vector<1x256xi32>
    %c0_i32_41 = arith.constant 0 : i32
    %90 = vector.broadcast %c0_i32_41 : i32 to vector<1x256xi32>
    %91 = arith.addi %1, %90 : vector<1x256xi32>
    %c16_i32_42 = arith.constant 16 : i32
    %92 = vector.broadcast %c16_i32_42 : i32 to vector<1x256xi32>
    %93 = arith.cmpi slt, %91, %92 : vector<1x256xi32>
    %94 = arith.andi %89, %93 : vector<1x256xi1>
    %cst_43 = arith.constant 1.000000e+00 : f32
    %cst_44 = arith.constant 0.000000e+00 : f32
    %95 = vector.broadcast %cst_43 : f32 to vector<1x256xf32>
    %96 = vector.broadcast %cst_44 : f32 to vector<1x256xf32>
    %97 = arith.select %94, %95, %96 : vector<1x256xi1>, vector<1x256xf32>
    %c1_i32 = arith.constant 1 : i32
    %98 = vector.broadcast %c1_i32 : i32 to vector<1x256xi32>
    %99 = arith.addi %0, %98 : vector<1x256xi32>
    %c0_i32_45 = arith.constant 0 : i32
    %100 = vector.broadcast %c0_i32_45 : i32 to vector<1x256xi32>
    %101 = arith.cmpi sge, %99, %100 : vector<1x256xi32>
    %c1_i32_46 = arith.constant 1 : i32
    %102 = vector.broadcast %c1_i32_46 : i32 to vector<1x256xi32>
    %103 = arith.addi %0, %102 : vector<1x256xi32>
    %c16_i32_47 = arith.constant 16 : i32
    %104 = vector.broadcast %c16_i32_47 : i32 to vector<1x256xi32>
    %105 = arith.cmpi slt, %103, %104 : vector<1x256xi32>
    %106 = arith.andi %101, %105 : vector<1x256xi1>
    %cst_48 = arith.constant 1.000000e+00 : f32
    %cst_49 = arith.constant 0.000000e+00 : f32
    %107 = vector.broadcast %cst_48 : f32 to vector<1x256xf32>
    %108 = vector.broadcast %cst_49 : f32 to vector<1x256xf32>
    %109 = arith.select %106, %107, %108 : vector<1x256xi1>, vector<1x256xf32>
    %c1_i32_50 = arith.constant 1 : i32
    %110 = vector.broadcast %c1_i32_50 : i32 to vector<1x256xi32>
    %111 = arith.addi %1, %110 : vector<1x256xi32>
    %c0_i32_51 = arith.constant 0 : i32
    %112 = vector.broadcast %c0_i32_51 : i32 to vector<1x256xi32>
    %113 = arith.cmpi sge, %111, %112 : vector<1x256xi32>
    %c1_i32_52 = arith.constant 1 : i32
    %114 = vector.broadcast %c1_i32_52 : i32 to vector<1x256xi32>
    %115 = arith.addi %1, %114 : vector<1x256xi32>
    %c16_i32_53 = arith.constant 16 : i32
    %116 = vector.broadcast %c16_i32_53 : i32 to vector<1x256xi32>
    %117 = arith.cmpi slt, %115, %116 : vector<1x256xi32>
    %118 = arith.andi %113, %117 : vector<1x256xi1>
    %cst_54 = arith.constant 1.000000e+00 : f32
    %cst_55 = arith.constant 0.000000e+00 : f32
    %119 = vector.broadcast %cst_54 : f32 to vector<1x256xf32>
    %120 = vector.broadcast %cst_55 : f32 to vector<1x256xf32>
    %121 = arith.select %118, %119, %120 : vector<1x256xi1>, vector<1x256xf32>
    %c2_i32 = arith.constant 2 : i32
    %122 = vector.broadcast %c2_i32 : i32 to vector<1x256xi32>
    %123 = arith.addi %0, %122 : vector<1x256xi32>
    %c0_i32_56 = arith.constant 0 : i32
    %124 = vector.broadcast %c0_i32_56 : i32 to vector<1x256xi32>
    %125 = arith.cmpi sge, %123, %124 : vector<1x256xi32>
    %c2_i32_57 = arith.constant 2 : i32
    %126 = vector.broadcast %c2_i32_57 : i32 to vector<1x256xi32>
    %127 = arith.addi %0, %126 : vector<1x256xi32>
    %c16_i32_58 = arith.constant 16 : i32
    %128 = vector.broadcast %c16_i32_58 : i32 to vector<1x256xi32>
    %129 = arith.cmpi slt, %127, %128 : vector<1x256xi32>
    %130 = arith.andi %125, %129 : vector<1x256xi1>
    %cst_59 = arith.constant 1.000000e+00 : f32
    %cst_60 = arith.constant 0.000000e+00 : f32
    %131 = vector.broadcast %cst_59 : f32 to vector<1x256xf32>
    %132 = vector.broadcast %cst_60 : f32 to vector<1x256xf32>
    %133 = arith.select %130, %131, %132 : vector<1x256xi1>, vector<1x256xf32>
    %c2_i32_61 = arith.constant 2 : i32
    %134 = vector.broadcast %c2_i32_61 : i32 to vector<1x256xi32>
    %135 = arith.addi %1, %134 : vector<1x256xi32>
    %c0_i32_62 = arith.constant 0 : i32
    %136 = vector.broadcast %c0_i32_62 : i32 to vector<1x256xi32>
    %137 = arith.cmpi sge, %135, %136 : vector<1x256xi32>
    %c2_i32_63 = arith.constant 2 : i32
    %138 = vector.broadcast %c2_i32_63 : i32 to vector<1x256xi32>
    %139 = arith.addi %1, %138 : vector<1x256xi32>
    %c16_i32_64 = arith.constant 16 : i32
    %140 = vector.broadcast %c16_i32_64 : i32 to vector<1x256xi32>
    %141 = arith.cmpi slt, %139, %140 : vector<1x256xi32>
    %142 = arith.andi %137, %141 : vector<1x256xi1>
    %cst_65 = arith.constant 1.000000e+00 : f32
    %cst_66 = arith.constant 0.000000e+00 : f32
    %143 = vector.broadcast %cst_65 : f32 to vector<1x256xf32>
    %144 = vector.broadcast %cst_66 : f32 to vector<1x256xf32>
    %145 = arith.select %142, %143, %144 : vector<1x256xi1>, vector<1x256xf32>
    %c3_i32 = arith.constant 3 : i32
    %146 = vector.broadcast %c3_i32 : i32 to vector<1x256xi32>
    %147 = arith.addi %0, %146 : vector<1x256xi32>
    %c0_i32_67 = arith.constant 0 : i32
    %148 = vector.broadcast %c0_i32_67 : i32 to vector<1x256xi32>
    %149 = arith.cmpi sge, %147, %148 : vector<1x256xi32>
    %c3_i32_68 = arith.constant 3 : i32
    %150 = vector.broadcast %c3_i32_68 : i32 to vector<1x256xi32>
    %151 = arith.addi %0, %150 : vector<1x256xi32>
    %c16_i32_69 = arith.constant 16 : i32
    %152 = vector.broadcast %c16_i32_69 : i32 to vector<1x256xi32>
    %153 = arith.cmpi slt, %151, %152 : vector<1x256xi32>
    %154 = arith.andi %149, %153 : vector<1x256xi1>
    %cst_70 = arith.constant 1.000000e+00 : f32
    %cst_71 = arith.constant 0.000000e+00 : f32
    %155 = vector.broadcast %cst_70 : f32 to vector<1x256xf32>
    %156 = vector.broadcast %cst_71 : f32 to vector<1x256xf32>
    %157 = arith.select %154, %155, %156 : vector<1x256xi1>, vector<1x256xf32>
    %c3_i32_72 = arith.constant 3 : i32
    %158 = vector.broadcast %c3_i32_72 : i32 to vector<1x256xi32>
    %159 = arith.addi %1, %158 : vector<1x256xi32>
    %c0_i32_73 = arith.constant 0 : i32
    %160 = vector.broadcast %c0_i32_73 : i32 to vector<1x256xi32>
    %161 = arith.cmpi sge, %159, %160 : vector<1x256xi32>
    %c3_i32_74 = arith.constant 3 : i32
    %162 = vector.broadcast %c3_i32_74 : i32 to vector<1x256xi32>
    %163 = arith.addi %1, %162 : vector<1x256xi32>
    %c16_i32_75 = arith.constant 16 : i32
    %164 = vector.broadcast %c16_i32_75 : i32 to vector<1x256xi32>
    %165 = arith.cmpi slt, %163, %164 : vector<1x256xi32>
    %166 = arith.andi %161, %165 : vector<1x256xi1>
    %cst_76 = arith.constant 1.000000e+00 : f32
    %cst_77 = arith.constant 0.000000e+00 : f32
    %167 = vector.broadcast %cst_76 : f32 to vector<1x256xf32>
    %168 = vector.broadcast %cst_77 : f32 to vector<1x256xf32>
    %169 = arith.select %166, %167, %168 : vector<1x256xi1>, vector<1x256xf32>
    %c0_78 = arith.constant 0 : index
    %170 = memref.load %arg4[%c0_78] : memref<98xf32, #tpu.memory_space<smem>>
    %c1 = arith.constant 1 : index
    %171 = memref.load %arg4[%c1] : memref<98xf32, #tpu.memory_space<smem>>
    %c2 = arith.constant 2 : index
    %172 = memref.load %arg4[%c2] : memref<98xf32, #tpu.memory_space<smem>>
    %c3 = arith.constant 3 : index
    %173 = memref.load %arg4[%c3] : memref<98xf32, #tpu.memory_space<smem>>
    %c4 = arith.constant 4 : index
    %174 = memref.load %arg4[%c4] : memref<98xf32, #tpu.memory_space<smem>>
    %c5 = arith.constant 5 : index
    %175 = memref.load %arg4[%c5] : memref<98xf32, #tpu.memory_space<smem>>
    %c6 = arith.constant 6 : index
    %176 = memref.load %arg4[%c6] : memref<98xf32, #tpu.memory_space<smem>>
    %c7 = arith.constant 7 : index
    %177 = memref.load %arg4[%c7] : memref<98xf32, #tpu.memory_space<smem>>
    %c8 = arith.constant 8 : index
    %178 = memref.load %arg4[%c8] : memref<98xf32, #tpu.memory_space<smem>>
    %c9 = arith.constant 9 : index
    %179 = memref.load %arg4[%c9] : memref<98xf32, #tpu.memory_space<smem>>
    %c10 = arith.constant 10 : index
    %180 = memref.load %arg4[%c10] : memref<98xf32, #tpu.memory_space<smem>>
    %c11 = arith.constant 11 : index
    %181 = memref.load %arg4[%c11] : memref<98xf32, #tpu.memory_space<smem>>
    %c12 = arith.constant 12 : index
    %182 = memref.load %arg4[%c12] : memref<98xf32, #tpu.memory_space<smem>>
    %c13 = arith.constant 13 : index
    %183 = memref.load %arg4[%c13] : memref<98xf32, #tpu.memory_space<smem>>
    %c14 = arith.constant 14 : index
    %184 = memref.load %arg4[%c14] : memref<98xf32, #tpu.memory_space<smem>>
    %c15 = arith.constant 15 : index
    %185 = memref.load %arg4[%c15] : memref<98xf32, #tpu.memory_space<smem>>
    %c16 = arith.constant 16 : index
    %186 = memref.load %arg4[%c16] : memref<98xf32, #tpu.memory_space<smem>>
    %c17 = arith.constant 17 : index
    %187 = memref.load %arg4[%c17] : memref<98xf32, #tpu.memory_space<smem>>
    %c18 = arith.constant 18 : index
    %188 = memref.load %arg4[%c18] : memref<98xf32, #tpu.memory_space<smem>>
    %c19 = arith.constant 19 : index
    %189 = memref.load %arg4[%c19] : memref<98xf32, #tpu.memory_space<smem>>
    %c20 = arith.constant 20 : index
    %190 = memref.load %arg4[%c20] : memref<98xf32, #tpu.memory_space<smem>>
    %c21 = arith.constant 21 : index
    %191 = memref.load %arg4[%c21] : memref<98xf32, #tpu.memory_space<smem>>
    %c22 = arith.constant 22 : index
    %192 = memref.load %arg4[%c22] : memref<98xf32, #tpu.memory_space<smem>>
    %c23 = arith.constant 23 : index
    %193 = memref.load %arg4[%c23] : memref<98xf32, #tpu.memory_space<smem>>
    %c24 = arith.constant 24 : index
    %194 = memref.load %arg4[%c24] : memref<98xf32, #tpu.memory_space<smem>>
    %c25 = arith.constant 25 : index
    %195 = memref.load %arg4[%c25] : memref<98xf32, #tpu.memory_space<smem>>
    %c26 = arith.constant 26 : index
    %196 = memref.load %arg4[%c26] : memref<98xf32, #tpu.memory_space<smem>>
    %c27 = arith.constant 27 : index
    %197 = memref.load %arg4[%c27] : memref<98xf32, #tpu.memory_space<smem>>
    %c28 = arith.constant 28 : index
    %198 = memref.load %arg4[%c28] : memref<98xf32, #tpu.memory_space<smem>>
    %c29 = arith.constant 29 : index
    %199 = memref.load %arg4[%c29] : memref<98xf32, #tpu.memory_space<smem>>
    %c30 = arith.constant 30 : index
    %200 = memref.load %arg4[%c30] : memref<98xf32, #tpu.memory_space<smem>>
    %c31 = arith.constant 31 : index
    %201 = memref.load %arg4[%c31] : memref<98xf32, #tpu.memory_space<smem>>
    %c32 = arith.constant 32 : index
    %202 = memref.load %arg4[%c32] : memref<98xf32, #tpu.memory_space<smem>>
    %c33 = arith.constant 33 : index
    %203 = memref.load %arg4[%c33] : memref<98xf32, #tpu.memory_space<smem>>
    %c34 = arith.constant 34 : index
    %204 = memref.load %arg4[%c34] : memref<98xf32, #tpu.memory_space<smem>>
    %c35 = arith.constant 35 : index
    %205 = memref.load %arg4[%c35] : memref<98xf32, #tpu.memory_space<smem>>
    %c36 = arith.constant 36 : index
    %206 = memref.load %arg4[%c36] : memref<98xf32, #tpu.memory_space<smem>>
    %c37 = arith.constant 37 : index
    %207 = memref.load %arg4[%c37] : memref<98xf32, #tpu.memory_space<smem>>
    %c38 = arith.constant 38 : index
    %208 = memref.load %arg4[%c38] : memref<98xf32, #tpu.memory_space<smem>>
    %c39 = arith.constant 39 : index
    %209 = memref.load %arg4[%c39] : memref<98xf32, #tpu.memory_space<smem>>
    %c40 = arith.constant 40 : index
    %210 = memref.load %arg4[%c40] : memref<98xf32, #tpu.memory_space<smem>>
    %c41 = arith.constant 41 : index
    %211 = memref.load %arg4[%c41] : memref<98xf32, #tpu.memory_space<smem>>
    %c42 = arith.constant 42 : index
    %212 = memref.load %arg4[%c42] : memref<98xf32, #tpu.memory_space<smem>>
    %c43 = arith.constant 43 : index
    %213 = memref.load %arg4[%c43] : memref<98xf32, #tpu.memory_space<smem>>
    %c44 = arith.constant 44 : index
    %214 = memref.load %arg4[%c44] : memref<98xf32, #tpu.memory_space<smem>>
    %c45 = arith.constant 45 : index
    %215 = memref.load %arg4[%c45] : memref<98xf32, #tpu.memory_space<smem>>
    %c46 = arith.constant 46 : index
    %216 = memref.load %arg4[%c46] : memref<98xf32, #tpu.memory_space<smem>>
    %c47 = arith.constant 47 : index
    %217 = memref.load %arg4[%c47] : memref<98xf32, #tpu.memory_space<smem>>
    %c48 = arith.constant 48 : index
    %218 = memref.load %arg4[%c48] : memref<98xf32, #tpu.memory_space<smem>>
    %c49 = arith.constant 49 : index
    %219 = memref.load %arg4[%c49] : memref<98xf32, #tpu.memory_space<smem>>
    %c50 = arith.constant 50 : index
    %220 = memref.load %arg4[%c50] : memref<98xf32, #tpu.memory_space<smem>>
    %c51 = arith.constant 51 : index
    %221 = memref.load %arg4[%c51] : memref<98xf32, #tpu.memory_space<smem>>
    %c52 = arith.constant 52 : index
    %222 = memref.load %arg4[%c52] : memref<98xf32, #tpu.memory_space<smem>>
    %c53 = arith.constant 53 : index
    %223 = memref.load %arg4[%c53] : memref<98xf32, #tpu.memory_space<smem>>
    %c54 = arith.constant 54 : index
    %224 = memref.load %arg4[%c54] : memref<98xf32, #tpu.memory_space<smem>>
    %c55 = arith.constant 55 : index
    %225 = memref.load %arg4[%c55] : memref<98xf32, #tpu.memory_space<smem>>
    %c56 = arith.constant 56 : index
    %226 = memref.load %arg4[%c56] : memref<98xf32, #tpu.memory_space<smem>>
    %c57 = arith.constant 57 : index
    %227 = memref.load %arg4[%c57] : memref<98xf32, #tpu.memory_space<smem>>
    %c58 = arith.constant 58 : index
    %228 = memref.load %arg4[%c58] : memref<98xf32, #tpu.memory_space<smem>>
    %c59 = arith.constant 59 : index
    %229 = memref.load %arg4[%c59] : memref<98xf32, #tpu.memory_space<smem>>
    %c60 = arith.constant 60 : index
    %230 = memref.load %arg4[%c60] : memref<98xf32, #tpu.memory_space<smem>>
    %c61 = arith.constant 61 : index
    %231 = memref.load %arg4[%c61] : memref<98xf32, #tpu.memory_space<smem>>
    %c62 = arith.constant 62 : index
    %232 = memref.load %arg4[%c62] : memref<98xf32, #tpu.memory_space<smem>>
    %c63 = arith.constant 63 : index
    %233 = memref.load %arg4[%c63] : memref<98xf32, #tpu.memory_space<smem>>
    %c64 = arith.constant 64 : index
    %234 = memref.load %arg4[%c64] : memref<98xf32, #tpu.memory_space<smem>>
    %c65 = arith.constant 65 : index
    %235 = memref.load %arg4[%c65] : memref<98xf32, #tpu.memory_space<smem>>
    %c66 = arith.constant 66 : index
    %236 = memref.load %arg4[%c66] : memref<98xf32, #tpu.memory_space<smem>>
    %c67 = arith.constant 67 : index
    %237 = memref.load %arg4[%c67] : memref<98xf32, #tpu.memory_space<smem>>
    %c68 = arith.constant 68 : index
    %238 = memref.load %arg4[%c68] : memref<98xf32, #tpu.memory_space<smem>>
    %c69 = arith.constant 69 : index
    %239 = memref.load %arg4[%c69] : memref<98xf32, #tpu.memory_space<smem>>
    %c70 = arith.constant 70 : index
    %240 = memref.load %arg4[%c70] : memref<98xf32, #tpu.memory_space<smem>>
    %c71 = arith.constant 71 : index
    %241 = memref.load %arg4[%c71] : memref<98xf32, #tpu.memory_space<smem>>
    %c72 = arith.constant 72 : index
    %242 = memref.load %arg4[%c72] : memref<98xf32, #tpu.memory_space<smem>>
    %c73 = arith.constant 73 : index
    %243 = memref.load %arg4[%c73] : memref<98xf32, #tpu.memory_space<smem>>
    %c74 = arith.constant 74 : index
    %244 = memref.load %arg4[%c74] : memref<98xf32, #tpu.memory_space<smem>>
    %c75 = arith.constant 75 : index
    %245 = memref.load %arg4[%c75] : memref<98xf32, #tpu.memory_space<smem>>
    %c76 = arith.constant 76 : index
    %246 = memref.load %arg4[%c76] : memref<98xf32, #tpu.memory_space<smem>>
    %c77 = arith.constant 77 : index
    %247 = memref.load %arg4[%c77] : memref<98xf32, #tpu.memory_space<smem>>
    %c78 = arith.constant 78 : index
    %248 = memref.load %arg4[%c78] : memref<98xf32, #tpu.memory_space<smem>>
    %c79 = arith.constant 79 : index
    %249 = memref.load %arg4[%c79] : memref<98xf32, #tpu.memory_space<smem>>
    %c80 = arith.constant 80 : index
    %250 = memref.load %arg4[%c80] : memref<98xf32, #tpu.memory_space<smem>>
    %c81 = arith.constant 81 : index
    %251 = memref.load %arg4[%c81] : memref<98xf32, #tpu.memory_space<smem>>
    %c82 = arith.constant 82 : index
    %252 = memref.load %arg4[%c82] : memref<98xf32, #tpu.memory_space<smem>>
    %c83 = arith.constant 83 : index
    %253 = memref.load %arg4[%c83] : memref<98xf32, #tpu.memory_space<smem>>
    %c84 = arith.constant 84 : index
    %254 = memref.load %arg4[%c84] : memref<98xf32, #tpu.memory_space<smem>>
    %c85 = arith.constant 85 : index
    %255 = memref.load %arg4[%c85] : memref<98xf32, #tpu.memory_space<smem>>
    %c86 = arith.constant 86 : index
    %256 = memref.load %arg4[%c86] : memref<98xf32, #tpu.memory_space<smem>>
    %c87 = arith.constant 87 : index
    %257 = memref.load %arg4[%c87] : memref<98xf32, #tpu.memory_space<smem>>
    %c88 = arith.constant 88 : index
    %258 = memref.load %arg4[%c88] : memref<98xf32, #tpu.memory_space<smem>>
    %c89 = arith.constant 89 : index
    %259 = memref.load %arg4[%c89] : memref<98xf32, #tpu.memory_space<smem>>
    %c90 = arith.constant 90 : index
    %260 = memref.load %arg4[%c90] : memref<98xf32, #tpu.memory_space<smem>>
    %c91 = arith.constant 91 : index
    %261 = memref.load %arg4[%c91] : memref<98xf32, #tpu.memory_space<smem>>
    %c92 = arith.constant 92 : index
    %262 = memref.load %arg4[%c92] : memref<98xf32, #tpu.memory_space<smem>>
    %c93 = arith.constant 93 : index
    %263 = memref.load %arg4[%c93] : memref<98xf32, #tpu.memory_space<smem>>
    %c94 = arith.constant 94 : index
    %264 = memref.load %arg4[%c94] : memref<98xf32, #tpu.memory_space<smem>>
    %c95 = arith.constant 95 : index
    %265 = memref.load %arg4[%c95] : memref<98xf32, #tpu.memory_space<smem>>
    %c96 = arith.constant 96 : index
    %266 = memref.load %arg4[%c96] : memref<98xf32, #tpu.memory_space<smem>>
    %c97 = arith.constant 97 : index
    %267 = memref.load %arg4[%c97] : memref<98xf32, #tpu.memory_space<smem>>
    %268 = arith.mulf %13, %25 : vector<1x256xf32>
    %269 = vector.broadcast %170 : f32 to vector<1x256xf32>
    %270 = arith.mulf %268, %269 : vector<1x256xf32>
    %271 = arith.mulf %13, %49 : vector<1x256xf32>
    %272 = vector.broadcast %171 : f32 to vector<1x256xf32>
    %273 = arith.mulf %271, %272 : vector<1x256xf32>
    %274 = arith.mulf %13, %73 : vector<1x256xf32>
    %275 = vector.broadcast %172 : f32 to vector<1x256xf32>
    %276 = arith.mulf %274, %275 : vector<1x256xf32>
    %277 = arith.mulf %13, %97 : vector<1x256xf32>
    %278 = vector.broadcast %173 : f32 to vector<1x256xf32>
    %279 = arith.mulf %277, %278 : vector<1x256xf32>
    %280 = arith.mulf %13, %121 : vector<1x256xf32>
    %281 = vector.broadcast %174 : f32 to vector<1x256xf32>
    %282 = arith.mulf %280, %281 : vector<1x256xf32>
    %283 = arith.mulf %13, %145 : vector<1x256xf32>
    %284 = vector.broadcast %175 : f32 to vector<1x256xf32>
    %285 = arith.mulf %283, %284 : vector<1x256xf32>
    %286 = arith.mulf %13, %169 : vector<1x256xf32>
    %287 = vector.broadcast %176 : f32 to vector<1x256xf32>
    %288 = arith.mulf %286, %287 : vector<1x256xf32>
    %289 = arith.mulf %37, %25 : vector<1x256xf32>
    %290 = vector.broadcast %177 : f32 to vector<1x256xf32>
    %291 = arith.mulf %289, %290 : vector<1x256xf32>
    %292 = arith.mulf %37, %49 : vector<1x256xf32>
    %293 = vector.broadcast %178 : f32 to vector<1x256xf32>
    %294 = arith.mulf %292, %293 : vector<1x256xf32>
    %295 = arith.mulf %37, %73 : vector<1x256xf32>
    %296 = vector.broadcast %179 : f32 to vector<1x256xf32>
    %297 = arith.mulf %295, %296 : vector<1x256xf32>
    %298 = arith.mulf %37, %97 : vector<1x256xf32>
    %299 = vector.broadcast %180 : f32 to vector<1x256xf32>
    %300 = arith.mulf %298, %299 : vector<1x256xf32>
    %301 = arith.mulf %37, %121 : vector<1x256xf32>
    %302 = vector.broadcast %181 : f32 to vector<1x256xf32>
    %303 = arith.mulf %301, %302 : vector<1x256xf32>
    %304 = arith.mulf %37, %145 : vector<1x256xf32>
    %305 = vector.broadcast %182 : f32 to vector<1x256xf32>
    %306 = arith.mulf %304, %305 : vector<1x256xf32>
    %307 = arith.mulf %37, %169 : vector<1x256xf32>
    %308 = vector.broadcast %183 : f32 to vector<1x256xf32>
    %309 = arith.mulf %307, %308 : vector<1x256xf32>
    %310 = arith.mulf %61, %25 : vector<1x256xf32>
    %311 = vector.broadcast %184 : f32 to vector<1x256xf32>
    %312 = arith.mulf %310, %311 : vector<1x256xf32>
    %313 = arith.mulf %61, %49 : vector<1x256xf32>
    %314 = vector.broadcast %185 : f32 to vector<1x256xf32>
    %315 = arith.mulf %313, %314 : vector<1x256xf32>
    %316 = arith.mulf %61, %73 : vector<1x256xf32>
    %317 = vector.broadcast %186 : f32 to vector<1x256xf32>
    %318 = arith.mulf %316, %317 : vector<1x256xf32>
    %319 = arith.mulf %61, %97 : vector<1x256xf32>
    %320 = vector.broadcast %187 : f32 to vector<1x256xf32>
    %321 = arith.mulf %319, %320 : vector<1x256xf32>
    %322 = arith.mulf %61, %121 : vector<1x256xf32>
    %323 = vector.broadcast %188 : f32 to vector<1x256xf32>
    %324 = arith.mulf %322, %323 : vector<1x256xf32>
    %325 = arith.mulf %61, %145 : vector<1x256xf32>
    %326 = vector.broadcast %189 : f32 to vector<1x256xf32>
    %327 = arith.mulf %325, %326 : vector<1x256xf32>
    %328 = arith.mulf %61, %169 : vector<1x256xf32>
    %329 = vector.broadcast %190 : f32 to vector<1x256xf32>
    %330 = arith.mulf %328, %329 : vector<1x256xf32>
    %331 = arith.mulf %85, %25 : vector<1x256xf32>
    %332 = vector.broadcast %191 : f32 to vector<1x256xf32>
    %333 = arith.mulf %331, %332 : vector<1x256xf32>
    %334 = arith.mulf %85, %49 : vector<1x256xf32>
    %335 = vector.broadcast %192 : f32 to vector<1x256xf32>
    %336 = arith.mulf %334, %335 : vector<1x256xf32>
    %337 = arith.mulf %85, %73 : vector<1x256xf32>
    %338 = vector.broadcast %193 : f32 to vector<1x256xf32>
    %339 = arith.mulf %337, %338 : vector<1x256xf32>
    %340 = arith.mulf %85, %97 : vector<1x256xf32>
    %341 = vector.broadcast %194 : f32 to vector<1x256xf32>
    %342 = arith.mulf %340, %341 : vector<1x256xf32>
    %343 = arith.mulf %85, %121 : vector<1x256xf32>
    %344 = vector.broadcast %195 : f32 to vector<1x256xf32>
    %345 = arith.mulf %343, %344 : vector<1x256xf32>
    %346 = arith.mulf %85, %145 : vector<1x256xf32>
    %347 = vector.broadcast %196 : f32 to vector<1x256xf32>
    %348 = arith.mulf %346, %347 : vector<1x256xf32>
    %349 = arith.mulf %85, %169 : vector<1x256xf32>
    %350 = vector.broadcast %197 : f32 to vector<1x256xf32>
    %351 = arith.mulf %349, %350 : vector<1x256xf32>
    %352 = arith.mulf %109, %25 : vector<1x256xf32>
    %353 = vector.broadcast %198 : f32 to vector<1x256xf32>
    %354 = arith.mulf %352, %353 : vector<1x256xf32>
    %355 = arith.mulf %109, %49 : vector<1x256xf32>
    %356 = vector.broadcast %199 : f32 to vector<1x256xf32>
    %357 = arith.mulf %355, %356 : vector<1x256xf32>
    %358 = arith.mulf %109, %73 : vector<1x256xf32>
    %359 = vector.broadcast %200 : f32 to vector<1x256xf32>
    %360 = arith.mulf %358, %359 : vector<1x256xf32>
    %361 = arith.mulf %109, %97 : vector<1x256xf32>
    %362 = vector.broadcast %201 : f32 to vector<1x256xf32>
    %363 = arith.mulf %361, %362 : vector<1x256xf32>
    %364 = arith.mulf %109, %121 : vector<1x256xf32>
    %365 = vector.broadcast %202 : f32 to vector<1x256xf32>
    %366 = arith.mulf %364, %365 : vector<1x256xf32>
    %367 = arith.mulf %109, %145 : vector<1x256xf32>
    %368 = vector.broadcast %203 : f32 to vector<1x256xf32>
    %369 = arith.mulf %367, %368 : vector<1x256xf32>
    %370 = arith.mulf %109, %169 : vector<1x256xf32>
    %371 = vector.broadcast %204 : f32 to vector<1x256xf32>
    %372 = arith.mulf %370, %371 : vector<1x256xf32>
    %373 = arith.mulf %133, %25 : vector<1x256xf32>
    %374 = vector.broadcast %205 : f32 to vector<1x256xf32>
    %375 = arith.mulf %373, %374 : vector<1x256xf32>
    %376 = arith.mulf %133, %49 : vector<1x256xf32>
    %377 = vector.broadcast %206 : f32 to vector<1x256xf32>
    %378 = arith.mulf %376, %377 : vector<1x256xf32>
    %379 = arith.mulf %133, %73 : vector<1x256xf32>
    %380 = vector.broadcast %207 : f32 to vector<1x256xf32>
    %381 = arith.mulf %379, %380 : vector<1x256xf32>
    %382 = arith.mulf %133, %97 : vector<1x256xf32>
    %383 = vector.broadcast %208 : f32 to vector<1x256xf32>
    %384 = arith.mulf %382, %383 : vector<1x256xf32>
    %385 = arith.mulf %133, %121 : vector<1x256xf32>
    %386 = vector.broadcast %209 : f32 to vector<1x256xf32>
    %387 = arith.mulf %385, %386 : vector<1x256xf32>
    %388 = arith.mulf %133, %145 : vector<1x256xf32>
    %389 = vector.broadcast %210 : f32 to vector<1x256xf32>
    %390 = arith.mulf %388, %389 : vector<1x256xf32>
    %391 = arith.mulf %133, %169 : vector<1x256xf32>
    %392 = vector.broadcast %211 : f32 to vector<1x256xf32>
    %393 = arith.mulf %391, %392 : vector<1x256xf32>
    %394 = arith.mulf %157, %25 : vector<1x256xf32>
    %395 = vector.broadcast %212 : f32 to vector<1x256xf32>
    %396 = arith.mulf %394, %395 : vector<1x256xf32>
    %397 = arith.mulf %157, %49 : vector<1x256xf32>
    %398 = vector.broadcast %213 : f32 to vector<1x256xf32>
    %399 = arith.mulf %397, %398 : vector<1x256xf32>
    %400 = arith.mulf %157, %73 : vector<1x256xf32>
    %401 = vector.broadcast %214 : f32 to vector<1x256xf32>
    %402 = arith.mulf %400, %401 : vector<1x256xf32>
    %403 = arith.mulf %157, %97 : vector<1x256xf32>
    %404 = vector.broadcast %215 : f32 to vector<1x256xf32>
    %405 = arith.mulf %403, %404 : vector<1x256xf32>
    %406 = arith.mulf %157, %121 : vector<1x256xf32>
    %407 = vector.broadcast %216 : f32 to vector<1x256xf32>
    %408 = arith.mulf %406, %407 : vector<1x256xf32>
    %409 = arith.mulf %157, %145 : vector<1x256xf32>
    %410 = vector.broadcast %217 : f32 to vector<1x256xf32>
    %411 = arith.mulf %409, %410 : vector<1x256xf32>
    %412 = arith.mulf %157, %169 : vector<1x256xf32>
    %413 = vector.broadcast %218 : f32 to vector<1x256xf32>
    %414 = arith.mulf %412, %413 : vector<1x256xf32>
    %415 = arith.mulf %13, %25 : vector<1x256xf32>
    %416 = vector.broadcast %219 : f32 to vector<1x256xf32>
    %417 = arith.mulf %415, %416 : vector<1x256xf32>
    %418 = arith.mulf %13, %49 : vector<1x256xf32>
    %419 = vector.broadcast %220 : f32 to vector<1x256xf32>
    %420 = arith.mulf %418, %419 : vector<1x256xf32>
    %421 = arith.mulf %13, %73 : vector<1x256xf32>
    %422 = vector.broadcast %221 : f32 to vector<1x256xf32>
    %423 = arith.mulf %421, %422 : vector<1x256xf32>
    %424 = arith.mulf %13, %97 : vector<1x256xf32>
    %425 = vector.broadcast %222 : f32 to vector<1x256xf32>
    %426 = arith.mulf %424, %425 : vector<1x256xf32>
    %427 = arith.mulf %13, %121 : vector<1x256xf32>
    %428 = vector.broadcast %223 : f32 to vector<1x256xf32>
    %429 = arith.mulf %427, %428 : vector<1x256xf32>
    %430 = arith.mulf %13, %145 : vector<1x256xf32>
    %431 = vector.broadcast %224 : f32 to vector<1x256xf32>
    %432 = arith.mulf %430, %431 : vector<1x256xf32>
    %433 = arith.mulf %13, %169 : vector<1x256xf32>
    %434 = vector.broadcast %225 : f32 to vector<1x256xf32>
    %435 = arith.mulf %433, %434 : vector<1x256xf32>
    %436 = arith.mulf %37, %25 : vector<1x256xf32>
    %437 = vector.broadcast %226 : f32 to vector<1x256xf32>
    %438 = arith.mulf %436, %437 : vector<1x256xf32>
    %439 = arith.mulf %37, %49 : vector<1x256xf32>
    %440 = vector.broadcast %227 : f32 to vector<1x256xf32>
    %441 = arith.mulf %439, %440 : vector<1x256xf32>
    %442 = arith.mulf %37, %73 : vector<1x256xf32>
    %443 = vector.broadcast %228 : f32 to vector<1x256xf32>
    %444 = arith.mulf %442, %443 : vector<1x256xf32>
    %445 = arith.mulf %37, %97 : vector<1x256xf32>
    %446 = vector.broadcast %229 : f32 to vector<1x256xf32>
    %447 = arith.mulf %445, %446 : vector<1x256xf32>
    %448 = arith.mulf %37, %121 : vector<1x256xf32>
    %449 = vector.broadcast %230 : f32 to vector<1x256xf32>
    %450 = arith.mulf %448, %449 : vector<1x256xf32>
    %451 = arith.mulf %37, %145 : vector<1x256xf32>
    %452 = vector.broadcast %231 : f32 to vector<1x256xf32>
    %453 = arith.mulf %451, %452 : vector<1x256xf32>
    %454 = arith.mulf %37, %169 : vector<1x256xf32>
    %455 = vector.broadcast %232 : f32 to vector<1x256xf32>
    %456 = arith.mulf %454, %455 : vector<1x256xf32>
    %457 = arith.mulf %61, %25 : vector<1x256xf32>
    %458 = vector.broadcast %233 : f32 to vector<1x256xf32>
    %459 = arith.mulf %457, %458 : vector<1x256xf32>
    %460 = arith.mulf %61, %49 : vector<1x256xf32>
    %461 = vector.broadcast %234 : f32 to vector<1x256xf32>
    %462 = arith.mulf %460, %461 : vector<1x256xf32>
    %463 = arith.mulf %61, %73 : vector<1x256xf32>
    %464 = vector.broadcast %235 : f32 to vector<1x256xf32>
    %465 = arith.mulf %463, %464 : vector<1x256xf32>
    %466 = arith.mulf %61, %97 : vector<1x256xf32>
    %467 = vector.broadcast %236 : f32 to vector<1x256xf32>
    %468 = arith.mulf %466, %467 : vector<1x256xf32>
    %469 = arith.mulf %61, %121 : vector<1x256xf32>
    %470 = vector.broadcast %237 : f32 to vector<1x256xf32>
    %471 = arith.mulf %469, %470 : vector<1x256xf32>
    %472 = arith.mulf %61, %145 : vector<1x256xf32>
    %473 = vector.broadcast %238 : f32 to vector<1x256xf32>
    %474 = arith.mulf %472, %473 : vector<1x256xf32>
    %475 = arith.mulf %61, %169 : vector<1x256xf32>
    %476 = vector.broadcast %239 : f32 to vector<1x256xf32>
    %477 = arith.mulf %475, %476 : vector<1x256xf32>
    %478 = arith.mulf %85, %25 : vector<1x256xf32>
    %479 = vector.broadcast %240 : f32 to vector<1x256xf32>
    %480 = arith.mulf %478, %479 : vector<1x256xf32>
    %481 = arith.mulf %85, %49 : vector<1x256xf32>
    %482 = vector.broadcast %241 : f32 to vector<1x256xf32>
    %483 = arith.mulf %481, %482 : vector<1x256xf32>
    %484 = arith.mulf %85, %73 : vector<1x256xf32>
    %485 = vector.broadcast %242 : f32 to vector<1x256xf32>
    %486 = arith.mulf %484, %485 : vector<1x256xf32>
    %487 = arith.mulf %85, %97 : vector<1x256xf32>
    %488 = vector.broadcast %243 : f32 to vector<1x256xf32>
    %489 = arith.mulf %487, %488 : vector<1x256xf32>
    %490 = arith.mulf %85, %121 : vector<1x256xf32>
    %491 = vector.broadcast %244 : f32 to vector<1x256xf32>
    %492 = arith.mulf %490, %491 : vector<1x256xf32>
    %493 = arith.mulf %85, %145 : vector<1x256xf32>
    %494 = vector.broadcast %245 : f32 to vector<1x256xf32>
    %495 = arith.mulf %493, %494 : vector<1x256xf32>
    %496 = arith.mulf %85, %169 : vector<1x256xf32>
    %497 = vector.broadcast %246 : f32 to vector<1x256xf32>
    %498 = arith.mulf %496, %497 : vector<1x256xf32>
    %499 = arith.mulf %109, %25 : vector<1x256xf32>
    %500 = vector.broadcast %247 : f32 to vector<1x256xf32>
    %501 = arith.mulf %499, %500 : vector<1x256xf32>
    %502 = arith.mulf %109, %49 : vector<1x256xf32>
    %503 = vector.broadcast %248 : f32 to vector<1x256xf32>
    %504 = arith.mulf %502, %503 : vector<1x256xf32>
    %505 = arith.mulf %109, %73 : vector<1x256xf32>
    %506 = vector.broadcast %249 : f32 to vector<1x256xf32>
    %507 = arith.mulf %505, %506 : vector<1x256xf32>
    %508 = arith.mulf %109, %97 : vector<1x256xf32>
    %509 = vector.broadcast %250 : f32 to vector<1x256xf32>
    %510 = arith.mulf %508, %509 : vector<1x256xf32>
    %511 = arith.mulf %109, %121 : vector<1x256xf32>
    %512 = vector.broadcast %251 : f32 to vector<1x256xf32>
    %513 = arith.mulf %511, %512 : vector<1x256xf32>
    %514 = arith.mulf %109, %145 : vector<1x256xf32>
    %515 = vector.broadcast %252 : f32 to vector<1x256xf32>
    %516 = arith.mulf %514, %515 : vector<1x256xf32>
    %517 = arith.mulf %109, %169 : vector<1x256xf32>
    %518 = vector.broadcast %253 : f32 to vector<1x256xf32>
    %519 = arith.mulf %517, %518 : vector<1x256xf32>
    %520 = arith.mulf %133, %25 : vector<1x256xf32>
    %521 = vector.broadcast %254 : f32 to vector<1x256xf32>
    %522 = arith.mulf %520, %521 : vector<1x256xf32>
    %523 = arith.mulf %133, %49 : vector<1x256xf32>
    %524 = vector.broadcast %255 : f32 to vector<1x256xf32>
    %525 = arith.mulf %523, %524 : vector<1x256xf32>
    %526 = arith.mulf %133, %73 : vector<1x256xf32>
    %527 = vector.broadcast %256 : f32 to vector<1x256xf32>
    %528 = arith.mulf %526, %527 : vector<1x256xf32>
    %529 = arith.mulf %133, %97 : vector<1x256xf32>
    %530 = vector.broadcast %257 : f32 to vector<1x256xf32>
    %531 = arith.mulf %529, %530 : vector<1x256xf32>
    %532 = arith.mulf %133, %121 : vector<1x256xf32>
    %533 = vector.broadcast %258 : f32 to vector<1x256xf32>
    %534 = arith.mulf %532, %533 : vector<1x256xf32>
    %535 = arith.mulf %133, %145 : vector<1x256xf32>
    %536 = vector.broadcast %259 : f32 to vector<1x256xf32>
    %537 = arith.mulf %535, %536 : vector<1x256xf32>
    %538 = arith.mulf %133, %169 : vector<1x256xf32>
    %539 = vector.broadcast %260 : f32 to vector<1x256xf32>
    %540 = arith.mulf %538, %539 : vector<1x256xf32>
    %541 = arith.mulf %157, %25 : vector<1x256xf32>
    %542 = vector.broadcast %261 : f32 to vector<1x256xf32>
    %543 = arith.mulf %541, %542 : vector<1x256xf32>
    %544 = arith.mulf %157, %49 : vector<1x256xf32>
    %545 = vector.broadcast %262 : f32 to vector<1x256xf32>
    %546 = arith.mulf %544, %545 : vector<1x256xf32>
    %547 = arith.mulf %157, %73 : vector<1x256xf32>
    %548 = vector.broadcast %263 : f32 to vector<1x256xf32>
    %549 = arith.mulf %547, %548 : vector<1x256xf32>
    %550 = arith.mulf %157, %97 : vector<1x256xf32>
    %551 = vector.broadcast %264 : f32 to vector<1x256xf32>
    %552 = arith.mulf %550, %551 : vector<1x256xf32>
    %553 = arith.mulf %157, %121 : vector<1x256xf32>
    %554 = vector.broadcast %265 : f32 to vector<1x256xf32>
    %555 = arith.mulf %553, %554 : vector<1x256xf32>
    %556 = arith.mulf %157, %145 : vector<1x256xf32>
    %557 = vector.broadcast %266 : f32 to vector<1x256xf32>
    %558 = arith.mulf %556, %557 : vector<1x256xf32>
    %559 = arith.mulf %157, %169 : vector<1x256xf32>
    %560 = vector.broadcast %267 : f32 to vector<1x256xf32>
    %561 = arith.mulf %559, %560 : vector<1x256xf32>
    %c0_79 = arith.constant 0 : index
    %c0_80 = arith.constant 0 : index
    %c0_81 = arith.constant 0 : index
    %562 = vector.load %arg1[%c0_79, %c0_80, %c0_81] : memref<2x4x256xf32, #tpu.memory_space<vmem>>, vector<1x4x256xf32>
    %563 = vector.shape_cast %562 : vector<1x4x256xf32> to vector<4x256xf32>
    %cst_82 = arith.constant dense<0xFF800000> : vector<256xf32>
    %564 = vector.multi_reduction <maximumf>, %563, %cst_82 [0] : vector<4x256xf32> to vector<256xf32>
    %565 = vector.shape_cast %564 : vector<256xf32> to vector<1x256xf32>
    %cst_83 = arith.constant dense<0.000000e+00> : vector<256xf32>
    %566 = vector.multi_reduction <add>, %563, %cst_83 [0] : vector<4x256xf32> to vector<256xf32>
    %567 = vector.shape_cast %566 : vector<256xf32> to vector<1x256xf32>
    %cst_84 = arith.constant 4.000000e+00 : f32
    %568 = vector.broadcast %cst_84 : f32 to vector<1x256xf32>
    %569 = arith.divf %567, %568 : vector<1x256xf32>
    %cst_85 = arith.constant 0.000000e+00 : f32
    %570 = vector.broadcast %cst_85 : f32 to vector<1x256xf32>
    %c51_i32 = arith.constant 51 : i32
    %571 = tpu.dynamic_rotate %565 by %c51_i32 dim 1 : vector<1x256xf32>, i32 -> vector<1x256xf32>
    %572 = arith.mulf %571, %270 : vector<1x256xf32>
    %573 = arith.addf %570, %572 : vector<1x256xf32>
    %c50_i32 = arith.constant 50 : i32
    %574 = tpu.dynamic_rotate %565 by %c50_i32 dim 1 : vector<1x256xf32>, i32 -> vector<1x256xf32>
    %575 = arith.mulf %574, %273 : vector<1x256xf32>
    %576 = arith.addf %573, %575 : vector<1x256xf32>
    %c49_i32 = arith.constant 49 : i32
    %577 = tpu.dynamic_rotate %565 by %c49_i32 dim 1 : vector<1x256xf32>, i32 -> vector<1x256xf32>
    %578 = arith.mulf %577, %276 : vector<1x256xf32>
    %579 = arith.addf %576, %578 : vector<1x256xf32>
    %c48_i32 = arith.constant 48 : i32
    %580 = tpu.dynamic_rotate %565 by %c48_i32 dim 1 : vector<1x256xf32>, i32 -> vector<1x256xf32>
    %581 = arith.mulf %580, %279 : vector<1x256xf32>
    %582 = arith.addf %579, %581 : vector<1x256xf32>
    %c47_i32 = arith.constant 47 : i32
    %583 = tpu.dynamic_rotate %565 by %c47_i32 dim 1 : vector<1x256xf32>, i32 -> vector<1x256xf32>
    %584 = arith.mulf %583, %282 : vector<1x256xf32>
    %585 = arith.addf %582, %584 : vector<1x256xf32>
    %c46_i32 = arith.constant 46 : i32
    %586 = tpu.dynamic_rotate %565 by %c46_i32 dim 1 : vector<1x256xf32>, i32 -> vector<1x256xf32>
    %587 = arith.mulf %586, %285 : vector<1x256xf32>
    %588 = arith.addf %585, %587 : vector<1x256xf32>
    %c45_i32 = arith.constant 45 : i32
    %589 = tpu.dynamic_rotate %565 by %c45_i32 dim 1 : vector<1x256xf32>, i32 -> vector<1x256xf32>
    %590 = arith.mulf %589, %288 : vector<1x256xf32>
    %591 = arith.addf %588, %590 : vector<1x256xf32>
    %c35_i32 = arith.constant 35 : i32
    %592 = tpu.dynamic_rotate %565 by %c35_i32 dim 1 : vector<1x256xf32>, i32 -> vector<1x256xf32>
    %593 = arith.mulf %592, %291 : vector<1x256xf32>
    %594 = arith.addf %591, %593 : vector<1x256xf32>
    %c34_i32 = arith.constant 34 : i32
    %595 = tpu.dynamic_rotate %565 by %c34_i32 dim 1 : vector<1x256xf32>, i32 -> vector<1x256xf32>
    %596 = arith.mulf %595, %294 : vector<1x256xf32>
    %597 = arith.addf %594, %596 : vector<1x256xf32>
    %c33_i32 = arith.constant 33 : i32
    %598 = tpu.dynamic_rotate %565 by %c33_i32 dim 1 : vector<1x256xf32>, i32 -> vector<1x256xf32>
    %599 = arith.mulf %598, %297 : vector<1x256xf32>
    %600 = arith.addf %597, %599 : vector<1x256xf32>
    %c32_i32 = arith.constant 32 : i32
    %601 = tpu.dynamic_rotate %565 by %c32_i32 dim 1 : vector<1x256xf32>, i32 -> vector<1x256xf32>
    %602 = arith.mulf %601, %300 : vector<1x256xf32>
    %603 = arith.addf %600, %602 : vector<1x256xf32>
    %c31_i32 = arith.constant 31 : i32
    %604 = tpu.dynamic_rotate %565 by %c31_i32 dim 1 : vector<1x256xf32>, i32 -> vector<1x256xf32>
    %605 = arith.mulf %604, %303 : vector<1x256xf32>
    %606 = arith.addf %603, %605 : vector<1x256xf32>
    %c30_i32 = arith.constant 30 : i32
    %607 = tpu.dynamic_rotate %565 by %c30_i32 dim 1 : vector<1x256xf32>, i32 -> vector<1x256xf32>
    %608 = arith.mulf %607, %306 : vector<1x256xf32>
    %609 = arith.addf %606, %608 : vector<1x256xf32>
    %c29_i32 = arith.constant 29 : i32
    %610 = tpu.dynamic_rotate %565 by %c29_i32 dim 1 : vector<1x256xf32>, i32 -> vector<1x256xf32>
    %611 = arith.mulf %610, %309 : vector<1x256xf32>
    %612 = arith.addf %609, %611 : vector<1x256xf32>
    %c19_i32 = arith.constant 19 : i32
    %613 = tpu.dynamic_rotate %565 by %c19_i32 dim 1 : vector<1x256xf32>, i32 -> vector<1x256xf32>
    %614 = arith.mulf %613, %312 : vector<1x256xf32>
    %615 = arith.addf %612, %614 : vector<1x256xf32>
    %c18_i32 = arith.constant 18 : i32
    %616 = tpu.dynamic_rotate %565 by %c18_i32 dim 1 : vector<1x256xf32>, i32 -> vector<1x256xf32>
    %617 = arith.mulf %616, %315 : vector<1x256xf32>
    %618 = arith.addf %615, %617 : vector<1x256xf32>
    %c17_i32 = arith.constant 17 : i32
    %619 = tpu.dynamic_rotate %565 by %c17_i32 dim 1 : vector<1x256xf32>, i32 -> vector<1x256xf32>
    %620 = arith.mulf %619, %318 : vector<1x256xf32>
    %621 = arith.addf %618, %620 : vector<1x256xf32>
    %c16_i32_86 = arith.constant 16 : i32
    %622 = tpu.dynamic_rotate %565 by %c16_i32_86 dim 1 : vector<1x256xf32>, i32 -> vector<1x256xf32>
    %623 = arith.mulf %622, %321 : vector<1x256xf32>
    %624 = arith.addf %621, %623 : vector<1x256xf32>
    %c15_i32 = arith.constant 15 : i32
    %625 = tpu.dynamic_rotate %565 by %c15_i32 dim 1 : vector<1x256xf32>, i32 -> vector<1x256xf32>
    %626 = arith.mulf %625, %324 : vector<1x256xf32>
    %627 = arith.addf %624, %626 : vector<1x256xf32>
    %c14_i32 = arith.constant 14 : i32
    %628 = tpu.dynamic_rotate %565 by %c14_i32 dim 1 : vector<1x256xf32>, i32 -> vector<1x256xf32>
    %629 = arith.mulf %628, %327 : vector<1x256xf32>
    %630 = arith.addf %627, %629 : vector<1x256xf32>
    %c13_i32 = arith.constant 13 : i32
    %631 = tpu.dynamic_rotate %565 by %c13_i32 dim 1 : vector<1x256xf32>, i32 -> vector<1x256xf32>
    %632 = arith.mulf %631, %330 : vector<1x256xf32>
    %633 = arith.addf %630, %632 : vector<1x256xf32>
    %c3_i32_87 = arith.constant 3 : i32
    %634 = tpu.dynamic_rotate %565 by %c3_i32_87 dim 1 : vector<1x256xf32>, i32 -> vector<1x256xf32>
    %635 = arith.mulf %634, %333 : vector<1x256xf32>
    %636 = arith.addf %633, %635 : vector<1x256xf32>
    %c2_i32_88 = arith.constant 2 : i32
    %637 = tpu.dynamic_rotate %565 by %c2_i32_88 dim 1 : vector<1x256xf32>, i32 -> vector<1x256xf32>
    %638 = arith.mulf %637, %336 : vector<1x256xf32>
    %639 = arith.addf %636, %638 : vector<1x256xf32>
    %c1_i32_89 = arith.constant 1 : i32
    %640 = tpu.dynamic_rotate %565 by %c1_i32_89 dim 1 : vector<1x256xf32>, i32 -> vector<1x256xf32>
    %641 = arith.mulf %640, %339 : vector<1x256xf32>
    %642 = arith.addf %639, %641 : vector<1x256xf32>
    %643 = arith.mulf %565, %342 : vector<1x256xf32>
    %644 = arith.addf %642, %643 : vector<1x256xf32>
    %c255_i32 = arith.constant 255 : i32
    %645 = tpu.dynamic_rotate %565 by %c255_i32 dim 1 : vector<1x256xf32>, i32 -> vector<1x256xf32>
    %646 = arith.mulf %645, %345 : vector<1x256xf32>
    %647 = arith.addf %644, %646 : vector<1x256xf32>
    %c254_i32 = arith.constant 254 : i32
    %648 = tpu.dynamic_rotate %565 by %c254_i32 dim 1 : vector<1x256xf32>, i32 -> vector<1x256xf32>
    %649 = arith.mulf %648, %348 : vector<1x256xf32>
    %650 = arith.addf %647, %649 : vector<1x256xf32>
    %c253_i32 = arith.constant 253 : i32
    %651 = tpu.dynamic_rotate %565 by %c253_i32 dim 1 : vector<1x256xf32>, i32 -> vector<1x256xf32>
    %652 = arith.mulf %651, %351 : vector<1x256xf32>
    %653 = arith.addf %650, %652 : vector<1x256xf32>
    %c243_i32 = arith.constant 243 : i32
    %654 = tpu.dynamic_rotate %565 by %c243_i32 dim 1 : vector<1x256xf32>, i32 -> vector<1x256xf32>
    %655 = arith.mulf %654, %354 : vector<1x256xf32>
    %656 = arith.addf %653, %655 : vector<1x256xf32>
    %c242_i32 = arith.constant 242 : i32
    %657 = tpu.dynamic_rotate %565 by %c242_i32 dim 1 : vector<1x256xf32>, i32 -> vector<1x256xf32>
    %658 = arith.mulf %657, %357 : vector<1x256xf32>
    %659 = arith.addf %656, %658 : vector<1x256xf32>
    %c241_i32 = arith.constant 241 : i32
    %660 = tpu.dynamic_rotate %565 by %c241_i32 dim 1 : vector<1x256xf32>, i32 -> vector<1x256xf32>
    %661 = arith.mulf %660, %360 : vector<1x256xf32>
    %662 = arith.addf %659, %661 : vector<1x256xf32>
    %c240_i32 = arith.constant 240 : i32
    %663 = tpu.dynamic_rotate %565 by %c240_i32 dim 1 : vector<1x256xf32>, i32 -> vector<1x256xf32>
    %664 = arith.mulf %663, %363 : vector<1x256xf32>
    %665 = arith.addf %662, %664 : vector<1x256xf32>
    %c239_i32 = arith.constant 239 : i32
    %666 = tpu.dynamic_rotate %565 by %c239_i32 dim 1 : vector<1x256xf32>, i32 -> vector<1x256xf32>
    %667 = arith.mulf %666, %366 : vector<1x256xf32>
    %668 = arith.addf %665, %667 : vector<1x256xf32>
    %c238_i32 = arith.constant 238 : i32
    %669 = tpu.dynamic_rotate %565 by %c238_i32 dim 1 : vector<1x256xf32>, i32 -> vector<1x256xf32>
    %670 = arith.mulf %669, %369 : vector<1x256xf32>
    %671 = arith.addf %668, %670 : vector<1x256xf32>
    %c237_i32 = arith.constant 237 : i32
    %672 = tpu.dynamic_rotate %565 by %c237_i32 dim 1 : vector<1x256xf32>, i32 -> vector<1x256xf32>
    %673 = arith.mulf %672, %372 : vector<1x256xf32>
    %674 = arith.addf %671, %673 : vector<1x256xf32>
    %c227_i32 = arith.constant 227 : i32
    %675 = tpu.dynamic_rotate %565 by %c227_i32 dim 1 : vector<1x256xf32>, i32 -> vector<1x256xf32>
    %676 = arith.mulf %675, %375 : vector<1x256xf32>
    %677 = arith.addf %674, %676 : vector<1x256xf32>
    %c226_i32 = arith.constant 226 : i32
    %678 = tpu.dynamic_rotate %565 by %c226_i32 dim 1 : vector<1x256xf32>, i32 -> vector<1x256xf32>
    %679 = arith.mulf %678, %378 : vector<1x256xf32>
    %680 = arith.addf %677, %679 : vector<1x256xf32>
    %c225_i32 = arith.constant 225 : i32
    %681 = tpu.dynamic_rotate %565 by %c225_i32 dim 1 : vector<1x256xf32>, i32 -> vector<1x256xf32>
    %682 = arith.mulf %681, %381 : vector<1x256xf32>
    %683 = arith.addf %680, %682 : vector<1x256xf32>
    %c224_i32 = arith.constant 224 : i32
    %684 = tpu.dynamic_rotate %565 by %c224_i32 dim 1 : vector<1x256xf32>, i32 -> vector<1x256xf32>
    %685 = arith.mulf %684, %384 : vector<1x256xf32>
    %686 = arith.addf %683, %685 : vector<1x256xf32>
    %c223_i32 = arith.constant 223 : i32
    %687 = tpu.dynamic_rotate %565 by %c223_i32 dim 1 : vector<1x256xf32>, i32 -> vector<1x256xf32>
    %688 = arith.mulf %687, %387 : vector<1x256xf32>
    %689 = arith.addf %686, %688 : vector<1x256xf32>
    %c222_i32 = arith.constant 222 : i32
    %690 = tpu.dynamic_rotate %565 by %c222_i32 dim 1 : vector<1x256xf32>, i32 -> vector<1x256xf32>
    %691 = arith.mulf %690, %390 : vector<1x256xf32>
    %692 = arith.addf %689, %691 : vector<1x256xf32>
    %c221_i32 = arith.constant 221 : i32
    %693 = tpu.dynamic_rotate %565 by %c221_i32 dim 1 : vector<1x256xf32>, i32 -> vector<1x256xf32>
    %694 = arith.mulf %693, %393 : vector<1x256xf32>
    %695 = arith.addf %692, %694 : vector<1x256xf32>
    %c211_i32 = arith.constant 211 : i32
    %696 = tpu.dynamic_rotate %565 by %c211_i32 dim 1 : vector<1x256xf32>, i32 -> vector<1x256xf32>
    %697 = arith.mulf %696, %396 : vector<1x256xf32>
    %698 = arith.addf %695, %697 : vector<1x256xf32>
    %c210_i32 = arith.constant 210 : i32
    %699 = tpu.dynamic_rotate %565 by %c210_i32 dim 1 : vector<1x256xf32>, i32 -> vector<1x256xf32>
    %700 = arith.mulf %699, %399 : vector<1x256xf32>
    %701 = arith.addf %698, %700 : vector<1x256xf32>
    %c209_i32 = arith.constant 209 : i32
    %702 = tpu.dynamic_rotate %565 by %c209_i32 dim 1 : vector<1x256xf32>, i32 -> vector<1x256xf32>
    %703 = arith.mulf %702, %402 : vector<1x256xf32>
    %704 = arith.addf %701, %703 : vector<1x256xf32>
    %c208_i32 = arith.constant 208 : i32
    %705 = tpu.dynamic_rotate %565 by %c208_i32 dim 1 : vector<1x256xf32>, i32 -> vector<1x256xf32>
    %706 = arith.mulf %705, %405 : vector<1x256xf32>
    %707 = arith.addf %704, %706 : vector<1x256xf32>
    %c207_i32 = arith.constant 207 : i32
    %708 = tpu.dynamic_rotate %565 by %c207_i32 dim 1 : vector<1x256xf32>, i32 -> vector<1x256xf32>
    %709 = arith.mulf %708, %408 : vector<1x256xf32>
    %710 = arith.addf %707, %709 : vector<1x256xf32>
    %c206_i32 = arith.constant 206 : i32
    %711 = tpu.dynamic_rotate %565 by %c206_i32 dim 1 : vector<1x256xf32>, i32 -> vector<1x256xf32>
    %712 = arith.mulf %711, %411 : vector<1x256xf32>
    %713 = arith.addf %710, %712 : vector<1x256xf32>
    %c205_i32 = arith.constant 205 : i32
    %714 = tpu.dynamic_rotate %565 by %c205_i32 dim 1 : vector<1x256xf32>, i32 -> vector<1x256xf32>
    %715 = arith.mulf %714, %414 : vector<1x256xf32>
    %716 = arith.addf %713, %715 : vector<1x256xf32>
    %c51_i32_90 = arith.constant 51 : i32
    %717 = tpu.dynamic_rotate %569 by %c51_i32_90 dim 1 : vector<1x256xf32>, i32 -> vector<1x256xf32>
    %718 = arith.mulf %717, %417 : vector<1x256xf32>
    %719 = arith.addf %716, %718 : vector<1x256xf32>
    %c50_i32_91 = arith.constant 50 : i32
    %720 = tpu.dynamic_rotate %569 by %c50_i32_91 dim 1 : vector<1x256xf32>, i32 -> vector<1x256xf32>
    %721 = arith.mulf %720, %420 : vector<1x256xf32>
    %722 = arith.addf %719, %721 : vector<1x256xf32>
    %c49_i32_92 = arith.constant 49 : i32
    %723 = tpu.dynamic_rotate %569 by %c49_i32_92 dim 1 : vector<1x256xf32>, i32 -> vector<1x256xf32>
    %724 = arith.mulf %723, %423 : vector<1x256xf32>
    %725 = arith.addf %722, %724 : vector<1x256xf32>
    %c48_i32_93 = arith.constant 48 : i32
    %726 = tpu.dynamic_rotate %569 by %c48_i32_93 dim 1 : vector<1x256xf32>, i32 -> vector<1x256xf32>
    %727 = arith.mulf %726, %426 : vector<1x256xf32>
    %728 = arith.addf %725, %727 : vector<1x256xf32>
    %c47_i32_94 = arith.constant 47 : i32
    %729 = tpu.dynamic_rotate %569 by %c47_i32_94 dim 1 : vector<1x256xf32>, i32 -> vector<1x256xf32>
    %730 = arith.mulf %729, %429 : vector<1x256xf32>
    %731 = arith.addf %728, %730 : vector<1x256xf32>
    %c46_i32_95 = arith.constant 46 : i32
    %732 = tpu.dynamic_rotate %569 by %c46_i32_95 dim 1 : vector<1x256xf32>, i32 -> vector<1x256xf32>
    %733 = arith.mulf %732, %432 : vector<1x256xf32>
    %734 = arith.addf %731, %733 : vector<1x256xf32>
    %c45_i32_96 = arith.constant 45 : i32
    %735 = tpu.dynamic_rotate %569 by %c45_i32_96 dim 1 : vector<1x256xf32>, i32 -> vector<1x256xf32>
    %736 = arith.mulf %735, %435 : vector<1x256xf32>
    %737 = arith.addf %734, %736 : vector<1x256xf32>
    %c35_i32_97 = arith.constant 35 : i32
    %738 = tpu.dynamic_rotate %569 by %c35_i32_97 dim 1 : vector<1x256xf32>, i32 -> vector<1x256xf32>
    %739 = arith.mulf %738, %438 : vector<1x256xf32>
    %740 = arith.addf %737, %739 : vector<1x256xf32>
    %c34_i32_98 = arith.constant 34 : i32
    %741 = tpu.dynamic_rotate %569 by %c34_i32_98 dim 1 : vector<1x256xf32>, i32 -> vector<1x256xf32>
    %742 = arith.mulf %741, %441 : vector<1x256xf32>
    %743 = arith.addf %740, %742 : vector<1x256xf32>
    %c33_i32_99 = arith.constant 33 : i32
    %744 = tpu.dynamic_rotate %569 by %c33_i32_99 dim 1 : vector<1x256xf32>, i32 -> vector<1x256xf32>
    %745 = arith.mulf %744, %444 : vector<1x256xf32>
    %746 = arith.addf %743, %745 : vector<1x256xf32>
    %c32_i32_100 = arith.constant 32 : i32
    %747 = tpu.dynamic_rotate %569 by %c32_i32_100 dim 1 : vector<1x256xf32>, i32 -> vector<1x256xf32>
    %748 = arith.mulf %747, %447 : vector<1x256xf32>
    %749 = arith.addf %746, %748 : vector<1x256xf32>
    %c31_i32_101 = arith.constant 31 : i32
    %750 = tpu.dynamic_rotate %569 by %c31_i32_101 dim 1 : vector<1x256xf32>, i32 -> vector<1x256xf32>
    %751 = arith.mulf %750, %450 : vector<1x256xf32>
    %752 = arith.addf %749, %751 : vector<1x256xf32>
    %c30_i32_102 = arith.constant 30 : i32
    %753 = tpu.dynamic_rotate %569 by %c30_i32_102 dim 1 : vector<1x256xf32>, i32 -> vector<1x256xf32>
    %754 = arith.mulf %753, %453 : vector<1x256xf32>
    %755 = arith.addf %752, %754 : vector<1x256xf32>
    %c29_i32_103 = arith.constant 29 : i32
    %756 = tpu.dynamic_rotate %569 by %c29_i32_103 dim 1 : vector<1x256xf32>, i32 -> vector<1x256xf32>
    %757 = arith.mulf %756, %456 : vector<1x256xf32>
    %758 = arith.addf %755, %757 : vector<1x256xf32>
    %c19_i32_104 = arith.constant 19 : i32
    %759 = tpu.dynamic_rotate %569 by %c19_i32_104 dim 1 : vector<1x256xf32>, i32 -> vector<1x256xf32>
    %760 = arith.mulf %759, %459 : vector<1x256xf32>
    %761 = arith.addf %758, %760 : vector<1x256xf32>
    %c18_i32_105 = arith.constant 18 : i32
    %762 = tpu.dynamic_rotate %569 by %c18_i32_105 dim 1 : vector<1x256xf32>, i32 -> vector<1x256xf32>
    %763 = arith.mulf %762, %462 : vector<1x256xf32>
    %764 = arith.addf %761, %763 : vector<1x256xf32>
    %c17_i32_106 = arith.constant 17 : i32
    %765 = tpu.dynamic_rotate %569 by %c17_i32_106 dim 1 : vector<1x256xf32>, i32 -> vector<1x256xf32>
    %766 = arith.mulf %765, %465 : vector<1x256xf32>
    %767 = arith.addf %764, %766 : vector<1x256xf32>
    %c16_i32_107 = arith.constant 16 : i32
    %768 = tpu.dynamic_rotate %569 by %c16_i32_107 dim 1 : vector<1x256xf32>, i32 -> vector<1x256xf32>
    %769 = arith.mulf %768, %468 : vector<1x256xf32>
    %770 = arith.addf %767, %769 : vector<1x256xf32>
    %c15_i32_108 = arith.constant 15 : i32
    %771 = tpu.dynamic_rotate %569 by %c15_i32_108 dim 1 : vector<1x256xf32>, i32 -> vector<1x256xf32>
    %772 = arith.mulf %771, %471 : vector<1x256xf32>
    %773 = arith.addf %770, %772 : vector<1x256xf32>
    %c14_i32_109 = arith.constant 14 : i32
    %774 = tpu.dynamic_rotate %569 by %c14_i32_109 dim 1 : vector<1x256xf32>, i32 -> vector<1x256xf32>
    %775 = arith.mulf %774, %474 : vector<1x256xf32>
    %776 = arith.addf %773, %775 : vector<1x256xf32>
    %c13_i32_110 = arith.constant 13 : i32
    %777 = tpu.dynamic_rotate %569 by %c13_i32_110 dim 1 : vector<1x256xf32>, i32 -> vector<1x256xf32>
    %778 = arith.mulf %777, %477 : vector<1x256xf32>
    %779 = arith.addf %776, %778 : vector<1x256xf32>
    %c3_i32_111 = arith.constant 3 : i32
    %780 = tpu.dynamic_rotate %569 by %c3_i32_111 dim 1 : vector<1x256xf32>, i32 -> vector<1x256xf32>
    %781 = arith.mulf %780, %480 : vector<1x256xf32>
    %782 = arith.addf %779, %781 : vector<1x256xf32>
    %c2_i32_112 = arith.constant 2 : i32
    %783 = tpu.dynamic_rotate %569 by %c2_i32_112 dim 1 : vector<1x256xf32>, i32 -> vector<1x256xf32>
    %784 = arith.mulf %783, %483 : vector<1x256xf32>
    %785 = arith.addf %782, %784 : vector<1x256xf32>
    %c1_i32_113 = arith.constant 1 : i32
    %786 = tpu.dynamic_rotate %569 by %c1_i32_113 dim 1 : vector<1x256xf32>, i32 -> vector<1x256xf32>
    %787 = arith.mulf %786, %486 : vector<1x256xf32>
    %788 = arith.addf %785, %787 : vector<1x256xf32>
    %789 = arith.mulf %569, %489 : vector<1x256xf32>
    %790 = arith.addf %788, %789 : vector<1x256xf32>
    %c255_i32_114 = arith.constant 255 : i32
    %791 = tpu.dynamic_rotate %569 by %c255_i32_114 dim 1 : vector<1x256xf32>, i32 -> vector<1x256xf32>
    %792 = arith.mulf %791, %492 : vector<1x256xf32>
    %793 = arith.addf %790, %792 : vector<1x256xf32>
    %c254_i32_115 = arith.constant 254 : i32
    %794 = tpu.dynamic_rotate %569 by %c254_i32_115 dim 1 : vector<1x256xf32>, i32 -> vector<1x256xf32>
    %795 = arith.mulf %794, %495 : vector<1x256xf32>
    %796 = arith.addf %793, %795 : vector<1x256xf32>
    %c253_i32_116 = arith.constant 253 : i32
    %797 = tpu.dynamic_rotate %569 by %c253_i32_116 dim 1 : vector<1x256xf32>, i32 -> vector<1x256xf32>
    %798 = arith.mulf %797, %498 : vector<1x256xf32>
    %799 = arith.addf %796, %798 : vector<1x256xf32>
    %c243_i32_117 = arith.constant 243 : i32
    %800 = tpu.dynamic_rotate %569 by %c243_i32_117 dim 1 : vector<1x256xf32>, i32 -> vector<1x256xf32>
    %801 = arith.mulf %800, %501 : vector<1x256xf32>
    %802 = arith.addf %799, %801 : vector<1x256xf32>
    %c242_i32_118 = arith.constant 242 : i32
    %803 = tpu.dynamic_rotate %569 by %c242_i32_118 dim 1 : vector<1x256xf32>, i32 -> vector<1x256xf32>
    %804 = arith.mulf %803, %504 : vector<1x256xf32>
    %805 = arith.addf %802, %804 : vector<1x256xf32>
    %c241_i32_119 = arith.constant 241 : i32
    %806 = tpu.dynamic_rotate %569 by %c241_i32_119 dim 1 : vector<1x256xf32>, i32 -> vector<1x256xf32>
    %807 = arith.mulf %806, %507 : vector<1x256xf32>
    %808 = arith.addf %805, %807 : vector<1x256xf32>
    %c240_i32_120 = arith.constant 240 : i32
    %809 = tpu.dynamic_rotate %569 by %c240_i32_120 dim 1 : vector<1x256xf32>, i32 -> vector<1x256xf32>
    %810 = arith.mulf %809, %510 : vector<1x256xf32>
    %811 = arith.addf %808, %810 : vector<1x256xf32>
    %c239_i32_121 = arith.constant 239 : i32
    %812 = tpu.dynamic_rotate %569 by %c239_i32_121 dim 1 : vector<1x256xf32>, i32 -> vector<1x256xf32>
    %813 = arith.mulf %812, %513 : vector<1x256xf32>
    %814 = arith.addf %811, %813 : vector<1x256xf32>
    %c238_i32_122 = arith.constant 238 : i32
    %815 = tpu.dynamic_rotate %569 by %c238_i32_122 dim 1 : vector<1x256xf32>, i32 -> vector<1x256xf32>
    %816 = arith.mulf %815, %516 : vector<1x256xf32>
    %817 = arith.addf %814, %816 : vector<1x256xf32>
    %c237_i32_123 = arith.constant 237 : i32
    %818 = tpu.dynamic_rotate %569 by %c237_i32_123 dim 1 : vector<1x256xf32>, i32 -> vector<1x256xf32>
    %819 = arith.mulf %818, %519 : vector<1x256xf32>
    %820 = arith.addf %817, %819 : vector<1x256xf32>
    %c227_i32_124 = arith.constant 227 : i32
    %821 = tpu.dynamic_rotate %569 by %c227_i32_124 dim 1 : vector<1x256xf32>, i32 -> vector<1x256xf32>
    %822 = arith.mulf %821, %522 : vector<1x256xf32>
    %823 = arith.addf %820, %822 : vector<1x256xf32>
    %c226_i32_125 = arith.constant 226 : i32
    %824 = tpu.dynamic_rotate %569 by %c226_i32_125 dim 1 : vector<1x256xf32>, i32 -> vector<1x256xf32>
    %825 = arith.mulf %824, %525 : vector<1x256xf32>
    %826 = arith.addf %823, %825 : vector<1x256xf32>
    %c225_i32_126 = arith.constant 225 : i32
    %827 = tpu.dynamic_rotate %569 by %c225_i32_126 dim 1 : vector<1x256xf32>, i32 -> vector<1x256xf32>
    %828 = arith.mulf %827, %528 : vector<1x256xf32>
    %829 = arith.addf %826, %828 : vector<1x256xf32>
    %c224_i32_127 = arith.constant 224 : i32
    %830 = tpu.dynamic_rotate %569 by %c224_i32_127 dim 1 : vector<1x256xf32>, i32 -> vector<1x256xf32>
    %831 = arith.mulf %830, %531 : vector<1x256xf32>
    %832 = arith.addf %829, %831 : vector<1x256xf32>
    %c223_i32_128 = arith.constant 223 : i32
    %833 = tpu.dynamic_rotate %569 by %c223_i32_128 dim 1 : vector<1x256xf32>, i32 -> vector<1x256xf32>
    %834 = arith.mulf %833, %534 : vector<1x256xf32>
    %835 = arith.addf %832, %834 : vector<1x256xf32>
    %c222_i32_129 = arith.constant 222 : i32
    %836 = tpu.dynamic_rotate %569 by %c222_i32_129 dim 1 : vector<1x256xf32>, i32 -> vector<1x256xf32>
    %837 = arith.mulf %836, %537 : vector<1x256xf32>
    %838 = arith.addf %835, %837 : vector<1x256xf32>
    %c221_i32_130 = arith.constant 221 : i32
    %839 = tpu.dynamic_rotate %569 by %c221_i32_130 dim 1 : vector<1x256xf32>, i32 -> vector<1x256xf32>
    %840 = arith.mulf %839, %540 : vector<1x256xf32>
    %841 = arith.addf %838, %840 : vector<1x256xf32>
    %c211_i32_131 = arith.constant 211 : i32
    %842 = tpu.dynamic_rotate %569 by %c211_i32_131 dim 1 : vector<1x256xf32>, i32 -> vector<1x256xf32>
    %843 = arith.mulf %842, %543 : vector<1x256xf32>
    %844 = arith.addf %841, %843 : vector<1x256xf32>
    %c210_i32_132 = arith.constant 210 : i32
    %845 = tpu.dynamic_rotate %569 by %c210_i32_132 dim 1 : vector<1x256xf32>, i32 -> vector<1x256xf32>
    %846 = arith.mulf %845, %546 : vector<1x256xf32>
    %847 = arith.addf %844, %846 : vector<1x256xf32>
    %c209_i32_133 = arith.constant 209 : i32
    %848 = tpu.dynamic_rotate %569 by %c209_i32_133 dim 1 : vector<1x256xf32>, i32 -> vector<1x256xf32>
    %849 = arith.mulf %848, %549 : vector<1x256xf32>
    %850 = arith.addf %847, %849 : vector<1x256xf32>
    %c208_i32_134 = arith.constant 208 : i32
    %851 = tpu.dynamic_rotate %569 by %c208_i32_134 dim 1 : vector<1x256xf32>, i32 -> vector<1x256xf32>
    %852 = arith.mulf %851, %552 : vector<1x256xf32>
    %853 = arith.addf %850, %852 : vector<1x256xf32>
    %c207_i32_135 = arith.constant 207 : i32
    %854 = tpu.dynamic_rotate %569 by %c207_i32_135 dim 1 : vector<1x256xf32>, i32 -> vector<1x256xf32>
    %855 = arith.mulf %854, %555 : vector<1x256xf32>
    %856 = arith.addf %853, %855 : vector<1x256xf32>
    %c206_i32_136 = arith.constant 206 : i32
    %857 = tpu.dynamic_rotate %569 by %c206_i32_136 dim 1 : vector<1x256xf32>, i32 -> vector<1x256xf32>
    %858 = arith.mulf %857, %558 : vector<1x256xf32>
    %859 = arith.addf %856, %858 : vector<1x256xf32>
    %c205_i32_137 = arith.constant 205 : i32
    %860 = tpu.dynamic_rotate %569 by %c205_i32_137 dim 1 : vector<1x256xf32>, i32 -> vector<1x256xf32>
    %861 = arith.mulf %860, %561 : vector<1x256xf32>
    %862 = arith.addf %859, %861 : vector<1x256xf32>
    %863 = arith.negf %862 : vector<1x256xf32>
    %864 = math.exp %863 : vector<1x256xf32>
    %cst_138 = arith.constant 1.000000e+00 : f32
    %865 = vector.broadcast %cst_138 : f32 to vector<1x256xf32>
    %866 = arith.addf %865, %864 : vector<1x256xf32>
    %867 = arith.divf %865, %866 : vector<1x256xf32>
    %868 = vector.broadcast %867 : vector<1x256xf32> to vector<4x256xf32>
    %869 = arith.mulf %868, %563 : vector<4x256xf32>
    %c0_139 = arith.constant 0 : index
    %c0_140 = arith.constant 0 : index
    %c0_141 = arith.constant 0 : index
    %870 = vector.load %arg5[%c0_139, %c0_140, %c0_141] : memref<2x4x256xf32, #tpu.memory_space<vmem>>, vector<1x4x256xf32>
    %871 = vector.shape_cast %870 : vector<1x4x256xf32> to vector<4x256xf32>
    %872 = vector.shape_cast %869 : vector<4x256xf32> to vector<1x4x256xf32>
    tpu.vector_store %arg5[%c0_139, %c0_140, %c0_141], %872 {strides = array<i32>} : memref<2x4x256xf32, #tpu.memory_space<vmem>>, vector<1x4x256xf32>,
    %c1_142 = arith.constant 1 : index
    %c0_143 = arith.constant 0 : index
    %c0_144 = arith.constant 0 : index
    %873 = vector.load %arg1[%c1_142, %c0_143, %c0_144] : memref<2x4x256xf32, #tpu.memory_space<vmem>>, vector<1x4x256xf32>
    %874 = vector.shape_cast %873 : vector<1x4x256xf32> to vector<4x256xf32>
    %cst_145 = arith.constant dense<0xFF800000> : vector<256xf32>
    %875 = vector.multi_reduction <maximumf>, %874, %cst_145 [0] : vector<4x256xf32> to vector<256xf32>
    %876 = vector.shape_cast %875 : vector<256xf32> to vector<1x256xf32>
    %cst_146 = arith.constant dense<0.000000e+00> : vector<256xf32>
    %877 = vector.multi_reduction <add>, %874, %cst_146 [0] : vector<4x256xf32> to vector<256xf32>
    %878 = vector.shape_cast %877 : vector<256xf32> to vector<1x256xf32>
    %cst_147 = arith.constant 4.000000e+00 : f32
    %879 = vector.broadcast %cst_147 : f32 to vector<1x256xf32>
    %880 = arith.divf %878, %879 : vector<1x256xf32>
    %cst_148 = arith.constant 0.000000e+00 : f32
    %881 = vector.broadcast %cst_148 : f32 to vector<1x256xf32>
    %c51_i32_149 = arith.constant 51 : i32
    %882 = tpu.dynamic_rotate %876 by %c51_i32_149 dim 1 : vector<1x256xf32>, i32 -> vector<1x256xf32>
    %883 = arith.mulf %882, %270 : vector<1x256xf32>
    %884 = arith.addf %881, %883 : vector<1x256xf32>
    %c50_i32_150 = arith.constant 50 : i32
    %885 = tpu.dynamic_rotate %876 by %c50_i32_150 dim 1 : vector<1x256xf32>, i32 -> vector<1x256xf32>
    %886 = arith.mulf %885, %273 : vector<1x256xf32>
    %887 = arith.addf %884, %886 : vector<1x256xf32>
    %c49_i32_151 = arith.constant 49 : i32
    %888 = tpu.dynamic_rotate %876 by %c49_i32_151 dim 1 : vector<1x256xf32>, i32 -> vector<1x256xf32>
    %889 = arith.mulf %888, %276 : vector<1x256xf32>
    %890 = arith.addf %887, %889 : vector<1x256xf32>
    %c48_i32_152 = arith.constant 48 : i32
    %891 = tpu.dynamic_rotate %876 by %c48_i32_152 dim 1 : vector<1x256xf32>, i32 -> vector<1x256xf32>
    %892 = arith.mulf %891, %279 : vector<1x256xf32>
    %893 = arith.addf %890, %892 : vector<1x256xf32>
    %c47_i32_153 = arith.constant 47 : i32
    %894 = tpu.dynamic_rotate %876 by %c47_i32_153 dim 1 : vector<1x256xf32>, i32 -> vector<1x256xf32>
    %895 = arith.mulf %894, %282 : vector<1x256xf32>
    %896 = arith.addf %893, %895 : vector<1x256xf32>
    %c46_i32_154 = arith.constant 46 : i32
    %897 = tpu.dynamic_rotate %876 by %c46_i32_154 dim 1 : vector<1x256xf32>, i32 -> vector<1x256xf32>
    %898 = arith.mulf %897, %285 : vector<1x256xf32>
    %899 = arith.addf %896, %898 : vector<1x256xf32>
    %c45_i32_155 = arith.constant 45 : i32
    %900 = tpu.dynamic_rotate %876 by %c45_i32_155 dim 1 : vector<1x256xf32>, i32 -> vector<1x256xf32>
    %901 = arith.mulf %900, %288 : vector<1x256xf32>
    %902 = arith.addf %899, %901 : vector<1x256xf32>
    %c35_i32_156 = arith.constant 35 : i32
    %903 = tpu.dynamic_rotate %876 by %c35_i32_156 dim 1 : vector<1x256xf32>, i32 -> vector<1x256xf32>
    %904 = arith.mulf %903, %291 : vector<1x256xf32>
    %905 = arith.addf %902, %904 : vector<1x256xf32>
    %c34_i32_157 = arith.constant 34 : i32
    %906 = tpu.dynamic_rotate %876 by %c34_i32_157 dim 1 : vector<1x256xf32>, i32 -> vector<1x256xf32>
    %907 = arith.mulf %906, %294 : vector<1x256xf32>
    %908 = arith.addf %905, %907 : vector<1x256xf32>
    %c33_i32_158 = arith.constant 33 : i32
    %909 = tpu.dynamic_rotate %876 by %c33_i32_158 dim 1 : vector<1x256xf32>, i32 -> vector<1x256xf32>
    %910 = arith.mulf %909, %297 : vector<1x256xf32>
    %911 = arith.addf %908, %910 : vector<1x256xf32>
    %c32_i32_159 = arith.constant 32 : i32
    %912 = tpu.dynamic_rotate %876 by %c32_i32_159 dim 1 : vector<1x256xf32>, i32 -> vector<1x256xf32>
    %913 = arith.mulf %912, %300 : vector<1x256xf32>
    %914 = arith.addf %911, %913 : vector<1x256xf32>
    %c31_i32_160 = arith.constant 31 : i32
    %915 = tpu.dynamic_rotate %876 by %c31_i32_160 dim 1 : vector<1x256xf32>, i32 -> vector<1x256xf32>
    %916 = arith.mulf %915, %303 : vector<1x256xf32>
    %917 = arith.addf %914, %916 : vector<1x256xf32>
    %c30_i32_161 = arith.constant 30 : i32
    %918 = tpu.dynamic_rotate %876 by %c30_i32_161 dim 1 : vector<1x256xf32>, i32 -> vector<1x256xf32>
    %919 = arith.mulf %918, %306 : vector<1x256xf32>
    %920 = arith.addf %917, %919 : vector<1x256xf32>
    %c29_i32_162 = arith.constant 29 : i32
    %921 = tpu.dynamic_rotate %876 by %c29_i32_162 dim 1 : vector<1x256xf32>, i32 -> vector<1x256xf32>
    %922 = arith.mulf %921, %309 : vector<1x256xf32>
    %923 = arith.addf %920, %922 : vector<1x256xf32>
    %c19_i32_163 = arith.constant 19 : i32
    %924 = tpu.dynamic_rotate %876 by %c19_i32_163 dim 1 : vector<1x256xf32>, i32 -> vector<1x256xf32>
    %925 = arith.mulf %924, %312 : vector<1x256xf32>
    %926 = arith.addf %923, %925 : vector<1x256xf32>
    %c18_i32_164 = arith.constant 18 : i32
    %927 = tpu.dynamic_rotate %876 by %c18_i32_164 dim 1 : vector<1x256xf32>, i32 -> vector<1x256xf32>
    %928 = arith.mulf %927, %315 : vector<1x256xf32>
    %929 = arith.addf %926, %928 : vector<1x256xf32>
    %c17_i32_165 = arith.constant 17 : i32
    %930 = tpu.dynamic_rotate %876 by %c17_i32_165 dim 1 : vector<1x256xf32>, i32 -> vector<1x256xf32>
    %931 = arith.mulf %930, %318 : vector<1x256xf32>
    %932 = arith.addf %929, %931 : vector<1x256xf32>
    %c16_i32_166 = arith.constant 16 : i32
    %933 = tpu.dynamic_rotate %876 by %c16_i32_166 dim 1 : vector<1x256xf32>, i32 -> vector<1x256xf32>
    %934 = arith.mulf %933, %321 : vector<1x256xf32>
    %935 = arith.addf %932, %934 : vector<1x256xf32>
    %c15_i32_167 = arith.constant 15 : i32
    %936 = tpu.dynamic_rotate %876 by %c15_i32_167 dim 1 : vector<1x256xf32>, i32 -> vector<1x256xf32>
    %937 = arith.mulf %936, %324 : vector<1x256xf32>
    %938 = arith.addf %935, %937 : vector<1x256xf32>
    %c14_i32_168 = arith.constant 14 : i32
    %939 = tpu.dynamic_rotate %876 by %c14_i32_168 dim 1 : vector<1x256xf32>, i32 -> vector<1x256xf32>
    %940 = arith.mulf %939, %327 : vector<1x256xf32>
    %941 = arith.addf %938, %940 : vector<1x256xf32>
    %c13_i32_169 = arith.constant 13 : i32
    %942 = tpu.dynamic_rotate %876 by %c13_i32_169 dim 1 : vector<1x256xf32>, i32 -> vector<1x256xf32>
    %943 = arith.mulf %942, %330 : vector<1x256xf32>
    %944 = arith.addf %941, %943 : vector<1x256xf32>
    %c3_i32_170 = arith.constant 3 : i32
    %945 = tpu.dynamic_rotate %876 by %c3_i32_170 dim 1 : vector<1x256xf32>, i32 -> vector<1x256xf32>
    %946 = arith.mulf %945, %333 : vector<1x256xf32>
    %947 = arith.addf %944, %946 : vector<1x256xf32>
    %c2_i32_171 = arith.constant 2 : i32
    %948 = tpu.dynamic_rotate %876 by %c2_i32_171 dim 1 : vector<1x256xf32>, i32 -> vector<1x256xf32>
    %949 = arith.mulf %948, %336 : vector<1x256xf32>
    %950 = arith.addf %947, %949 : vector<1x256xf32>
    %c1_i32_172 = arith.constant 1 : i32
    %951 = tpu.dynamic_rotate %876 by %c1_i32_172 dim 1 : vector<1x256xf32>, i32 -> vector<1x256xf32>
    %952 = arith.mulf %951, %339 : vector<1x256xf32>
    %953 = arith.addf %950, %952 : vector<1x256xf32>
    %954 = arith.mulf %876, %342 : vector<1x256xf32>
    %955 = arith.addf %953, %954 : vector<1x256xf32>
    %c255_i32_173 = arith.constant 255 : i32
    %956 = tpu.dynamic_rotate %876 by %c255_i32_173 dim 1 : vector<1x256xf32>, i32 -> vector<1x256xf32>
    %957 = arith.mulf %956, %345 : vector<1x256xf32>
    %958 = arith.addf %955, %957 : vector<1x256xf32>
    %c254_i32_174 = arith.constant 254 : i32
    %959 = tpu.dynamic_rotate %876 by %c254_i32_174 dim 1 : vector<1x256xf32>, i32 -> vector<1x256xf32>
    %960 = arith.mulf %959, %348 : vector<1x256xf32>
    %961 = arith.addf %958, %960 : vector<1x256xf32>
    %c253_i32_175 = arith.constant 253 : i32
    %962 = tpu.dynamic_rotate %876 by %c253_i32_175 dim 1 : vector<1x256xf32>, i32 -> vector<1x256xf32>
    %963 = arith.mulf %962, %351 : vector<1x256xf32>
    %964 = arith.addf %961, %963 : vector<1x256xf32>
    %c243_i32_176 = arith.constant 243 : i32
    %965 = tpu.dynamic_rotate %876 by %c243_i32_176 dim 1 : vector<1x256xf32>, i32 -> vector<1x256xf32>
    %966 = arith.mulf %965, %354 : vector<1x256xf32>
    %967 = arith.addf %964, %966 : vector<1x256xf32>
    %c242_i32_177 = arith.constant 242 : i32
    %968 = tpu.dynamic_rotate %876 by %c242_i32_177 dim 1 : vector<1x256xf32>, i32 -> vector<1x256xf32>
    %969 = arith.mulf %968, %357 : vector<1x256xf32>
    %970 = arith.addf %967, %969 : vector<1x256xf32>
    %c241_i32_178 = arith.constant 241 : i32
    %971 = tpu.dynamic_rotate %876 by %c241_i32_178 dim 1 : vector<1x256xf32>, i32 -> vector<1x256xf32>
    %972 = arith.mulf %971, %360 : vector<1x256xf32>
    %973 = arith.addf %970, %972 : vector<1x256xf32>
    %c240_i32_179 = arith.constant 240 : i32
    %974 = tpu.dynamic_rotate %876 by %c240_i32_179 dim 1 : vector<1x256xf32>, i32 -> vector<1x256xf32>
    %975 = arith.mulf %974, %363 : vector<1x256xf32>
    %976 = arith.addf %973, %975 : vector<1x256xf32>
    %c239_i32_180 = arith.constant 239 : i32
    %977 = tpu.dynamic_rotate %876 by %c239_i32_180 dim 1 : vector<1x256xf32>, i32 -> vector<1x256xf32>
    %978 = arith.mulf %977, %366 : vector<1x256xf32>
    %979 = arith.addf %976, %978 : vector<1x256xf32>
    %c238_i32_181 = arith.constant 238 : i32
    %980 = tpu.dynamic_rotate %876 by %c238_i32_181 dim 1 : vector<1x256xf32>, i32 -> vector<1x256xf32>
    %981 = arith.mulf %980, %369 : vector<1x256xf32>
    %982 = arith.addf %979, %981 : vector<1x256xf32>
    %c237_i32_182 = arith.constant 237 : i32
    %983 = tpu.dynamic_rotate %876 by %c237_i32_182 dim 1 : vector<1x256xf32>, i32 -> vector<1x256xf32>
    %984 = arith.mulf %983, %372 : vector<1x256xf32>
    %985 = arith.addf %982, %984 : vector<1x256xf32>
    %c227_i32_183 = arith.constant 227 : i32
    %986 = tpu.dynamic_rotate %876 by %c227_i32_183 dim 1 : vector<1x256xf32>, i32 -> vector<1x256xf32>
    %987 = arith.mulf %986, %375 : vector<1x256xf32>
    %988 = arith.addf %985, %987 : vector<1x256xf32>
    %c226_i32_184 = arith.constant 226 : i32
    %989 = tpu.dynamic_rotate %876 by %c226_i32_184 dim 1 : vector<1x256xf32>, i32 -> vector<1x256xf32>
    %990 = arith.mulf %989, %378 : vector<1x256xf32>
    %991 = arith.addf %988, %990 : vector<1x256xf32>
    %c225_i32_185 = arith.constant 225 : i32
    %992 = tpu.dynamic_rotate %876 by %c225_i32_185 dim 1 : vector<1x256xf32>, i32 -> vector<1x256xf32>
    %993 = arith.mulf %992, %381 : vector<1x256xf32>
    %994 = arith.addf %991, %993 : vector<1x256xf32>
    %c224_i32_186 = arith.constant 224 : i32
    %995 = tpu.dynamic_rotate %876 by %c224_i32_186 dim 1 : vector<1x256xf32>, i32 -> vector<1x256xf32>
    %996 = arith.mulf %995, %384 : vector<1x256xf32>
    %997 = arith.addf %994, %996 : vector<1x256xf32>
    %c223_i32_187 = arith.constant 223 : i32
    %998 = tpu.dynamic_rotate %876 by %c223_i32_187 dim 1 : vector<1x256xf32>, i32 -> vector<1x256xf32>
    %999 = arith.mulf %998, %387 : vector<1x256xf32>
    %1000 = arith.addf %997, %999 : vector<1x256xf32>
    %c222_i32_188 = arith.constant 222 : i32
    %1001 = tpu.dynamic_rotate %876 by %c222_i32_188 dim 1 : vector<1x256xf32>, i32 -> vector<1x256xf32>
    %1002 = arith.mulf %1001, %390 : vector<1x256xf32>
    %1003 = arith.addf %1000, %1002 : vector<1x256xf32>
    %c221_i32_189 = arith.constant 221 : i32
    %1004 = tpu.dynamic_rotate %876 by %c221_i32_189 dim 1 : vector<1x256xf32>, i32 -> vector<1x256xf32>
    %1005 = arith.mulf %1004, %393 : vector<1x256xf32>
    %1006 = arith.addf %1003, %1005 : vector<1x256xf32>
    %c211_i32_190 = arith.constant 211 : i32
    %1007 = tpu.dynamic_rotate %876 by %c211_i32_190 dim 1 : vector<1x256xf32>, i32 -> vector<1x256xf32>
    %1008 = arith.mulf %1007, %396 : vector<1x256xf32>
    %1009 = arith.addf %1006, %1008 : vector<1x256xf32>
    %c210_i32_191 = arith.constant 210 : i32
    %1010 = tpu.dynamic_rotate %876 by %c210_i32_191 dim 1 : vector<1x256xf32>, i32 -> vector<1x256xf32>
    %1011 = arith.mulf %1010, %399 : vector<1x256xf32>
    %1012 = arith.addf %1009, %1011 : vector<1x256xf32>
    %c209_i32_192 = arith.constant 209 : i32
    %1013 = tpu.dynamic_rotate %876 by %c209_i32_192 dim 1 : vector<1x256xf32>, i32 -> vector<1x256xf32>
    %1014 = arith.mulf %1013, %402 : vector<1x256xf32>
    %1015 = arith.addf %1012, %1014 : vector<1x256xf32>
    %c208_i32_193 = arith.constant 208 : i32
    %1016 = tpu.dynamic_rotate %876 by %c208_i32_193 dim 1 : vector<1x256xf32>, i32 -> vector<1x256xf32>
    %1017 = arith.mulf %1016, %405 : vector<1x256xf32>
    %1018 = arith.addf %1015, %1017 : vector<1x256xf32>
    %c207_i32_194 = arith.constant 207 : i32
    %1019 = tpu.dynamic_rotate %876 by %c207_i32_194 dim 1 : vector<1x256xf32>, i32 -> vector<1x256xf32>
    %1020 = arith.mulf %1019, %408 : vector<1x256xf32>
    %1021 = arith.addf %1018, %1020 : vector<1x256xf32>
    %c206_i32_195 = arith.constant 206 : i32
    %1022 = tpu.dynamic_rotate %876 by %c206_i32_195 dim 1 : vector<1x256xf32>, i32 -> vector<1x256xf32>
    %1023 = arith.mulf %1022, %411 : vector<1x256xf32>
    %1024 = arith.addf %1021, %1023 : vector<1x256xf32>
    %c205_i32_196 = arith.constant 205 : i32
    %1025 = tpu.dynamic_rotate %876 by %c205_i32_196 dim 1 : vector<1x256xf32>, i32 -> vector<1x256xf32>
    %1026 = arith.mulf %1025, %414 : vector<1x256xf32>
    %1027 = arith.addf %1024, %1026 : vector<1x256xf32>
    %c51_i32_197 = arith.constant 51 : i32
    %1028 = tpu.dynamic_rotate %880 by %c51_i32_197 dim 1 : vector<1x256xf32>, i32 -> vector<1x256xf32>
    %1029 = arith.mulf %1028, %417 : vector<1x256xf32>
    %1030 = arith.addf %1027, %1029 : vector<1x256xf32>
    %c50_i32_198 = arith.constant 50 : i32
    %1031 = tpu.dynamic_rotate %880 by %c50_i32_198 dim 1 : vector<1x256xf32>, i32 -> vector<1x256xf32>
    %1032 = arith.mulf %1031, %420 : vector<1x256xf32>
    %1033 = arith.addf %1030, %1032 : vector<1x256xf32>
    %c49_i32_199 = arith.constant 49 : i32
    %1034 = tpu.dynamic_rotate %880 by %c49_i32_199 dim 1 : vector<1x256xf32>, i32 -> vector<1x256xf32>
    %1035 = arith.mulf %1034, %423 : vector<1x256xf32>
    %1036 = arith.addf %1033, %1035 : vector<1x256xf32>
    %c48_i32_200 = arith.constant 48 : i32
    %1037 = tpu.dynamic_rotate %880 by %c48_i32_200 dim 1 : vector<1x256xf32>, i32 -> vector<1x256xf32>
    %1038 = arith.mulf %1037, %426 : vector<1x256xf32>
    %1039 = arith.addf %1036, %1038 : vector<1x256xf32>
    %c47_i32_201 = arith.constant 47 : i32
    %1040 = tpu.dynamic_rotate %880 by %c47_i32_201 dim 1 : vector<1x256xf32>, i32 -> vector<1x256xf32>
    %1041 = arith.mulf %1040, %429 : vector<1x256xf32>
    %1042 = arith.addf %1039, %1041 : vector<1x256xf32>
    %c46_i32_202 = arith.constant 46 : i32
    %1043 = tpu.dynamic_rotate %880 by %c46_i32_202 dim 1 : vector<1x256xf32>, i32 -> vector<1x256xf32>
    %1044 = arith.mulf %1043, %432 : vector<1x256xf32>
    %1045 = arith.addf %1042, %1044 : vector<1x256xf32>
    %c45_i32_203 = arith.constant 45 : i32
    %1046 = tpu.dynamic_rotate %880 by %c45_i32_203 dim 1 : vector<1x256xf32>, i32 -> vector<1x256xf32>
    %1047 = arith.mulf %1046, %435 : vector<1x256xf32>
    %1048 = arith.addf %1045, %1047 : vector<1x256xf32>
    %c35_i32_204 = arith.constant 35 : i32
    %1049 = tpu.dynamic_rotate %880 by %c35_i32_204 dim 1 : vector<1x256xf32>, i32 -> vector<1x256xf32>
    %1050 = arith.mulf %1049, %438 : vector<1x256xf32>
    %1051 = arith.addf %1048, %1050 : vector<1x256xf32>
    %c34_i32_205 = arith.constant 34 : i32
    %1052 = tpu.dynamic_rotate %880 by %c34_i32_205 dim 1 : vector<1x256xf32>, i32 -> vector<1x256xf32>
    %1053 = arith.mulf %1052, %441 : vector<1x256xf32>
    %1054 = arith.addf %1051, %1053 : vector<1x256xf32>
    %c33_i32_206 = arith.constant 33 : i32
    %1055 = tpu.dynamic_rotate %880 by %c33_i32_206 dim 1 : vector<1x256xf32>, i32 -> vector<1x256xf32>
    %1056 = arith.mulf %1055, %444 : vector<1x256xf32>
    %1057 = arith.addf %1054, %1056 : vector<1x256xf32>
    %c32_i32_207 = arith.constant 32 : i32
    %1058 = tpu.dynamic_rotate %880 by %c32_i32_207 dim 1 : vector<1x256xf32>, i32 -> vector<1x256xf32>
    %1059 = arith.mulf %1058, %447 : vector<1x256xf32>
    %1060 = arith.addf %1057, %1059 : vector<1x256xf32>
    %c31_i32_208 = arith.constant 31 : i32
    %1061 = tpu.dynamic_rotate %880 by %c31_i32_208 dim 1 : vector<1x256xf32>, i32 -> vector<1x256xf32>
    %1062 = arith.mulf %1061, %450 : vector<1x256xf32>
    %1063 = arith.addf %1060, %1062 : vector<1x256xf32>
    %c30_i32_209 = arith.constant 30 : i32
    %1064 = tpu.dynamic_rotate %880 by %c30_i32_209 dim 1 : vector<1x256xf32>, i32 -> vector<1x256xf32>
    %1065 = arith.mulf %1064, %453 : vector<1x256xf32>
    %1066 = arith.addf %1063, %1065 : vector<1x256xf32>
    %c29_i32_210 = arith.constant 29 : i32
    %1067 = tpu.dynamic_rotate %880 by %c29_i32_210 dim 1 : vector<1x256xf32>, i32 -> vector<1x256xf32>
    %1068 = arith.mulf %1067, %456 : vector<1x256xf32>
    %1069 = arith.addf %1066, %1068 : vector<1x256xf32>
    %c19_i32_211 = arith.constant 19 : i32
    %1070 = tpu.dynamic_rotate %880 by %c19_i32_211 dim 1 : vector<1x256xf32>, i32 -> vector<1x256xf32>
    %1071 = arith.mulf %1070, %459 : vector<1x256xf32>
    %1072 = arith.addf %1069, %1071 : vector<1x256xf32>
    %c18_i32_212 = arith.constant 18 : i32
    %1073 = tpu.dynamic_rotate %880 by %c18_i32_212 dim 1 : vector<1x256xf32>, i32 -> vector<1x256xf32>
    %1074 = arith.mulf %1073, %462 : vector<1x256xf32>
    %1075 = arith.addf %1072, %1074 : vector<1x256xf32>
    %c17_i32_213 = arith.constant 17 : i32
    %1076 = tpu.dynamic_rotate %880 by %c17_i32_213 dim 1 : vector<1x256xf32>, i32 -> vector<1x256xf32>
    %1077 = arith.mulf %1076, %465 : vector<1x256xf32>
    %1078 = arith.addf %1075, %1077 : vector<1x256xf32>
    %c16_i32_214 = arith.constant 16 : i32
    %1079 = tpu.dynamic_rotate %880 by %c16_i32_214 dim 1 : vector<1x256xf32>, i32 -> vector<1x256xf32>
    %1080 = arith.mulf %1079, %468 : vector<1x256xf32>
    %1081 = arith.addf %1078, %1080 : vector<1x256xf32>
    %c15_i32_215 = arith.constant 15 : i32
    %1082 = tpu.dynamic_rotate %880 by %c15_i32_215 dim 1 : vector<1x256xf32>, i32 -> vector<1x256xf32>
    %1083 = arith.mulf %1082, %471 : vector<1x256xf32>
    %1084 = arith.addf %1081, %1083 : vector<1x256xf32>
    %c14_i32_216 = arith.constant 14 : i32
    %1085 = tpu.dynamic_rotate %880 by %c14_i32_216 dim 1 : vector<1x256xf32>, i32 -> vector<1x256xf32>
    %1086 = arith.mulf %1085, %474 : vector<1x256xf32>
    %1087 = arith.addf %1084, %1086 : vector<1x256xf32>
    %c13_i32_217 = arith.constant 13 : i32
    %1088 = tpu.dynamic_rotate %880 by %c13_i32_217 dim 1 : vector<1x256xf32>, i32 -> vector<1x256xf32>
    %1089 = arith.mulf %1088, %477 : vector<1x256xf32>
    %1090 = arith.addf %1087, %1089 : vector<1x256xf32>
    %c3_i32_218 = arith.constant 3 : i32
    %1091 = tpu.dynamic_rotate %880 by %c3_i32_218 dim 1 : vector<1x256xf32>, i32 -> vector<1x256xf32>
    %1092 = arith.mulf %1091, %480 : vector<1x256xf32>
    %1093 = arith.addf %1090, %1092 : vector<1x256xf32>
    %c2_i32_219 = arith.constant 2 : i32
    %1094 = tpu.dynamic_rotate %880 by %c2_i32_219 dim 1 : vector<1x256xf32>, i32 -> vector<1x256xf32>
    %1095 = arith.mulf %1094, %483 : vector<1x256xf32>
    %1096 = arith.addf %1093, %1095 : vector<1x256xf32>
    %c1_i32_220 = arith.constant 1 : i32
    %1097 = tpu.dynamic_rotate %880 by %c1_i32_220 dim 1 : vector<1x256xf32>, i32 -> vector<1x256xf32>
    %1098 = arith.mulf %1097, %486 : vector<1x256xf32>
    %1099 = arith.addf %1096, %1098 : vector<1x256xf32>
    %1100 = arith.mulf %880, %489 : vector<1x256xf32>
    %1101 = arith.addf %1099, %1100 : vector<1x256xf32>
    %c255_i32_221 = arith.constant 255 : i32
    %1102 = tpu.dynamic_rotate %880 by %c255_i32_221 dim 1 : vector<1x256xf32>, i32 -> vector<1x256xf32>
    %1103 = arith.mulf %1102, %492 : vector<1x256xf32>
    %1104 = arith.addf %1101, %1103 : vector<1x256xf32>
    %c254_i32_222 = arith.constant 254 : i32
    %1105 = tpu.dynamic_rotate %880 by %c254_i32_222 dim 1 : vector<1x256xf32>, i32 -> vector<1x256xf32>
    %1106 = arith.mulf %1105, %495 : vector<1x256xf32>
    %1107 = arith.addf %1104, %1106 : vector<1x256xf32>
    %c253_i32_223 = arith.constant 253 : i32
    %1108 = tpu.dynamic_rotate %880 by %c253_i32_223 dim 1 : vector<1x256xf32>, i32 -> vector<1x256xf32>
    %1109 = arith.mulf %1108, %498 : vector<1x256xf32>
    %1110 = arith.addf %1107, %1109 : vector<1x256xf32>
    %c243_i32_224 = arith.constant 243 : i32
    %1111 = tpu.dynamic_rotate %880 by %c243_i32_224 dim 1 : vector<1x256xf32>, i32 -> vector<1x256xf32>
    %1112 = arith.mulf %1111, %501 : vector<1x256xf32>
    %1113 = arith.addf %1110, %1112 : vector<1x256xf32>
    %c242_i32_225 = arith.constant 242 : i32
    %1114 = tpu.dynamic_rotate %880 by %c242_i32_225 dim 1 : vector<1x256xf32>, i32 -> vector<1x256xf32>
    %1115 = arith.mulf %1114, %504 : vector<1x256xf32>
    %1116 = arith.addf %1113, %1115 : vector<1x256xf32>
    %c241_i32_226 = arith.constant 241 : i32
    %1117 = tpu.dynamic_rotate %880 by %c241_i32_226 dim 1 : vector<1x256xf32>, i32 -> vector<1x256xf32>
    %1118 = arith.mulf %1117, %507 : vector<1x256xf32>
    %1119 = arith.addf %1116, %1118 : vector<1x256xf32>
    %c240_i32_227 = arith.constant 240 : i32
    %1120 = tpu.dynamic_rotate %880 by %c240_i32_227 dim 1 : vector<1x256xf32>, i32 -> vector<1x256xf32>
    %1121 = arith.mulf %1120, %510 : vector<1x256xf32>
    %1122 = arith.addf %1119, %1121 : vector<1x256xf32>
    %c239_i32_228 = arith.constant 239 : i32
    %1123 = tpu.dynamic_rotate %880 by %c239_i32_228 dim 1 : vector<1x256xf32>, i32 -> vector<1x256xf32>
    %1124 = arith.mulf %1123, %513 : vector<1x256xf32>
    %1125 = arith.addf %1122, %1124 : vector<1x256xf32>
    %c238_i32_229 = arith.constant 238 : i32
    %1126 = tpu.dynamic_rotate %880 by %c238_i32_229 dim 1 : vector<1x256xf32>, i32 -> vector<1x256xf32>
    %1127 = arith.mulf %1126, %516 : vector<1x256xf32>
    %1128 = arith.addf %1125, %1127 : vector<1x256xf32>
    %c237_i32_230 = arith.constant 237 : i32
    %1129 = tpu.dynamic_rotate %880 by %c237_i32_230 dim 1 : vector<1x256xf32>, i32 -> vector<1x256xf32>
    %1130 = arith.mulf %1129, %519 : vector<1x256xf32>
    %1131 = arith.addf %1128, %1130 : vector<1x256xf32>
    %c227_i32_231 = arith.constant 227 : i32
    %1132 = tpu.dynamic_rotate %880 by %c227_i32_231 dim 1 : vector<1x256xf32>, i32 -> vector<1x256xf32>
    %1133 = arith.mulf %1132, %522 : vector<1x256xf32>
    %1134 = arith.addf %1131, %1133 : vector<1x256xf32>
    %c226_i32_232 = arith.constant 226 : i32
    %1135 = tpu.dynamic_rotate %880 by %c226_i32_232 dim 1 : vector<1x256xf32>, i32 -> vector<1x256xf32>
    %1136 = arith.mulf %1135, %525 : vector<1x256xf32>
    %1137 = arith.addf %1134, %1136 : vector<1x256xf32>
    %c225_i32_233 = arith.constant 225 : i32
    %1138 = tpu.dynamic_rotate %880 by %c225_i32_233 dim 1 : vector<1x256xf32>, i32 -> vector<1x256xf32>
    %1139 = arith.mulf %1138, %528 : vector<1x256xf32>
    %1140 = arith.addf %1137, %1139 : vector<1x256xf32>
    %c224_i32_234 = arith.constant 224 : i32
    %1141 = tpu.dynamic_rotate %880 by %c224_i32_234 dim 1 : vector<1x256xf32>, i32 -> vector<1x256xf32>
    %1142 = arith.mulf %1141, %531 : vector<1x256xf32>
    %1143 = arith.addf %1140, %1142 : vector<1x256xf32>
    %c223_i32_235 = arith.constant 223 : i32
    %1144 = tpu.dynamic_rotate %880 by %c223_i32_235 dim 1 : vector<1x256xf32>, i32 -> vector<1x256xf32>
    %1145 = arith.mulf %1144, %534 : vector<1x256xf32>
    %1146 = arith.addf %1143, %1145 : vector<1x256xf32>
    %c222_i32_236 = arith.constant 222 : i32
    %1147 = tpu.dynamic_rotate %880 by %c222_i32_236 dim 1 : vector<1x256xf32>, i32 -> vector<1x256xf32>
    %1148 = arith.mulf %1147, %537 : vector<1x256xf32>
    %1149 = arith.addf %1146, %1148 : vector<1x256xf32>
    %c221_i32_237 = arith.constant 221 : i32
    %1150 = tpu.dynamic_rotate %880 by %c221_i32_237 dim 1 : vector<1x256xf32>, i32 -> vector<1x256xf32>
    %1151 = arith.mulf %1150, %540 : vector<1x256xf32>
    %1152 = arith.addf %1149, %1151 : vector<1x256xf32>
    %c211_i32_238 = arith.constant 211 : i32
    %1153 = tpu.dynamic_rotate %880 by %c211_i32_238 dim 1 : vector<1x256xf32>, i32 -> vector<1x256xf32>
    %1154 = arith.mulf %1153, %543 : vector<1x256xf32>
    %1155 = arith.addf %1152, %1154 : vector<1x256xf32>
    %c210_i32_239 = arith.constant 210 : i32
    %1156 = tpu.dynamic_rotate %880 by %c210_i32_239 dim 1 : vector<1x256xf32>, i32 -> vector<1x256xf32>
    %1157 = arith.mulf %1156, %546 : vector<1x256xf32>
    %1158 = arith.addf %1155, %1157 : vector<1x256xf32>
    %c209_i32_240 = arith.constant 209 : i32
    %1159 = tpu.dynamic_rotate %880 by %c209_i32_240 dim 1 : vector<1x256xf32>, i32 -> vector<1x256xf32>
    %1160 = arith.mulf %1159, %549 : vector<1x256xf32>
    %1161 = arith.addf %1158, %1160 : vector<1x256xf32>
    %c208_i32_241 = arith.constant 208 : i32
    %1162 = tpu.dynamic_rotate %880 by %c208_i32_241 dim 1 : vector<1x256xf32>, i32 -> vector<1x256xf32>
    %1163 = arith.mulf %1162, %552 : vector<1x256xf32>
    %1164 = arith.addf %1161, %1163 : vector<1x256xf32>
    %c207_i32_242 = arith.constant 207 : i32
    %1165 = tpu.dynamic_rotate %880 by %c207_i32_242 dim 1 : vector<1x256xf32>, i32 -> vector<1x256xf32>
    %1166 = arith.mulf %1165, %555 : vector<1x256xf32>
    %1167 = arith.addf %1164, %1166 : vector<1x256xf32>
    %c206_i32_243 = arith.constant 206 : i32
    %1168 = tpu.dynamic_rotate %880 by %c206_i32_243 dim 1 : vector<1x256xf32>, i32 -> vector<1x256xf32>
    %1169 = arith.mulf %1168, %558 : vector<1x256xf32>
    %1170 = arith.addf %1167, %1169 : vector<1x256xf32>
    %c205_i32_244 = arith.constant 205 : i32
    %1171 = tpu.dynamic_rotate %880 by %c205_i32_244 dim 1 : vector<1x256xf32>, i32 -> vector<1x256xf32>
    %1172 = arith.mulf %1171, %561 : vector<1x256xf32>
    %1173 = arith.addf %1170, %1172 : vector<1x256xf32>
    %1174 = arith.negf %1173 : vector<1x256xf32>
    %1175 = math.exp %1174 : vector<1x256xf32>
    %cst_245 = arith.constant 1.000000e+00 : f32
    %1176 = vector.broadcast %cst_245 : f32 to vector<1x256xf32>
    %1177 = arith.addf %1176, %1175 : vector<1x256xf32>
    %1178 = arith.divf %1176, %1177 : vector<1x256xf32>
    %1179 = vector.broadcast %1178 : vector<1x256xf32> to vector<4x256xf32>
    %1180 = arith.mulf %1179, %874 : vector<4x256xf32>
    %c1_246 = arith.constant 1 : index
    %c0_247 = arith.constant 0 : index
    %c0_248 = arith.constant 0 : index
    %1181 = vector.load %arg5[%c1_246, %c0_247, %c0_248] : memref<2x4x256xf32, #tpu.memory_space<vmem>>, vector<1x4x256xf32>
    %1182 = vector.shape_cast %1181 : vector<1x4x256xf32> to vector<4x256xf32>
    %1183 = vector.shape_cast %1180 : vector<4x256xf32> to vector<1x4x256xf32>
    tpu.vector_store %arg5[%c1_246, %c0_247, %c0_248], %1183 {strides = array<i32>} : memref<2x4x256xf32, #tpu.memory_space<vmem>>, vector<1x4x256xf32>,
    return
  }
  func.func @transform_0(%arg0: i32) -> (i32, i32, i32) {
    %c0_i32 = arith.constant 0 : i32
    %c0_i32_0 = arith.constant 0 : i32
    %c0_i32_1 = arith.constant 0 : i32
    return %arg0, %c0_i32, %c0_i32_0 : i32, i32, i32
  }
  func.func @transform_1(%arg0: i32) -> (i32, i32) {
    %c0_i32 = arith.constant 0 : i32
    %c0_i32_0 = arith.constant 0 : i32
    %c0_i32_1 = arith.constant 0 : i32
    return %c0_i32, %c0_i32_0 : i32, i32
  }
  func.func @transform_2(%arg0: i32) -> (i32, i32) {
    %c0_i32 = arith.constant 0 : i32
    %c0_i32_0 = arith.constant 0 : i32
    %c0_i32_1 = arith.constant 0 : i32
    return %c0_i32, %c0_i32_0 : i32, i32
  }
  func.func @transform_3(%arg0: i32) -> i32 {
    %c0_i32 = arith.constant 0 : i32
    %c0_i32_0 = arith.constant 0 : i32
    return %c0_i32 : i32
  }
  func.func @transform_4(%arg0: i32) -> (i32, i32, i32) {
    %c0_i32 = arith.constant 0 : i32
    %c0_i32_0 = arith.constant 0 : i32
    %c0_i32_1 = arith.constant 0 : i32
    return %arg0, %c0_i32, %c0_i32_0 : i32, i32, i32
  }
}

</mosaic_0001>

<bundles_post_ra>
// kernel: tpu_custom_call.1
= control target key start
LH: loop header
LB: loop body
LE: loop exit
PB: predicated region body
PF: predicated region fallthrough
CT: control target
= control target key end

     0   :  { %6 = vsyncpa [#allocation3], 0  ;;  %s118_s0 = inlined_call_operand.hbm [shape: s32[1,128], index: 0, kind: input, shape index: {}]   ;;  %s119_s1 = inlined_call_operand.hbm [shape: s32[1,128], index: 1, kind: output, shape index: {}]  }
   0x1   :  { %7 = vsyncpa [#allocation4], 0  ;;  %s13_s8 = sshll.u32 %s118_s0, 4  ;;  %s99_s9 = smov [#allocation2]   ;;  %s14_s8 = int_to_ptr.hbm [resolvable:$true] %s13_s8 }
   0x2   :  { %s15_s10 = sshll.u32 %s99_s9, 4  ;;  %s16_s10 = int_to_ptr.vmem [resolvable:$true] %s15_s10 }
   0x3   :  { %18 = dma.hbm_to_vmem [thread:$0]  %s14_s8, 16, %s16_s10, [#allocation3]  }
   0x4   :  { %95 = dma.done.wait [#allocation3], 16  }
   0x5   :  { %96 = vsyncadd [#allocation3], 4294967280  ;;  %v23_v0 = vld [vmem:[#allocation2] sm:$0x1]  ;;  %s100_s11 = smov 1   ;;  %s101_s12 = smov [#allocation5]  }
   0x6   :  { %24 = vrot.lane.b32.xlu0 %v23_v0, %s100_s11  ;;  %s32_s13 = sshll.u32 %s101_s12, 4  ;;  %s34_s16 = sshll.u32 %s119_s1, 4  ;;  %s33_s13 = int_to_ptr.vmem [resolvable:$true] %s32_s13  ;;  %s35_s16 = int_to_ptr.hbm [resolvable:$true] %s34_s16 }
  0x78   :  { %v25_v1 = vpop.permute.xlu0 %24 }
  0x79   :  { %26 = vst [vmem:[#allocation5] sm:$0x1] %v25_v1 }
  0x7a   :  { %37 = dma.vmem_to_hbm [thread:$0]  %s33_s13, 16, %s35_s16, [#allocation4]  }
  0x7b   :  { %97 = dma.done.wait [#allocation4], 16  }
  0x7c   :  { %98 = vsyncadd [#allocation4], 4294967280 }
  0x7d   :  { %42 = vsyncpa [#allocation3], 1 }
  0x7e   :  { %43 = vsyncpa [#allocation4], 1 }

// kernel: tpu_custom_call.1
= control target key start
LH: loop header
LB: loop body
LE: loop exit
PB: predicated region body
PF: predicated region fallthrough
CT: control target
= control target key end

     0   :  { %s7981_s0 = inlined_call_operand.hbm [shape: f32[2,4,256], index: 0, kind: input, shape index: {}]   ;;  %s7982_s1 = inlined_call_operand.hbm [shape: s32[1,256], index: 1, kind: input, shape index: {}]   ;;  %s7983_s2 = inlined_call_operand.hbm [shape: s32[1,256], index: 2, kind: input, shape index: {}]   ;;  %s7984_s3 = inlined_call_operand.vmem [shape: f32[98], index: 3, kind: input, shape index: {}]   ;;  %s7985_s4 = inlined_call_operand.hbm [shape: f32[2,4,256], index: 4, kind: output, shape index: {}]  }
   0x1   :  { %8481 = sst [smem:[#allocation139_spill]] %s7985_s4 }
   0x2   :  { %9 = vsyncpa [#allocation3], 0 }
   0x3   :  { %10 = vsyncpa [#allocation7], 0 }
   0x4   :  { %11 = vsyncpa [#allocation5], 0  ;;  %s31_s17 = sshll.u32 %s7982_s1, 4  ;;  %s32_s17 = int_to_ptr.hbm [resolvable:$true] %s31_s17 }
   0x5   :  { %12 = vsyncpa [#allocation4], 0  ;;  %s3477_s18 = smov [#allocation6]   ;;  %s17_s22 = sshll.u32 %s7981_s0, 4  ;;  %s18_s22 = int_to_ptr.hbm [resolvable:$true] %s17_s22 }
   0x6   :  { %s33_s19 = sshll.u32 %s3477_s18, 4  ;;  %s3478_s23 = smov [#allocation2]   ;;  %s34_s19 = int_to_ptr.vmem [resolvable:$true] %s33_s19 }
   0x7   :  { %36 = dma.hbm_to_vmem [thread:$0]  %s32_s17, 32, %s34_s19, [#allocation7]  }
   0x8   :  { %s19_s24 = sshll.u32 %s3478_s23, 4  ;;  %s7986_s25 = smov 128   ;;  %s20_s24 = int_to_ptr.vmem [resolvable:$true] %s19_s24 }
   0x9   :  { %s7987_s26 = smov 8   ;;  %s42_s28 = sshll.u32 %s7983_s2, 4  ;;  %s43_s28 = int_to_ptr.hbm [resolvable:$true] %s42_s28 }
   0xa   :  { %25 = dma.hbm_to_vmem [thread:$0]  %s18_s22, 256, %s20_s24, [#allocation3], %s7986_s25, %s7986_s25, %s7987_s26  }
   0xb   :  { %s3481_s29 = smov [#allocation8]   ;;  %s53_s6 = sshll.u32 %s7984_s3, 4  ;;  %s54_s6 = int_to_ptr.vmem [resolvable:$true] %s53_s6 }
   0xc   :  { %s44_s30 = sshll.u32 %s3481_s29, 4  ;;  %s3482_s7 = smov [#allocation9]   ;;  %s45_s30 = int_to_ptr.vmem [resolvable:$true] %s44_s30 }
   0xd   :  { %47 = dma.hbm_to_vmem [thread:$0]  %s43_s28, 32, %s45_s30, [#allocation7]  }
   0xe   :  { %56 = dma.vmem_to_smem %s54_s6, 16, %s3482_s7, [#allocation5]  }
   0xf   :  { %3469 = dma.done.wait [#allocation3], 256  }
  0x10   :  { %3470 = vsyncadd [#allocation3], 4294967040 }
  0x11   :  { %3471 = dma.done.wait [#allocation7], 64  }
  0x12   :  { %3472 = vsyncadd [#allocation7], 4294967232 }
  0x13   :  { %3473 = dma.done.wait [#allocation5], 16  }
  0x14   :  { %3474 = vsyncadd [#allocation5], 4294967280 }
  0x15   :  { %73 = sfence }
  0x16   :  { %v3574_v0 = vld [vmem:[#allocation2] sm:$0xff]  ;;  %vm494_vm0 = vcmask 1043456   ;;  %s8386_s2 = smov 50   ;;  %s8349_s3 = smov 51  }
  0x17   :  { %489 = vst [vmem:[#allocation1] ss:$2 sm:$0xff] %v3574_v0  ;;  %s8376_s8 = smov 49   ;;  %s8374_s9 = smov 48  }
  0x18   :  { %s8372_s10 = smov 47   ;;  %s8325_s11 = smov 46  }
  0x19   :  { %s8319_s12 = smov 45   ;;  %s8309_s13 = smov 35  }
  0x1a   :  { %s8295_s14 = smov 34   ;;  %s8072_s15 = smov 33  }
  0x1b   :  { %s8063_s16 = smov 32   ;;  %s8055_s17 = smov 31  }
  0x1c   :  { %s8061_s18 = smov 30   ;;  %s8079_s19 = smov 29  }
  0x1d   :  { %s8293_s20 = smov 19   ;;  %s8291_s21 = smov 18  }
  0x1e   :  { %v490_v1 = vld.sshfl [vmem:[#allocation1] sm:$0xff pattern:$0x75316420]  ;;  %v491_v2 = vld.sshfl [vmem:[#allocation1 + $0x8] sm:$0xff pattern:$0x75316420] }
  0x1f   :  { %v495_v3 = vsel %vm494_vm0, %v490_v1, -inf  ;;  %v502_v4 = vsel %vm494_vm0, %v491_v2, -inf  ;;  %509 = vst [vmem:[#allocation1] ss:$2 sm:$0xff] %v3574_v0  ;;  %s8265_s22 = smov 17   ;;  %s8263_s23 = smov 16  }
  0x20   :  { %v496_v5 = vrot.slane %v495_v3, 4  ;;  %v503_v6 = vrot.slane %v502_v4, 4  ;;  %s8238_s24 = smov 15   ;;  %s8232_s1 = smov 14  }
  0x21   :  { %s8219_s27 = smov 13   ;;  %s8217_s28 = smov 3  }
  0x22   :  { %v497_v7 = vmax.f32 %v495_v3, %v496_v5  ;;  %v504_v8 = vmax.f32 %v502_v4, %v503_v6  ;;  %s8202_s29 = smov 2   ;;  %s8185_s30 = smov 1   ;;  %v3855_v5 = vld [vmem:[#allocation2 + $0x8] sm:$0xff] }
  0x23   :  { %s8182_s0 = smov 127   ;;  %s8170_s5 = smov 126   ;;  %8501 = vst [vmem:[#allocation34_spill] sm:$0xff] %v3855_v5 }
  0x24   :  { %v498_v9 = vrot.slane %v497_v7, 2  ;;  %v505_v10 = vrot.slane %v504_v8, 2  ;;  %s7990_s6 = smov 125   ;;  %s7988_s7 = smov 115  }
  0x25   :  { %s7996_s25 = smov 114   ;;  %s7992_s26 = smov 113  }
  0x26   :  { %v499_v11 = vmax.f32 %v497_v7, %v498_v9  ;;  %v506_v13 = vmax.f32 %v504_v8, %v505_v10  ;;  %v511_v56 = vld.sshfl [vmem:[#allocation1 + $0x8] sm:$0xff pattern:$0x75316420]  ;;  %v510_v57 = vld.sshfl [vmem:[#allocation1] sm:$0xff pattern:$0x75316420] }
  0x27   :  { %2085 = vst [vmem:[#allocation1] ss:$2 sm:$0xff] %v3574_v0  ;;  %v3526_v0 = vmov 4.0   ;;  %v521_v3 = vsel %vm494_vm0, %v511_v56, 0.0  ;;  %v514_v4 = vsel %vm494_vm0, %v510_v57, 0.0  ;;  %s9019_s4 = smov 29  }
  0x28   :  { %v500_v12 = vrot.slane %v499_v11, 1  ;;  %v507_v15 = vrot.slane %v506_v13, 1  ;;  %3342 = vrcp.f32 %v3526_v0  ;;  %v522_v9 = vrot.slane %v521_v3, 4 }
  0x29   :  { %v515_v10 = vrot.slane %v514_v4, 4 }
  0x2a   :  { %v3580_v14 = vmax.f32 %v499_v11, %v500_v12  ;;  %v3588_v16 = vmax.f32 %v506_v13, %v507_v15  ;;  %v523_v12 = vadd.f32 %v522_v9, %v521_v3 }
  0x2b   :  { %v516_v13 = vadd.f32 %v515_v10, %v514_v4 }
  0x2c   :  { %8482 = vst [vmem:[#allocation15_spill] sm:$0xff] %v3580_v14  ;;  %555 = vrot.lane.b32.xlu1 %v3580_v14, %s8386_s2  ;;  %537 = vrot.lane.b32.xlu0 %v3580_v14, %s8349_s3 }
  0x2d   :  { %571 = vrot.lane.b32.xlu2 %v3580_v14, %s8376_s8  ;;  %8483 = vst [vmem:[#allocation16_spill] sm:$0xff] %v3588_v16 }
  0x2e   :  { %v3847_v1 = vld.sshfl [vmem:[#allocation1] sm:$0xff pattern:$0x75316420]  ;;  %v3849_v2 = vld.sshfl [vmem:[#allocation1 + $0x8] sm:$0xff pattern:$0x75316420]  ;;  %v3343_v11 = vpop.eup %3342 }
  0x2f   :  { %8499 = vst [vmem:[#allocation32_spill] sm:$0xff] %v3847_v1  ;;  %v529_v15 = vmul.f32 4.0, %v3343_v11  ;;  %v524_v1 = vrot.slane %v523_v12, 2  ;;  %vm533_vm1 = vweird.f32 %v3343_v11 }
  0x30   :  { %8500 = vst [vmem:[#allocation33_spill] sm:$0xff] %v3849_v2  ;;  %v517_v2 = vrot.slane %v516_v13, 2 }
  0x31   :  { %2101 = vst [vmem:[#allocation1] ss:$2 sm:$0xff] %v3855_v5  ;;  %v530_v5 = vsub.f32 1.0, %v529_v15  ;;  %v525_v3 = vadd.f32 %v524_v1, %v523_v12 }
  0x32   :  { %v518_v4 = vadd.f32 %v517_v2, %v516_v13 }
  0x33   :  { %v531_v9 = vmul.f32 %v3343_v11, %v530_v5  ;;  %v526_v15 = vrot.slane %v525_v3, 1 }
  0x34   :  { %557 = vrot.lane.b32.xlu1 %v3588_v16, %s8386_s2  ;;  %539 = vrot.lane.b32.xlu0 %v3588_v16, %s8349_s3 }
  0x35   :  { %573 = vrot.lane.b32.xlu2 %v3588_v16, %s8376_s8  ;;  %v527_v1 = vadd.f32 %v526_v15, %v525_v3 }
  0x3c   :  { %589 = vrot.lane.b32.xlu1 %v3588_v16, %s8374_s9  ;;  %587 = vrot.lane.b32.xlu0 %v3580_v14, %s8374_s9 }
  0x3d   :  { %603 = vrot.lane.b32.xlu2 %v3580_v14, %s8372_s10 }
  0x44   :  { %619 = vrot.lane.b32.xlu1 %v3580_v14, %s8325_s11  ;;  %605 = vrot.lane.b32.xlu0 %v3588_v16, %s8372_s10 }
  0x45   :  { %621 = vrot.lane.b32.xlu2 %v3588_v16, %s8325_s11 }
  0x4c   :  { %637 = vrot.lane.b32.xlu1 %v3588_v16, %s8319_s12  ;;  %635 = vrot.lane.b32.xlu0 %v3580_v14, %s8319_s12 }
  0x4d   :  { %651 = vrot.lane.b32.xlu2 %v3580_v14, %s8309_s13 }
  0x54   :  { %667 = vrot.lane.b32.xlu1 %v3580_v14, %s8295_s14  ;;  %653 = vrot.lane.b32.xlu0 %v3588_v16, %s8309_s13 }
  0x55   :  { %669 = vrot.lane.b32.xlu2 %v3588_v16, %s8295_s14 }
  0x5c   :  { %685 = vrot.lane.b32.xlu1 %v3588_v16, %s8072_s15  ;;  %683 = vrot.lane.b32.xlu0 %v3580_v14, %s8072_s15 }
  0x5d   :  { %699 = vrot.lane.b32.xlu2 %v3580_v14, %s8063_s16 }
  0x64   :  { %715 = vrot.lane.b32.xlu1 %v3580_v14, %s8055_s17  ;;  %701 = vrot.lane.b32.xlu0 %v3588_v16, %s8063_s16 }
  0x65   :  { %717 = vrot.lane.b32.xlu2 %v3588_v16, %s8055_s17 }
  0x6c   :  { %733 = vrot.lane.b32.xlu1 %v3588_v16, %s8061_s18  ;;  %731 = vrot.lane.b32.xlu0 %v3580_v14, %s8061_s18 }
  0x6d   :  { %747 = vrot.lane.b32.xlu2 %v3580_v14, %s8079_s19 }
  0x74   :  { %763 = vrot.lane.b32.xlu1 %v3580_v14, %s8293_s20  ;;  %749 = vrot.lane.b32.xlu0 %v3588_v16, %s8079_s19 }
  0x75   :  { %765 = vrot.lane.b32.xlu2 %v3588_v16, %s8293_s20 }
  0x7c   :  { %781 = vrot.lane.b32.xlu1 %v3588_v16, %s8291_s21  ;;  %779 = vrot.lane.b32.xlu0 %v3580_v14, %s8291_s21 }
  0x7d   :  { %795 = vrot.lane.b32.xlu2 %v3580_v14, %s8265_s22 }
  0x84   :  { %811 = vrot.lane.b32.xlu1 %v3580_v14, %s8263_s23  ;;  %797 = vrot.lane.b32.xlu0 %v3588_v16, %s8265_s22 }
  0x85   :  { %813 = vrot.lane.b32.xlu2 %v3588_v16, %s8263_s23 }
  0x87   :  { %v3656_v17 = vpop.permute.xlu2 %571 }
  0x8c   :  { %829 = vrot.lane.b32.xlu1 %v3588_v16, %s8238_s24  ;;  %827 = vrot.lane.b32.xlu0 %v3580_v14, %s8238_s24 }
  0x8d   :  { %843 = vrot.lane.b32.xlu2 %v3580_v14, %s8232_s1 }
  0x8f   :  { %v3664_v18 = vpop.permute.xlu2 %573 }
  0x94   :  { %859 = vrot.lane.b32.xlu1 %v3580_v14, %s8219_s27  ;;  %845 = vrot.lane.b32.xlu0 %v3588_v16, %s8232_s1 }
  0x95   :  { %861 = vrot.lane.b32.xlu2 %v3588_v16, %s8219_s27 }
  0x97   :  { %v3672_v19 = vpop.permute.xlu2 %603 }
  0x9c   :  { %877 = vrot.lane.b32.xlu1 %v3588_v16, %s8217_s28  ;;  %875 = vrot.lane.b32.xlu0 %v3580_v14, %s8217_s28 }
  0x9d   :  { %891 = vrot.lane.b32.xlu2 %v3580_v14, %s8202_s29 }
  0x9e   :  { %v3680_v20 = vpop.permute.xlu1 %555  ;;  %v3682_v21 = vpop.permute.xlu0 %537 }
  0x9f   :  { %v3684_v22 = vpop.permute.xlu2 %621 }
  0xa4   :  { %907 = vrot.lane.b32.xlu1 %v3580_v14, %s8185_s30  ;;  %893 = vrot.lane.b32.xlu0 %v3588_v16, %s8202_s29 }
  0xa5   :  { %909 = vrot.lane.b32.xlu2 %v3588_v16, %s8185_s30 }
  0xa6   :  { %v3692_v23 = vpop.permute.xlu1 %557  ;;  %v3694_v24 = vpop.permute.xlu0 %539 }
  0xa7   :  { %v3696_v25 = vpop.permute.xlu2 %651 }
  0xac   :  { %934 = vrot.lane.b32.xlu1 %v3588_v16, %s8182_s0  ;;  %932 = vrot.lane.b32.xlu0 %v3580_v14, %s8182_s0 }
  0xad   :  { %948 = vrot.lane.b32.xlu2 %v3580_v14, %s8170_s5 }
  0xae   :  { %v3704_v26 = vpop.permute.xlu1 %589  ;;  %v3706_v27 = vpop.permute.xlu0 %587 }
  0xaf   :  { %v3708_v28 = vpop.permute.xlu2 %669 }
  0xb4   :  { %964 = vrot.lane.b32.xlu1 %v3580_v14, %s7990_s6  ;;  %950 = vrot.lane.b32.xlu0 %v3588_v16, %s8170_s5 }
  0xb5   :  { %966 = vrot.lane.b32.xlu2 %v3588_v16, %s7990_s6  ;;  %s8002_s6 = smov 111  }
  0xb6   :  { %v3716_v29 = vpop.permute.xlu1 %619  ;;  %v3718_v30 = vpop.permute.xlu0 %605 }
  0xb7   :  { %v3720_v31 = vpop.permute.xlu2 %699 }
  0xbc   :  { %982 = vrot.lane.b32.xlu1 %v3588_v16, %s7988_s7  ;;  %980 = vrot.lane.b32.xlu0 %v3580_v14, %s7988_s7  ;;  %s7994_s7 = smov 112  }
  0xbd   :  { %996 = vrot.lane.b32.xlu2 %v3580_v14, %s7996_s25 }
  0xbe   :  { %v3728_v32 = vpop.permute.xlu1 %637  ;;  %v3730_v33 = vpop.permute.xlu0 %635 }
  0xbf   :  { %v3732_v34 = vpop.permute.xlu2 %717 }
  0xc4   :  { %1012 = vrot.lane.b32.xlu1 %v3580_v14, %s7992_s26  ;;  %998 = vrot.lane.b32.xlu0 %v3588_v16, %s7996_s25  ;;  %s8008_s25 = smov 99  }
  0xc5   :  { %1014 = vrot.lane.b32.xlu2 %v3588_v16, %s7992_s26  ;;  %s7998_s26 = smov 110  }
  0xc6   :  { %v3740_v35 = vpop.permute.xlu1 %667  ;;  %v3742_v36 = vpop.permute.xlu0 %653 }
  0xc7   :  { %v3744_v37 = vpop.permute.xlu2 %747 }
  0xcc   :  { %1030 = vrot.lane.b32.xlu1 %v3588_v16, %s7994_s7  ;;  %1028 = vrot.lane.b32.xlu0 %v3580_v14, %s7994_s7  ;;  %s8000_s7 = smov 109  }
  0xcd   :  { %1044 = vrot.lane.b32.xlu2 %v3580_v14, %s8002_s6 }
  0xce   :  { %v3752_v38 = vpop.permute.xlu1 %685  ;;  %v3754_v39 = vpop.permute.xlu0 %683 }
  0xcf   :  { %v3756_v40 = vpop.permute.xlu2 %765 }
  0xd4   :  { %1060 = vrot.lane.b32.xlu1 %v3580_v14, %s7998_s26  ;;  %1046 = vrot.lane.b32.xlu0 %v3588_v16, %s8002_s6  ;;  %s8281_s6 = smov 96  }
  0xd5   :  { %1062 = vrot.lane.b32.xlu2 %v3588_v16, %s7998_s26  ;;  %s8004_s26 = smov 98  }
  0xd6   :  { %v3764_v41 = vpop.permute.xlu1 %715  ;;  %v3766_v42 = vpop.permute.xlu0 %701 }
  0xd7   :  { %v3768_v43 = vpop.permute.xlu2 %795 }
  0xd8   :  { %8484 = vst [vmem:[#allocation17_spill] sm:$0xff] %v3768_v43 }
  0xdc   :  { %1078 = vrot.lane.b32.xlu1 %v3588_v16, %s8000_s7  ;;  %1076 = vrot.lane.b32.xlu0 %v3580_v14, %s8000_s7  ;;  %s8006_s7 = smov 97  }
  0xdd   :  { %1092 = vrot.lane.b32.xlu2 %v3580_v14, %s8008_s25 }
  0xde   :  { %v3776_v44 = vpop.permute.xlu1 %733  ;;  %v3778_v45 = vpop.permute.xlu0 %731 }
  0xdf   :  { %v3780_v46 = vpop.permute.xlu2 %813 }
  0xe0   :  { %8485 = vst [vmem:[#allocation18_spill] sm:$0xff] %v3780_v46 }
  0xe4   :  { %1108 = vrot.lane.b32.xlu1 %v3580_v14, %s8004_s26  ;;  %1094 = vrot.lane.b32.xlu0 %v3588_v16, %s8008_s25  ;;  %s8020_s25 = smov 93  }
  0xe5   :  { %1110 = vrot.lane.b32.xlu2 %v3588_v16, %s8004_s26  ;;  %s8010_s26 = smov 95  }
  0xe6   :  { %v3788_v47 = vpop.permute.xlu1 %763  ;;  %v3790_v48 = vpop.permute.xlu0 %749 }
  0xe7   :  { %v3792_v49 = vpop.permute.xlu2 %843 }
  0xe8   :  { %8486 = vst [vmem:[#allocation19_spill] sm:$0xff] %v3792_v49 }
  0xec   :  { %1126 = vrot.lane.b32.xlu1 %v3588_v16, %s8006_s7  ;;  %1124 = vrot.lane.b32.xlu0 %v3580_v14, %s8006_s7  ;;  %s8012_s7 = smov 94  }
  0xed   :  { %1140 = vrot.lane.b32.xlu2 %v3580_v14, %s8281_s6 }
  0xee   :  { %v3800_v50 = vpop.permute.xlu1 %781  ;;  %v3802_v51 = vpop.permute.xlu0 %779 }
  0xef   :  { %8487 = vst [vmem:[#allocation20_spill] sm:$0xff] %v3800_v50  ;;  %v3804_v52 = vpop.permute.xlu2 %861 }
  0xf0   :  { %8488 = vst [vmem:[#allocation21_spill] sm:$0xff] %v3802_v51 }
  0xf1   :  { %8489 = vst [vmem:[#allocation22_spill] sm:$0xff] %v3804_v52 }
  0xf4   :  { %1156 = vrot.lane.b32.xlu1 %v3580_v14, %s8010_s26  ;;  %1142 = vrot.lane.b32.xlu0 %v3588_v16, %s8281_s6 }
  0xf5   :  { %1158 = vrot.lane.b32.xlu2 %v3588_v16, %s8010_s26  ;;  %s8014_s26 = smov 83  }
  0xf6   :  { %v3812_v53 = vpop.permute.xlu1 %811  ;;  %v3814_v54 = vpop.permute.xlu0 %797 }
  0xf7   :  { %8490 = vst [vmem:[#allocation23_spill] sm:$0xff] %v3812_v53  ;;  %v3816_v55 = vpop.permute.xlu2 %891 }
  0xf8   :  { %8491 = vst [vmem:[#allocation24_spill] sm:$0xff] %v3814_v54 }
  0xf9   :  { %8492 = vst [vmem:[#allocation25_spill] sm:$0xff] %v3816_v55 }
  0xfc   :  { %1174 = vrot.lane.b32.xlu1 %v3588_v16, %s8012_s7  ;;  %1172 = vrot.lane.b32.xlu0 %v3580_v14, %s8012_s7  ;;  %s8016_s7 = smov 82  }
  0xfd   :  { %1188 = vrot.lane.b32.xlu2 %v3580_v14, %s8020_s25 }
  0xfe   :  { %v3825_v58 = vpop.permute.xlu1 %829  ;;  %v3827_v59 = vpop.permute.xlu0 %827 }
  0xff   :  { %8493 = vst [vmem:[#allocation26_spill] sm:$0xff] %v3825_v58  ;;  %v3829_v60 = vpop.permute.xlu2 %909 }
 0x100   :  { %8494 = vst [vmem:[#allocation27_spill] sm:$0xff] %v3827_v59 }
 0x101   :  { %8495 = vst [vmem:[#allocation28_spill] sm:$0xff] %v3829_v60  ;;  %v532_v60 = vadd.f32 %v3343_v11, %v531_v9 }
 0x103   :  { %v3892_v5 = vsel %vm533_vm1, %v3343_v11, %v532_v60 }
 0x104   :  { %1204 = vrot.lane.b32.xlu1 %v3580_v14, %s8014_s26  ;;  %1190 = vrot.lane.b32.xlu0 %v3588_v16, %s8020_s25  ;;  %s8401_s25 = smov 79   ;;  %8511 = vst [vmem:[#allocation44_spill] sm:$0xff] %v3892_v5 }
 0x105   :  { %1206 = vrot.lane.b32.xlu2 %v3588_v16, %s8014_s26  ;;  %s8028_s26 = smov 81  }
 0x106   :  { %v3837_v61 = vpop.permute.xlu1 %859  ;;  %v3839_v62 = vpop.permute.xlu0 %845 }
 0x107   :  { %8496 = vst [vmem:[#allocation29_spill] sm:$0xff] %v3837_v61  ;;  %v3841_v63 = vpop.permute.xlu2 %948 }
 0x108   :  { %8497 = vst [vmem:[#allocation30_spill] sm:$0xff] %v3839_v62 }
 0x109   :  { %8498 = vst [vmem:[#allocation31_spill] sm:$0xff] %v3841_v63  ;;  %v519_v63 = vrot.slane %v518_v4, 1 }
 0x10b   :  { %v520_v2 = vadd.f32 %v519_v63, %v518_v4 }
 0x10c   :  { %1222 = vrot.lane.b32.xlu1 %v3588_v16, %s8016_s7  ;;  %1220 = vrot.lane.b32.xlu0 %v3580_v14, %s8016_s7  ;;  %s8022_s7 = smov 80  }
 0x10d   :  { %1236 = vrot.lane.b32.xlu2 %v3580_v14, %s8028_s26 }
 0x10e   :  { %v3857_v6 = vpop.permute.xlu1 %877  ;;  %v3859_v7 = vpop.permute.xlu0 %875 }
 0x10f   :  { %8502 = vst [vmem:[#allocation35_spill] sm:$0xff] %v3857_v6  ;;  %v3862_v8 = vpop.permute.xlu2 %966 }
 0x110   :  { %8503 = vst [vmem:[#allocation36_spill] sm:$0xff] %v3859_v7 }
 0x111   :  { %8504 = vst [vmem:[#allocation37_spill] sm:$0xff] %v3862_v8 }
 0x114   :  { %1252 = vrot.lane.b32.xlu1 %v3580_v14, %s8022_s7  ;;  %1238 = vrot.lane.b32.xlu0 %v3588_v16, %s8028_s26  ;;  %s8394_s26 = smov 77  }
 0x115   :  { %1254 = vrot.lane.b32.xlu2 %v3588_v16, %s8022_s7  ;;  %s8399_s7 = smov 78  }
 0x116   :  { %v3870_v56 = vpop.permute.xlu1 %907  ;;  %v3872_v57 = vpop.permute.xlu0 %893 }
 0x117   :  { %8505 = vst [vmem:[#allocation38_spill] sm:$0xff] %v3870_v56  ;;  %v3874_v0 = vpop.permute.xlu2 %996 }
 0x118   :  { %8506 = vst [vmem:[#allocation39_spill] sm:$0xff] %v3872_v57 }
 0x119   :  { %8507 = vst [vmem:[#allocation40_spill] sm:$0xff] %v3874_v0 }
 0x11c   :  { %1270 = vrot.lane.b32.xlu1 %v3588_v16, %s8401_s25  ;;  %1268 = vrot.lane.b32.xlu0 %v3580_v14, %s8401_s25 }
 0x11d   :  { %1284 = vrot.lane.b32.xlu2 %v3580_v14, %s8399_s7 }
 0x11e   :  { %v3882_v10 = vpop.permute.xlu1 %934  ;;  %v3884_v0 = vpop.permute.xlu0 %932 }
 0x11f   :  { %8508 = vst [vmem:[#allocation41_spill] sm:$0xff] %v3882_v10  ;;  %v3886_v8 = vpop.permute.xlu2 %1014 }
 0x120   :  { %8509 = vst [vmem:[#allocation42_spill] sm:$0xff] %v3884_v0  ;;  %v3906_v0 = vmul.f32 %v3892_v5, %v520_v2 }
 0x121   :  { %8510 = vst [vmem:[#allocation43_spill] sm:$0xff] %v3886_v8  ;;  %v3903_v8 = vmul.f32 %v3892_v5, %v527_v1 }
 0x124   :  { %1300 = vrot.lane.b32.xlu1 %v3580_v14, %s8394_s26  ;;  %1286 = vrot.lane.b32.xlu0 %v3588_v16, %s8399_s7 }
 0x125   :  { %1302 = vrot.lane.b32.xlu2 %v3588_v16, %s8394_s26 }
 0x126   :  { %v3896_v12 = vpop.permute.xlu1 %964  ;;  %v3898_v13 = vpop.permute.xlu0 %950 }
 0x127   :  { %8512 = vst [vmem:[#allocation45_spill] sm:$0xff] %v3896_v12  ;;  %v3900_v9 = vpop.permute.xlu2 %1044 }
 0x128   :  { %8513 = vst [vmem:[#allocation46_spill] sm:$0xff] %v3898_v13 }
 0x129   :  { %8514 = vst [vmem:[#allocation47_spill] sm:$0xff] %v3900_v9 }
 0x12c   :  { %1318 = vrot.lane.b32.xlu1 %v3903_v8, %s8349_s3  ;;  %1316 = vrot.lane.b32.xlu0 %v3906_v0, %s8349_s3 }
 0x12d   :  { %1331 = vrot.lane.b32.xlu2 %v3906_v0, %s8386_s2 }
 0x12e   :  { %v3914_v60 = vpop.permute.xlu1 %982  ;;  %v3916_v63 = vpop.permute.xlu0 %980 }
 0x12f   :  { %8515 = vst [vmem:[#allocation48_spill] sm:$0xff] %v3914_v60  ;;  %v3918_v11 = vpop.permute.xlu2 %1062 }
 0x130   :  { %8516 = vst [vmem:[#allocation49_spill] sm:$0xff] %v3916_v63 }
 0x131   :  { %8517 = vst [vmem:[#allocation50_spill] sm:$0xff] %v3918_v11 }
 0x134   :  { %1346 = vrot.lane.b32.xlu1 %v3906_v0, %s8376_s8  ;;  %1333 = vrot.lane.b32.xlu0 %v3903_v8, %s8386_s2 }
 0x135   :  { %1348 = vrot.lane.b32.xlu2 %v3903_v8, %s8376_s8 }
 0x136   :  { %v3926_v3 = vpop.permute.xlu1 %1012  ;;  %v3928_v4 = vpop.permute.xlu0 %998 }
 0x137   :  { %8518 = vst [vmem:[#allocation51_spill] sm:$0xff] %v3926_v3  ;;  %v3930_v15 = vpop.permute.xlu2 %1092 }
 0x138   :  { %8519 = vst [vmem:[#allocation52_spill] sm:$0xff] %v3928_v4 }
 0x139   :  { %8520 = vst [vmem:[#allocation53_spill] sm:$0xff] %v3930_v15 }
 0x13c   :  { %1363 = vrot.lane.b32.xlu1 %v3903_v8, %s8374_s9  ;;  %1361 = vrot.lane.b32.xlu0 %v3906_v0, %s8374_s9 }
 0x13d   :  { %1376 = vrot.lane.b32.xlu2 %v3906_v0, %s8372_s10 }
 0x13e   :  { %v3938_v1 = vpop.permute.xlu1 %1030  ;;  %v3940_v2 = vpop.permute.xlu0 %1028 }
 0x13f   :  { %8521 = vst [vmem:[#allocation54_spill] sm:$0xff] %v3938_v1  ;;  %v3942_v5 = vpop.permute.xlu2 %1110 }
 0x140   :  { %8522 = vst [vmem:[#allocation55_spill] sm:$0xff] %v3940_v2 }
 0x141   :  { %8523 = vst [vmem:[#allocation56_spill] sm:$0xff] %v3942_v5 }
 0x144   :  { %1391 = vrot.lane.b32.xlu1 %v3906_v0, %s8325_s11  ;;  %1378 = vrot.lane.b32.xlu0 %v3903_v8, %s8372_s10 }
 0x145   :  { %1393 = vrot.lane.b32.xlu2 %v3903_v8, %s8325_s11  ;;  %s5654_s11 = sld [smem:[#allocation9 + $0x3a]] }
 0x146   :  { %v3950_v15 = vpop.permute.xlu1 %1060  ;;  %v3952_v11 = vpop.permute.xlu0 %1046 }
 0x147   :  { %8524 = vst [vmem:[#allocation57_spill] sm:$0xff] %v3950_v15  ;;  %v3954_v9 = vpop.permute.xlu2 %1140 }
 0x148   :  { %8525 = vst [vmem:[#allocation58_spill] sm:$0xff] %v3952_v11 }
 0x149   :  { %8526 = vst [vmem:[#allocation59_spill] sm:$0xff] %v3954_v9 }
 0x14c   :  { %1408 = vrot.lane.b32.xlu1 %v3903_v8, %s8319_s12  ;;  %1406 = vrot.lane.b32.xlu0 %v3906_v0, %s8319_s12  ;;  %s5582_s12 = sld [smem:[#allocation9 + $0x37]] }
 0x14d   :  { %1421 = vrot.lane.b32.xlu2 %v3906_v0, %s8309_s13 }
 0x14e   :  { %v3962_v5 = vpop.permute.xlu1 %1078  ;;  %v3964_v2 = vpop.permute.xlu0 %1076 }
 0x14f   :  { %8527 = vst [vmem:[#allocation60_spill] sm:$0xff] %v3962_v5  ;;  %v3966_v1 = vpop.permute.xlu2 %1158 }
 0x150   :  { %8528 = vst [vmem:[#allocation61_spill] sm:$0xff] %v3964_v2 }
 0x151   :  { %8529 = vst [vmem:[#allocation62_spill] sm:$0xff] %v3966_v1 }
 0x154   :  { %1436 = vrot.lane.b32.xlu1 %v3906_v0, %s8295_s14  ;;  %1423 = vrot.lane.b32.xlu0 %v3903_v8, %s8309_s13  ;;  %s5500_s13 = sld [smem:[#allocation9 + $0x34]] }
 0x155   :  { %1438 = vrot.lane.b32.xlu2 %v3903_v8, %s8295_s14  ;;  %s5428_s14 = sld [smem:[#allocation9 + $0x32]] }
 0x156   :  { %v3974_v9 = vpop.permute.xlu1 %1108  ;;  %v3976_v15 = vpop.permute.xlu0 %1094 }
 0x157   :  { %8530 = vst [vmem:[#allocation63_spill] sm:$0xff] %v3974_v9  ;;  %v3978_v11 = vpop.permute.xlu2 %1188  ;;  %v3992_v9 = vld [vmem:[#allocation6] sm:$0x3] }
 0x158   :  { %8531 = vst [vmem:[#allocation64_spill] sm:$0xff] %v3976_v15  ;;  %v75_v15 = vld [vmem:[#allocation8] sm:$0x3]  ;;  %v86_v10 = vadd.s32 4294967294, %v3992_v9 }
 0x159   :  { %8532 = vst [vmem:[#allocation65_spill] sm:$0xff] %v3978_v11  ;;  %v76_v11 = vadd.s32 4294967293, %v3992_v9  ;;  %v101_v3 = vadd.s32 4294967295, %v75_v15  ;;  %v91_v4 = vadd.s32 4294967294, %v75_v15  ;;  %v81_v63 = vadd.s32 4294967293, %v75_v15 }
 0x15a   :  { %vm110_vm14 = vcmp.ge.s32.totalorder %v75_v15, 0  ;;  %vm111_vm15 = vcmp.lt.s32.totalorder %v75_v15, 16  ;;  %v139_v12 = vadd.s32 3, %v75_v15 }
 0x15b   :  { %vm77_vm2 = vcmp.ge.s32.totalorder %v76_v11, 0  ;;  %vm78_vm3 = vcmp.lt.s32.totalorder %v76_v11, 16  ;;  %vm102_vm4 = vcmp.ge.s32.totalorder %v101_v3, 0  ;;  %vm103_vm5 = vcmp.lt.s32.totalorder %v101_v3, 16 }
 0x15c   :  { %1453 = vrot.lane.b32.xlu1 %v3903_v8, %s8072_s15  ;;  %1451 = vrot.lane.b32.xlu0 %v3906_v0, %s8072_s15  ;;  %vm79_vm6 = vmand %vm77_vm2, %vm78_vm3  ;;  %vm92_vm8 = vcmp.ge.s32.totalorder %v91_v4, 0  ;;  %vm93_vm9 = vcmp.lt.s32.totalorder %v91_v4, 16  ;;  %vm82_vm10 = vcmp.ge.s32.totalorder %v81_v63, 0  ;;  %vm83_vm11 = vcmp.lt.s32.totalorder %v81_v63, 16  ;;  %s4049_s15 = sld [smem:[#allocation9 + $0x3]] }
 0x15d   :  { %1466 = vrot.lane.b32.xlu2 %v3906_v0, %s8063_s16  ;;  %vm104_vm7 = vmand %vm102_vm4, %vm103_vm5  ;;  %v119_v4 = vadd.s32 1, %v75_v15 }
 0x15e   :  { %v3986_v1 = vpop.permute.xlu1 %1126  ;;  %v3988_v2 = vpop.permute.xlu0 %1124  ;;  %vm94_vm12 = vmand %vm92_vm8, %vm93_vm9  ;;  %vm141_vm8 = vcmp.lt.s32.totalorder %v139_v12, 16  ;;  %vm87_vm9 = vcmp.ge.s32.totalorder %v86_v10, 0 }
 0x15f   :  { %8533 = vst [vmem:[#allocation66_spill] sm:$0xff] %v3986_v1  ;;  %v3990_v5 = vpop.permute.xlu2 %1206  ;;  %vm84_vm13 = vmand %vm82_vm10, %vm83_vm11  ;;  %vm120_vm1 = vcmp.ge.s32.totalorder %v119_v4, 0  ;;  %vm121_vm2 = vcmp.lt.s32.totalorder %v119_v4, 16  ;;  %vm88_vm10 = vcmp.lt.s32.totalorder %v86_v10, 16 }
 0x160   :  { %8534 = vst [vmem:[#allocation67_spill] sm:$0xff] %v3988_v2  ;;  %vm112_vm3 = vmand %vm110_vm14, %vm111_vm15 }
 0x161   :  { %8535 = vst [vmem:[#allocation68_spill] sm:$0xff] %v3990_v5 }
 0x164   :  { %1481 = vrot.lane.b32.xlu1 %v3906_v0, %s8055_s17  ;;  %1468 = vrot.lane.b32.xlu0 %v3903_v8, %s8063_s16  ;;  %s4029_s16 = sld [smem:[#allocation9]] }
 0x165   :  { %1483 = vrot.lane.b32.xlu2 %v3903_v8, %s8055_s17  ;;  %s4013_s17 = sld [smem:[#allocation9 + $0x2]] }
 0x166   :  { %v4001_v1 = vpop.permute.xlu1 %1156  ;;  %v4003_v2 = vpop.permute.xlu0 %1142 }
 0x167   :  { %8536 = vst [vmem:[#allocation69_spill] sm:$0xff] %v4001_v1  ;;  %v4005_v5 = vpop.permute.xlu2 %1236  ;;  %v8077_v1 = vmov 0.0  }
 0x168   :  { %8537 = vst [vmem:[#allocation70_spill] sm:$0xff] %v4003_v2  ;;  %v4022_v2 = vsel %vm79_vm6, 1.0, %v8077_v1  ;;  %v4025_v60 = vsel %vm104_vm7, 1.0, %v8077_v1  ;;  %v4043_v13 = vsel %vm84_vm13, 1.0, %v8077_v1  ;;  %vm122_vm6 = vmand %vm120_vm1, %vm121_vm2  ;;  %vm140_vm7 = vcmp.ge.s32.totalorder %v139_v12, 0 }
 0x169   :  { %8538 = vst [vmem:[#allocation71_spill] sm:$0xff] %v4005_v5  ;;  %v4033_v63 = vmul.f32 %v4025_v60, %v4022_v2  ;;  %vm4094_vm13 = vmand %vm87_vm9, %vm88_vm10 }
 0x16b   :  { %8542 = vst [vmem:[#allocation75_spill] sm:$0xff] %v4033_v63  ;;  %v249_v16 = vstv %s4013_s17  ;;  %s4078_s17 = sld [smem:[#allocation9 + $0x5]] }
 0x16c   :  { %1498 = vrot.lane.b32.xlu1 %v3903_v8, %s8061_s18  ;;  %1496 = vrot.lane.b32.xlu0 %v3906_v0, %s8061_s18  ;;  %s4027_s18 = sld [smem:[#allocation9 + $0x1]] }
 0x16d   :  { %1511 = vrot.lane.b32.xlu2 %v3906_v0, %s8079_s19 }
 0x16e   :  { %v4015_v11 = vpop.permute.xlu1 %1174  ;;  %v4017_v3 = vpop.permute.xlu0 %1172 }
 0x16f   :  { %8539 = vst [vmem:[#allocation72_spill] sm:$0xff] %v4015_v11  ;;  %v4019_v5 = vpop.permute.xlu2 %1254  ;;  %v4036_v11 = vsel %vm94_vm12, 1.0, %v8077_v1  ;;  %vm142_vm12 = vmand %vm140_vm7, %vm141_vm8 }
 0x170   :  { %8540 = vst [vmem:[#allocation73_spill] sm:$0xff] %v4017_v3  ;;  %v541_v3 = vlaneseq  ;;  %v4059_v1 = vmul.f32 %v4036_v11, %v4022_v2 }
 0x171   :  { %8541 = vst [vmem:[#allocation74_spill] sm:$0xff] %v4019_v5  ;;  %v129_v5 = vadd.s32 2, %v75_v15  ;;  %v243_v15 = vstv %s4029_s16  ;;  %s4098_s16 = sld [smem:[#allocation9 + $0x7]] }
 0x172   :  { %v4055_v57 = vand.u32 127, %v541_v3  ;;  %8545 = vst [vmem:[#allocation78_spill] sm:$0xff] %v4059_v1  ;;  %v246_v6 = vstv %s4027_s18  ;;  %v4075_v3 = vmul.f32 %v249_v16, %v4033_v63  ;;  %s4083_s18 = sld [smem:[#allocation9 + $0x6]]  ;;  %v258_v63 = vstv %s4078_s17 }
 0x173   :  { %vm130_vm4 = vcmp.ge.s32.totalorder %v129_v5, 0  ;;  %vm131_vm5 = vcmp.lt.s32.totalorder %v129_v5, 16  ;;  %v8549_v5 = vmov 0.0   ;;  %v4086_v4 = vmul.f32 %v246_v6, %v4059_v1  ;;  %s4216_s17 = sld [smem:[#allocation9 + $0xa]] }
 0x174   :  { %1526 = vrot.lane.b32.xlu1 %v3906_v0, %s8293_s20  ;;  %1513 = vrot.lane.b32.xlu0 %v3903_v8, %s8079_s19  ;;  %s4063_s19 = sld [smem:[#allocation9 + $0x4]]  ;;  %8548 = vst [vmem:[#allocation81_spill] sm:$0xff] %v4075_v3  ;;  %vm132_vm11 = vmand %vm130_vm4, %vm131_vm5  ;;  %v4089_v12 = vsel %vm122_vm6, 1.0, %v8549_v5  ;;  %vm575_vm14 = vcmp.lt.s32.totalorder %v4055_v57, 49  ;;  %v4122_v6 = vsel %vm142_vm12, 1.0, %v8549_v5  ;;  %vm559_vm15 = vcmp.lt.s32.totalorder %v4055_v57, 50 }
 0x175   :  { %1528 = vrot.lane.b32.xlu2 %v3903_v8, %s8293_s20  ;;  %8550 = vst [vmem:[#allocation82_spill] sm:$0xff] %v4086_v4  ;;  %v4134_v1 = vsel %vm4094_vm13, 1.0, %v8549_v5  ;;  %vm543_vm1 = vcmp.lt.s32.totalorder %v4055_v57, 51  ;;  %v576_v53 = vsel %vm575_vm14, %v3656_v17, %v3664_v18  ;;  %vm591_vm2 = vcmp.lt.s32.totalorder %v4055_v57, 48  ;;  %s8813_s20 = smov 93  }
 0x176   :  { %v4051_v14 = vpop.permute.xlu1 %1204  ;;  %v4053_v56 = vpop.permute.xlu0 %1190  ;;  %v8570_v51 = vperm.slane %v4075_v3, 1  ;;  %vm8340_vm4 = vcmp.lt.s32.totalorder %v4055_v57, 46  ;;  %vm8341_vm5 = vcmp.lt.s32.totalorder %v4055_v57, 45  ;;  %vm8136_vm6 = vcmp.lt.s32.totalorder %v4055_v57, 35 }
 0x177   :  { %8543 = vst [vmem:[#allocation76_spill] sm:$0xff] %v4051_v14  ;;  %v4065_v55 = vpop.permute.xlu2 %1284  ;;  %v4070_v14 = vmul.f32 %v4043_v13, %v4022_v2  ;;  %vm8134_vm9 = vcmp.lt.s32.totalorder %v4055_v57, 34  ;;  %vm8133_vm10 = vcmp.lt.s32.totalorder %v4055_v57, 33  ;;  %vm8132_vm12 = vcmp.lt.s32.totalorder %v4055_v57, 32 }
 0x178   :  { %8544 = vst [vmem:[#allocation77_spill] sm:$0xff] %v4053_v56  ;;  %v4119_v56 = vmul.f32 %v4089_v12, %v4022_v2  ;;  %v261_v61 = vstv %s4083_s18  ;;  %v584_v50 = vmul.f32 %v8570_v51, %v576_v53  ;;  %v4239_v53 = vmul.f32 %v4036_v11, %v4134_v1  ;;  %s4250_s18 = sld [smem:[#allocation9 + $0xb]] }
 0x179   :  { %8546 = vst [vmem:[#allocation79_spill] sm:$0xff] %v4065_v55  ;;  %v4081_v55 = vsel %vm112_vm3, 1.0, %v8549_v5  ;;  %v4092_v16 = vmul.f32 %v243_v15, %v4070_v14  ;;  %v4111_v15 = vsel %vm132_vm11, 1.0, %v8549_v5  ;;  %vm8352_vm3 = vcmp.lt.s32.totalorder %v4055_v57, 47 }
 0x17a   :  { %8547 = vst [vmem:[#allocation80_spill] sm:$0xff] %v4070_v14  ;;  %v4108_v10 = vmul.f32 %v4081_v55, %v4022_v2  ;;  %v252_v14 = vstv %s4049_s15  ;;  %v255_v62 = vstv %s4063_s19  ;;  %s4154_s15 = sld [smem:[#allocation9 + $0x8]]  ;;  %vm8135_vm13 = vcmp.lt.s32.totalorder %v4055_v57, 31 }
 0x17b   :  { %8551 = vst [vmem:[#allocation83_spill] sm:$0xff] %v4092_v16  ;;  %v4161_v58 = vmul.f32 %v255_v62, %v4119_v56  ;;  %v544_v62 = vsel %vm543_vm1, %v3682_v21, %v3694_v24  ;;  %s4204_s19 = sld [smem:[#allocation9 + $0x9]] }
 0x17c   :  { %1543 = vrot.lane.b32.xlu1 %v3903_v8, %s8291_s21  ;;  %1541 = vrot.lane.b32.xlu0 %v3906_v0, %s8291_s21  ;;  %8554 = vst [vmem:[#allocation84_spill] sm:$0xff] %v4108_v10  ;;  %v4147_v59 = vmul.f32 %v252_v14, %v4108_v10  ;;  %v4166_v14 = vmul.f32 %v4134_v1, %v4043_v13  ;;  %s5417_s21 = sld [smem:[#allocation9 + $0x31]] }
 0x17d   :  { %1556 = vrot.lane.b32.xlu2 %v3906_v0, %s8265_s22  ;;  %8555 = vst [vmem:[#allocation85_spill] sm:$0xff] %v4119_v56  ;;  %v561_v10 = vsel %vm559_vm15, %v3692_v23, %v3680_v20  ;;  %v545_v56 = vsel %vm543_vm1, %v3694_v24, %v3682_v21  ;;  %v8569_v24 = vperm.slane %v4092_v16, 1 }
 0x17e   :  { %v4124_v7 = vpop.permute.xlu1 %1222  ;;  %v4126_v52 = vpop.permute.xlu0 %1220  ;;  %8560 = vst [vmem:[#allocation90_spill] sm:$0xff] %v4147_v59 }
 0x17f   :  { %8556 = vst [vmem:[#allocation86_spill] sm:$0xff] %v4124_v7  ;;  %v4136_v49 = vpop.permute.xlu2 %1302  ;;  %v577_v7 = vsel %vm575_vm14, %v3664_v18, %v3656_v17  ;;  %v8566_v18 = vperm.slane %v4086_v4, 0  ;;  %v552_v54 = vmul.f32 %v8569_v24, %v544_v62  ;;  %v593_v24 = vsel %vm591_vm2, %v3704_v26, %v3706_v27 }
 0x180   :  { %8557 = vst [vmem:[#allocation87_spill] sm:$0xff] %v4126_v52  ;;  %v4143_v52 = vmul.f32 %v4111_v15, %v4022_v2  ;;  %v8575_v62 = vperm.slane %v4147_v59, 1 }
 0x181   :  { %8558 = vst [vmem:[#allocation88_spill] sm:$0xff] %v4136_v49  ;;  %v4152_v49 = vmul.f32 %v4122_v6, %v4022_v2  ;;  %v560_v2 = vsel %vm559_vm15, %v3680_v20, %v3692_v23  ;;  %v264_v20 = vstv %s4098_s16  ;;  %v8564_v23 = vperm.slane %v4075_v3, 0  ;;  %s4281_s16 = sld [smem:[#allocation9 + $0xc]] }
 0x182   :  { %8559 = vst [vmem:[#allocation89_spill] sm:$0xff] %v4143_v52  ;;  %v4190_v46 = vmul.f32 %v258_v63, %v4143_v52  ;;  %v567_v63 = vmul.f32 %v8566_v18, %v561_v10  ;;  %v8567_v52 = vperm.slane %v4086_v4, 1  ;;  %v4227_v10 = vmul.f32 %v264_v20, %v4166_v14 }
 0x183   :  { %8561 = vst [vmem:[#allocation91_spill] sm:$0xff] %v4152_v49  ;;  %v583_v21 = vmul.f32 %v8564_v23, %v577_v7  ;;  %v4202_v17 = vmul.f32 %v261_v61, %v4152_v49  ;;  %v8568_v7 = vperm.slane %v4092_v16, 0  ;;  %v267_v20 = vstv %s4154_s15  ;;  %s4312_s15 = sld [smem:[#allocation9 + $0xd]] }
 0x184   :  { %8562 = vst [vmem:[#allocation92_spill] sm:$0xff] %v4161_v58  ;;  %1571 = vrot.lane.b32.xlu1 %v3906_v0, %s8263_s23  ;;  %1558 = vrot.lane.b32.xlu0 %v3903_v8, %s8265_s22  ;;  %v568_v43 = vmul.f32 %v8567_v52, %v560_v2  ;;  %v592_v2 = vsel %vm591_vm2, %v3706_v27, %v3704_v26  ;;  %v273_v4 = vstv %s4216_s17  ;;  %s4367_s17 = sld [smem:[#allocation9 + $0xf]] }
 0x185   :  { %8563 = vst [vmem:[#allocation93_spill] sm:$0xff] %v4190_v46  ;;  %1573 = vrot.lane.b32.xlu2 %v3903_v8, %s8263_s23  ;;  %v551_v23 = vmul.f32 %v8568_v7, %v545_v56  ;;  %v609_v26 = vsel %vm8352_vm3, %v3718_v30, %v3672_v19  ;;  %v600_v52 = vmul.f32 %v8575_v62, %v592_v2  ;;  %v8578_v2 = vperm.slane %v4161_v58, 0  ;;  %s5217_s23 = sld [smem:[#allocation9 + $0x2b]] }
 0x186   :  { %8565 = vst [vmem:[#allocation94_spill] sm:$0xff] %v4202_v17  ;;  %v4218_v61 = vpop.permute.xlu1 %1252  ;;  %v4220_v49 = vpop.permute.xlu0 %1238  ;;  %v570_v7 = vadd.f32 %v568_v43, %v552_v54  ;;  %v96_v43 = vadd.s32 4294967295, %v3992_v9  ;;  %v608_v54 = vsel %vm8352_vm3, %v3672_v19, %v3718_v30  ;;  %v4278_v19 = vmul.f32 %v267_v20, %v4239_v53  ;;  %s5266_s22 = sld [smem:[#allocation9 + $0x2c]] }
 0x187   :  { %8571 = vst [vmem:[#allocation95_spill] sm:$0xff] %v4227_v10  ;;  %v4229_v56 = vpop.permute.xlu2 %1331  ;;  %v569_v18 = vadd.f32 %v567_v63, %v551_v23  ;;  %v4267_v23 = vmul.f32 %v4025_v60, %v4134_v1  ;;  %v8574_v63 = vperm.slane %v4147_v59, 0  ;;  %v270_v30 = vstv %s4204_s19  ;;  %s4316_s19 = sld [smem:[#allocation9 + $0xe]] }
 0x188   :  { %8572 = vst [vmem:[#allocation96_spill] sm:$0xff] %v4239_v53  ;;  %v586_v3 = vadd.f32 %v584_v50, %v570_v7  ;;  %v4287_v16 = vmul.f32 %v4081_v55, %v4134_v1  ;;  %v615_v62 = vmul.f32 %v8578_v2, %v609_v26  ;;  %v8579_v20 = vperm.slane %v4161_v58, 1 }
 0x189   :  { %8573 = vst [vmem:[#allocation97_spill] sm:$0xff] %v4267_v23  ;;  %v599_v51 = vmul.f32 %v8574_v63, %v593_v24  ;;  %v585_v27 = vadd.f32 %v583_v21, %v569_v18  ;;  %vm97_vm7 = vcmp.ge.s32.totalorder %v96_v43, 0  ;;  %vm98_vm8 = vcmp.lt.s32.totalorder %v96_v43, 16 }
 0x18a   :  { %8576 = vst [vmem:[#allocation98_spill] sm:$0xff] %v4278_v19  ;;  %v616_v59 = vmul.f32 %v8579_v20, %v608_v54  ;;  %v624_v50 = vsel %vm8340_vm4, %v3716_v29, %v3684_v22  ;;  %v625_v18 = vsel %vm8340_vm4, %v3684_v22, %v3716_v29  ;;  %v4310_v7 = vmul.f32 %v270_v30, %v4267_v23  ;;  %vm99_vm11 = vmand %vm97_vm7, %vm98_vm8 }
 0x18b   :  { %8577 = vst [vmem:[#allocation99_spill] sm:$0xff] %v4287_v16  ;;  %v601_v54 = vadd.f32 %v599_v51, %v585_v27  ;;  %v602_v26 = vadd.f32 %v600_v52, %v586_v3  ;;  %v4320_v58 = vmul.f32 %v273_v4, %v4287_v16  ;;  %v4324_v22 = vmul.f32 %v4089_v12, %v4134_v1 }
 0x18c   :  { %1588 = vrot.lane.b32.xlu1 %v3903_v8, %s8238_s24  ;;  %1586 = vrot.lane.b32.xlu0 %v3906_v0, %s8238_s24  ;;  %8580 = vst [vmem:[#allocation100_spill] sm:$0xff] %v4310_v7  ;;  %v276_v29 = vstv %s4250_s18  ;;  %v8583_v51 = vperm.slane %v4190_v46, 0  ;;  %v8584_v30 = vperm.slane %v4190_v46, 1  ;;  %v640_v4 = vsel %vm8341_vm5, %v3730_v33, %v3728_v32  ;;  %s4381_s18 = sld [smem:[#allocation9 + $0x10]] }
 0x18d   :  { %1601 = vrot.lane.b32.xlu2 %v3906_v0, %s8232_s1  ;;  %8581 = vst [vmem:[#allocation101_spill] sm:$0xff] %v4320_v58  ;;  %v617_v3 = vadd.f32 %v615_v62, %v601_v54  ;;  %v618_v52 = vadd.f32 %v616_v59, %v602_v26  ;;  %v641_v2 = vsel %vm8341_vm5, %v3728_v32, %v3730_v33  ;;  %v8587_v43 = vperm.slane %v4202_v17, 0  ;;  %s5130_s24 = sld [smem:[#allocation9 + $0x28]] }
 0x18e   :  { %v4290_v24 = vpop.permute.xlu1 %1270  ;;  %v4292_v63 = vpop.permute.xlu0 %1268  ;;  %8582 = vst [vmem:[#allocation102_spill] sm:$0xff] %v4324_v22  ;;  %v631_v27 = vmul.f32 %v8583_v51, %v625_v18  ;;  %v632_v20 = vmul.f32 %v8584_v30, %v624_v50  ;;  %v4344_v59 = vmul.f32 %v4111_v15, %v4134_v1  ;;  %v279_v50 = vstv %s4281_s16  ;;  %s4437_s16 = sld [smem:[#allocation9 + $0x11]] }
 0x18f   :  { %v4298_v21 = vpop.permute.xlu2 %1348  ;;  %v4354_v18 = vsel %vm99_vm11, 1.0, %v8549_v5  ;;  %v657_v32 = vsel %vm8136_vm6, %v3742_v36, %v3696_v25  ;;  %v4365_v26 = vmul.f32 %v276_v29, %v4324_v22  ;;  %v647_v46 = vmul.f32 %v8587_v43, %v641_v2 }
 0x190   :  { %8585 = vst [vmem:[#allocation103_spill] sm:$0xff] %v4344_v59  ;;  %v633_v62 = vadd.f32 %v631_v27, %v617_v3  ;;  %v8588_v16 = vperm.slane %v4202_v17, 1  ;;  %v656_v29 = vsel %vm8136_vm6, %v3696_v25, %v3742_v36  ;;  %v634_v22 = vadd.f32 %v632_v20, %v618_v52 }
 0x191   :  { %8586 = vst [vmem:[#allocation104_spill] sm:$0xff] %v4365_v26  ;;  %v4386_v23 = vmul.f32 %v279_v50, %v4344_v59  ;;  %v4390_v3 = vmul.f32 %v4122_v6, %v4134_v1  ;;  %v8592_v2 = vperm.slane %v4227_v10, 0  ;;  %v673_v25 = vsel %vm8134_vm9, %v3708_v28, %v3740_v35 }
 0x192   :  { %v648_v33 = vmul.f32 %v8588_v16, %v640_v4  ;;  %v4394_v16 = vmul.f32 %v4354_v18, %v4043_v13  ;;  %v282_v36 = vstv %s4312_s15  ;;  %v285_v20 = vstv %s4316_s19  ;;  %s4471_s15 = sld [smem:[#allocation9 + $0x12]] }
 0x193   :  { %8589 = vst [vmem:[#allocation105_spill] sm:$0xff] %v4386_v23  ;;  %v663_v27 = vmul.f32 %v8592_v2, %v657_v32  ;;  %v8593_v52 = vperm.slane %v4227_v10, 1  ;;  %v672_v1 = vsel %vm8134_vm9, %v3740_v35, %v3708_v28  ;;  %v649_v50 = vadd.f32 %v647_v46, %v633_v62  ;;  %s4485_s19 = sld [smem:[#allocation9 + $0x13]] }
 0x194   :  { %1616 = vrot.lane.b32.xlu1 %v3906_v0, %s8219_s27  ;;  %1603 = vrot.lane.b32.xlu0 %v3903_v8, %s8232_s1  ;;  %8590 = vst [vmem:[#allocation106_spill] sm:$0xff] %v4390_v3  ;;  %v650_v32 = vadd.f32 %v648_v33, %v634_v22  ;;  %vm8262_vm7 = vcmp.lt.s32.totalorder %v4055_v57, 30  ;;  %v8594_v17 = vperm.slane %v4278_v19, 0  ;;  %v4421_v28 = vmul.f32 %v285_v20, %v4394_v16  ;;  %s8740_s1 = smov 99  }
 0x195   :  { %1618 = vrot.lane.b32.xlu2 %v3903_v8, %s8219_s27  ;;  %8591 = vst [vmem:[#allocation107_spill] sm:$0xff] %v4394_v16  ;;  %v664_v4 = vmul.f32 %v8593_v52, %v656_v29  ;;  %v4418_v52 = vmul.f32 %v282_v36, %v4390_v3  ;;  %v665_v35 = vadd.f32 %v663_v27, %v649_v50  ;;  %v8597_v46 = vperm.slane %v4278_v19, 1  ;;  %s8717_s27 = smov 110  }
 0x196   :  { %v4369_v51 = vpop.permute.xlu1 %1300  ;;  %v4371_v30 = vpop.permute.xlu0 %1286  ;;  %v679_v10 = vmul.f32 %v8594_v17, %v673_v25  ;;  %8596 = vst [vmem:[#allocation109_spill] sm:$0xff] %v4421_v28  ;;  %v689_v17 = vsel %vm8133_vm10, %v3752_v38, %v3754_v39  ;;  %v4435_v62 = vmul.f32 %v4354_v18, %v4036_v11  ;;  %v688_v27 = vsel %vm8133_vm10, %v3754_v39, %v3752_v38 }
 0x197   :  { %v4383_v54 = vpop.permute.xlu2 %1376  ;;  %8595 = vst [vmem:[#allocation108_spill] sm:$0xff] %v4418_v52  ;;  %v680_v22 = vmul.f32 %v8597_v46, %v672_v1  ;;  %v666_v33 = vadd.f32 %v664_v4, %v650_v32  ;;  %v288_v25 = vstv %s4367_s17  ;;  %v4448_v36 = vmul.f32 %v4025_v60, %v4354_v18  ;;  %s4493_s17 = sld [smem:[#allocation9 + $0x14]] }
 0x198   :  { %8598 = vst [vmem:[#allocation110_spill] sm:$0xff] %v4435_v62  ;;  %v705_v50 = vsel %vm8132_vm12, %v3766_v42, %v3720_v31  ;;  %vm8169_vm8 = vcmp.lt.s32.totalorder %v4055_v57, 29  ;;  %v291_v32 = vstv %s4381_s18  ;;  %v8600_v39 = vperm.slane %v4310_v7, 0  ;;  %s4514_s18 = sld [smem:[#allocation9 + $0x15]] }
 0x199   :  { %8599 = vst [vmem:[#allocation111_spill] sm:$0xff] %v4448_v36  ;;  %v704_v29 = vsel %vm8132_vm12, %v3720_v31, %v3766_v42  ;;  %v8601_v4 = vperm.slane %v4310_v7, 1  ;;  %vm8168_vm11 = vcmp.lt.s32.totalorder %v4055_v57, 19  ;;  %v682_v3 = vadd.f32 %v680_v22, %v666_v33 }
 0x19a   :  { %v695_v46 = vmul.f32 %v8600_v39, %v689_v17  ;;  %v4478_v17 = vmul.f32 %v288_v25, %v4435_v62  ;;  %v681_v39 = vadd.f32 %v679_v10, %v665_v35  ;;  %v8603_v31 = vperm.slane %v4320_v58, 0 }
 0x19b   :  { %v696_v19 = vmul.f32 %v8601_v4, %v688_v27  ;;  %v4483_v2 = vmul.f32 %v291_v32, %v4448_v36  ;;  %v8605_v43 = vperm.slane %v4320_v58, 1  ;;  %v721_v25 = vsel %vm8135_vm13, %v3732_v34, %v3764_v41  ;;  %v8644_v36 = vld [vmem:[#allocation26_spill] sm:$0xff] }
 0x19c   :  { %1633 = vrot.lane.b32.xlu1 %v3903_v8, %s8217_s28  ;;  %1631 = vrot.lane.b32.xlu0 %v3906_v0, %s8217_s28  ;;  %8602 = vst [vmem:[#allocation112_spill] sm:$0xff] %v4478_v17  ;;  %v711_v42 = vmul.f32 %v8603_v31, %v705_v50  ;;  %vm106_vm12 = vcmp.ge.s32.totalorder %v3992_v9, 0  ;;  %vm107_vm10 = vcmp.lt.s32.totalorder %v3992_v9, 16  ;;  %v697_v10 = vadd.f32 %v695_v46, %v681_v39  ;;  %s4992_s28 = sld [smem:[#allocation9 + $0x24]] }
 0x19d   :  { %1646 = vrot.lane.b32.xlu2 %v3906_v0, %s8202_s29  ;;  %8604 = vst [vmem:[#allocation113_spill] sm:$0xff] %v4483_v2  ;;  %v712_v27 = vmul.f32 %v8605_v43, %v704_v29  ;;  %v720_v35 = vsel %vm8135_vm13, %v3764_v41, %v3732_v34  ;;  %v4504_v43 = vmul.f32 %v4081_v55, %v4354_v18  ;;  %vm8151_vm9 = vcmp.lt.s32.totalorder %v4055_v57, 18  ;;  %vm4529_vm13 = vmand %vm106_vm12, %vm107_vm10 }
 0x19e   :  { %v4450_v20 = vpop.permute.xlu1 %1318  ;;  %v4452_v1 = vpop.permute.xlu0 %1316  ;;  %v698_v29 = vadd.f32 %v696_v19, %v682_v3  ;;  %v294_v34 = vstv %s4437_s16  ;;  %v713_v41 = vadd.f32 %v711_v42, %v697_v10  ;;  %v8607_v4 = vperm.slane %v4365_v26, 0  ;;  %s4599_s16 = sld [smem:[#allocation9 + $0x16]] }
 0x19f   :  { %v4461_v38 = vpop.permute.xlu2 %1393  ;;  %8606 = vst [vmem:[#allocation114_spill] sm:$0xff] %v4504_v43  ;;  %v737_v19 = vsel %vm8262_vm7, %v3776_v44, %v3778_v45  ;;  %vm8152_vm6 = vcmp.lt.s32.totalorder %v4055_v57, 17  ;;  %v752_v3 = vsel %vm8169_vm8, %v3744_v37, %v3790_v48  ;;  %v4567_v33 = vmul.f32 %v4111_v15, %v4354_v18 }
 0x1a0   :  { %v727_v32 = vmul.f32 %v8607_v4, %v721_v25  ;;  %v714_v42 = vadd.f32 %v712_v27, %v698_v29  ;;  %v8610_v25 = vperm.slane %v4365_v26, 1  ;;  %v736_v4 = vsel %vm8262_vm7, %v3778_v45, %v3776_v44 }
 0x1a1   :  { %v753_v27 = vsel %vm8169_vm8, %v3790_v48, %v3744_v37  ;;  %v4552_v29 = vmul.f32 %v294_v34, %v4504_v43  ;;  %v297_v44 = vstv %s4471_s15  ;;  %v8614_v45 = vperm.slane %v4386_v23, 0  ;;  %8615 = vst [vmem:[#allocation118_spill] sm:$0xff] %v4567_v33  ;;  %s4612_s15 = sld [smem:[#allocation9 + $0x17]]  ;;  %v8643_v43 = vld [vmem:[#allocation27_spill] sm:$0xff] }
 0x1a2   :  { %v728_v10 = vmul.f32 %v8610_v25, %v720_v35  ;;  %v4556_v35 = vmul.f32 %v4089_v12, %v4354_v18  ;;  %v4572_v34 = vsel %vm4529_vm13, 1.0, %v8549_v5  ;;  %v729_v22 = vadd.f32 %v727_v32, %v713_v41 }
 0x1a3   :  { %8612 = vst [vmem:[#allocation116_spill] sm:$0xff] %v4552_v29  ;;  %v743_v25 = vmul.f32 %v8614_v45, %v737_v19  ;;  %v8616_v16 = vperm.slane %v4386_v23, 1  ;;  %v300_v58 = vstv %s4485_s19  ;;  %v4579_v19 = vmul.f32 %v4122_v6, %v4354_v18  ;;  %s4630_s19 = sld [smem:[#allocation9 + $0x18]] }
 0x1a4   :  { %1661 = vrot.lane.b32.xlu1 %v3906_v0, %s8185_s30  ;;  %1648 = vrot.lane.b32.xlu0 %v3903_v8, %s8202_s29  ;;  %8613 = vst [vmem:[#allocation117_spill] sm:$0xff] %v4556_v35  ;;  %v730_v37 = vadd.f32 %v728_v10, %v714_v42  ;;  %v8618_v48 = vperm.slane %v4418_v52, 0  ;;  %v768_v46 = vsel %vm8168_vm11, %v3788_v47, %v3756_v40  ;;  %v303_v7 = vstv %s4493_s17  ;;  %s4665_s17 = sld [smem:[#allocation9 + $0x19]] }
 0x1a5   :  { %1663 = vrot.lane.b32.xlu2 %v3903_v8, %s8185_s30  ;;  %v744_v26 = vmul.f32 %v8616_v16, %v736_v4  ;;  %8617 = vst [vmem:[#allocation119_spill] sm:$0xff] %v4579_v19  ;;  %v8619_v41 = vperm.slane %v4418_v52, 1  ;;  %v769_v16 = vsel %vm8168_vm11, %v3756_v40, %v3788_v47  ;;  %vm8161_vm10 = vcmp.lt.s32.totalorder %v4055_v57, 16  ;;  %s8678_s30 = smov 113   ;;  %s4941_s29 = sld [smem:[#allocation9 + $0x21]] }
 0x1a6   :  { %v4533_v39 = vpop.permute.xlu1 %1346  ;;  %v4535_v31 = vpop.permute.xlu0 %1333  ;;  %v759_v45 = vmul.f32 %v8618_v48, %v753_v27  ;;  %v4597_v18 = vmul.f32 %v4572_v34, %v4043_v13  ;;  %v4606_v42 = vmul.f32 %v297_v44, %v4556_v35  ;;  %v4609_v40 = vmul.f32 %v300_v58, %v4567_v33  ;;  %v8628_v27 = vld [vmem:[#allocation21_spill] sm:$0xff] }
 0x1a7   :  { %v4545_v50 = vpop.permute.xlu2 %1421  ;;  %v760_v32 = vmul.f32 %v8619_v41, %v752_v3  ;;  %v745_v3 = vadd.f32 %v743_v25, %v729_v22  ;;  %v306_v47 = vstv %s4514_s18  ;;  %v746_v10 = vadd.f32 %v744_v26, %v730_v37  ;;  %s8636_s18 = smov 125  }
 0x1a8   :  { %8611 = vst [vmem:[#allocation115_spill] sm:$0xff] %v4545_v50  ;;  %v4619_v48 = vmul.f32 %v303_v7, %v4579_v19  ;;  %v8624_v25 = vperm.slane %v4421_v28, 0  ;;  %v8625_v52 = vperm.slane %v4421_v28, 1  ;;  %vm8167_vm12 = vcmp.lt.s32.totalorder %v4055_v57, 15  ;;  %v8627_v7 = vld [vmem:[#allocation20_spill] sm:$0xff] }
 0x1a9   :  { %8620 = vst [vmem:[#allocation120_spill] sm:$0xff] %v4597_v18  ;;  %v761_v58 = vadd.f32 %v759_v45, %v745_v3  ;;  %v762_v37 = vadd.f32 %v760_v32, %v746_v10  ;;  %v784_v4 = vsel %vm8151_vm9, %v8628_v27, %v8627_v7  ;;  %v785_v45 = vsel %vm8151_vm9, %v8627_v7, %v8628_v27  ;;  %v8630_v3 = vld [vmem:[#allocation17_spill] sm:$0xff]  ;;  %v8631_v10 = vld [vmem:[#allocation24_spill] sm:$0xff] }
 0x1aa   :  { %8621 = vst [vmem:[#allocation121_spill] sm:$0xff] %v4606_v42  ;;  %v775_v41 = vmul.f32 %v8624_v25, %v769_v16  ;;  %v776_v23 = vmul.f32 %v8625_v52, %v768_v46  ;;  %v4643_v16 = vmul.f32 %v306_v47, %v4597_v18  ;;  %vm8172_vm13 = vcmp.lt.s32.totalorder %v4055_v57, 14  ;;  %v8640_v47 = vld [vmem:[#allocation23_spill] sm:$0xff] }
 0x1ab   :  { %8622 = vst [vmem:[#allocation122_spill] sm:$0xff] %v4609_v40  ;;  %v801_v25 = vsel %vm8152_vm6, %v8631_v10, %v8630_v3  ;;  %v8632_v52 = vperm.slane %v4478_v17, 0  ;;  %v8633_v18 = vperm.slane %v4478_v17, 1  ;;  %v800_v19 = vsel %vm8152_vm6, %v8630_v3, %v8631_v10  ;;  %v8639_v10 = vld [vmem:[#allocation18_spill] sm:$0xff] }
 0x1ac   :  { %1687 = vrot.lane.b32.xlu1 %v3903_v8, %s8182_s0  ;;  %1685 = vrot.lane.b32.xlu0 %v3906_v0, %s8182_s0  ;;  %8623 = vst [vmem:[#allocation123_spill] sm:$0xff] %v4619_v48  ;;  %v777_v7 = vadd.f32 %v775_v41, %v761_v58  ;;  %vm8211_vm9 = vcmp.lt.s32.totalorder %v4055_v57, 13  ;;  %v778_v27 = vadd.f32 %v776_v23, %v762_v37  ;;  %vm8210_vm6 = vcmp.lt.s32.totalorder %v4055_v57, 3  ;;  %s4832_s0 = sld [smem:[#allocation9 + $0x1e]] }
 0x1ad   :  { %1700 = vrot.lane.b32.xlu2 %v3906_v0, %s8170_s5  ;;  %8629 = vst [vmem:[#allocation20_spill] sm:$0xff] %v4643_v16  ;;  %v791_v46 = vmul.f32 %v8632_v52, %v785_v45  ;;  %v792_v32 = vmul.f32 %v8633_v18, %v784_v4  ;;  %v4670_v58 = vmul.f32 %v4572_v34, %v4036_v11  ;;  %v8637_v18 = vperm.slane %v4483_v2, 0 }
 0x1ae   :  { %v4621_v22 = vpop.permute.xlu1 %1363  ;;  %v4623_v44 = vpop.permute.xlu0 %1361  ;;  %v4674_v41 = vmul.f32 %v4572_v34, %v4025_v60  ;;  %v309_v37 = vstv %s4599_s16  ;;  %v312_v45 = vstv %s4612_s15  ;;  %v8638_v52 = vperm.slane %v4483_v2, 1  ;;  %s4729_s16 = sld [smem:[#allocation9 + $0x1a]] }
 0x1af   :  { %v4632_v26 = vpop.permute.xlu2 %1438  ;;  %8634 = vst [vmem:[#allocation21_spill] sm:$0xff] %v4670_v58  ;;  %v807_v23 = vmul.f32 %v8637_v18, %v801_v25  ;;  %v816_v28 = vsel %vm8161_vm10, %v8640_v47, %v8639_v10  ;;  %v817_v25 = vsel %vm8161_vm10, %v8639_v10, %v8640_v47  ;;  %v4700_v18 = vmul.f32 %v4081_v55, %v4572_v34  ;;  %s4745_s15 = sld [smem:[#allocation9 + $0x1b]] }
 0x1b0   :  { %8626 = vst [vmem:[#allocation124_spill] sm:$0xff] %v4632_v26  ;;  %v808_v3 = vmul.f32 %v8638_v52, %v800_v19  ;;  %v793_v2 = vadd.f32 %v791_v46, %v777_v7  ;;  %v794_v19 = vadd.f32 %v792_v32, %v778_v27  ;;  %v315_v52 = vstv %s4630_s19  ;;  %s8655_s19 = smov 115  }
 0x1b1   :  { %8635 = vst [vmem:[#allocation17_spill] sm:$0xff] %v4674_v41  ;;  %v114_v33 = vadd.s32 1, %v3992_v9  ;;  %v833_v47 = vsel %vm8167_vm12, %v8644_v36, %v8643_v43  ;;  %vm8201_vm10 = vcmp.lt.s32.totalorder %v4055_v57, 2  ;;  %v4716_v10 = vmul.f32 %v309_v37, %v4670_v58  ;;  %v8649_v37 = vld [vmem:[#allocation19_spill] sm:$0xff]  ;;  %v8650_v58 = vld [vmem:[#allocation30_spill] sm:$0xff] }
 0x1b2   :  { %8641 = vst [vmem:[#allocation24_spill] sm:$0xff] %v4700_v18  ;;  %v4719_v62 = vmul.f32 %v312_v45, %v4674_v41  ;;  %v809_v46 = vadd.f32 %v807_v23, %v793_v2  ;;  %v8647_v32 = vperm.slane %v4552_v29, 0  ;;  %v8648_v7 = vperm.slane %v4552_v29, 1 }
 0x1b3   :  { %8645 = vst [vmem:[#allocation23_spill] sm:$0xff] %v4716_v10  ;;  %v832_v59 = vsel %vm8167_vm12, %v8643_v43, %v8644_v36  ;;  %v810_v26 = vadd.f32 %v808_v3, %v794_v19  ;;  %v849_v45 = vsel %vm8172_vm13, %v8650_v58, %v8649_v37  ;;  %v4736_v2 = vmul.f32 %v315_v52, %v4700_v18  ;;  %v8668_v18 = vld [vmem:[#allocation35_spill] sm:$0xff] }
 0x1b4   :  { %1715 = vrot.lane.b32.xlu1 %v3906_v0, %s8636_s18  ;;  %1702 = vrot.lane.b32.xlu0 %v3903_v8, %s8170_s5  ;;  %8646 = vst [vmem:[#allocation27_spill] sm:$0xff] %v4719_v62  ;;  %v823_v27 = vmul.f32 %v8647_v32, %v817_v25  ;;  %v4740_v23 = vmul.f32 %v4089_v12, %v4572_v34  ;;  %v318_v32 = vstv %s4665_s17  ;;  %vm115_vm12 = vcmp.ge.s32.totalorder %v114_v33, 0  ;;  %s4763_s17 = sld [smem:[#allocation9 + $0x1c]]  ;;  %s8657_s5 = smov 114  }
 0x1b5   :  { %1717 = vrot.lane.b32.xlu2 %v3903_v8, %s8636_s18  ;;  %8651 = vst [vmem:[#allocation26_spill] sm:$0xff] %v4736_v2  ;;  %vm116_vm11 = vcmp.lt.s32.totalorder %v114_v33, 16  ;;  %v8654_v36 = vperm.slane %v4606_v42, 1  ;;  %v848_v3 = vsel %vm8172_vm13, %v8649_v37, %v8650_v58  ;;  %vm8196_vm8 = vcmp.lt.s32.totalorder %v4055_v57, 1  ;;  %v8658_v37 = vld [vmem:[#allocation29_spill] sm:$0xff] }
 0x1b6   :  { %v4702_v4 = vpop.permute.xlu1 %1391  ;;  %v4704_v17 = vpop.permute.xlu0 %1378  ;;  %8652 = vst [vmem:[#allocation19_spill] sm:$0xff] %v4740_v23  ;;  %vm4777_vm13 = vmand %vm115_vm12, %vm116_vm11  ;;  %vm8215_vm11 = vcmp.lt.s32.totalorder %v4055_v57, 127  ;;  %v324_v41 = vstv %s4745_s15  ;;  %s4855_s15 = sld [smem:[#allocation9 + $0x1f]]  ;;  %vm8216_vm12 = vcmp.lt.s32.totalorder %v4055_v57, 126  ;;  %vm8283_vm7 = vcmp.lt.s32.totalorder %v4055_v57, 96 }
 0x1b7   :  { %v4708_v35 = vpop.permute.xlu2 %1466  ;;  %v840_v43 = vmul.f32 %v8654_v36, %v832_v59  ;;  %v8659_v36 = vld [vmem:[#allocation22_spill] sm:$0xff]  ;;  %v8665_v59 = vperm.slane %v4609_v40, 1 }
 0x1b8   :  { %8642 = vst [vmem:[#allocation18_spill] sm:$0xff] %v4708_v35  ;;  %v824_v35 = vmul.f32 %v8648_v7, %v816_v28  ;;  %v8653_v28 = vperm.slane %v4606_v42, 0  ;;  %v8656_v7 = vperm.slane %v4609_v40, 0  ;;  %v865_v52 = vsel %vm8211_vm9, %v8659_v36, %v8658_v37 }
 0x1b9   :  { %v856_v19 = vmul.f32 %v8665_v59, %v848_v3  ;;  %v864_v29 = vsel %vm8211_vm9, %v8658_v37, %v8659_v36  ;;  %v4801_v3 = vmul.f32 %v4111_v15, %v4572_v34  ;;  %v8670_v59 = vperm.slane %v4619_v48, 0  ;;  %v8671_v36 = vld [vmem:[#allocation25_spill] sm:$0xff] }
 0x1ba   :  { %v839_v25 = vmul.f32 %v8653_v28, %v833_v47  ;;  %v825_v47 = vadd.f32 %v823_v27, %v809_v46  ;;  %v855_v28 = vmul.f32 %v8656_v7, %v849_v45  ;;  %v826_v58 = vadd.f32 %v824_v35, %v810_v26  ;;  %v8672_v46 = vld [vmem:[#allocation39_spill] sm:$0xff] }
 0x1bb   :  { %v4773_v27 = vmul.f32 %v318_v32, %v4740_v23  ;;  %v8667_v23 = vld [vmem:[#allocation36_spill] sm:$0xff]  ;;  %v871_v32 = vmul.f32 %v8670_v59, %v865_v52  ;;  %v8674_v59 = vperm.slane %v4619_v48, 1  ;;  %v896_v52 = vsel %vm8201_vm10, %v8671_v36, %v8672_v46  ;;  %v8683_v48 = vld [vmem:[#allocation15_spill] sm:$0xff] }
 0x1bc   :  { %1732 = vrot.lane.b32.xlu1 %v3903_v8, %s8655_s19  ;;  %1730 = vrot.lane.b32.xlu0 %v3906_v0, %s8655_s19  ;;  %v841_v26 = vadd.f32 %v839_v25, %v825_v47  ;;  %v842_v33 = vadd.f32 %v840_v43, %v826_v58  ;;  %v881_v25 = vsel %vm8210_vm6, %v8668_v18, %v8667_v23  ;;  %v321_v43 = vstv %s4729_s16  ;;  %s4825_s16 = sld [smem:[#allocation9 + $0x1d]] }
 0x1bd   :  { %1745 = vrot.lane.b32.xlu2 %v3906_v0, %s8657_s5  ;;  %8660 = vst [vmem:[#allocation30_spill] sm:$0xff] %v4773_v27  ;;  %v4810_v58 = vsel %vm4777_vm13, 1.0, %v8549_v5  ;;  %v880_v37 = vsel %vm8210_vm6, %v8667_v23, %v8668_v18  ;;  %v872_v40 = vmul.f32 %v8674_v59, %v864_v29  ;;  %v8675_v18 = vperm.slane %v4643_v16, 0 }
 0x1be   :  { %v4781_v7 = vpop.permute.xlu1 %1408  ;;  %v4783_v35 = vpop.permute.xlu0 %1406  ;;  %8669 = vst [vmem:[#allocation36_spill] sm:$0xff] %v4801_v3  ;;  %v857_v47 = vadd.f32 %v855_v28, %v841_v26  ;;  %v897_v28 = vsel %vm8201_vm10, %v8672_v46, %v8671_v36  ;;  %v4823_v26 = vmul.f32 %v4122_v6, %v4572_v34  ;;  %v858_v45 = vadd.f32 %v856_v19, %v842_v33 }
 0x1bf   :  { %8663 = vst [vmem:[#allocation29_spill] sm:$0xff] %v4781_v7  ;;  %v4789_v42 = vpop.permute.xlu2 %1483  ;;  %v887_v23 = vmul.f32 %v8675_v18, %v881_v25  ;;  %v4844_v19 = vmul.f32 %v4810_v58, %v4043_v13  ;;  %v8679_v33 = vperm.slane %v4643_v16, 1  ;;  %v8680_v46 = vperm.slane %v4716_v10, 0  ;;  %v8682_v18 = vld [vmem:[#allocation28_spill] sm:$0xff] }
 0x1c0   :  { %8664 = vst [vmem:[#allocation22_spill] sm:$0xff] %v4783_v35  ;;  %v873_v29 = vadd.f32 %v871_v32, %v857_v47  ;;  %v327_v59 = vstv %s4763_s17  ;;  %v8684_v32 = vperm.slane %v4736_v2, 0  ;;  %v8685_v16 = vld [vmem:[#allocation16_spill] sm:$0xff]  ;;  %v874_v50 = vadd.f32 %v872_v40, %v858_v45  ;;  %s4892_s17 = sld [smem:[#allocation9 + $0x20]] }
 0x1c1   :  { %8666 = vst [vmem:[#allocation125_spill] sm:$0xff] %v4789_v42  ;;  %v4840_v42 = vmul.f32 %v321_v43, %v4801_v3  ;;  %v888_v25 = vmul.f32 %v8679_v33, %v880_v37  ;;  %v903_v36 = vmul.f32 %v8680_v46, %v897_v28  ;;  %v8681_v43 = vld [vmem:[#allocation38_spill] sm:$0xff]  ;;  %v8686_v37 = vperm.slane %v4736_v2, 1  ;;  %v8702_v2 = vld [vmem:[#allocation31_spill] sm:$0xff] }
 0x1c2   :  { %8673 = vst [vmem:[#allocation35_spill] sm:$0xff] %v4823_v26  ;;  %v913_v34 = vsel %vm8196_vm8, %v8682_v18, %v8681_v43  ;;  %v928_v47 = vmul.f32 %v8684_v32, %v8683_v48  ;;  %v4872_v28 = vmul.f32 %v324_v41, %v4823_v26  ;;  %v889_v7 = vadd.f32 %v887_v23, %v873_v29 }
 0x1c3   :  { %8676 = vst [vmem:[#allocation25_spill] sm:$0xff] %v4840_v42  ;;  %v4869_v33 = vmul.f32 %v8686_v37, %v8685_v16  ;;  %v8688_v35 = vperm.slane %v4716_v10, 1  ;;  %v912_v16 = vsel %vm8196_vm8, %v8681_v43, %v8682_v18  ;;  %v4890_v40 = vmul.f32 %v327_v59, %v4844_v19 }
 0x1c4   :  { %8677 = vst [vmem:[#allocation39_spill] sm:$0xff] %v4844_v19  ;;  %1760 = vrot.lane.b32.xlu1 %v3906_v0, %s8678_s30  ;;  %1747 = vrot.lane.b32.xlu0 %v3903_v8, %s8657_s5  ;;  %v8691_v45 = vperm.slane %v4719_v62, 0  ;;  %v4898_v29 = vmul.f32 %v4810_v58, %v4036_v11  ;;  %vm8251_vm13 = vcmp.lt.s32.totalorder %v4055_v57, 125  ;;  %v330_v18 = vstv %s4825_s16  ;;  %s8698_s16 = smov 112  }
 0x1c5   :  { %1762 = vrot.lane.b32.xlu2 %v3903_v8, %s8678_s30  ;;  %8687 = vst [vmem:[#allocation38_spill] sm:$0xff] %v4872_v28  ;;  %v904_v53 = vmul.f32 %v8688_v35, %v896_v52  ;;  %v890_v35 = vadd.f32 %v888_v25, %v874_v50  ;;  %v905_v52 = vadd.f32 %v903_v36, %v889_v7  ;;  %v8694_v50 = vperm.slane %v4719_v62, 1  ;;  %v8695_v36 = vld [vmem:[#allocation41_spill] sm:$0xff] }
 0x1c6   :  { %v4874_v46 = vpop.permute.xlu1 %1436  ;;  %v4876_v3 = vpop.permute.xlu0 %1423  ;;  %8690 = vst [vmem:[#allocation15_spill] sm:$0xff] %v4890_v40  ;;  %v919_v23 = vmul.f32 %v8691_v45, %v913_v34  ;;  %v4905_v59 = vmul.f32 %v4810_v58, %v4025_v60  ;;  %v333_v25 = vstv %s4832_s0  ;;  %v8696_v45 = vld [vmem:[#allocation42_spill] sm:$0xff]  ;;  %vm8250_vm8 = vcmp.lt.s32.totalorder %v4055_v57, 115  ;;  %s8700_s0 = smov 111  }
 0x1c7   :  { %v4881_v48 = vpop.permute.xlu2 %1511  ;;  %8692 = vst [vmem:[#allocation16_spill] sm:$0xff] %v4898_v29  ;;  %v906_v37 = vadd.f32 %v904_v53, %v890_v35  ;;  %v920_v7 = vmul.f32 %v8694_v50, %v912_v16  ;;  %v937_v32 = vsel %vm8215_vm11, %v8696_v45, %v8695_v36  ;;  %v4918_v43 = vmul.f32 %v4810_v58, %v4081_v55  ;;  %v8701_v34 = vld [vmem:[#allocation46_spill] sm:$0xff] }
 0x1c8   :  { %8689 = vst [vmem:[#allocation28_spill] sm:$0xff] %v4881_v48  ;;  %v124_v41 = vadd.s32 2, %v3992_v9  ;;  %v921_v53 = vadd.f32 %v919_v23, %v905_v52  ;;  %v4927_v35 = vmul.f32 %v330_v18, %v4898_v29  ;;  %v336_v50 = vstv %s4855_s15  ;;  %s4963_s15 = sld [smem:[#allocation9 + $0x22]] }
 0x1c9   :  { %8693 = vst [vmem:[#allocation126_spill] sm:$0xff] %v4905_v59  ;;  %v953_v9 = vsel %vm8216_vm12, %v8702_v2, %v8701_v34  ;;  %vm8237_vm10 = vcmp.lt.s32.totalorder %v4055_v57, 114  ;;  %v4939_v52 = vmul.f32 %v333_v25, %v4905_v59  ;;  %v922_v16 = vadd.f32 %v920_v7, %v906_v37 }
 0x1ca   :  { %8697 = vst [vmem:[#allocation41_spill] sm:$0xff] %v4918_v43  ;;  %v938_v10 = vsel %vm8215_vm11, %v8695_v36, %v8696_v45  ;;  %v8704_v29 = vperm.slane %v4773_v27, 0  ;;  %v4955_v19 = vmul.f32 %v4089_v12, %v4810_v58  ;;  %v4960_v59 = vmul.f32 %v336_v50, %v4918_v43  ;;  %v8710_v43 = vld [vmem:[#allocation37_spill] sm:$0xff]  ;;  %v8724_v36 = vld [vmem:[#allocation40_spill] sm:$0xff] }
 0x1cb   :  { %8699 = vst [vmem:[#allocation42_spill] sm:$0xff] %v4927_v35  ;;  %v339_v26 = vstv %s4892_s17  ;;  %vm125_vm6 = vcmp.ge.s32.totalorder %v124_v41, 0  ;;  %vm126_vm9 = vcmp.lt.s32.totalorder %v124_v41, 16  ;;  %v930_v37 = vadd.f32 %v928_v47, %v921_v53  ;;  %s4980_s17 = sld [smem:[#allocation9 + $0x23]]  ;;  %v8723_v47 = vld [vmem:[#allocation52_spill] sm:$0xff] }
 0x1cc   :  { %1777 = vrot.lane.b32.xlu1 %v3903_v8, %s8698_s16  ;;  %1775 = vrot.lane.b32.xlu0 %v3906_v0, %s8698_s16  ;;  %8703 = vst [vmem:[#allocation46_spill] sm:$0xff] %v4939_v52  ;;  %v944_v62 = vmul.f32 %v8704_v29, %v937_v32  ;;  %v954_v32 = vsel %vm8216_vm12, %v8701_v34, %v8702_v2  ;;  %v8708_v29 = vperm.slane %v4840_v42, 0  ;;  %v8709_v45 = vperm.slane %v4773_v27, 1  ;;  %vm4988_vm12 = vmand %vm125_vm6, %vm126_vm9 }
 0x1cd   :  { %1790 = vrot.lane.b32.xlu2 %v3906_v0, %s8700_s0  ;;  %8705 = vst [vmem:[#allocation31_spill] sm:$0xff] %v4955_v19  ;;  %vm8234_vm11 = vcmp.lt.s32.totalorder %v4055_v57, 113  ;;  %v5000_v53 = vmul.f32 %v4111_v15, %v4810_v58  ;;  %v8718_v41 = vperm.slane %v4872_v28, 0  ;;  %vm8247_vm6 = vcmp.lt.s32.totalorder %v4055_v57, 112 }
 0x1ce   :  { %v4943_v23 = vpop.permute.xlu1 %1453  ;;  %v4945_v18 = vpop.permute.xlu0 %1451  ;;  %8707 = vst [vmem:[#allocation128_spill] sm:$0xff] %v4960_v59  ;;  %v960_v7 = vmul.f32 %v8708_v29, %v953_v9  ;;  %v945_v50 = vmul.f32 %v8709_v45, %v938_v10  ;;  %v946_v2 = vadd.f32 %v944_v62, %v930_v37  ;;  %v4985_v9 = vmul.f32 %v339_v26, %v4955_v19 }
 0x1cf   :  { %v4957_v25 = vpop.permute.xlu2 %1528  ;;  %v931_v29 = vadd.f32 %v4869_v33, %v922_v16  ;;  %v8715_v45 = vperm.slane %v4840_v42, 1  ;;  %v342_v34 = vstv %s4941_s29  ;;  %vm8249_vm9 = vcmp.lt.s32.totalorder %v4055_v57, 111  ;;  %s5051_s29 = sld [smem:[#allocation9 + $0x25]] }
 0x1d0   :  { %8706 = vst [vmem:[#allocation127_spill] sm:$0xff] %v4957_v25  ;;  %v8711_v25 = vld [vmem:[#allocation45_spill] sm:$0xff]  ;;  %v962_v26 = vadd.f32 %v960_v7, %v946_v2  ;;  %v8727_v27 = vperm.slane %v4872_v28, 1  ;;  %v5058_v10 = vmul.f32 %v342_v34, %v5000_v53 }
 0x1d1   :  { %v969_v48 = vsel %vm8251_vm13, %v8711_v25, %v8710_v43  ;;  %8712 = vst [vmem:[#allocation37_spill] sm:$0xff] %v4985_v9  ;;  %v961_v62 = vmul.f32 %v8715_v45, %v954_v32  ;;  %v970_v33 = vsel %vm8251_vm13, %v8710_v43, %v8711_v25  ;;  %v8719_v32 = vld [vmem:[#allocation48_spill] sm:$0xff]  ;;  %v8720_v45 = vld [vmem:[#allocation49_spill] sm:$0xff]  ;;  %v947_v7 = vadd.f32 %v945_v50, %v931_v29 }
 0x1d2   :  { %8716 = vst [vmem:[#allocation45_spill] sm:$0xff] %v5000_v53  ;;  %v976_v16 = vmul.f32 %v8718_v41, %v969_v48  ;;  %v985_v37 = vsel %vm8250_vm8, %v8720_v45, %v8719_v32  ;;  %v5024_v43 = vsel %vm4988_vm12, 1.0, %v8549_v5  ;;  %v986_v41 = vsel %vm8250_vm8, %v8719_v32, %v8720_v45 }
 0x1d3   :  { %v1001_v50 = vsel %vm8237_vm10, %v8724_v36, %v8723_v47  ;;  %v5042_v29 = vmul.f32 %v4122_v6, %v4810_v58  ;;  %v963_v42 = vadd.f32 %v961_v62, %v947_v7  ;;  %v977_v32 = vmul.f32 %v8727_v27, %v970_v33  ;;  %8729 = vst [vmem:[#allocation129_spill] sm:$0xff] %v5058_v10 }
 0x1d4   :  { %1805 = vrot.lane.b32.xlu1 %v3906_v0, %s8717_s27  ;;  %1792 = vrot.lane.b32.xlu0 %v3903_v8, %s8700_s0  ;;  %v8728_v45 = vperm.slane %v4890_v40, 0  ;;  %v1002_v58 = vsel %vm8237_vm10, %v8723_v47, %v8724_v36  ;;  %v5062_v62 = vmul.f32 %v5024_v43, %v4043_v13  ;;  %v8731_v27 = vperm.slane %v4890_v40, 1  ;;  %v8735_v36 = vld [vmem:[#allocation51_spill] sm:$0xff] }
 0x1d5   :  { %1807 = vrot.lane.b32.xlu2 %v3903_v8, %s8717_s27  ;;  %8725 = vst [vmem:[#allocation52_spill] sm:$0xff] %v5042_v29  ;;  %v351_v40 = vstv %s4992_s28  ;;  %vm8258_vm12 = vcmp.lt.s32.totalorder %v4055_v57, 110  ;;  %s5100_s28 = sld [smem:[#allocation9 + $0x27]]  ;;  %vm1096_vm10 = vcmp.lt.s32.totalorder %v4055_v57, 99  ;;  %vm8278_vm13 = vcmp.lt.s32.totalorder %v4055_v57, 97 }
 0x1d6   :  { %v5026_v48 = vpop.permute.xlu1 %1481  ;;  %v5028_v25 = vpop.permute.xlu0 %1468  ;;  %v992_v19 = vmul.f32 %v8728_v45, %v985_v37  ;;  %8730 = vst [vmem:[#allocation130_spill] sm:$0xff] %v5062_v62  ;;  %v993_v33 = vmul.f32 %v8731_v27, %v986_v41  ;;  %v8732_v37 = vperm.slane %v4927_v35, 0  ;;  %v348_v45 = vstv %s4980_s17  ;;  %s8738_s17 = smov 109  }
 0x1d7   :  { %8721 = vst [vmem:[#allocation48_spill] sm:$0xff] %v5026_v48  ;;  %v5044_v2 = vpop.permute.xlu2 %1556  ;;  %v345_v48 = vstv %s4963_s15  ;;  %s5082_s15 = sld [smem:[#allocation9 + $0x26]]  ;;  %v979_v41 = vadd.f32 %v977_v32, %v963_v42  ;;  %v8737_v27 = vperm.slane %v4927_v35, 1 }
 0x1d8   :  { %8722 = vst [vmem:[#allocation49_spill] sm:$0xff] %v5028_v25  ;;  %v978_v25 = vadd.f32 %v976_v16, %v962_v26  ;;  %v1008_v7 = vmul.f32 %v8732_v37, %v1001_v50  ;;  %v5071_v26 = vmul.f32 %v5024_v43, %v4036_v11  ;;  %v8734_v16 = vld [vmem:[#allocation43_spill] sm:$0xff]  ;;  %v5079_v28 = vmul.f32 %v345_v48, %v5042_v29 }
 0x1d9   :  { %8726 = vst [vmem:[#allocation40_spill] sm:$0xff] %v5044_v2  ;;  %v1017_v47 = vsel %vm8234_vm11, %v8735_v36, %v8734_v16  ;;  %v1009_v37 = vmul.f32 %v8737_v27, %v1002_v58  ;;  %v1018_v48 = vsel %vm8234_vm11, %v8734_v16, %v8735_v36  ;;  %v8741_v58 = vperm.slane %v4939_v52, 0 }
 0x1da   :  { %8733 = vst [vmem:[#allocation131_spill] sm:$0xff] %v5071_v26  ;;  %v994_v50 = vadd.f32 %v992_v19, %v978_v25  ;;  %v5098_v19 = vmul.f32 %v348_v45, %v5062_v62  ;;  %v995_v25 = vadd.f32 %v993_v33, %v979_v41  ;;  %v5107_v16 = vmul.f32 %v351_v40, %v5071_v26  ;;  %v8749_v26 = vld [vmem:[#allocation58_spill] sm:$0xff]  ;;  %v8750_v62 = vld [vmem:[#allocation47_spill] sm:$0xff] }
 0x1db   :  { %8736 = vst [vmem:[#allocation43_spill] sm:$0xff] %v5079_v28  ;;  %v1024_v27 = vmul.f32 %v8741_v58, %v1017_v47  ;;  %vm1080_vm11 = vcmp.lt.s32.totalorder %v4055_v57, 109  ;;  %v5118_v33 = vmul.f32 %v5024_v43, %v4025_v60  ;;  %v8746_v40 = vperm.slane %v4939_v52, 1  ;;  %v8748_v58 = vld [vmem:[#allocation55_spill] sm:$0xff] }
 0x1dc   :  { %1822 = vrot.lane.b32.xlu1 %v3903_v8, %s8738_s17  ;;  %1820 = vrot.lane.b32.xlu0 %v3906_v0, %s8738_s17  ;;  %8739 = vst [vmem:[#allocation51_spill] sm:$0xff] %v5098_v19  ;;  %v1010_v32 = vadd.f32 %v1008_v7, %v994_v50  ;;  %v1011_v47 = vadd.f32 %v1009_v37, %v995_v25  ;;  %v8747_v50 = vld [vmem:[#allocation54_spill] sm:$0xff]  ;;  %v354_v45 = vstv %s5051_s29  ;;  %v3360_v25 = vld [vmem:[#allocation6] sm:$0x3]  ;;  %v8754_v37 = vperm.slane %v4960_v59, 1  ;;  %s8756_s29 = smov 98  }
 0x1dd   :  { %1835 = vrot.lane.b32.xlu2 %v3906_v0, %s8740_s1  ;;  %8742 = vst [vmem:[#allocation132_spill] sm:$0xff] %v5107_v16  ;;  %v1025_v41 = vmul.f32 %v8746_v40, %v1018_v48  ;;  %v1033_v35 = vsel %vm8247_vm6, %v8748_v58, %v8747_v50  ;;  %v1034_v34 = vsel %vm8247_vm6, %v8747_v50, %v8748_v58  ;;  %v134_v40 = vadd.s32 3, %v3360_v25 }
 0x1de   :  { %v5109_v36 = vpop.permute.xlu1 %1498  ;;  %v5111_v42 = vpop.permute.xlu0 %1496  ;;  %8744 = vst [vmem:[#allocation134_spill] sm:$0xff] %v5118_v33  ;;  %v1026_v52 = vadd.f32 %v1024_v27, %v1010_v32  ;;  %v1049_v29 = vsel %vm8249_vm9, %v8750_v62, %v8749_v26  ;;  %v8752_v50 = vperm.slane %v4960_v59, 0  ;;  %v1050_v32 = vsel %vm8249_vm9, %v8749_v26, %v8750_v62 }
 0x1df   :  { %8743 = vst [vmem:[#allocation133_spill] sm:$0xff] %v5109_v36  ;;  %v5120_v7 = vpop.permute.xlu2 %1573  ;;  %v5154_v27 = vmul.f32 %v354_v45, %v5118_v33  ;;  %v357_v25 = vstv %s5082_s15  ;;  %v1027_v48 = vadd.f32 %v1025_v41, %v1011_v47  ;;  %v1041_v53 = vmul.f32 %v8754_v37, %v1034_v34  ;;  %s5172_s15 = sld [smem:[#allocation9 + $0x29]]  ;;  %v8759_v41 = vld [vmem:[#allocation50_spill] sm:$0xff]  ;;  %v8760_v37 = vld [vmem:[#allocation57_spill] sm:$0xff] }
 0x1e0   :  { %8745 = vst [vmem:[#allocation135_spill] sm:$0xff] %v5120_v7  ;;  %v5145_v7 = vmul.f32 %v5024_v43, %v4081_v55  ;;  %v1040_v58 = vmul.f32 %v8752_v50, %v1033_v35  ;;  %vm1112_vm6 = vcmp.lt.s32.totalorder %v4055_v57, 98  ;;  %v5163_v35 = vmul.f32 %v5024_v43, %v4089_v12 }
 0x1e1   :  { %8753 = vst [vmem:[#allocation55_spill] sm:$0xff] %v5154_v27  ;;  %v8757_v62 = vperm.slane %v4985_v9, 0  ;;  %v360_v45 = vstv %s5100_s28  ;;  %vm135_vm9 = vcmp.ge.s32.totalorder %v134_v40, 0  ;;  %vm136_vm8 = vcmp.lt.s32.totalorder %v134_v40, 16  ;;  %s5199_s28 = sld [smem:[#allocation9 + $0x2a]] }
 0x1e2   :  { %8751 = vst [vmem:[#allocation54_spill] sm:$0xff] %v5145_v7  ;;  %v8758_v34 = vperm.slane %v4985_v9, 1  ;;  %v1065_v50 = vsel %vm8258_vm12, %v8760_v37, %v8759_v41  ;;  %v1042_v59 = vadd.f32 %v1040_v58, %v1026_v52  ;;  %v5197_v9 = vmul.f32 %v4111_v15, %v5024_v43 }
 0x1e3   :  { %8755 = vst [vmem:[#allocation58_spill] sm:$0xff] %v5163_v35  ;;  %v1056_v26 = vmul.f32 %v8757_v62, %v1049_v29  ;;  %v5184_v29 = vmul.f32 %v357_v25, %v5145_v7  ;;  %v1043_v7 = vadd.f32 %v1041_v53, %v1027_v48  ;;  %v5205_v52 = vmul.f32 %v360_v45, %v5163_v35  ;;  %v8787_v35 = vld [vmem:[#allocation67_spill] sm:$0xff] }
 0x1e4   :  { %1850 = vrot.lane.b32.xlu1 %v3906_v0, %s8756_s29  ;;  %1837 = vrot.lane.b32.xlu0 %v3903_v8, %s8740_s1  ;;  %v1057_v47 = vmul.f32 %v8758_v34, %v1050_v32  ;;  %v1066_v32 = vsel %vm8258_vm12, %v8759_v41, %v8760_v37  ;;  %8764 = vst [vmem:[#allocation136_spill] sm:$0xff] %v5197_v9  ;;  %v363_v58 = vstv %s5130_s24  ;;  %vm137_vm12 = vmand %vm135_vm9, %vm136_vm8  ;;  %v8767_v37 = vperm.slane %v5058_v10, 0  ;;  %s8776_s24 = smov 97  }
 0x1e5   :  { %1852 = vrot.lane.b32.xlu2 %v3903_v8, %s8756_s29  ;;  %8761 = vst [vmem:[#allocation47_spill] sm:$0xff] %v5184_v29  ;;  %v1058_v41 = vadd.f32 %v1056_v26, %v1042_v59  ;;  %v8770_v48 = vperm.slane %v5058_v10, 1  ;;  %v8771_v26 = vld [vmem:[#allocation64_spill] sm:$0xff]  ;;  %vm8454_vm8 = vcmp.lt.s32.totalorder %v4055_v57, 95  ;;  %v5247_v33 = vmul.f32 %v4122_v6, %v5024_v43 }
 0x1e6   :  { %v5186_v62 = vpop.permute.xlu1 %1526  ;;  %v5188_v2 = vpop.permute.xlu0 %1513  ;;  %8766 = vst [vmem:[#allocation138_spill] sm:$0xff] %v5205_v52  ;;  %v1072_v34 = vmul.f32 %v8767_v37, %v1065_v50  ;;  %v1059_v53 = vadd.f32 %v1057_v47, %v1043_v7  ;;  %v8772_v50 = vld [vmem:[#allocation53_spill] sm:$0xff]  ;;  %v5232_v7 = vmul.f32 %v363_v58, %v5197_v9  ;;  %v5235_v47 = vsel %vm137_vm12, 1.0, %v8549_v5 }
 0x1e7   :  { %8762 = vst [vmem:[#allocation50_spill] sm:$0xff] %v5186_v62  ;;  %v5201_v25 = vpop.permute.xlu2 %1601  ;;  %v8768_v62 = vld [vmem:[#allocation60_spill] sm:$0xff]  ;;  %v1073_v45 = vmul.f32 %v8770_v48, %v1066_v32  ;;  %v1097_v37 = vsel %vm1096_vm10, %v8772_v50, %v8771_v26  ;;  %v8774_v32 = vperm.slane %v5079_v28, 0  ;;  %v8778_v43 = vperm.slane %v5098_v19, 0 }
 0x1e8   :  { %8763 = vst [vmem:[#allocation57_spill] sm:$0xff] %v5188_v2  ;;  %v8769_v2 = vld [vmem:[#allocation61_spill] sm:$0xff]  ;;  %v1074_v5 = vadd.f32 %v1072_v34, %v1058_v41  ;;  %vm8290_vm9 = vcmp.lt.s32.totalorder %v4055_v57, 94  ;;  %v5264_v40 = vmul.f32 %v5235_v47, %v4043_v13  ;;  %vm8301_vm12 = vcmp.lt.s32.totalorder %v4055_v57, 93 }
 0x1e9   :  { %8765 = vst [vmem:[#allocation137_spill] sm:$0xff] %v5201_v25  ;;  %v1081_v36 = vsel %vm1080_vm11, %v8769_v2, %v8768_v62  ;;  %v1082_v59 = vsel %vm1080_vm11, %v8768_v62, %v8769_v2  ;;  %v1098_v2 = vsel %vm1096_vm10, %v8771_v26, %v8772_v50  ;;  %v366_v50 = vstv %s5172_s15  ;;  %s5308_s15 = sld [smem:[#allocation9 + $0x2d]] }
 0x1ea   :  { %8773 = vst [vmem:[#allocation60_spill] sm:$0xff] %v5232_v7  ;;  %v1088_v48 = vmul.f32 %v8774_v32, %v1081_v36  ;;  %v8777_v36 = vperm.slane %v5079_v28, 1  ;;  %v1075_v32 = vadd.f32 %v1073_v45, %v1059_v53  ;;  %v1104_v62 = vmul.f32 %v8778_v43, %v1097_v37  ;;  %v8781_v53 = vld [vmem:[#allocation56_spill] sm:$0xff]  ;;  %v8782_v45 = vld [vmem:[#allocation63_spill] sm:$0xff] }
 0x1eb   :  { %8775 = vst [vmem:[#allocation61_spill] sm:$0xff] %v5247_v33  ;;  %v1113_v37 = vsel %vm1112_vm6, %v8782_v45, %v8781_v53  ;;  %v369_v26 = vstv %s5199_s28  ;;  %v1114_v10 = vsel %vm1112_vm6, %v8781_v53, %v8782_v45  ;;  %v5287_v9 = vmul.f32 %v366_v50, %v5247_v33  ;;  %v8792_v33 = vld [vmem:[#allocation59_spill] sm:$0xff]  ;;  %s5339_s28 = sld [smem:[#allocation9 + $0x2e]] }
 0x1ec   :  { %1867 = vrot.lane.b32.xlu1 %v3903_v8, %s8776_s24  ;;  %1865 = vrot.lane.b32.xlu0 %v3906_v0, %s8776_s24  ;;  %v1089_v58 = vmul.f32 %v8777_v36, %v1082_v59  ;;  %8779 = vst [vmem:[#allocation64_spill] sm:$0xff] %v5264_v40  ;;  %v8780_v59 = vperm.slane %v5098_v19, 1  ;;  %v1090_v28 = vadd.f32 %v1088_v48, %v1074_v5  ;;  %v8786_v19 = vld [vmem:[#allocation66_spill] sm:$0xff]  ;;  %v372_v5 = vstv %s5217_s23  ;;  %s8795_s23 = smov 95  }
 0x1ed   :  { %1880 = vrot.lane.b32.xlu2 %v3906_v0, %s8281_s6  ;;  %8784 = vst [vmem:[#allocation56_spill] sm:$0xff] %v5287_v9  ;;  %v1129_v43 = vsel %vm8278_vm13, %v8787_v35, %v8786_v19  ;;  %v8788_v25 = vperm.slane %v5107_v16, 0  ;;  %v1130_v50 = vsel %vm8278_vm13, %v8786_v19, %v8787_v35  ;;  %v8791_v48 = vld [vmem:[#allocation70_spill] sm:$0xff]  ;;  %vm8307_vm13 = vcmp.lt.s32.totalorder %v4055_v57, 83 }
 0x1ee   :  { %v5268_v34 = vpop.permute.xlu1 %1543  ;;  %v5270_v41 = vpop.permute.xlu0 %1541  ;;  %v1105_v36 = vmul.f32 %v8780_v59, %v1098_v2  ;;  %v5291_v2 = vmul.f32 %v5235_v47, %v4036_v11  ;;  %v1091_v59 = vadd.f32 %v1089_v58, %v1075_v32  ;;  %v5306_v11 = vmul.f32 %v369_v26, %v5264_v40 }
 0x1ef   :  { %v5280_v13 = vpop.permute.xlu2 %1618  ;;  %v1120_v53 = vmul.f32 %v8788_v25, %v1113_v37  ;;  %v8790_v32 = vperm.slane %v5107_v16, 1  ;;  %v8793_v25 = vperm.slane %v5154_v27, 0  ;;  %v1146_v35 = vsel %vm8283_vm7, %v8791_v48, %v8792_v33 }
 0x1f0   :  { %8783 = vst [vmem:[#allocation53_spill] sm:$0xff] %v5280_v13  ;;  %v1106_v13 = vadd.f32 %v1104_v62, %v1090_v28  ;;  %v1107_v58 = vadd.f32 %v1105_v36, %v1091_v59  ;;  %v1145_v28 = vsel %vm8283_vm7, %v8792_v33, %v8791_v48  ;;  %v8796_v26 = vperm.slane %v5154_v27, 1  ;;  %v8800_v62 = vld [vmem:[#allocation62_spill] sm:$0xff]  ;;  %v8801_v27 = vld [vmem:[#allocation69_spill] sm:$0xff] }
 0x1f1   :  { %8785 = vst [vmem:[#allocation63_spill] sm:$0xff] %v5291_v2  ;;  %v1121_v45 = vmul.f32 %v8790_v32, %v1114_v10  ;;  %v1136_v19 = vmul.f32 %v8793_v25, %v1129_v43  ;;  %v5325_v10 = vmul.f32 %v372_v5, %v5291_v2  ;;  %v5337_v33 = vmul.f32 %v5235_v47, %v4025_v60  ;;  %v8803_v5 = vld [vmem:[#allocation73_spill] sm:$0xff] }
 0x1f2   :  { %8789 = vst [vmem:[#allocation66_spill] sm:$0xff] %v5306_v11  ;;  %v1137_v36 = vmul.f32 %v8796_v26, %v1130_v50  ;;  %v1122_v43 = vadd.f32 %v1120_v53, %v1106_v13  ;;  %v8798_v59 = vperm.slane %v5184_v29, 0  ;;  %v375_v50 = vstv %s5266_s22  ;;  %v8809_v2 = vld [vmem:[#allocation65_spill] sm:$0xff]  ;;  %s5404_s22 = sld [smem:[#allocation9 + $0x30]] }
 0x1f3   :  { %8794 = vst [vmem:[#allocation67_spill] sm:$0xff] %v5325_v10  ;;  %v1123_v26 = vadd.f32 %v1121_v45, %v1107_v58  ;;  %v8799_v60 = vperm.slane %v5184_v29, 1  ;;  %v1161_v13 = vsel %vm8454_vm8, %v8801_v27, %v8800_v62  ;;  %v1162_v58 = vsel %vm8454_vm8, %v8800_v62, %v8801_v27 }
 0x1f4   :  { %1895 = vrot.lane.b32.xlu1 %v3906_v0, %s8795_s23  ;;  %1882 = vrot.lane.b32.xlu0 %v3903_v8, %s8281_s6  ;;  %8797 = vst [vmem:[#allocation70_spill] sm:$0xff] %v5337_v33  ;;  %v1152_v48 = vmul.f32 %v8798_v59, %v1145_v28  ;;  %s5358_s6 = sld [smem:[#allocation9 + $0x2f]]  ;;  %v1138_v59 = vadd.f32 %v1136_v19, %v1122_v43  ;;  %vm8451_vm7 = vcmp.lt.s32.totalorder %v4055_v57, 82  ;;  %v8806_v27 = vperm.slane %v5205_v52, 0 }
 0x1f5   :  { %1897 = vrot.lane.b32.xlu2 %v3903_v8, %s8795_s23  ;;  %v1153_v37 = vmul.f32 %v8799_v60, %v1146_v35  ;;  %v1139_v35 = vadd.f32 %v1137_v36, %v1123_v26  ;;  %v8802_v60 = vld [vmem:[#allocation72_spill] sm:$0xff]  ;;  %v5373_v29 = vmul.f32 %v375_v50, %v5337_v33  ;;  %v5377_v19 = vmul.f32 %v5235_v47, %v4081_v55  ;;  %v8808_v33 = vld [vmem:[#allocation77_spill] sm:$0xff] }
 0x1f6   :  { %v5347_v32 = vpop.permute.xlu1 %1571  ;;  %v5349_v25 = vpop.permute.xlu0 %1558  ;;  %v1177_v53 = vsel %vm8290_vm9, %v8803_v5, %v8802_v60  ;;  %v1154_v43 = vadd.f32 %v1152_v48, %v1138_v59  ;;  %v1168_v62 = vmul.f32 %v8806_v27, %v1161_v13  ;;  %v1178_v36 = vsel %vm8290_vm9, %v8802_v60, %v8803_v5 }
 0x1f7   :  { %v5360_v28 = vpop.permute.xlu2 %1646  ;;  %8804 = vst [vmem:[#allocation59_spill] sm:$0xff] %v5373_v29  ;;  %v378_v26 = vstv %s5308_s15  ;;  %v1155_v45 = vadd.f32 %v1153_v37, %v1139_v35  ;;  %v8807_v16 = vperm.slane %v5205_v52, 1  ;;  %v1193_v55 = vsel %vm8301_vm12, %v8809_v2, %v8808_v33  ;;  %s8811_s15 = smov 94  }
 0x1f8   :  { %8805 = vst [vmem:[#allocation62_spill] sm:$0xff] %v5377_v19  ;;  %v8810_v13 = vperm.slane %v5232_v7, 0  ;;  %v1194_v5 = vsel %vm8301_vm12, %v8808_v33, %v8809_v2  ;;  %vm8308_vm9 = vcmp.lt.s32.totalorder %v4055_v57, 81  ;;  %v8812_v37 = vperm.slane %v5232_v7, 1 }
 0x1f9   :  { %v1169_v50 = vmul.f32 %v8807_v16, %v1162_v58  ;;  %v5402_v16 = vmul.f32 %v5235_v47, %v4089_v12  ;;  %v5414_v33 = vmul.f32 %v378_v26, %v5377_v19  ;;  %v381_v58 = vstv %s5339_s28  ;;  %v5445_v7 = vld.sshfl [vmem:[#allocation1] sm:$0xff pattern:$0x75316420]  ;;  %v8823_v19 = vld [vmem:[#allocation87_spill] sm:$0xff]  ;;  %s8829_s28 = smov 83  }
 0x1fa   :  { %v1184_v59 = vmul.f32 %v8810_v13, %v1177_v53  ;;  %v1185_v53 = vmul.f32 %v8812_v37, %v1178_v36  ;;  %v1170_v12 = vadd.f32 %v1168_v62, %v1154_v43  ;;  %v8814_v35 = vperm.slane %v5287_v9, 0  ;;  %v8817_v43 = vld [vmem:[#allocation68_spill] sm:$0xff] }
 0x1fb   :  { %v5426_v36 = vmul.f32 %v5235_v47, %v4111_v15  ;;  %v1171_v37 = vadd.f32 %v1169_v50, %v1155_v45  ;;  %v8816_v2 = vperm.slane %v5287_v9, 1  ;;  %v8818_v62 = vld [vmem:[#allocation76_spill] sm:$0xff]  ;;  %v5443_v15 = vld.sshfl [vmem:[#allocation1 + $0x8] sm:$0xff pattern:$0x75316420]  ;;  %vm8318_vm12 = vcmp.lt.s32.totalorder %v4055_v57, 80 }
 0x1fc   :  { %1912 = vrot.lane.b32.xlu1 %v3903_v8, %s8811_s15  ;;  %1910 = vrot.lane.b32.xlu0 %v3906_v0, %s8811_s15  ;;  %v1200_v60 = vmul.f32 %v8814_v35, %v1193_v55  ;;  %v1209_v55 = vsel %vm8307_vm13, %v8818_v62, %v8817_v43  ;;  %v384_v35 = vstv %s5358_s6  ;;  %v1186_v52 = vadd.f32 %v1184_v59, %v1170_v12  ;;  %v8822_v9 = vld [vmem:[#allocation86_spill] sm:$0xff]  ;;  %s5462_s6 = sld [smem:[#allocation9 + $0x33]]  ;;  %v8827_v12 = vld [vmem:[#allocation71_spill] sm:$0xff] }
 0x1fd   :  { %1925 = vrot.lane.b32.xlu2 %v3906_v0, %s8813_s20  ;;  %8815 = vst [vmem:[#allocation69_spill] sm:$0xff] %v5426_v36  ;;  %v1201_v48 = vmul.f32 %v8816_v2, %v1194_v5  ;;  %v1210_v45 = vsel %vm8307_vm13, %v8817_v43, %v8818_v62  ;;  %v5453_v50 = vmul.f32 %v381_v58, %v5402_v16  ;;  %v8821_v5 = vld [vmem:[#allocation34_spill] sm:$0xff]  ;;  %v8824_v62 = vperm.slane %v5306_v11, 0 }
 0x1fe   :  { %v5430_v26 = vpop.permute.xlu1 %1588  ;;  %v5432_v13 = vpop.permute.xlu0 %1586  ;;  %2120 = vst [vmem:[#allocation1] ss:$2 sm:$0xff] %v8821_v5  ;;  %v1187_v2 = vadd.f32 %v1185_v53, %v1171_v37  ;;  %v1225_v40 = vsel %vm8451_vm7, %v8823_v19, %v8822_v9  ;;  %v1202_v43 = vadd.f32 %v1200_v60, %v1186_v52  ;;  %v1226_v53 = vsel %vm8451_vm7, %v8822_v9, %v8823_v19  ;;  %v8833_v19 = vld [vmem:[#allocation74_spill] sm:$0xff] }
 0x1ff   :  { %v5441_v27 = vpop.permute.xlu2 %1663  ;;  %8820 = vst [vmem:[#allocation73_spill] sm:$0xff] %v5453_v50  ;;  %v5471_v58 = vmul.f32 %v384_v35, %v5426_v36  ;;  %v8826_v59 = vperm.slane %v5306_v11, 1  ;;  %v1241_v52 = vsel %vm8308_vm9, %v8827_v12, %v4220_v49  ;;  %vm8448_vm13 = vcmp.lt.s32.totalorder %v4055_v57, 79 }
 0x200   :  { %8819 = vst [vmem:[#allocation72_spill] sm:$0xff] %v5441_v27  ;;  %v1216_v27 = vmul.f32 %v8824_v62, %v1209_v55  ;;  %v1203_v37 = vadd.f32 %v1201_v48, %v1187_v2  ;;  %v8828_v60 = vperm.slane %v5325_v10, 0  ;;  %v1242_v9 = vsel %vm8308_vm9, %v4220_v49, %v8827_v12 }
 0x201   :  { %8825 = vst [vmem:[#allocation77_spill] sm:$0xff] %v5471_v58  ;;  %v1217_v5 = vmul.f32 %v8826_v59, %v1210_v45  ;;  %v5489_v48 = vmul.f32 %v4122_v6, %v5235_v47  ;;  %v8830_v35 = vperm.slane %v5325_v10, 1  ;;  %vm8445_vm9 = vcmp.lt.s32.totalorder %v4055_v57, 78 }
 0x202   :  { %v1232_v55 = vmul.f32 %v8828_v60, %v1225_v40  ;;  %v387_v49 = vstv %s5404_s22  ;;  %v1218_v6 = vadd.f32 %v1216_v27, %v1202_v43  ;;  %v8831_v47 = vperm.slane %v5373_v29, 0  ;;  %s8844_s22 = smov 82  }
 0x203   :  { %v1233_v40 = vmul.f32 %v8830_v35, %v1226_v53  ;;  %v389_v12 = vstv %s5417_s21  ;;  %v1219_v60 = vadd.f32 %v1217_v5, %v1203_v37  ;;  %v8832_v35 = vperm.slane %v5373_v29, 1  ;;  %s5555_s21 = sld [smem:[#allocation9 + $0x36]] }
 0x204   :  { %1940 = vrot.lane.b32.xlu1 %v3906_v0, %s8829_s28  ;;  %1927 = vrot.lane.b32.xlu0 %v3903_v8, %s8813_s20  ;;  %v1248_v2 = vmul.f32 %v8831_v47, %v1241_v52  ;;  %v1257_v27 = vsel %vm8318_vm12, %v4218_v61, %v8833_v19  ;;  %v391_v43 = vstv %s5428_s14  ;;  %v1234_v52 = vadd.f32 %v1232_v55, %v1218_v6  ;;  %s5546_s14 = sld [smem:[#allocation9 + $0x35]] }
 0x205   :  { %1942 = vrot.lane.b32.xlu2 %v3903_v8, %s8829_s28  ;;  %v1249_v45 = vmul.f32 %v8832_v35, %v1242_v9  ;;  %v1258_v47 = vsel %vm8318_vm12, %v8833_v19, %v4218_v61  ;;  %v8321_v59 = vperm.slane %v5471_v58, 1  ;;  %v5527_v5 = vmul.f32 %v387_v49, %v5489_v48  ;;  %v8835_v35 = vld [vmem:[#allocation80_spill] sm:$0xff]  ;;  %v8838_v19 = vld [vmem:[#allocation78_spill] sm:$0xff] }
 0x206   :  { %v5508_v62 = vpop.permute.xlu1 %1616  ;;  %v5510_v53 = vpop.permute.xlu0 %1603  ;;  %v1235_v37 = vadd.f32 %v1233_v40, %v1219_v60  ;;  %v1273_v9 = vsel %vm8448_vm13, %v4292_v63, %v4290_v24  ;;  %v5534_v29 = vmul.f32 %v389_v12, %v8835_v35  ;;  %v393_v55 = vstv %s5462_s6  ;;  %s8846_s6 = smov 81  }
 0x207   :  { %v5519_v10 = vpop.permute.xlu2 %1700  ;;  %8834 = vst [vmem:[#allocation65_spill] sm:$0xff] %v5527_v5  ;;  %v1250_v6 = vadd.f32 %v1248_v2, %v1234_v52  ;;  %v8837_v11 = vperm.slane %v5414_v33, 0  ;;  %v1274_v61 = vsel %vm8448_vm13, %v4290_v24, %v4292_v63  ;;  %v5544_v40 = vmul.f32 %v391_v43, %v8838_v19  ;;  %v8841_v2 = vld [vmem:[#allocation79_spill] sm:$0xff] }
 0x208   :  { %8836 = vst [vmem:[#allocation68_spill] sm:$0xff] %v5534_v29  ;;  %v1251_v49 = vadd.f32 %v1249_v45, %v1235_v37  ;;  %v8840_v12 = vperm.slane %v5414_v33, 1  ;;  %vm8442_vm12 = vcmp.lt.s32.totalorder %v4055_v57, 77  ;;  %v8842_v24 = vperm.slane %v5453_v50, 0  ;;  %v8843_v43 = vld [vmem:[#allocation75_spill] sm:$0xff] }
 0x209   :  { %v1264_v36 = vmul.f32 %v8837_v11, %v1257_v27  ;;  %8839 = vst [vmem:[#allocation76_spill] sm:$0xff] %v5544_v40  ;;  %v1289_v11 = vsel %vm8445_vm9, %v8841_v2, %v4371_v30  ;;  %v1290_v45 = vsel %vm8445_vm9, %v4371_v30, %v8841_v2  ;;  %v8322_v27 = vperm.slane %v5527_v5, 0 }
 0x20a   :  { %v1265_v60 = vmul.f32 %v8840_v12, %v1258_v47  ;;  %v1280_v63 = vmul.f32 %v8842_v24, %v1273_v9  ;;  %v5565_v52 = vmul.f32 %v393_v55, %v8843_v43  ;;  %v8845_v47 = vperm.slane %v5453_v50, 1  ;;  %v8848_v9 = vld [vmem:[#allocation88_spill] sm:$0xff] }
 0x20b   :  { %v395_v19 = vstv %s5500_s13  ;;  %v1266_v30 = vadd.f32 %v1264_v36, %v1250_v6  ;;  %v8847_v55 = vperm.slane %v5471_v58, 0  ;;  %v8327_v2 = vperm.slane %v5534_v29, 1  ;;  %s5609_s13 = sld [smem:[#allocation9 + $0x38]] }
 0x20c   :  { %1957 = vrot.lane.b32.xlu1 %v3903_v8, %s8844_s22  ;;  %1955 = vrot.lane.b32.xlu0 %v3906_v0, %s8844_s22  ;;  %v1281_v37 = vmul.f32 %v8845_v47, %v1274_v61  ;;  %v1267_v47 = vadd.f32 %v1265_v60, %v1251_v49  ;;  %v1297_v35 = vmul.f32 %v8321_v59, %v1290_v45  ;;  %v8849_v45 = vld [vmem:[#allocation84_spill] sm:$0xff] }
 0x20d   :  { %1970 = vrot.lane.b32.xlu2 %v3906_v0, %s8846_s6  ;;  %v1296_v12 = vmul.f32 %v8847_v55, %v1289_v11  ;;  %v1305_v36 = vsel %vm8442_vm12, %v4369_v51, %v8848_v9  ;;  %v1282_v55 = vadd.f32 %v1280_v63, %v1266_v30  ;;  %v1306_v49 = vsel %vm8442_vm12, %v8848_v9, %v4369_v51 }
 0x20e   :  { %v5584_v43 = vpop.permute.xlu1 %1633  ;;  %v5586_v61 = vpop.permute.xlu0 %1631  ;;  %v5603_v59 = vmul.f32 %v395_v19, %v8849_v45  ;;  %v1283_v24 = vadd.f32 %v1281_v37, %v1267_v47  ;;  %v1321_v6 = vsel %vm543_vm1, %v4450_v20, %v4452_v1  ;;  %v2113_v63 = vsel %vm494_vm0, %v5443_v15, -inf }
 0x20f   :  { %v5595_v11 = vpop.permute.xlu2 %1717  ;;  %v2106_v30 = vsel %vm494_vm0, %v5445_v7, -inf  ;;  %v1298_v51 = vadd.f32 %v1296_v12, %v1282_v55  ;;  %v1312_v9 = vmul.f32 %v8322_v27, %v1305_v36  ;;  %v1320_v37 = vsel %vm543_vm1, %v4452_v1, %v4450_v20 }
 0x210   :  { %v397_v19 = vstv %s5546_s14  ;;  %v1299_v47 = vadd.f32 %v1297_v35, %v1283_v24  ;;  %v8850_v45 = vperm.slane %v5527_v5, 1  ;;  %v1336_v15 = vsel %vm559_vm15, %v4535_v31, %v4229_v56  ;;  %s8852_s14 = smov 80  }
 0x211   :  { %v399_v7 = vstv %s5555_s21  ;;  %v8851_v12 = vperm.slane %v5534_v29, 0  ;;  %v1335_v20 = vsel %vm559_vm15, %v4229_v56, %v4535_v31  ;;  %v2114_v1 = vrot.slane %v2113_v63, 4  ;;  %s5646_s21 = sld [smem:[#allocation9 + $0x39]] }
 0x212   :  { %v1313_v60 = vmul.f32 %v8850_v45, %v1306_v49  ;;  %v2107_v35 = vrot.slane %v2106_v30, 4  ;;  %v1328_v24 = vmul.f32 %v8327_v2, %v1320_v37  ;;  %v8853_v49 = vld [vmem:[#allocation85_spill] sm:$0xff]  ;;  %v1314_v56 = vadd.f32 %v1312_v9, %v1298_v51 }
 0x213   :  { %v1327_v36 = vmul.f32 %v8851_v12, %v1321_v6  ;;  %v5644_v45 = vmul.f32 %v397_v19, %v8853_v49  ;;  %v8855_v31 = vperm.slane %v5544_v40, 0  ;;  %v401_v29 = vstv %s5582_s12  ;;  %v8857_v9 = vld [vmem:[#allocation89_spill] sm:$0xff]  ;;  %s5690_s12 = sld [smem:[#allocation9 + $0x3b]] }
 0x214   :  { %1985 = vrot.lane.b32.xlu1 %v3906_v0, %s8852_s14  ;;  %1972 = vrot.lane.b32.xlu0 %v3903_v8, %s8846_s6  ;;  %v1315_v19 = vadd.f32 %v1313_v60, %v1299_v47  ;;  %v8856_v49 = vperm.slane %v5544_v40, 1  ;;  %v1351_v51 = vsel %vm575_vm14, %v4298_v21, %v4533_v39  ;;  %v1350_v55 = vsel %vm575_vm14, %v4533_v39, %v4298_v21 }
 0x215   :  { %8854 = vst [vmem:[#allocation86_spill] sm:$0xff] %v5644_v45  ;;  %1987 = vrot.lane.b32.xlu2 %v3903_v8, %s8852_s14  ;;  %v1342_v12 = vmul.f32 %v8855_v31, %v1336_v15  ;;  %v5667_v15 = vmul.f32 %v399_v7, %v8857_v9  ;;  %v1329_v27 = vadd.f32 %v1327_v36, %v1314_v56  ;;  %v403_v58 = vstv %s5609_s13  ;;  %s5721_s13 = sld [smem:[#allocation9 + $0x3c]]  ;;  %v8866_v56 = vld [vmem:[#allocation29_spill] sm:$0xff] }
 0x216   :  { %v5656_v37 = vpop.permute.xlu1 %1661  ;;  %v5658_v2 = vpop.permute.xlu0 %1648  ;;  %v1343_v6 = vmul.f32 %v8856_v49, %v1335_v20  ;;  %v2115_v60 = vmax.f32 %v2113_v63, %v2114_v1  ;;  %v2108_v47 = vmax.f32 %v2106_v30, %v2107_v35  ;;  %v1330_v40 = vadd.f32 %v1328_v24, %v1315_v19  ;;  %v8858_v49 = vld [vmem:[#allocation91_spill] sm:$0xff] }
 0x217   :  { %v5669_v31 = vpop.permute.xlu2 %1745  ;;  %v8337_v20 = vperm.slane %v5644_v45, 0  ;;  %v5677_v5 = vmul.f32 %v401_v29, %v8858_v49  ;;  %v1344_v50 = vadd.f32 %v1342_v12, %v1329_v27  ;;  %v8859_v7 = vperm.slane %v5565_v52, 0 }
 0x218   :  { %v1365_v36 = vsel %vm591_vm2, %v4623_v44, %v4621_v22  ;;  %v1366_v21 = vsel %vm591_vm2, %v4621_v22, %v4623_v44  ;;  %v1345_v39 = vadd.f32 %v1343_v6, %v1330_v40  ;;  %v8860_v29 = vperm.slane %v5565_v52, 1 }
 0x219   :  { %v1357_v9 = vmul.f32 %v8859_v7, %v1351_v51  ;;  %v8336_v27 = vperm.slane %v5644_v45, 1  ;;  %v8342_v30 = vperm.slane %v5667_v15, 0  ;;  %v1380_v1 = vsel %vm8352_vm3, %v4383_v54, %v4704_v17 }
 0x21a   :  { %v1358_v63 = vmul.f32 %v8860_v29, %v1350_v55  ;;  %v1381_v22 = vsel %vm8352_vm3, %v4704_v17, %v4383_v54  ;;  %v2116_v44 = vrot.slane %v2115_v60, 2  ;;  %v2109_v40 = vrot.slane %v2108_v47, 2  ;;  %v8865_v17 = vld [vmem:[#allocation22_spill] sm:$0xff] }
 0x21b   :  { %v8861_v35 = vperm.slane %v5603_v59, 0  ;;  %v8862_v55 = vperm.slane %v5603_v59, 1  ;;  %v5714_v12 = vmul.f32 %v403_v58, %v4166_v14  ;;  %v1359_v54 = vadd.f32 %v1357_v9, %v1344_v50 }
 0x21c   :  { %2002 = vrot.lane.b32.xlu1 %v3903_v8, %s8401_s25  ;;  %2000 = vrot.lane.b32.xlu0 %v3906_v0, %s8401_s25  ;;  %v405_v19 = vstv %s5646_s21  ;;  %v407_v51 = vstv %s5654_s11  ;;  %v1388_v14 = vmul.f32 %v8336_v27, %v1380_v1  ;;  %v1396_v50 = vsel %vm8340_vm4, %v4461_v38, %v4702_v4  ;;  %s5735_s11 = sld [smem:[#allocation9 + $0x3d]]  ;;  %s9002_s25 = smov 31  }
 0x21d   :  { %v1372_v24 = vmul.f32 %v8861_v35, %v1366_v21  ;;  %v1373_v6 = vmul.f32 %v8862_v55, %v1365_v36  ;;  %2015 = vrot.lane.b32.xlu2 %v3906_v0, %s8399_s7  ;;  %v1360_v36 = vadd.f32 %v1358_v63, %v1345_v39  ;;  %v1387_v21 = vmul.f32 %v8337_v20, %v1381_v22  ;;  %v8863_v55 = vld [vmem:[#allocation96_spill] sm:$0xff]  ;;  %s5758_s21 = sld [smem:[#allocation9 + $0x3e]] }
 0x21e   :  { %v5723_v49 = vpop.permute.xlu1 %1687  ;;  %v5725_v7 = vpop.permute.xlu0 %1685  ;;  %v1395_v9 = vsel %vm8340_vm4, %v4702_v4, %v4461_v38  ;;  %v8343_v39 = vperm.slane %v5677_v5, 1  ;;  %v2117_v29 = vmax.f32 %v2115_v60, %v2116_v44  ;;  %v2110_v63 = vmax.f32 %v2108_v47, %v2109_v40  ;;  %v8867_v38 = vld [vmem:[#allocation97_spill] sm:$0xff] }
 0x21f   :  { %v5737_v58 = vpop.permute.xlu2 %1762  ;;  %v1374_v22 = vadd.f32 %v1372_v24, %v1359_v54  ;;  %v1375_v1 = vadd.f32 %v1373_v6, %v1360_v36  ;;  %v8345_v35 = vperm.slane %v5714_v12, 0  ;;  %v5746_v27 = vmul.f32 %v405_v19, %v8863_v55  ;;  %v8870_v54 = vld [vmem:[#allocation115_spill] sm:$0xff] }
 0x220   :  { %v1402_v20 = vmul.f32 %v8342_v30, %v1396_v50  ;;  %v1411_v45 = vsel %vm8341_vm5, %v8866_v56, %v8865_v17  ;;  %v5755_v4 = vmul.f32 %v407_v51, %v8867_v38  ;;  %v409_v60 = vstv %s5690_s12  ;;  %s5799_s12 = sld [smem:[#allocation9 + $0x3f]] }
 0x221   :  { %8864 = vst [vmem:[#allocation87_spill] sm:$0xff] %v5746_v27  ;;  %v1389_v47 = vadd.f32 %v1387_v21, %v1374_v22  ;;  %v1390_v44 = vadd.f32 %v1388_v14, %v1375_v1  ;;  %v8869_v40 = vperm.slane %v5667_v15, 1  ;;  %v1410_v6 = vsel %vm8341_vm5, %v8865_v17, %v8866_v56 }
 0x222   :  { %8868 = vst [vmem:[#allocation71_spill] sm:$0xff] %v5755_v4  ;;  %vm8871_vm4 = vcmp.lt.s32.totalorder %v4055_v57, 35  ;;  %v8344_v51 = vperm.slane %v5714_v12, 1  ;;  %v2118_v36 = vrot.slane %v2117_v29, 1  ;;  %v2111_v21 = vrot.slane %v2110_v63, 1 }
 0x223   :  { %v1403_v24 = vmul.f32 %v8869_v40, %v1395_v9  ;;  %v1426_v19 = vsel %vm8871_vm4, %v4876_v3, %v8870_v54  ;;  %v8872_v14 = vperm.slane %v5677_v5, 0  ;;  %vm8873_vm5 = vmmov %vm8871_vm4  ;;  %v8348_v17 = vperm.slane %v5746_v27, 0  ;;  %v8874_v9 = vld [vmem:[#allocation99_spill] sm:$0xff] }
 0x224   :  { %2030 = vrot.lane.b32.xlu1 %v3906_v0, %s8394_s26  ;;  %2017 = vrot.lane.b32.xlu0 %v3903_v8, %s8399_s7  ;;  %v1425_v56 = vsel %vm8873_vm5, %v8870_v54, %v4876_v3  ;;  %v5783_v22 = vmul.f32 %v409_v60, %v8874_v9  ;;  %v1418_v1 = vmul.f32 %v8343_v39, %v1410_v6  ;;  %v8346_v55 = vperm.slane %v5746_v27, 1  ;;  %v8876_v39 = vld [vmem:[#allocation124_spill] sm:$0xff]  ;;  %v8905_v27 = vld [vmem:[#allocation57_spill] sm:$0xff]  ;;  %s6331_s7 = sld [smem:[#allocation9 + $0x56]] }
 0x225   :  { %v1417_v50 = vmul.f32 %v8872_v14, %v1411_v45  ;;  %2032 = vrot.lane.b32.xlu2 %v3903_v8, %s8394_s26  ;;  %v411_v38 = vstv %s5721_s13  ;;  %v1404_v3 = vadd.f32 %v1402_v20, %v1389_v47  ;;  %v1405_v54 = vadd.f32 %v1403_v24, %v1390_v44  ;;  %s5809_s13 = sld [smem:[#allocation9 + $0x40]]  ;;  %s8988_s26 = smov 33  }
 0x226   :  { %8875 = vst [vmem:[#allocation74_spill] sm:$0xff] %v5783_v22  ;;  %v5792_v40 = vpop.permute.xlu1 %1715  ;;  %v5794_v14 = vpop.permute.xlu0 %1702  ;;  %v1432_v60 = vmul.f32 %v8345_v35, %v1426_v19  ;;  %v413_v9 = vstv %s5735_s11  ;;  %v1433_v6 = vmul.f32 %v8344_v51, %v1425_v56  ;;  %vm8877_vm4 = vcmp.lt.s32.totalorder %v4055_v57, 34  ;;  %s5829_s11 = sld [smem:[#allocation9 + $0x41]] }
 0x227   :  { %v5801_v30 = vpop.permute.xlu2 %1790  ;;  %v1441_v45 = vsel %vm8877_vm4, %v8876_v39, %v4874_v46  ;;  %v5811_v20 = vmax.f32 %v2117_v29, %v2118_v36  ;;  %v5813_v47 = vmax.f32 %v2110_v63, %v2111_v21  ;;  %v1419_v44 = vadd.f32 %v1417_v50, %v1404_v3  ;;  %vm8878_vm5 = vmmov %vm8877_vm4  ;;  %v8880_v29 = vld [vmem:[#allocation102_spill] sm:$0xff]  ;;  %v8883_v50 = vld [vmem:[#allocation103_spill] sm:$0xff] }
 0x228   :  { %v1440_v24 = vsel %vm8878_vm5, %v4874_v46, %v8876_v39  ;;  %v8347_v19 = vperm.slane %v5755_v4, 1  ;;  %v8351_v56 = vperm.slane %v5783_v22, 0  ;;  %v1420_v51 = vadd.f32 %v1418_v1, %v1405_v54  ;;  %v8885_v54 = vld [vmem:[#allocation18_spill] sm:$0xff] }
 0x229   :  { %vm8879_vm4 = vcmp.lt.s32.totalorder %v4055_v57, 33  ;;  %v5826_v36 = vmul.f32 %v411_v38, %v8880_v29  ;;  %v415_v63 = vstv %s5758_s21  ;;  %v1434_v21 = vadd.f32 %v1432_v60, %v1419_v44  ;;  %v8886_v29 = vld [vmem:[#allocation49_spill] sm:$0xff]  ;;  %s5874_s21 = sld [smem:[#allocation9 + $0x42]] }
 0x22a   :  { %v1456_v35 = vsel %vm8879_vm4, %v4943_v23, %v4945_v18  ;;  %v1447_v46 = vmul.f32 %v8348_v17, %v1441_v45  ;;  %vm8882_vm5 = vmmov %vm8879_vm4  ;;  %v5838_v1 = vmul.f32 %v413_v9, %v8883_v50  ;;  %v1435_v3 = vadd.f32 %v1433_v6, %v1420_v51  ;;  %v8890_v9 = vld [vmem:[#allocation106_spill] sm:$0xff]  ;;  %v8892_v17 = vld [vmem:[#allocation48_spill] sm:$0xff] }
 0x22b   :  { %8881 = vst [vmem:[#allocation80_spill] sm:$0xff] %v5826_v36  ;;  %v1455_v39 = vsel %vm8882_vm5, %v4945_v18, %v4943_v23  ;;  %v1448_v38 = vmul.f32 %v8346_v55, %v1440_v24  ;;  %vm8887_vm4 = vcmp.lt.s32.totalorder %v4055_v57, 32  ;;  %v8353_v45 = vperm.slane %v5783_v22, 1  ;;  %v8893_v50 = vld [vmem:[#allocation125_spill] sm:$0xff]  ;;  %v8898_v24 = vld [vmem:[#allocation107_spill] sm:$0xff] }
 0x22c   :  { %8884 = vst [vmem:[#allocation78_spill] sm:$0xff] %v5838_v1  ;;  %v1471_v60 = vsel %vm8887_vm4, %v8886_v29, %v8885_v54  ;;  %2143 = vrot.lane.b32.xlu1 %v5811_v20, %s8349_s3  ;;  %2141 = vrot.lane.b32.xlu0 %v5813_v47, %s8349_s3  ;;  %v8888_v23 = vperm.slane %v5755_v4, 0  ;;  %vm8889_vm5 = vmmov %vm8887_vm4  ;;  %v5858_v6 = vmul.f32 %v415_v63, %v8890_v9  ;;  %vm8894_vm4 = vcmp.lt.s32.totalorder %v4055_v57, 31  ;;  %s5885_s3 = sld [smem:[#allocation9 + $0x43]] }
 0x22d   :  { %v1470_v51 = vsel %vm8889_vm5, %v8885_v54, %v8886_v29  ;;  %2151 = vrot.lane.b32.xlu2 %v5813_v47, %s8386_s2  ;;  %v1463_v44 = vmul.f32 %v8347_v19, %v1455_v39  ;;  %v1449_v55 = vadd.f32 %v1447_v46, %v1434_v21  ;;  %v1477_v63 = vmul.f32 %v8351_v56, %v1471_v60  ;;  %vm8895_vm5 = vmmov %vm8894_vm4 }
 0x22e   :  { %v1462_v18 = vmul.f32 %v8888_v23, %v1456_v35  ;;  %8891 = vst [vmem:[#allocation79_spill] sm:$0xff] %v5858_v6  ;;  %v5866_v35 = vpop.permute.xlu1 %1732  ;;  %v5868_v23 = vpop.permute.xlu0 %1730  ;;  %v417_v29 = vstv %s5799_s12  ;;  %v1450_v39 = vadd.f32 %v1448_v38, %v1435_v3  ;;  %v1478_v19 = vmul.f32 %v8353_v45, %v1470_v51  ;;  %v8896_v51 = vld [vmem:[#allocation133_spill] sm:$0xff]  ;;  %s5901_s12 = sld [smem:[#allocation9 + $0x44]] }
 0x22f   :  { %v5876_v9 = vpop.permute.xlu2 %1807  ;;  %v1486_v21 = vsel %vm8894_vm4, %v8893_v50, %v8892_v17  ;;  %v419_v46 = vstv %s5809_s13  ;;  %v1485_v56 = vsel %vm8895_vm5, %v8892_v17, %v8893_v50  ;;  %vm8897_vm3 = vcmp.lt.s32.totalorder %v4055_v57, 30  ;;  %v8901_v50 = vld [vmem:[#allocation110_spill] sm:$0xff]  ;;  %s5946_s13 = sld [smem:[#allocation9 + $0x45]] }
 0x230   :  { %v1464_v60 = vadd.f32 %v1462_v18, %v1449_v55  ;;  %v1465_v38 = vadd.f32 %v1463_v44, %v1450_v39  ;;  %v1501_v45 = vsel %vm8897_vm3, %v8896_v51, %v5111_v42  ;;  %v5898_v22 = vmul.f32 %v417_v29, %v8898_v24  ;;  %vm8900_vm4 = vmmov %vm8897_vm3  ;;  %v8904_v29 = vld [vmem:[#allocation28_spill] sm:$0xff] }
 0x231   :  { %v421_v4 = vstv %s5829_s11  ;;  %v8899_v18 = vperm.slane %v5826_v36, 0  ;;  %v1500_v44 = vsel %vm8900_vm4, %v5111_v42, %v8896_v51  ;;  %v5910_v39 = vmul.f32 %v419_v46, %v8901_v50  ;;  %v8914_v51 = vld [vmem:[#allocation50_spill] sm:$0xff]  ;;  %s5982_s11 = sld [smem:[#allocation9 + $0x47]] }
 0x232   :  { %v1479_v55 = vadd.f32 %v1477_v63, %v1464_v60  ;;  %v1480_v3 = vadd.f32 %v1478_v19, %v1465_v38  ;;  %v8903_v54 = vperm.slane %v5826_v36, 1  ;;  %vm8906_vm3 = vcmp.lt.s32.totalorder %v4055_v57, 29 }
 0x233   :  { %v1492_v17 = vmul.f32 %v8899_v18, %v1486_v21  ;;  %8902 = vst [vmem:[#allocation75_spill] sm:$0xff] %v5910_v39  ;;  %v1516_v63 = vsel %vm8906_vm3, %v8905_v27, %v8904_v29  ;;  %v8907_v42 = vperm.slane %v5838_v1, 0  ;;  %vm8908_vm5 = vmmov %vm8906_vm3  ;;  %v8911_v60 = vperm.slane %v5838_v1, 1  ;;  %v8915_v1 = vld [vmem:[#allocation127_spill] sm:$0xff] }
 0x234   :  { %v1493_v24 = vmul.f32 %v8903_v54, %v1485_v56  ;;  %2161 = vrot.lane.b32.xlu1 %v5813_v47, %s8376_s8  ;;  %2153 = vrot.lane.b32.xlu0 %v5811_v20, %s8386_s2  ;;  %v1515_v56 = vsel %vm8908_vm5, %v8904_v29, %v8905_v27  ;;  %v8909_v54 = vld [vmem:[#allocation111_spill] sm:$0xff]  ;;  %v8912_v27 = vperm.slane %v5858_v6, 0  ;;  %vm8916_vm4 = vcmp.lt.s32.totalorder %v4055_v57, 19  ;;  %s8976_s2 = smov 34  }
 0x235   :  { %v1507_v19 = vmul.f32 %v8907_v42, %v1501_v45  ;;  %v5930_v46 = vmul.f32 %v421_v4, %v8909_v54  ;;  %2163 = vrot.lane.b32.xlu2 %v5811_v20, %s8376_s8  ;;  %v1508_v38 = vmul.f32 %v8911_v60, %v1500_v44  ;;  %v1494_v42 = vadd.f32 %v1492_v17, %v1479_v55  ;;  %vm8917_vm3 = vmmov %vm8916_vm4  ;;  %s6149_s8 = sld [smem:[#allocation9 + $0x4e]] }
 0x236   :  { %v5938_v45 = vpop.permute.xlu1 %1760  ;;  %v5940_v50 = vpop.permute.xlu0 %1747  ;;  %v1522_v4 = vmul.f32 %v8912_v27, %v1516_v63  ;;  %v423_v54 = vstv %s5874_s21  ;;  %v1495_v44 = vadd.f32 %v1493_v24, %v1480_v3  ;;  %v8913_v60 = vperm.slane %v5858_v6, 1  ;;  %v8925_v27 = vld [vmem:[#allocation40_spill] sm:$0xff]  ;;  %s6026_s21 = sld [smem:[#allocation9 + $0x48]] }
 0x237   :  { %8910 = vst [vmem:[#allocation88_spill] sm:$0xff] %v5930_v46  ;;  %v5948_v21 = vpop.permute.xlu2 %1835  ;;  %v1531_v55 = vsel %vm8916_vm4, %v8915_v1, %v8914_v51  ;;  %v425_v17 = vstv %s5885_s3  ;;  %v1509_v36 = vadd.f32 %v1507_v19, %v1494_v42  ;;  %v1530_v63 = vsel %vm8917_vm3, %v8914_v51, %v8915_v1  ;;  %s5971_s3 = sld [smem:[#allocation9 + $0x46]]  ;;  %v8922_v51 = vld [vmem:[#allocation117_spill] sm:$0xff] }
 0x238   :  { %v1523_v18 = vmul.f32 %v8913_v60, %v1515_v56  ;;  %v1510_v3 = vadd.f32 %v1508_v38, %v1495_v44  ;;  %vm8918_vm5 = vcmp.lt.s32.totalorder %v4055_v57, 18  ;;  %v8919_v56 = vld [vmem:[#allocation114_spill] sm:$0xff]  ;;  %v427_v6 = vstv %s5901_s12  ;;  %s6042_s12 = sld [smem:[#allocation9 + $0x49]] }
 0x239   :  { %v1546_v24 = vsel %vm8918_vm5, %v5268_v34, %v5270_v41  ;;  %v5968_v60 = vmul.f32 %v423_v54, %v8919_v56  ;;  %v1524_v19 = vadd.f32 %v1522_v4, %v1509_v36  ;;  %v8920_v42 = vperm.slane %v5898_v22, 0  ;;  %vm8921_vm4 = vmmov %vm8918_vm5 }
 0x23a   :  { %v1545_v38 = vsel %vm8921_vm4, %v5270_v41, %v5268_v34  ;;  %v5980_v44 = vmul.f32 %v425_v17, %v8922_v51  ;;  %v1525_v29 = vadd.f32 %v1523_v18, %v1510_v3  ;;  %v8924_v54 = vperm.slane %v5898_v22, 1 }
 0x23b   :  { %v1537_v1 = vmul.f32 %v8920_v42, %v1531_v55  ;;  %vm8926_vm3 = vcmp.lt.s32.totalorder %v4055_v57, 17  ;;  %v8927_v34 = vperm.slane %v5910_v39, 0  ;;  %v8929_v55 = vld [vmem:[#allocation118_spill] sm:$0xff]  ;;  %vm8934_vm4 = vcmp.lt.s32.totalorder %v4055_v57, 16 }
 0x23c   :  { %8923 = vst [vmem:[#allocation84_spill] sm:$0xff] %v5980_v44  ;;  %v1538_v56 = vmul.f32 %v8924_v54, %v1530_v63  ;;  %v1561_v36 = vsel %vm8926_vm3, %v5349_v25, %v8925_v27  ;;  %2173 = vrot.lane.b32.xlu1 %v5811_v20, %s8374_s9  ;;  %2171 = vrot.lane.b32.xlu0 %v5813_v47, %s8374_s9  ;;  %vm8928_vm5 = vmmov %vm8926_vm3  ;;  %v8930_v63 = vperm.slane %v5910_v39, 1  ;;  %v8932_v39 = vperm.slane %v5930_v46, 1  ;;  %s8967_s9 = smov 35  }
 0x23d   :  { %v1552_v41 = vmul.f32 %v8927_v34, %v1546_v24  ;;  %v1560_v18 = vsel %vm8928_vm5, %v8925_v27, %v5349_v25  ;;  %v6002_v17 = vmul.f32 %v427_v6, %v8929_v55  ;;  %2181 = vrot.lane.b32.xlu2 %v5813_v47, %s8372_s10  ;;  %v1539_v24 = vadd.f32 %v1537_v1, %v1524_v19  ;;  %vm8935_vm3 = vmmov %vm8934_vm4 }
 0x23e   :  { %v1553_v3 = vmul.f32 %v8930_v63, %v1545_v38  ;;  %v6009_v51 = vpop.permute.xlu1 %1777  ;;  %v6011_v54 = vpop.permute.xlu0 %1775  ;;  %v8931_v34 = vperm.slane %v5930_v46, 0  ;;  %v429_v6 = vstv %s5946_s13  ;;  %v1540_v55 = vadd.f32 %v1538_v56, %v1525_v29  ;;  %v8933_v63 = vld [vmem:[#allocation135_spill] sm:$0xff]  ;;  %v8942_v46 = vld [vmem:[#allocation137_spill] sm:$0xff]  ;;  %s8944_s13 = smov 46  }
 0x23f   :  { %v6017_v27 = vpop.permute.xlu2 %1852  ;;  %v1568_v38 = vmul.f32 %v8932_v39, %v1560_v18  ;;  %v1576_v42 = vsel %vm8934_vm4, %v8933_v63, %v5347_v32  ;;  %v1554_v1 = vadd.f32 %v1552_v41, %v1539_v24  ;;  %vm8936_vm5 = vcmp.lt.s32.totalorder %v4055_v57, 15 }
 0x240   :  { %v1567_v4 = vmul.f32 %v8931_v34, %v1561_v36  ;;  %v1575_v36 = vsel %vm8935_vm3, %v5347_v32, %v8933_v63  ;;  %v1555_v56 = vadd.f32 %v1553_v3, %v1540_v55  ;;  %v1591_v18 = vsel %vm8936_vm5, %v5430_v26, %v5432_v13  ;;  %v8937_v34 = vld [vmem:[#allocation119_spill] sm:$0xff]  ;;  %vm8940_vm4 = vmmov %vm8936_vm5 }
 0x241   :  { %v6039_v19 = vmul.f32 %v429_v6, %v8937_v34  ;;  %v431_v25 = vstv %s5971_s3  ;;  %v8939_v24 = vperm.slane %v5968_v60, 0  ;;  %v1590_v3 = vsel %vm8940_vm4, %v5432_v13, %v5430_v26  ;;  %s6078_s3 = sld [smem:[#allocation9 + $0x4a]] }
 0x242   :  { %v1569_v41 = vadd.f32 %v1567_v4, %v1554_v1  ;;  %v433_v55 = vstv %s5982_s11  ;;  %v1570_v63 = vadd.f32 %v1568_v38, %v1555_v56  ;;  %v8941_v39 = vperm.slane %v5968_v60, 1  ;;  %v8947_v38 = vld [vmem:[#allocation120_spill] sm:$0xff]  ;;  %v8950_v56 = vld [vmem:[#allocation21_spill] sm:$0xff]  ;;  %s6097_s11 = sld [smem:[#allocation9 + $0x4b]] }
 0x243   :  { %8938 = vst [vmem:[#allocation85_spill] sm:$0xff] %v6039_v19  ;;  %v1582_v32 = vmul.f32 %v8939_v24, %v1576_v42  ;;  %vm8943_vm3 = vcmp.lt.s32.totalorder %v4055_v57, 14  ;;  %v8945_v26 = vperm.slane %v5980_v44, 0  ;;  %v6069_v1 = vmul.f32 %v431_v25, %v8947_v38 }
 0x244   :  { %v1583_v29 = vmul.f32 %v8941_v39, %v1575_v36  ;;  %v1606_v6 = vsel %vm8943_vm3, %v5510_v53, %v8942_v46  ;;  %2191 = vrot.lane.b32.xlu1 %v5813_v47, %s8944_s13  ;;  %2183 = vrot.lane.b32.xlu0 %v5811_v20, %s8372_s10  ;;  %vm8946_vm5 = vmmov %vm8943_vm3  ;;  %v8949_v36 = vperm.slane %v5980_v44, 1  ;;  %v6076_v34 = vmul.f32 %v433_v55, %v8950_v56  ;;  %v8954_v56 = vld [vmem:[#allocation53_spill] sm:$0xff]  ;;  %s8963_s10 = smov 45  }
 0x245   :  { %v1597_v13 = vmul.f32 %v8945_v26, %v1591_v18  ;;  %v1605_v42 = vsel %vm8946_vm5, %v8942_v46, %v5510_v53  ;;  %8948 = vst [vmem:[#allocation89_spill] sm:$0xff] %v6069_v1  ;;  %2193 = vrot.lane.b32.xlu2 %v5811_v20, %s8944_s13  ;;  %v1584_v53 = vadd.f32 %v1582_v32, %v1569_v41  ;;  %v8952_v46 = vperm.slane %v6002_v17, 0 }
 0x246   :  { %v1598_v39 = vmul.f32 %v8949_v36, %v1590_v3  ;;  %8951 = vst [vmem:[#allocation91_spill] sm:$0xff] %v6076_v34  ;;  %v6080_v18 = vpop.permute.xlu1 %1805  ;;  %v6082_v24 = vpop.permute.xlu0 %1792  ;;  %v1585_v3 = vadd.f32 %v1583_v29, %v1570_v63  ;;  %v8953_v55 = vperm.slane %v6002_v17, 1  ;;  %vm8955_vm4 = vcmp.lt.s32.totalorder %v4055_v57, 13 }
 0x247   :  { %v1612_v25 = vmul.f32 %v8952_v46, %v1606_v6  ;;  %v6088_v4 = vpop.permute.xlu2 %1880  ;;  %v1621_v44 = vsel %vm8955_vm4, %v8954_v56, %v5508_v62  ;;  %v435_v41 = vstv %s6026_s21  ;;  %v1599_v32 = vadd.f32 %v1597_v13, %v1584_v53  ;;  %vm8956_vm3 = vmmov %vm8955_vm4  ;;  %s6120_s21 = sld [smem:[#allocation9 + $0x4c]] }
 0x248   :  { %v1613_v36 = vmul.f32 %v8953_v55, %v1605_v42  ;;  %v1620_v6 = vsel %vm8956_vm3, %v5508_v62, %v8954_v56  ;;  %v8378_v46 = vperm.slane %v6069_v1, 0  ;;  %v1600_v63 = vadd.f32 %v1598_v39, %v1585_v3  ;;  %v8960_v56 = vld [vmem:[#allocation17_spill] sm:$0xff] }
 0x249   :  { %vm8957_vm5 = vcmp.lt.s32.totalorder %v4055_v57, 3  ;;  %v437_v38 = vstv %s6042_s12  ;;  %v1614_v26 = vadd.f32 %v1612_v25, %v1599_v32  ;;  %v8958_v13 = vperm.slane %v6039_v19, 0  ;;  %s6129_s12 = sld [smem:[#allocation9 + $0x4d]] }
 0x24a   :  { %v1636_v42 = vsel %vm8957_vm5, %v5584_v43, %v5586_v61  ;;  %vm8959_vm4 = vmmov %vm8957_vm5  ;;  %v6118_v39 = vmul.f32 %v435_v41, %v8960_v56  ;;  %v1615_v3 = vadd.f32 %v1613_v36, %v1600_v63  ;;  %v8961_v29 = vperm.slane %v6039_v19, 1  ;;  %v8965_v36 = vld [vmem:[#allocation24_spill] sm:$0xff] }
 0x24b   :  { %v1627_v53 = vmul.f32 %v8958_v13, %v1621_v44  ;;  %v1635_v62 = vsel %vm8959_vm4, %v5586_v61, %v5584_v43  ;;  %vm8962_vm3 = vcmp.lt.s32.totalorder %v4055_v57, 2  ;;  %v8381_v25 = vperm.slane %v6076_v34, 1 }
 0x24c   :  { %v1628_v55 = vmul.f32 %v8961_v29, %v1620_v6  ;;  %v1651_v44 = vsel %vm8962_vm3, %v5658_v2, %v5360_v28  ;;  %2203 = vrot.lane.b32.xlu1 %v5811_v20, %s8963_s10  ;;  %2201 = vrot.lane.b32.xlu0 %v5813_v47, %s8963_s10  ;;  %v1642_v43 = vmul.f32 %v8378_v46, %v1636_v42  ;;  %vm8964_vm5 = vmmov %vm8962_vm3  ;;  %v8968_v32 = vperm.slane %v6069_v1, 1 }
 0x24d   :  { %v1650_v61 = vsel %vm8964_vm5, %v5360_v28, %v5658_v2  ;;  %v6142_v41 = vmul.f32 %v437_v38, %v8965_v36  ;;  %2211 = vrot.lane.b32.xlu2 %v5813_v47, %s8967_s9  ;;  %v439_v29 = vstv %s6078_s3  ;;  %v1629_v13 = vadd.f32 %v1627_v53, %v1614_v26  ;;  %s6182_s3 = sld [smem:[#allocation9 + $0x4f]] }
 0x24e   :  { %v1643_v6 = vmul.f32 %v8968_v32, %v1635_v62  ;;  %v6151_v63 = vpop.permute.xlu1 %1822  ;;  %v6153_v42 = vpop.permute.xlu0 %1820  ;;  %v8969_v28 = vperm.slane %v6076_v34, 0  ;;  %v8389_v38 = vperm.slane %v6118_v39, 0  ;;  %v1630_v46 = vadd.f32 %v1628_v55, %v1615_v3  ;;  %v8970_v32 = vld [vmem:[#allocation72_spill] sm:$0xff] }
 0x24f   :  { %8966 = vst [vmem:[#allocation96_spill] sm:$0xff] %v6142_v41  ;;  %v6159_v36 = vpop.permute.xlu2 %1897  ;;  %v1658_v62 = vmul.f32 %v8381_v25, %v1650_v61  ;;  %vm8971_vm4 = vcmp.lt.s32.totalorder %v4055_v57, 1  ;;  %v441_v53 = vstv %s6097_s11  ;;  %v1644_v1 = vadd.f32 %v1642_v43, %v1629_v13  ;;  %v8974_v34 = vld [vmem:[#allocation36_spill] sm:$0xff]  ;;  %s6188_s11 = sld [smem:[#allocation9 + $0x50]] }
 0x250   :  { %v1657_v2 = vmul.f32 %v8969_v28, %v1651_v44  ;;  %v1666_v26 = vsel %vm8971_vm4, %v8970_v32, %v5656_v37  ;;  %vm8972_vm3 = vmmov %vm8971_vm4  ;;  %v8973_v28 = vld [vmem:[#allocation19_spill] sm:$0xff]  ;;  %v8388_v55 = vperm.slane %v6142_v41, 0  ;;  %v1645_v3 = vadd.f32 %v1643_v6, %v1630_v46 }
 0x251   :  { %v1665_v44 = vsel %vm8972_vm3, %v5656_v37, %v8970_v32  ;;  %v6173_v56 = vmul.f32 %v439_v29, %v8973_v28  ;;  %v1672_v25 = vmul.f32 %v8389_v38, %v1666_v26  ;;  %v6179_v19 = vmul.f32 %v441_v53, %v8974_v34 }
 0x252   :  { %v1659_v61 = vadd.f32 %v1657_v2, %v1644_v1  ;;  %v443_v43 = vstv %s6120_s21  ;;  %v1660_v13 = vadd.f32 %v1658_v62, %v1645_v3  ;;  %v8975_v37 = vperm.slane %v6118_v39, 1  ;;  %v8978_v2 = vld [vmem:[#allocation35_spill] sm:$0xff]  ;;  %s6209_s21 = sld [smem:[#allocation9 + $0x51]] }
 0x253   :  { %v8390_v29 = vperm.slane %v6142_v41, 1  ;;  %v445_v28 = vstv %s6129_s12  ;;  %v1681_v1 = vmul.f32 %v8388_v55, %v3906_v0  ;;  %v8393_v34 = vperm.slane %v6173_v56, 0  ;;  %v8980_v55 = vld [vmem:[#allocation39_spill] sm:$0xff]  ;;  %s6259_s12 = sld [smem:[#allocation9 + $0x53]] }
 0x254   :  { %v1673_v32 = vmul.f32 %v8975_v37, %v1665_v44  ;;  %2221 = vrot.lane.b32.xlu1 %v5813_v47, %s8976_s2  ;;  %2213 = vrot.lane.b32.xlu0 %v5811_v20, %s8967_s9  ;;  %vm8977_vm5 = vcmp.lt.s32.totalorder %v4055_v57, 127  ;;  %v6206_v62 = vmul.f32 %v443_v43, %v8978_v2  ;;  %v447_v26 = vstv %s6149_s8  ;;  %s6250_s8 = sld [smem:[#allocation9 + $0x52]] }
 0x255   :  { %2223 = vrot.lane.b32.xlu2 %v5811_v20, %s8976_s2  ;;  %v1689_v46 = vsel %vm8977_vm5, %v5725_v7, %v5723_v49  ;;  %v1674_v44 = vadd.f32 %v1672_v25, %v1659_v61  ;;  %vm8979_vm4 = vmmov %vm8977_vm5  ;;  %v6221_v38 = vmul.f32 %v445_v28, %v8980_v55  ;;  %v1682_v6 = vmul.f32 %v8390_v29, %v3903_v8  ;;  %v8983_v61 = vld [vmem:[#allocation16_spill] sm:$0xff] }
 0x256   :  { %v6211_v53 = vpop.permute.xlu1 %1850  ;;  %v6213_v0 = vpop.permute.xlu0 %1837  ;;  %v1690_v3 = vsel %vm8979_vm4, %v5723_v49, %v5725_v7  ;;  %v1675_v2 = vadd.f32 %v1673_v32, %v1660_v13  ;;  %vm8981_vm3 = vcmp.lt.s32.totalorder %v4055_v57, 126  ;;  %v1696_v7 = vmul.f32 %v8393_v34, %v1689_v46 }
 0x257   :  { %v6223_v43 = vpop.permute.xlu2 %1925  ;;  %v1704_v25 = vsel %vm8981_vm3, %v5519_v10, %v5794_v14  ;;  %vm8982_vm5 = vmmov %vm8981_vm3  ;;  %v6240_v13 = vmul.f32 %v447_v26, %v8983_v61  ;;  %v8984_v8 = vperm.slane %v6173_v56, 1  ;;  %v8397_v28 = vperm.slane %v6206_v62, 0 }
 0x258   :  { %v1705_v55 = vsel %vm8982_vm5, %v5794_v14, %v5519_v10  ;;  %v8396_v29 = vperm.slane %v6206_v62, 1  ;;  %v1683_v37 = vadd.f32 %v1681_v1, %v1674_v44  ;;  %v8985_v49 = vperm.slane %v6179_v19, 0 }
 0x259   :  { %v1697_v32 = vmul.f32 %v8984_v8, %v1690_v3  ;;  %v8398_v46 = vperm.slane %v6221_v38, 0  ;;  %v449_v34 = vstv %s6182_s3  ;;  %v1684_v10 = vadd.f32 %v1682_v6, %v1675_v2  ;;  %s8990_s3 = smov 32  }
 0x25a   :  { %v1711_v41 = vmul.f32 %v8985_v49, %v1704_v25  ;;  %v8986_v14 = vperm.slane %v6179_v19, 1  ;;  %vm8987_vm4 = vcmp.lt.s32.totalorder %v4055_v57, 125  ;;  %v451_v61 = vstv %s6188_s11  ;;  %s6281_s11 = sld [smem:[#allocation9 + $0x54]] }
 0x25b   :  { %v1719_v3 = vsel %vm8987_vm4, %v5792_v40, %v5595_v11  ;;  %v1698_v1 = vadd.f32 %v1696_v7, %v1683_v37  ;;  %vm8989_vm3 = vmmov %vm8987_vm4  ;;  %v1699_v25 = vadd.f32 %v1697_v32, %v1684_v10  ;;  %vm8991_vm5 = vcmp.lt.s32.totalorder %v4055_v57, 115  ;;  %v8994_v10 = vld [vmem:[#allocation41_spill] sm:$0xff] }
 0x25c   :  { %v1712_v26 = vmul.f32 %v8986_v14, %v1705_v55  ;;  %2233 = vrot.lane.b32.xlu1 %v5811_v20, %s8988_s26  ;;  %2231 = vrot.lane.b32.xlu0 %v5813_v47, %s8988_s26  ;;  %v1720_v6 = vsel %vm8989_vm3, %v5595_v11, %v5792_v40  ;;  %v1734_v49 = vsel %vm8991_vm5, %v5868_v23, %v5866_v35  ;;  %v8992_v55 = vld [vmem:[#allocation126_spill] sm:$0xff]  ;;  %v453_v7 = vstv %s6209_s21  ;;  %vm8993_vm4 = vmmov %vm8991_vm5  ;;  %s6322_s21 = sld [smem:[#allocation9 + $0x55]] }
 0x25d   :  { %2241 = vrot.lane.b32.xlu2 %v5813_v47, %s8990_s3  ;;  %v6278_v37 = vmul.f32 %v449_v34, %v8992_v55  ;;  %v1713_v8 = vadd.f32 %v1711_v41, %v1698_v1  ;;  %v1726_v14 = vmul.f32 %v8397_v28, %v1719_v3  ;;  %v1735_v32 = vsel %vm8993_vm4, %v5866_v35, %v5868_v23 }
 0x25e   :  { %v6283_v11 = vpop.permute.xlu1 %1867  ;;  %v6285_v40 = vpop.permute.xlu0 %1865  ;;  %v6294_v34 = vmul.f32 %v451_v61, %v8994_v10  ;;  %v1714_v2 = vadd.f32 %v1712_v26, %v1699_v25  ;;  %v1727_v44 = vmul.f32 %v8396_v29, %v1720_v6  ;;  %vm8995_vm3 = vcmp.lt.s32.totalorder %v4055_v57, 114  ;;  %v8997_v26 = vld [vmem:[#allocation31_spill] sm:$0xff] }
 0x25f   :  { %v6296_v55 = vpop.permute.xlu2 %1942  ;;  %v1749_v41 = vsel %vm8995_vm3, %v5669_v31, %v5940_v50  ;;  %v1741_v35 = vmul.f32 %v8398_v46, %v1734_v49  ;;  %vm8996_vm5 = vmmov %vm8995_vm3  ;;  %v6312_v61 = vmul.f32 %v453_v7, %v8997_v26  ;;  %v8998_v1 = vperm.slane %v6221_v38, 1 }
 0x260   :  { %v1750_v23 = vsel %vm8996_vm5, %v5940_v50, %v5669_v31  ;;  %v8404_v25 = vperm.slane %v6278_v37, 0  ;;  %v8403_v10 = vperm.slane %v6278_v37, 1  ;;  %v1728_v29 = vadd.f32 %v1726_v14, %v1713_v8 }
 0x261   :  { %v1742_v6 = vmul.f32 %v8998_v1, %v1735_v32  ;;  %v8999_v28 = vperm.slane %v6240_v13, 0  ;;  %v8405_v49 = vperm.slane %v6294_v34, 0  ;;  %v455_v46 = vstv %s6250_s8  ;;  %s6357_s8 = sld [smem:[#allocation9 + $0x57]] }
 0x262   :  { %v1729_v31 = vadd.f32 %v1727_v44, %v1714_v2  ;;  %v9000_v50 = vperm.slane %v6240_v13, 1  ;;  %vm9001_vm4 = vcmp.lt.s32.totalorder %v4055_v57, 113  ;;  %v457_v26 = vstv %s6259_s12  ;;  %s6394_s12 = sld [smem:[#allocation9 + $0x58]] }
 0x263   :  { %v1756_v3 = vmul.f32 %v8999_v28, %v1749_v41  ;;  %v1764_v32 = vsel %vm9001_vm4, %v5938_v45, %v5737_v58  ;;  %v1743_v28 = vadd.f32 %v1741_v35, %v1728_v29  ;;  %vm9003_vm3 = vmmov %vm9001_vm4  ;;  %vm9004_vm5 = vcmp.lt.s32.totalorder %v4055_v57, 112 }
 0x264   :  { %v1757_v7 = vmul.f32 %v9000_v50, %v1750_v23  ;;  %2251 = vrot.lane.b32.xlu1 %v5813_v47, %s9002_s25  ;;  %2243 = vrot.lane.b32.xlu0 %v5811_v20, %s8990_s3  ;;  %v1765_v44 = vsel %vm9003_vm3, %v5737_v58, %v5938_v45  ;;  %v1744_v14 = vadd.f32 %v1742_v6, %v1729_v31  ;;  %v9005_v23 = vld [vmem:[#allocation45_spill] sm:$0xff]  ;;  %v459_v35 = vstv %s6281_s11  ;;  %vm9006_vm4 = vmmov %vm9004_vm5  ;;  %v9007_v31 = vld [vmem:[#allocation52_spill] sm:$0xff]  ;;  %s9017_s11 = smov 30  }
 0x265   :  { %2253 = vrot.lane.b32.xlu2 %v5811_v20, %s9002_s25  ;;  %v1779_v41 = vsel %vm9004_vm5, %v6011_v54, %v6009_v51  ;;  %v6350_v29 = vmul.f32 %v455_v46, %v9005_v23  ;;  %v1758_v45 = vadd.f32 %v1756_v3, %v1743_v28  ;;  %v1771_v50 = vmul.f32 %v8404_v25, %v1764_v32 }
 0x266   :  { %v6353_v1 = vpop.permute.xlu1 %1895  ;;  %v6355_v58 = vpop.permute.xlu0 %1882  ;;  %v1780_v6 = vsel %vm9006_vm4, %v6009_v51, %v6011_v54  ;;  %v6366_v46 = vmul.f32 %v457_v26, %v9007_v31  ;;  %v1759_v8 = vadd.f32 %v1757_v7, %v1744_v14  ;;  %v1772_v2 = vmul.f32 %v8403_v10, %v1765_v44  ;;  %v9011_v7 = vld [vmem:[#allocation130_spill] sm:$0xff] }
 0x267   :  { %v6368_v23 = vpop.permute.xlu2 %1970  ;;  %vm9009_vm3 = vcmp.lt.s32.totalorder %v4055_v57, 111  ;;  %v1786_v51 = vmul.f32 %v8405_v49, %v1779_v41  ;;  %v6384_v26 = vmul.f32 %v459_v35, %v9011_v7  ;;  %v9013_v28 = vperm.slane %v6294_v34, 1 }
 0x268   :  { %9008 = vst [vmem:[#allocation22_spill] sm:$0xff] %v6366_v46  ;;  %v1794_v3 = vsel %vm9009_vm3, %v5801_v30, %v6082_v24  ;;  %vm9010_vm5 = vmmov %vm9009_vm3  ;;  %v8407_v14 = vperm.slane %v6350_v29, 0  ;;  %v8406_v31 = vperm.slane %v6350_v29, 1  ;;  %v1773_v10 = vadd.f32 %v1771_v50, %v1758_v45 }
 0x269   :  { %v1795_v54 = vsel %vm9010_vm5, %v6082_v24, %v5801_v30  ;;  %9012 = vst [vmem:[#allocation29_spill] sm:$0xff] %v6384_v26  ;;  %v1787_v44 = vmul.f32 %v9013_v28, %v1780_v6  ;;  %v9014_v25 = vperm.slane %v6312_v61, 0  ;;  %v8408_v41 = vperm.slane %v6366_v46, 0 }
 0x26a   :  { %v461_v49 = vstv %s6322_s21  ;;  %v1774_v30 = vadd.f32 %v1772_v2, %v1759_v8  ;;  %v9015_v24 = vperm.slane %v6312_v61, 1  ;;  %vm9016_vm4 = vcmp.lt.s32.totalorder %v4055_v57, 110  ;;  %s6413_s21 = sld [smem:[#allocation9 + $0x59]] }
 0x26b   :  { %v1801_v32 = vmul.f32 %v9014_v25, %v1794_v3  ;;  %v1809_v6 = vsel %vm9016_vm4, %v6080_v18, %v5876_v9  ;;  %v463_v7 = vstv %s6331_s7  ;;  %v1788_v25 = vadd.f32 %v1786_v51, %v1773_v10  ;;  %vm9018_vm3 = vmmov %vm9016_vm4  ;;  %v9020_v3 = vld [vmem:[#allocation131_spill] sm:$0xff]  ;;  %s6429_s7 = sld [smem:[#allocation9 + $0x5a]] }
 0x26c   :  { %v1802_v35 = vmul.f32 %v9015_v24, %v1795_v54  ;;  %2263 = vrot.lane.b32.xlu1 %v5811_v20, %s9017_s11  ;;  %2261 = vrot.lane.b32.xlu0 %v5813_v47, %s9017_s11  ;;  %v1810_v2 = vsel %vm9018_vm3, %v5876_v9, %v6080_v18  ;;  %v1789_v50 = vadd.f32 %v1787_v44, %v1774_v30  ;;  %v465_v54 = vstv %s6357_s8  ;;  %v9022_v30 = vld [vmem:[#allocation134_spill] sm:$0xff]  ;;  %s6466_s8 = sld [smem:[#allocation9 + $0x5b]]  ;;  %s9029_s11 = smov 19  }
 0x26d   :  { %2271 = vrot.lane.b32.xlu2 %v5813_v47, %s9019_s4  ;;  %v1824_v10 = vsel %vm1080_vm11, %v6153_v42, %v6151_v63  ;;  %v6422_v51 = vmul.f32 %v461_v49, %v9020_v3  ;;  %v1803_v28 = vadd.f32 %v1801_v32, %v1788_v25  ;;  %v1816_v24 = vmul.f32 %v8407_v14, %v1809_v6 }
 0x26e   :  { %v6425_v9 = vpop.permute.xlu1 %1912  ;;  %v6427_v18 = vpop.permute.xlu0 %1910  ;;  %v1825_v44 = vsel %vm1080_vm11, %v6151_v63, %v6153_v42  ;;  %v6438_v49 = vmul.f32 %v463_v7, %v9022_v30  ;;  %v1804_v45 = vadd.f32 %v1802_v35, %v1789_v50  ;;  %v1817_v8 = vmul.f32 %v8406_v31, %v1810_v2  ;;  %v9024_v7 = vld [vmem:[#allocation54_spill] sm:$0xff] }
 0x26f   :  { %9021 = vst [vmem:[#allocation97_spill] sm:$0xff] %v6422_v51  ;;  %v6440_v3 = vpop.permute.xlu2 %1987  ;;  %v1839_v32 = vsel %vm1096_vm10, %v5948_v21, %v6213_v0  ;;  %v1831_v63 = vmul.f32 %v8408_v41, %v1824_v10  ;;  %v1840_v42 = vsel %vm1096_vm10, %v6213_v0, %v5948_v21  ;;  %v6456_v35 = vmul.f32 %v465_v54, %v9024_v7  ;;  %v9031_v7 = vld [vmem:[#allocation58_spill] sm:$0xff] }
 0x270   :  { %9023 = vst [vmem:[#allocation115_spill] sm:$0xff] %v6438_v49  ;;  %v9026_v25 = vperm.slane %v6366_v46, 1  ;;  %v8411_v50 = vperm.slane %v6422_v51, 0  ;;  %v8410_v30 = vperm.slane %v6422_v51, 1  ;;  %v1818_v31 = vadd.f32 %v1816_v24, %v1803_v28 }
 0x271   :  { %9025 = vst [vmem:[#allocation99_spill] sm:$0xff] %v6456_v35  ;;  %v9027_v14 = vperm.slane %v6384_v26, 0  ;;  %v8412_v41 = vperm.slane %v6438_v49, 0  ;;  %v467_v6 = vstv %s6394_s12  ;;  %v1819_v21 = vadd.f32 %v1817_v8, %v1804_v45  ;;  %s6497_s12 = sld [smem:[#allocation9 + $0x5c]] }
 0x272   :  { %v1832_v2 = vmul.f32 %v9026_v25, %v1825_v44  ;;  %v9028_v0 = vperm.slane %v6384_v26, 1  ;;  %v1854_v44 = vsel %vm1112_vm6, %v6211_v53, %v6017_v27  ;;  %v8415_v28 = vperm.slane %v6438_v49, 1 }
 0x273   :  { %v1846_v10 = vmul.f32 %v9027_v14, %v1839_v32  ;;  %v1833_v14 = vadd.f32 %v1831_v63, %v1818_v31  ;;  %v1855_v8 = vsel %vm1112_vm6, %v6017_v27, %v6211_v53  ;;  %v469_v24 = vstv %s6413_s21  ;;  %s6517_s21 = sld [smem:[#allocation9 + $0x5d]] }
 0x274   :  { %v1847_v54 = vmul.f32 %v9028_v0, %v1840_v42  ;;  %2281 = vrot.lane.b32.xlu1 %v5813_v47, %s9029_s11  ;;  %2273 = vrot.lane.b32.xlu0 %v5811_v20, %s9019_s4  ;;  %v1834_v32 = vadd.f32 %v1832_v2, %v1819_v21  ;;  %vm9030_vm5 = vcmp.lt.s32.totalorder %v4055_v57, 97  ;;  %v6492_v25 = vmul.f32 %v467_v6, %v9031_v7 }
 0x275   :  { %2283 = vrot.lane.b32.xlu2 %v5811_v20, %s9029_s11  ;;  %v1869_v42 = vsel %vm9030_vm5, %v6285_v40, %v6283_v11  ;;  %v471_v0 = vstv %s6429_s7  ;;  %v1848_v27 = vadd.f32 %v1846_v10, %v1833_v14  ;;  %v1861_v53 = vmul.f32 %v8411_v50, %v1854_v44  ;;  %vm9033_vm4 = vmmov %vm9030_vm5  ;;  %v9035_v44 = vld [vmem:[#allocation136_spill] sm:$0xff]  ;;  %s6535_s7 = sld [smem:[#allocation9 + $0x5e]]  ;;  %s9042_s11 = smov 18  }
 0x276   :  { %9032 = vst [vmem:[#allocation124_spill] sm:$0xff] %v6492_v25  ;;  %v6494_v31 = vpop.permute.xlu1 %1940  ;;  %v1928_v63 = vpop.permute.xlu0 %1927  ;;  %v1870_v2 = vsel %vm9033_vm4, %v6283_v11, %v6285_v40  ;;  %v1849_v7 = vadd.f32 %v1847_v54, %v1834_v32  ;;  %v1862_v45 = vmul.f32 %v8410_v30, %v1855_v8  ;;  %vm9034_vm3 = vcmp.lt.s32.totalorder %v4055_v57, 96  ;;  %v9038_v54 = vld [vmem:[#allocation61_spill] sm:$0xff] }
 0x277   :  { %v6506_v6 = vpop.permute.xlu2 %2015  ;;  %v1884_v10 = vsel %vm9034_vm3, %v6088_v4, %v6355_v58  ;;  %v6515_v14 = vmul.f32 %v469_v24, %v9035_v44  ;;  %v1876_v11 = vmul.f32 %v8412_v41, %v1869_v42  ;;  %vm9037_vm5 = vmmov %vm9034_vm3  ;;  %v6526_v8 = vmul.f32 %v471_v0, %v9038_v54 }
 0x278   :  { %v1885_v40 = vsel %vm9037_vm5, %v6355_v58, %v6088_v4  ;;  %v1877_v32 = vmul.f32 %v8415_v28, %v1870_v2  ;;  %v8416_v30 = vperm.slane %v6492_v25, 0  ;;  %v1863_v24 = vadd.f32 %v1861_v53, %v1848_v27 }
 0x279   :  { %9036 = vst [vmem:[#allocation102_spill] sm:$0xff] %v6515_v14  ;;  %v9040_v44 = vperm.slane %v6456_v35, 0  ;;  %v8417_v21 = vperm.slane %v6492_v25, 1  ;;  %v473_v42 = vstv %s6466_s8  ;;  %v1864_v41 = vadd.f32 %v1862_v45, %v1849_v7  ;;  %s9043_s8 = smov 17  }
 0x27a   :  { %9039 = vst [vmem:[#allocation103_spill] sm:$0xff] %v6526_v8  ;;  %v9041_v4 = vperm.slane %v6456_v35, 1  ;;  %v1899_v0 = vsel %vm8454_vm8, %v6353_v1, %v6159_v36  ;;  %v8420_v27 = vperm.slane %v6515_v14, 0  ;;  %v1878_v53 = vadd.f32 %v1876_v11, %v1863_v24  ;;  %v9045_v11 = vld [vmem:[#allocation64_spill] sm:$0xff] }
 0x27b   :  { %v1891_v50 = vmul.f32 %v9040_v44, %v1884_v10  ;;  %v1900_v45 = vsel %vm8454_vm8, %v6159_v36, %v6353_v1  ;;  %v8424_v2 = vperm.slane %v6515_v14, 1  ;;  %v8421_v7 = vperm.slane %v6526_v8, 0 }
 0x27c   :  { %v1892_v58 = vmul.f32 %v9041_v4, %v1885_v40  ;;  %2293 = vrot.lane.b32.xlu1 %v5811_v20, %s9042_s11  ;;  %2291 = vrot.lane.b32.xlu0 %v5813_v47, %s9042_s11  ;;  %v1879_v10 = vadd.f32 %v1877_v32, %v1864_v41  ;;  %vm9044_vm4 = vcmp.lt.s32.totalorder %v4055_v57, 94  ;;  %v6561_v54 = vmul.f32 %v473_v42, %v9045_v11  ;;  %s6564_s11 = sld [smem:[#allocation9 + $0x5f]]  ;;  %v9052_v32 = vld [vmem:[#allocation70_spill] sm:$0xff] }
 0x27d   :  { %2301 = vrot.lane.b32.xlu2 %v5813_v47, %s9043_s8  ;;  %v1914_v40 = vsel %vm9044_vm4, %v6427_v18, %v6425_v9  ;;  %v475_v36 = vstv %s6497_s12  ;;  %v1893_v1 = vadd.f32 %v1891_v50, %v1878_v53  ;;  %v1906_v4 = vmul.f32 %v8416_v30, %v1899_v0  ;;  %vm9047_vm3 = vmmov %vm9044_vm4  ;;  %s6598_s12 = sld [smem:[#allocation9 + $0x60]] }
 0x27e   :  { %9046 = vst [vmem:[#allocation18_spill] sm:$0xff] %v6561_v54  ;;  %v1958_v24 = vpop.permute.xlu1 %1957  ;;  %v1956_v44 = vpop.permute.xlu0 %1955  ;;  %v1915_v41 = vsel %vm9047_vm3, %v6425_v9, %v6427_v18  ;;  %v1894_v42 = vadd.f32 %v1892_v58, %v1879_v10  ;;  %v1907_v11 = vmul.f32 %v8417_v21, %v1900_v45  ;;  %vm9048_vm5 = vcmp.lt.s32.totalorder %v4055_v57, 93  ;;  %v9050_v18 = vld [vmem:[#allocation63_spill] sm:$0xff] }
 0x27f   :  { %v6573_v28 = vpop.permute.xlu2 %2032  ;;  %v1929_v50 = vsel %vm9048_vm5, %v6223_v43, %v1928_v63  ;;  %v477_v53 = vstv %s6517_s21  ;;  %v1921_v0 = vmul.f32 %v8420_v27, %v1914_v40  ;;  %vm9049_vm4 = vmmov %vm9048_vm5  ;;  %v6587_v30 = vmul.f32 %v475_v36, %v9050_v18  ;;  %s9056_s21 = smov 16  }
 0x280   :  { %v1930_v9 = vsel %vm9049_vm4, %v1928_v63, %v6223_v43  ;;  %v1922_v58 = vmul.f32 %v8424_v2, %v1915_v41  ;;  %v8423_v45 = vperm.slane %v6561_v54, 0  ;;  %v1908_v10 = vadd.f32 %v1906_v4, %v1893_v1 }
 0x281   :  { %9051 = vst [vmem:[#allocation49_spill] sm:$0xff] %v6587_v30  ;;  %v1936_v21 = vmul.f32 %v8421_v7, %v1929_v50  ;;  %v6595_v25 = vmul.f32 %v477_v53, %v9052_v32  ;;  %v479_v40 = vstv %s6535_s7  ;;  %v1909_v27 = vadd.f32 %v1907_v11, %v1894_v42  ;;  %s6611_s7 = sld [smem:[#allocation9 + $0x61]] }
 0x282   :  { %v9054_v43 = vperm.slane %v6526_v8, 1  ;;  %vm9055_vm3 = vcmp.lt.s32.totalorder %v4055_v57, 83  ;;  %v8422_v1 = vperm.slane %v6561_v54, 1  ;;  %v1923_v4 = vadd.f32 %v1921_v0, %v1908_v10 }
 0x283   :  { %9053 = vst [vmem:[#allocation106_spill] sm:$0xff] %v6595_v25  ;;  %v1944_v36 = vsel %vm9055_vm3, %v6494_v31, %v6296_v55  ;;  %vm9057_vm5 = vmmov %vm9055_vm3  ;;  %v8441_v32 = vperm.slane %v6587_v30, 0  ;;  %v1924_v42 = vadd.f32 %v1922_v58, %v1909_v27  ;;  %v8427_v11 = vperm.slane %v6587_v30, 1 }
 0x284   :  { %v1937_v63 = vmul.f32 %v9054_v43, %v1930_v9  ;;  %2311 = vrot.lane.b32.xlu1 %v5813_v47, %s9056_s21  ;;  %2303 = vrot.lane.b32.xlu0 %v5811_v20, %s9043_s8  ;;  %v1945_v41 = vsel %vm9057_vm5, %v6296_v55, %v6494_v31  ;;  %v9058_v9 = vld [vmem:[#allocation62_spill] sm:$0xff]  ;;  %v481_v43 = vstv %s6564_s11  ;;  %v1938_v0 = vadd.f32 %v1936_v21, %v1923_v4  ;;  %s9063_s11 = smov 15  }
 0x285   :  { %2313 = vrot.lane.b32.xlu2 %v5811_v20, %s9056_s21  ;;  %v6622_v18 = vmul.f32 %v479_v40, %v9058_v9  ;;  %v1951_v10 = vmul.f32 %v8423_v45, %v1944_v36  ;;  %v1959_v55 = vsel %vm8451_vm7, %v1956_v44, %v1958_v24  ;;  %v1960_v31 = vsel %vm8451_vm7, %v1958_v24, %v1956_v44 }
 0x286   :  { %v1986_v50 = vpop.permute.xlu1 %1985  ;;  %v1973_v53 = vpop.permute.xlu0 %1972  ;;  %v1939_v58 = vadd.f32 %v1937_v63, %v1924_v42  ;;  %v1952_v7 = vmul.f32 %v8422_v1, %v1945_v41  ;;  %v8426_v40 = vperm.slane %v6595_v25, 0  ;;  %v8425_v21 = vperm.slane %v6595_v25, 1 }
 0x287   :  { %9059 = vst [vmem:[#allocation48_spill] sm:$0xff] %v6622_v18  ;;  %v6631_v27 = vpop.permute.xlu2 %2151  ;;  %vm9060_vm4 = vcmp.lt.s32.totalorder %v4055_v57, 81  ;;  %v1966_v24 = vmul.f32 %v8441_v32, %v1959_v55  ;;  %v1967_v44 = vmul.f32 %v8427_v11, %v1960_v31  ;;  %v6648_v63 = vmul.f32 %v481_v43, %v5402_v16 }
 0x288   :  { %v1974_v36 = vsel %vm9060_vm4, %v6368_v23, %v1973_v53  ;;  %vm9061_vm3 = vmmov %vm9060_vm4  ;;  %v1953_v41 = vadd.f32 %v1951_v10, %v1938_v0  ;;  %v8440_v42 = vperm.slane %v6622_v18, 0  ;;  %v8439_v9 = vperm.slane %v6622_v18, 1 }
 0x289   :  { %v1975_v4 = vsel %vm9061_vm3, %v1973_v53, %v6368_v23  ;;  %9062 = vst [vmem:[#allocation125_spill] sm:$0xff] %v6648_v63  ;;  %v483_v1 = vstv %s6598_s12  ;;  %v1954_v45 = vadd.f32 %v1952_v7, %v1939_v58  ;;  %v1981_v2 = vmul.f32 %v8426_v40, %v1974_v36  ;;  %s9066_s12 = smov 14  }
 0x28a   :  { %v1982_v23 = vmul.f32 %v8425_v21, %v1975_v4  ;;  %v485_v16 = vstv %s6611_s7  ;;  %vm9064_vm5 = vcmp.lt.s32.totalorder %v4055_v57, 80  ;;  %v1968_v43 = vadd.f32 %v1966_v24, %v1953_v41  ;;  %v9067_v21 = vld [vmem:[#allocation69_spill] sm:$0xff]  ;;  %s9070_s7 = smov 13  }
 0x28b   :  { %v1989_v53 = vsel %vm9064_vm5, %v1986_v50, %v6440_v3  ;;  %vm9065_vm4 = vmmov %vm9064_vm5  ;;  %v1969_v0 = vadd.f32 %v1967_v44, %v1954_v45  ;;  %v8438_v31 = vperm.slane %v6648_v63, 0  ;;  %v8437_v58 = vperm.slane %v6648_v63, 1 }
 0x28c   :  { %2323 = vrot.lane.b32.xlu1 %v5811_v20, %s9063_s11  ;;  %2321 = vrot.lane.b32.xlu0 %v5813_v47, %s9063_s11  ;;  %v1990_v7 = vsel %vm9065_vm4, %v6440_v3, %v1986_v50  ;;  %v6677_v40 = vmul.f32 %v483_v1, %v9067_v21  ;;  %v6680_v3 = vmul.f32 %v485_v16, %v5489_v48  ;;  %s9073_s11 = smov 1  }
 0x28d   :  { %2331 = vrot.lane.b32.xlu2 %v5813_v47, %s9066_s12  ;;  %v1983_v45 = vadd.f32 %v1981_v2, %v1968_v43  ;;  %v1984_v24 = vadd.f32 %v1982_v23, %v1969_v0  ;;  %v1996_v44 = vmul.f32 %v8440_v42, %v1989_v53  ;;  %v1997_v41 = vmul.f32 %v8439_v9, %v1990_v7 }
 0x28e   :  { %v2003_v10 = vpop.permute.xlu1 %2002  ;;  %v2001_v55 = vpop.permute.xlu0 %2000  ;;  %9068 = vst [vmem:[#allocation133_spill] sm:$0xff] %v6677_v40  ;;  %v8436_v21 = vperm.slane %v6677_v40, 0  ;;  %v8435_v48 = vperm.slane %v6677_v40, 1  ;;  %v8434_v2 = vperm.slane %v6680_v3, 0  ;;  %v8433_v23 = vperm.slane %v6680_v3, 1 }
 0x28f   :  { %v2004_v36 = vsel %vm8448_vm13, %v2001_v55, %v2003_v10  ;;  %v2005_v4 = vsel %vm8448_vm13, %v2003_v10, %v2001_v55  ;;  %9069 = vst [vmem:[#allocation107_spill] sm:$0xff] %v6680_v3  ;;  %v6682_v50 = vpop.permute.xlu2 %2163  ;;  %v1998_v16 = vadd.f32 %v1996_v44, %v1983_v45  ;;  %v1999_v10 = vadd.f32 %v1997_v41, %v1984_v24 }
 0x290   :  { %v2011_v11 = vmul.f32 %v8438_v31, %v2004_v36  ;;  %v2012_v1 = vmul.f32 %v8437_v58, %v2005_v4 }
 0x292   :  { %v2013_v53 = vadd.f32 %v2011_v11, %v1998_v16  ;;  %v2014_v7 = vadd.f32 %v2012_v1, %v1999_v10 }
 0x294   :  { %2341 = vrot.lane.b32.xlu1 %v5813_v47, %s9070_s7  ;;  %2333 = vrot.lane.b32.xlu0 %v5811_v20, %s9066_s12  ;;  %s9072_s12 = smov 2  }
 0x295   :  { %2343 = vrot.lane.b32.xlu2 %v5811_v20, %s9070_s7  ;;  %s9071_s7 = smov 3  }
 0x296   :  { %v2031_v43 = vpop.permute.xlu1 %2030  ;;  %v2018_v0 = vpop.permute.xlu0 %2017 }
 0x297   :  { %v2019_v55 = vsel %vm8445_vm9, %v6506_v6, %v2018_v0  ;;  %v2020_v36 = vsel %vm8445_vm9, %v2018_v0, %v6506_v6  ;;  %v2034_v4 = vsel %vm8442_vm12, %v2031_v43, %v6573_v28  ;;  %v2035_v45 = vsel %vm8442_vm12, %v6573_v28, %v2031_v43  ;;  %v6714_v11 = vpop.permute.xlu2 %2181 }
 0x298   :  { %v2026_v24 = vmul.f32 %v8436_v21, %v2019_v55  ;;  %v2027_v44 = vmul.f32 %v8435_v48, %v2020_v36  ;;  %v2041_v41 = vmul.f32 %v8434_v2, %v2034_v4  ;;  %v2042_v6 = vmul.f32 %v8433_v23, %v2035_v45 }
 0x29a   :  { %v2028_v1 = vadd.f32 %v2026_v24, %v2013_v53  ;;  %v2029_v16 = vadd.f32 %v2027_v44, %v2014_v7 }
 0x29c   :  { %v2043_v10 = vadd.f32 %v2041_v41, %v2028_v1  ;;  %v2044_v0 = vadd.f32 %v2042_v6, %v2029_v16  ;;  %2353 = vrot.lane.b32.xlu1 %v5811_v20, %s9071_s7  ;;  %2351 = vrot.lane.b32.xlu0 %v5813_v47, %s9071_s7  ;;  %s9074_s7 = smov 127  }
 0x29d   :  { %2361 = vrot.lane.b32.xlu2 %v5813_v47, %s9072_s12 }
 0x29e   :  { %v3281_v28 = vmul.f32 -1.442695, %v2043_v10  ;;  %v3282_v43 = vmul.f32 -1.442695, %v2044_v0  ;;  %v6730_v55 = vpop.permute.xlu1 %2143  ;;  %v6732_v36 = vpop.permute.xlu0 %2141 }
 0x29f   :  { %v6734_v4 = vpop.permute.xlu2 %2193 }
 0x2a0   :  { %3344 = vpow2.f32 %v3281_v28 }
 0x2a1   :  { %3346 = vpow2.f32 %v3282_v43 }
 0x2a4   :  { %2371 = vrot.lane.b32.xlu1 %v5813_v47, %s9073_s11  ;;  %2363 = vrot.lane.b32.xlu0 %v5811_v20, %s9072_s12  ;;  %s9075_s12 = smov 126  }
 0x2a5   :  { %2373 = vrot.lane.b32.xlu2 %v5811_v20, %s9073_s11 }
 0x2a6   :  { %v3345_v53 = vpop.eup %3344  ;;  %v6742_v7 = vpop.permute.xlu1 %2161 }
 0x2a7   :  { %v6744_v45 = vpop.permute.xlu0 %2153  ;;  %v3347_v24 = vpop.eup %3346  ;;  %v2051_v44 = vadd.f32 1.0, %v3345_v53 }
 0x2a8   :  { %v6746_v41 = vpop.permute.xlu2 %2211  ;;  %v2052_v6 = vadd.f32 1.0, %v3347_v24 }
 0x2a9   :  { %3348 = vrcp.f32 %v2051_v44  ;;  %v2064_v48 = vand.u32 2147483648, %v2051_v44  ;;  %v2062_v21 = vand.u32 2147483647, %v2051_v44  ;;  %vm2058_vm5 = vweird.f32 %v2051_v44 }
 0x2aa   :  { %3350 = vrcp.f32 %v2052_v6  ;;  %v2077_v32 = vand.u32 2147483647, %v2052_v6  ;;  %vm2073_vm13 = vweird.f32 %v2052_v6 }
 0x2ab   :  { %vm2063_vm9 = vcmp.eq.f32.partialorder %v2062_v21, 8.507059e+37 }
 0x2ac   :  { %2387 = vrot.lane.b32.xlu1 %v5811_v20, %s9074_s7  ;;  %2385 = vrot.lane.b32.xlu0 %v5813_v47, %s9074_s7  ;;  %vm2078_vm8 = vcmp.eq.f32.partialorder %v2077_v32, 8.507059e+37 }
 0x2ad   :  { %2395 = vrot.lane.b32.xlu2 %v5813_v47, %s9075_s12 }
 0x2ae   :  { %v6754_v1 = vpop.permute.xlu1 %2173 }
 0x2af   :  { %v6756_v16 = vpop.permute.xlu0 %2171  ;;  %v3349_v10 = vpop.eup %3348 }
 0x2b0   :  { %v6758_v0 = vpop.permute.xlu2 %2223  ;;  %v3351_v28 = vpop.eup %3350  ;;  %v2054_v43 = vmul.f32 %v3349_v10, %v2051_v44  ;;  %vm2059_vm3 = vweird.f32 %v3349_v10 }
 0x2b1   :  { %v2069_v53 = vmul.f32 %v3351_v28, %v2052_v6  ;;  %vm2074_vm4 = vweird.f32 %v3351_v28  ;;  %vm2060_vm12 = vmor %vm2058_vm5, %vm2059_vm3  ;;  %vm9102_vm5 = vcmp.lt.s32.totalorder %v4055_v57, 35 }
 0x2b2   :  { %v2055_v24 = vsub.f32 1.0, %v2054_v43  ;;  %vm2075_vm7 = vmor %vm2073_vm13, %vm2074_vm4 }
 0x2b3   :  { %v2070_v23 = vsub.f32 1.0, %v2069_v53  ;;  %v2079_v53 = vand.u32 2147483648, %v2052_v6  ;;  %v9077_v6 = vld [vmem:[#allocation32_spill] sm:$0xff]  ;;  %vm9105_vm4 = vmmov %vm9102_vm5 }
 0x2b4   :  { %2405 = vrot.lane.b32.xlu1 %v5813_v47, %s8636_s18  ;;  %2397 = vrot.lane.b32.xlu0 %v5811_v20, %s9075_s12  ;;  %v2056_v2 = vmul.f32 %v3349_v10, %v2055_v24  ;;  %v2065_v24 = vor.u32 1.1754944e-38, %v2064_v48 }
 0x2b5   :  { %2407 = vrot.lane.b32.xlu2 %v5811_v20, %s8636_s18  ;;  %v2071_v58 = vmul.f32 %v3351_v28, %v2070_v23  ;;  %v2080_v23 = vor.u32 1.1754944e-38, %v2079_v53 }
 0x2b6   :  { %v6766_v31 = vpop.permute.xlu1 %2191  ;;  %v2057_v43 = vadd.f32 %v3349_v10, %v2056_v2 }
 0x2b7   :  { %v6768_v9 = vpop.permute.xlu0 %2183  ;;  %v2072_v40 = vadd.f32 %v3351_v28, %v2071_v58 }
 0x2b8   :  { %v6770_v42 = vpop.permute.xlu2 %2241  ;;  %v2061_v3 = vsel %vm2060_vm12, %v3349_v10, %v2057_v43  ;;  %vm9097_vm12 = vcmp.lt.s32.totalorder %v4055_v57, 45 }
 0x2b9   :  { %v2066_v63 = vsel %vm2063_vm9, %v2065_v24, %v2061_v3  ;;  %v2076_v18 = vsel %vm2075_vm7, %v3351_v28, %v2072_v40  ;;  %v9076_v40 = vld [vmem:[#allocation33_spill] sm:$0xff]  ;;  %vm9087_vm7 = vcmp.lt.s32.totalorder %v4055_v57, 47  ;;  %vm9100_vm3 = vmmov %vm9097_vm12 }
 0x2ba   :  { %v2081_v2 = vsel %vm2078_vm8, %v2080_v23, %v2076_v18  ;;  %v2083_v48 = vperm.slane %v2066_v63, 0  ;;  %v2186_v51 = vsel %vm9087_vm7, %v6768_v9, %v6714_v11  ;;  %vm9090_vm13 = vmmov %vm9087_vm7  ;;  %vm9095_vm8 = vcmp.lt.s32.totalorder %v4055_v57, 46 }
 0x2bb   :  { %v2084_v44 = vperm.slane %v2081_v2, 0  ;;  %vm9096_vm9 = vmmov %vm9095_vm8  ;;  %vm9110_vm7 = vcmp.lt.s32.totalorder %v4055_v57, 34 }
 0x2bc   :  { %2417 = vrot.lane.b32.xlu1 %v5811_v20, %s8655_s19  ;;  %2415 = vrot.lane.b32.xlu0 %v5813_v47, %s8655_s19  ;;  %v2090_v10 = vmul.f32 %v9077_v6, %v2083_v48  ;;  %v2155_v6 = vsel %vm559_vm15, %v6631_v27, %v6744_v45 }
 0x2bd   :  { %2425 = vrot.lane.b32.xlu2 %v5813_v47, %s8657_s5  ;;  %v2091_v32 = vmul.f32 %v9076_v40, %v2084_v44 }
 0x2be   :  { %v6778_v21 = vpop.permute.xlu1 %2203 }
 0x2bf   :  { %v6780_v58 = vpop.permute.xlu0 %2201  ;;  %v2094_v28 = vrot.slane %v2091_v32, 4  ;;  %v2156_v32 = vsel %vm559_vm15, %v6744_v45, %v6631_v27  ;;  %v2166_v27 = vsel %vm575_vm14, %v6682_v50, %v6742_v7  ;;  %v9081_v45 = vld [vmem:[#allocation83_spill] sm:$0xff] }
 0x2c0   :  { %v6782_v3 = vpop.permute.xlu2 %2253  ;;  %v9082_v14 = vperm.slane %v9081_v45, 0 }
 0x2c1   :  { %v2095_v43 = vsel %vm494_vm0, %v2090_v10, %v2094_v28  ;;  %v2146_v10 = vsel %vm543_vm1, %v6730_v55, %v6732_v36  ;;  %v2145_v28 = vsel %vm543_vm1, %v6732_v36, %v6730_v55 }
 0x2c2   :  { %2097 = vst [vmem:[#allocation10] sm:$0xff] %v2095_v43  ;;  %v9078_v43 = vld [vmem:[#allocation82_spill] sm:$0xff]  ;;  %v2147_v55 = vmul.f32 %v2146_v10, %v9082_v14  ;;  %v9084_v10 = vld [vmem:[#allocation81_spill] sm:$0xff] }
 0x2c3   :  { %v9079_v25 = vperm.slane %v9078_v43, 0  ;;  %v9080_v54 = vperm.slane %v9078_v43, 1  ;;  %v9085_v35 = vperm.slane %v9084_v10, 0 }
 0x2c4   :  { %2435 = vrot.lane.b32.xlu1 %v5813_v47, %s8678_s30  ;;  %2427 = vrot.lane.b32.xlu0 %v5811_v20, %s8657_s5 }
 0x2c5   :  { %2437 = vrot.lane.b32.xlu2 %v5811_v20, %s8678_s30  ;;  %v2157_v30 = vmul.f32 %v2156_v32, %v9079_v25  ;;  %v2158_v8 = vmul.f32 %v2155_v6, %v9080_v54  ;;  %v2165_v25 = vsel %vm575_vm14, %v6742_v7, %v6682_v50  ;;  %v9083_v54 = vperm.slane %v9081_v45, 1 }
 0x2c6   :  { %v6793_v18 = vpop.permute.xlu1 %2221  ;;  %v2176_v32 = vsel %vm591_vm2, %v6754_v1, %v6756_v16  ;;  %v2167_v49 = vmul.f32 %v2166_v27, %v9085_v35  ;;  %v2175_v50 = vsel %vm591_vm2, %v6756_v16, %v6754_v1  ;;  %v9086_v45 = vperm.slane %v9084_v10, 1  ;;  %v9092_v27 = vld [vmem:[#allocation92_spill] sm:$0xff] }
 0x2c7   :  { %v6795_v63 = vpop.permute.xlu0 %2213  ;;  %v2148_v36 = vmul.f32 %v2145_v28, %v9083_v54  ;;  %v2159_v14 = vadd.f32 %v2157_v30, %v2147_v55  ;;  %v9088_v30 = vld [vmem:[#allocation90_spill] sm:$0xff]  ;;  %v2185_v35 = vsel %vm9090_vm13, %v6714_v11, %v6768_v9  ;;  %v2206_v11 = vsel %vm9097_vm12, %v6778_v21, %v6780_v58  ;;  %vm9111_vm13 = vmmov %vm9110_vm7 }
 0x2c8   :  { %v6797_v53 = vpop.permute.xlu2 %2271  ;;  %v2168_v54 = vmul.f32 %v2165_v25, %v9086_v45  ;;  %v9089_v55 = vperm.slane %v9088_v30, 0  ;;  %v9091_v1 = vperm.slane %v9088_v30, 1  ;;  %v9094_v45 = vperm.slane %v9092_v27, 1 }
 0x2c9   :  { %v2160_v28 = vadd.f32 %v2158_v8, %v2148_v36  ;;  %v2169_v8 = vadd.f32 %v2167_v49, %v2159_v14  ;;  %v9093_v36 = vperm.slane %v9092_v27, 0  ;;  %vm9118_vm12 = vcmp.lt.s32.totalorder %v4055_v57, 32 }
 0x2ca   :  { %v2177_v26 = vmul.f32 %v2176_v32, %v9089_v55  ;;  %v2178_v16 = vmul.f32 %v2175_v50, %v9091_v1  ;;  %v2188_v46 = vmul.f32 %v2185_v35, %v9094_v45  ;;  %v2196_v32 = vsel %vm9095_vm8, %v6734_v4, %v6766_v31 }
 0x2cb   :  { %v2187_v25 = vmul.f32 %v2186_v51, %v9093_v36  ;;  %v2170_v10 = vadd.f32 %v2168_v54, %v2160_v28  ;;  %v2195_v51 = vsel %vm9096_vm9, %v6766_v31, %v6734_v4  ;;  %v9098_v54 = vld [vmem:[#allocation93_spill] sm:$0xff]  ;;  %v2205_v31 = vsel %vm9100_vm3, %v6780_v58, %v6778_v21  ;;  %vm9121_vm3 = vmmov %vm9118_vm12 }
 0x2cc   :  { %2447 = vrot.lane.b32.xlu1 %v5811_v20, %s8698_s16  ;;  %2445 = vrot.lane.b32.xlu0 %v5813_v47, %s8698_s16  ;;  %v2179_v9 = vadd.f32 %v2177_v26, %v2169_v8  ;;  %v9099_v26 = vperm.slane %v9098_v54, 0  ;;  %v9101_v35 = vperm.slane %v9098_v54, 1  ;;  %v9103_v8 = vld [vmem:[#allocation94_spill] sm:$0xff]  ;;  %vm9113_vm8 = vcmp.lt.s32.totalorder %v4055_v57, 33 }
 0x2cd   :  { %2455 = vrot.lane.b32.xlu2 %v5813_v47, %s8700_s0  ;;  %v2180_v49 = vadd.f32 %v2178_v16, %v2170_v10  ;;  %v2216_v16 = vsel %vm9102_vm5, %v6795_v63, %v6746_v41  ;;  %v9104_v27 = vperm.slane %v9103_v8, 0  ;;  %v9106_v21 = vperm.slane %v9103_v8, 1  ;;  %v9107_v10 = vld [vmem:[#allocation95_spill] sm:$0xff]  ;;  %vm9116_vm9 = vmmov %vm9113_vm8 }
 0x2ce   :  { %v6805_v24 = vpop.permute.xlu1 %2233  ;;  %v2189_v28 = vadd.f32 %v2187_v25, %v2179_v9  ;;  %v2197_v30 = vmul.f32 %v2196_v32, %v9099_v26  ;;  %v2198_v1 = vmul.f32 %v2195_v51, %v9101_v35  ;;  %v2215_v25 = vsel %vm9105_vm4, %v6746_v41, %v6795_v63 }
 0x2cf   :  { %v6807_v23 = vpop.permute.xlu0 %2231  ;;  %v2190_v55 = vadd.f32 %v2188_v46, %v2180_v49  ;;  %v2207_v36 = vmul.f32 %v2206_v11, %v9104_v27  ;;  %v2208_v58 = vmul.f32 %v2205_v31, %v9106_v21  ;;  %v9108_v45 = vperm.slane %v9107_v10, 0 }
 0x2d0   :  { %v6809_v2 = vpop.permute.xlu2 %2283  ;;  %v2199_v46 = vadd.f32 %v2197_v30, %v2189_v28  ;;  %v9109_v51 = vperm.slane %v9107_v10, 1  ;;  %v2226_v11 = vsel %vm9110_vm7, %v6758_v0, %v6793_v18  ;;  %v2225_v63 = vsel %vm9111_vm13, %v6793_v18, %v6758_v0 }
 0x2d1   :  { %v2217_v32 = vmul.f32 %v2216_v16, %v9108_v45  ;;  %v2200_v9 = vadd.f32 %v2198_v1, %v2190_v55  ;;  %v2236_v54 = vsel %vm9113_vm8, %v6805_v24, %v6807_v23  ;;  %v9114_v55 = vld [vmem:[#allocation98_spill] sm:$0xff]  ;;  %v2235_v0 = vsel %vm9116_vm9, %v6807_v23, %v6805_v24  ;;  %v9123_v45 = vld [vmem:[#allocation101_spill] sm:$0xff] }
 0x2d2   :  { %v2218_v49 = vmul.f32 %v2215_v25, %v9109_v51  ;;  %v2209_v41 = vadd.f32 %v2207_v36, %v2199_v46  ;;  %v9115_v35 = vperm.slane %v9114_v55, 0  ;;  %v9117_v8 = vperm.slane %v9114_v55, 1  ;;  %v9119_v25 = vld [vmem:[#allocation100_spill] sm:$0xff] }
 0x2d3   :  { %v2210_v28 = vadd.f32 %v2208_v58, %v2200_v9  ;;  %v9120_v21 = vperm.slane %v9119_v25, 0  ;;  %v9122_v24 = vperm.slane %v9119_v25, 1  ;;  %vm9126_vm5 = vcmp.lt.s32.totalorder %v4055_v57, 31  ;;  %v9134_v25 = vld [vmem:[#allocation105_spill] sm:$0xff] }
 0x2d4   :  { %2465 = vrot.lane.b32.xlu1 %v5813_v47, %s8717_s27  ;;  %2457 = vrot.lane.b32.xlu0 %v5811_v20, %s8700_s0  ;;  %v2219_v31 = vadd.f32 %v2217_v32, %v2209_v41  ;;  %v2227_v1 = vmul.f32 %v2226_v11, %v9115_v35  ;;  %v2228_v27 = vmul.f32 %v2225_v63, %v9117_v8  ;;  %v9124_v32 = vperm.slane %v9123_v45, 0  ;;  %vm9127_vm4 = vmmov %vm9126_vm5  ;;  %v9129_v35 = vld [vmem:[#allocation104_spill] sm:$0xff] }
 0x2d5   :  { %2467 = vrot.lane.b32.xlu2 %v5811_v20, %s8717_s27  ;;  %v2220_v16 = vadd.f32 %v2218_v49, %v2210_v28  ;;  %v2237_v58 = vmul.f32 %v2236_v54, %v9120_v21  ;;  %v2238_v23 = vmul.f32 %v2235_v0, %v9122_v24  ;;  %v9125_v49 = vperm.slane %v9123_v45, 1 }
 0x2d6   :  { %v6817_v48 = vpop.permute.xlu1 %2251  ;;  %v2229_v10 = vadd.f32 %v2227_v1, %v2219_v31  ;;  %vm9128_vm7 = vcmp.lt.s32.totalorder %v4055_v57, 30  ;;  %v9130_v1 = vperm.slane %v9129_v35, 0  ;;  %v9132_v8 = vperm.slane %v9129_v35, 1 }
 0x2d7   :  { %v6819_v44 = vpop.permute.xlu0 %2243  ;;  %v2230_v51 = vadd.f32 %v2228_v27, %v2220_v16  ;;  %v2256_v41 = vsel %vm9126_vm5, %v6782_v3, %v6817_v48  ;;  %vm9131_vm13 = vmmov %vm9128_vm7  ;;  %vm9133_vm8 = vcmp.lt.s32.totalorder %v4055_v57, 29  ;;  %v9135_v21 = vperm.slane %v9134_v25, 0 }
 0x2d8   :  { %v6821_v40 = vpop.permute.xlu2 %2301  ;;  %v2246_v36 = vsel %vm9118_vm12, %v6819_v44, %v6770_v42  ;;  %v2245_v46 = vsel %vm9121_vm3, %v6770_v42, %v6819_v44  ;;  %v2239_v42 = vadd.f32 %v2237_v58, %v2229_v10  ;;  %v2255_v44 = vsel %vm9127_vm4, %v6817_v48, %v6782_v3  ;;  %vm9136_vm9 = vmmov %vm9133_vm8 }
 0x2d9   :  { %v2247_v9 = vmul.f32 %v2246_v36, %v9124_v32  ;;  %v2248_v11 = vmul.f32 %v2245_v46, %v9125_v49  ;;  %v2240_v63 = vadd.f32 %v2238_v23, %v2230_v51  ;;  %v2257_v0 = vmul.f32 %v2256_v41, %v9130_v1  ;;  %v9138_v23 = vld [vmem:[#allocation108_spill] sm:$0xff]  ;;  %v2121_v41 = vld.sshfl [vmem:[#allocation1] sm:$0xff pattern:$0x75316420] }
 0x2da   :  { %v2258_v27 = vmul.f32 %v2255_v44, %v9132_v8  ;;  %v9137_v24 = vperm.slane %v9134_v25, 1  ;;  %v9139_v10 = vperm.slane %v9138_v23, 0  ;;  %vm9141_vm12 = vcmp.lt.s32.totalorder %v4055_v57, 19  ;;  %v9145_v1 = vld [vmem:[#allocation109_spill] sm:$0xff]  ;;  %v9150_v25 = vld [vmem:[#allocation112_spill] sm:$0xff] }
 0x2db   :  { %v2249_v55 = vadd.f32 %v2247_v9, %v2239_v42  ;;  %v2250_v16 = vadd.f32 %v2248_v11, %v2240_v63  ;;  %v9140_v9 = vperm.slane %v9138_v23, 1  ;;  %vm9142_vm3 = vmmov %vm9141_vm12  ;;  %v2122_v11 = vld.sshfl [vmem:[#allocation1 + $0x8] sm:$0xff pattern:$0x75316420]  ;;  %vm9143_vm5 = vcmp.lt.s32.totalorder %v4055_v57, 18 }
 0x2dc   :  { %2477 = vrot.lane.b32.xlu1 %v5811_v20, %s8738_s17  ;;  %2475 = vrot.lane.b32.xlu0 %v5813_v47, %s8738_s17  ;;  %vm9147_vm4 = vmmov %vm9143_vm5  ;;  %v9148_v8 = vperm.slane %v9145_v1, 1 }
 0x2dd   :  { %2485 = vrot.lane.b32.xlu2 %v5813_v47, %s8740_s1  ;;  %v2260_v32 = vadd.f32 %v2258_v27, %v2250_v16 }
 0x2de   :  { %v6865_v6 = vpop.permute.xlu1 %2263 }
 0x2df   :  { %v6867_v43 = vpop.permute.xlu0 %2261 }
 0x2e0   :  { %v6875_v7 = vpop.permute.xlu2 %2313  ;;  %v2266_v28 = vsel %vm9128_vm7, %v6865_v6, %v6867_v43  ;;  %v2265_v3 = vsel %vm9131_vm13, %v6867_v43, %v6865_v6  ;;  %v2259_v43 = vadd.f32 %v2257_v0, %v2249_v55  ;;  %v9144_v55 = vld [vmem:[#allocation34_spill] sm:$0xff]  ;;  %v9146_v0 = vperm.slane %v9145_v1, 0 }
 0x2e1   :  { %v2267_v58 = vmul.f32 %v2266_v28, %v9135_v21  ;;  %v2268_v6 = vmul.f32 %v2265_v3, %v9137_v24  ;;  %3149 = vst [vmem:[#allocation1] ss:$2 sm:$0xff] %v9144_v55  ;;  %vm9149_vm7 = vcmp.lt.s32.totalorder %v4055_v57, 17  ;;  %v9151_v21 = vperm.slane %v9150_v25, 0 }
 0x2e2   :  { %vm9152_vm13 = vmmov %vm9149_vm7  ;;  %v9153_v24 = vperm.slane %v9150_v25, 1 }
 0x2e3   :  { %v2270_v42 = vadd.f32 %v2268_v6, %v2260_v32  ;;  %v9154_v6 = vld [vmem:[#allocation113_spill] sm:$0xff] }
 0x2e4   :  { %2495 = vrot.lane.b32.xlu1 %v5813_v47, %s8756_s29  ;;  %2487 = vrot.lane.b32.xlu0 %v5811_v20, %s8740_s1 }
 0x2e5   :  { %2497 = vrot.lane.b32.xlu2 %v5811_v20, %s8756_s29  ;;  %s9112_s29 = smov 96  }
 0x2e6   :  { %v6913_v14 = vpop.permute.xlu1 %2281 }
 0x2e7   :  { %v2274_v50 = vpop.permute.xlu0 %2273  ;;  %v2286_v49 = vsel %vm9141_vm12, %v6809_v2, %v6913_v14  ;;  %vm9161_vm12 = vcmp.lt.s32.totalorder %v4055_v57, 15 }
 0x2e8   :  { %v6921_v4 = vpop.permute.xlu2 %2331  ;;  %v2276_v36 = vsel %vm9133_vm8, %v2274_v50, %v6797_v53  ;;  %v2275_v46 = vsel %vm9136_vm9, %v6797_v53, %v2274_v50  ;;  %v2269_v53 = vadd.f32 %v2267_v58, %v2259_v43  ;;  %v2285_v50 = vsel %vm9142_vm3, %v6913_v14, %v6809_v2  ;;  %vm9162_vm3 = vmmov %vm9161_vm12 }
 0x2e9   :  { %v2277_v45 = vmul.f32 %v2276_v36, %v9139_v10  ;;  %v2278_v51 = vmul.f32 %v2275_v46, %v9140_v9  ;;  %v2287_v3 = vmul.f32 %v2286_v49, %v9146_v0  ;;  %v2288_v27 = vmul.f32 %v2285_v50, %v9148_v8  ;;  %v9166_v8 = vld [vmem:[#allocation121_spill] sm:$0xff] }
 0x2ea   :  { %v9155_v43 = vperm.slane %v9154_v6, 0  ;;  %vm9157_vm8 = vcmp.lt.s32.totalorder %v4055_v57, 16  ;;  %v9168_v25 = vperm.slane %v9166_v8, 1 }
 0x2eb   :  { %v2279_v35 = vadd.f32 %v2277_v45, %v2269_v53  ;;  %v2280_v16 = vadd.f32 %v2278_v51, %v2270_v42  ;;  %v9156_v45 = vperm.slane %v9154_v6, 1  ;;  %vm9158_vm9 = vmmov %vm9157_vm8  ;;  %v9159_v42 = vld [vmem:[#allocation116_spill] sm:$0xff] }
 0x2ec   :  { %2507 = vrot.lane.b32.xlu1 %v5811_v20, %s8776_s24  ;;  %2505 = vrot.lane.b32.xlu0 %v5813_v47, %s8776_s24 }
 0x2ed   :  { %2515 = vrot.lane.b32.xlu2 %v5813_v47, %s9112_s29  ;;  %v2290_v10 = vadd.f32 %v2288_v27, %v2280_v16  ;;  %v9167_v27 = vperm.slane %v9166_v8, 0 }
 0x2ee   :  { %v2294_v26 = vpop.permute.xlu1 %2293 }
 0x2ef   :  { %v2292_v30 = vpop.permute.xlu0 %2291 }
 0x2f0   :  { %v6965_v18 = vpop.permute.xlu2 %2343  ;;  %v2296_v44 = vsel %vm9143_vm5, %v2294_v26, %v2292_v30  ;;  %v2295_v2 = vsel %vm9147_vm4, %v2292_v30, %v2294_v26  ;;  %v2289_v30 = vadd.f32 %v2287_v3, %v2279_v35  ;;  %vm9164_vm5 = vcmp.lt.s32.totalorder %v4055_v57, 14 }
 0x2f1   :  { %v2297_v58 = vmul.f32 %v2296_v44, %v9151_v21  ;;  %v2298_v26 = vmul.f32 %v2295_v2, %v9153_v24  ;;  %v9160_v44 = vperm.slane %v9159_v42, 0  ;;  %vm9165_vm4 = vmmov %vm9164_vm5  ;;  %v2132_v21 = vsel %vm494_vm0, %v2122_v11, 0.0  ;;  %v9169_v24 = vld [vmem:[#allocation122_spill] sm:$0xff] }
 0x2f2   :  { %v9171_v6 = vperm.slane %v9169_v24, 1 }
 0x2f3   :  { %v2300_v51 = vadd.f32 %v2298_v26, %v2290_v10  ;;  %v9170_v26 = vperm.slane %v9169_v24, 0 }
 0x2f4   :  { %2525 = vrot.lane.b32.xlu1 %v5813_v47, %s8795_s23  ;;  %2517 = vrot.lane.b32.xlu0 %v5811_v20, %s9112_s29 }
 0x2f5   :  { %2527 = vrot.lane.b32.xlu2 %v5811_v20, %s8795_s23 }
 0x2f6   :  { %v2312_v54 = vpop.permute.xlu1 %2311 }
 0x2f7   :  { %v2304_v31 = vpop.permute.xlu0 %2303  ;;  %v2316_v9 = vsel %vm9157_vm8, %v6875_v7, %v2312_v54  ;;  %vm9174_vm8 = vcmp.lt.s32.totalorder %v4055_v57, 3 }
 0x2f8   :  { %v7009_v48 = vpop.permute.xlu2 %2361  ;;  %v2306_v36 = vsel %vm9149_vm7, %v2304_v31, %v6821_v40  ;;  %v2305_v46 = vsel %vm9152_vm13, %v6821_v40, %v2304_v31  ;;  %v2299_v40 = vadd.f32 %v2297_v58, %v2289_v30  ;;  %v2315_v31 = vsel %vm9158_vm9, %v2312_v54, %v6875_v7  ;;  %vm9175_vm9 = vmmov %vm9174_vm8 }
 0x2f9   :  { %v2307_v23 = vmul.f32 %v2306_v36, %v9155_v43  ;;  %v2308_v32 = vmul.f32 %v2305_v46, %v9156_v45  ;;  %v2317_v55 = vmul.f32 %v2316_v9, %v9160_v44  ;;  %v9163_v7 = vperm.slane %v9159_v42, 1 }
 0x2fa   :  { %v2125_v58 = vsel %vm494_vm0, %v2121_v41, 0.0  ;;  %vm9172_vm7 = vcmp.lt.s32.totalorder %v4055_v57, 13 }
 0x2fb   :  { %v2309_v50 = vadd.f32 %v2307_v23, %v2299_v40  ;;  %v2310_v3 = vadd.f32 %v2308_v32, %v2300_v51  ;;  %v2318_v54 = vmul.f32 %v2315_v31, %v9163_v7  ;;  %vm9173_vm13 = vmmov %vm9172_vm7  ;;  %v2133_v32 = vrot.slane %v2132_v21, 4 }
 0x2fc   :  { %2537 = vrot.lane.b32.xlu1 %v5811_v20, %s8811_s15  ;;  %2535 = vrot.lane.b32.xlu0 %v5813_v47, %s8811_s15  ;;  %v2126_v9 = vrot.slane %v2125_v58, 4 }
 0x2fd   :  { %2545 = vrot.lane.b32.xlu2 %v5813_v47, %s8813_s20  ;;  %v2320_v46 = vadd.f32 %v2318_v54, %v2310_v3 }
 0x2fe   :  { %v2324_v63 = vpop.permute.xlu1 %2323 }
 0x2ff   :  { %v2322_v28 = vpop.permute.xlu0 %2321 }
 0x300   :  { %v7048_v14 = vpop.permute.xlu2 %2373  ;;  %v2325_v35 = vsel %vm9161_vm12, %v2322_v28, %v2324_v63  ;;  %v2326_v1 = vsel %vm9162_vm3, %v2324_v63, %v2322_v28  ;;  %v2319_v28 = vadd.f32 %v2317_v55, %v2309_v50  ;;  %vm9182_vm12 = vcmp.lt.s32.totalorder %v4055_v57, 2 }
 0x301   :  { %v2327_v36 = vmul.f32 %v2326_v1, %v9167_v27  ;;  %v2328_v63 = vmul.f32 %v2325_v35, %v9168_v25  ;;  %v9179_v35 = vld [vmem:[#allocation20_spill] sm:$0xff]  ;;  %vm9183_vm3 = vmmov %vm9182_vm12 }
 0x302   :  { %v9180_v1 = vperm.slane %v9179_v35, 0  ;;  %v9181_v7 = vperm.slane %v9179_v35, 1 }
 0x303   :  { %v2329_v41 = vadd.f32 %v2327_v36, %v2319_v28  ;;  %v2330_v23 = vadd.f32 %v2328_v63, %v2320_v46 }
 0x304   :  { %2555 = vrot.lane.b32.xlu1 %v5813_v47, %s8829_s28  ;;  %2547 = vrot.lane.b32.xlu0 %v5811_v20, %s8813_s20 }
 0x305   :  { %2557 = vrot.lane.b32.xlu2 %v5811_v20, %s8829_s28 }
 0x306   :  { %v2342_v49 = vpop.permute.xlu1 %2341 }
 0x307   :  { %v2334_v53 = vpop.permute.xlu0 %2333  ;;  %v2346_v11 = vsel %vm9173_vm13, %v6965_v18, %v2342_v49 }
 0x308   :  { %v7084_v0 = vpop.permute.xlu2 %2395  ;;  %v2335_v2 = vsel %vm9164_vm5, %v6921_v4, %v2334_v53  ;;  %v2336_v16 = vsel %vm9165_vm4, %v2334_v53, %v6921_v4  ;;  %v2345_v4 = vsel %vm9172_vm7, %v2342_v49, %v6965_v18  ;;  %v9176_v18 = vld [vmem:[#allocation123_spill] sm:$0xff]  ;;  %vm9184_vm5 = vcmp.lt.s32.totalorder %v4055_v57, 1 }
 0x309   :  { %v2337_v30 = vmul.f32 %v2336_v16, %v9170_v26  ;;  %v2338_v43 = vmul.f32 %v2335_v2, %v9171_v6  ;;  %v9177_v49 = vperm.slane %v9176_v18, 0  ;;  %v9178_v44 = vperm.slane %v9176_v18, 1  ;;  %vm9185_vm4 = vmmov %vm9184_vm5  ;;  %v9192_v18 = vld [vmem:[#allocation26_spill] sm:$0xff] }
 0x30a   :  { %v2134_v2 = vadd.f32 %v2133_v32, %v2132_v21  ;;  %v2127_v16 = vadd.f32 %v2126_v9, %v2125_v58  ;;  %vm9197_vm7 = vcmp.lt.s32.totalorder %v4055_v57, 127 }
 0x30b   :  { %v2339_v53 = vadd.f32 %v2337_v30, %v2329_v41  ;;  %v2340_v50 = vadd.f32 %v2338_v43, %v2330_v23  ;;  %v2347_v42 = vmul.f32 %v2346_v11, %v9177_v49  ;;  %v2348_v55 = vmul.f32 %v2345_v4, %v9178_v44  ;;  %v9186_v43 = vld [vmem:[#allocation23_spill] sm:$0xff]  ;;  %vm9198_vm13 = vmmov %vm9197_vm7 }
 0x30c   :  { %2567 = vrot.lane.b32.xlu1 %v5811_v20, %s8844_s22  ;;  %2565 = vrot.lane.b32.xlu0 %v5813_v47, %s8844_s22  ;;  %v2135_v46 = vrot.slane %v2134_v2, 2  ;;  %v2128_v24 = vrot.slane %v2127_v16, 2  ;;  %v9187_v4 = vperm.slane %v9186_v43, 0  ;;  %v9188_v41 = vperm.slane %v9186_v43, 1 }
 0x30d   :  { %2575 = vrot.lane.b32.xlu2 %v5813_v47, %s8846_s6  ;;  %v2349_v8 = vadd.f32 %v2347_v42, %v2339_v53  ;;  %v2350_v27 = vadd.f32 %v2348_v55, %v2340_v50  ;;  %v9194_v55 = vperm.slane %v9192_v18, 1 }
 0x30e   :  { %v2354_v10 = vpop.permute.xlu1 %2353  ;;  %v2136_v53 = vadd.f32 %v2135_v46, %v2134_v2  ;;  %v2129_v50 = vadd.f32 %v2128_v24, %v2127_v16 }
 0x30f   :  { %v2352_v45 = vpop.permute.xlu0 %2351  ;;  %v2382_v35 = vmul.f32 %v5811_v20, %v9194_v55 }
 0x310   :  { %v2355_v40 = vsel %vm9174_vm8, %v2352_v45, %v2354_v10  ;;  %v2356_v31 = vsel %vm9175_vm9, %v2354_v10, %v2352_v45  ;;  %v7120_v51 = vpop.permute.xlu2 %2407  ;;  %v9189_v10 = vld [vmem:[#allocation27_spill] sm:$0xff]  ;;  %vm9204_vm8 = vcmp.lt.s32.totalorder %v4055_v57, 126 }
 0x311   :  { %v2357_v3 = vmul.f32 %v2356_v31, %v9180_v1  ;;  %v2358_v54 = vmul.f32 %v2355_v40, %v9181_v7  ;;  %v9190_v45 = vperm.slane %v9189_v10, 0  ;;  %v2137_v7 = vrot.slane %v2136_v53, 1  ;;  %vm9205_vm9 = vmmov %vm9204_vm8 }
 0x313   :  { %v2359_v36 = vadd.f32 %v2357_v3, %v2349_v8  ;;  %v2360_v25 = vadd.f32 %v2358_v54, %v2350_v27  ;;  %v2130_v54 = vrot.slane %v2129_v50, 1 }
 0x314   :  { %2585 = vrot.lane.b32.xlu1 %v5813_v47, %s8852_s14  ;;  %2577 = vrot.lane.b32.xlu0 %v5811_v20, %s8846_s6  ;;  %s9196_s6 = smov 78  }
 0x315   :  { %2587 = vrot.lane.b32.xlu2 %v5811_v20, %s8852_s14  ;;  %s9195_s14 = smov 79  }
 0x316   :  { %v2372_v63 = vpop.permute.xlu1 %2371 }
 0x317   :  { %v2364_v28 = vpop.permute.xlu0 %2363  ;;  %v2375_v26 = vsel %vm9184_vm5, %v2372_v63, %v7048_v14  ;;  %v2376_v30 = vsel %vm9185_vm4, %v7048_v14, %v2372_v63  ;;  %v9193_v14 = vperm.slane %v9192_v18, 0  ;;  %vm9216_vm5 = vcmp.lt.s32.totalorder %v4055_v57, 115 }
 0x318   :  { %v2365_v21 = vsel %vm9182_vm12, %v7009_v48, %v2364_v28  ;;  %v2366_v58 = vsel %vm9183_vm3, %v2364_v28, %v7009_v48  ;;  %v7148_v6 = vpop.permute.xlu2 %2425  ;;  %v2377_v32 = vmul.f32 %v2376_v30, %v9190_v45  ;;  %v9191_v48 = vperm.slane %v9189_v10, 1  ;;  %vm9217_vm4 = vmmov %vm9216_vm5 }
 0x319   :  { %v2367_v11 = vmul.f32 %v2366_v58, %v9187_v4  ;;  %v2368_v23 = vmul.f32 %v2365_v21, %v9188_v41  ;;  %v2381_v49 = vmul.f32 %v5813_v47, %v9193_v14  ;;  %v2131_v30 = vadd.f32 %v2130_v54, %v2129_v50  ;;  %v9211_v50 = vld [vmem:[#allocation38_spill] sm:$0xff] }
 0x31a   :  { %v2378_v9 = vmul.f32 %v2375_v26, %v9191_v48  ;;  %v2138_v26 = vadd.f32 %v2137_v7, %v2136_v53  ;;  %vm9206_vm12 = vcmp.lt.s32.totalorder %v4055_v57, 125  ;;  %v9208_v48 = vld [vmem:[#allocation25_spill] sm:$0xff]  ;;  %v9212_v18 = vperm.slane %v9211_v50, 0 }
 0x31b   :  { %v2369_v40 = vadd.f32 %v2367_v11, %v2359_v36  ;;  %v2370_v31 = vadd.f32 %v2368_v23, %v2360_v25  ;;  %v9199_v25 = vld [vmem:[#allocation30_spill] sm:$0xff]  ;;  %v9203_v11 = vld [vmem:[#allocation44_spill] sm:$0xff]  ;;  %vm9207_vm3 = vmmov %vm9206_vm12 }
 0x31c   :  { %2597 = vrot.lane.b32.xlu1 %v5811_v20, %s9195_s14  ;;  %2595 = vrot.lane.b32.xlu0 %v5813_v47, %s9195_s14  ;;  %v9200_v63 = vperm.slane %v9199_v25, 0  ;;  %v9201_v46 = vperm.slane %v9199_v25, 1  ;;  %s9202_s14 = smov 77   ;;  %v7185_v41 = vmul.f32 %v2138_v26, %v9203_v11  ;;  %v7188_v23 = vmul.f32 %v2131_v30, %v9203_v11 }
 0x31d   :  { %v2379_v42 = vadd.f32 %v2377_v32, %v2369_v40  ;;  %v2380_v44 = vadd.f32 %v2378_v9, %v2370_v31  ;;  %2605 = vrot.lane.b32.xlu2 %v5813_v47, %s9196_s6  ;;  %v9209_v9 = vperm.slane %v9208_v48, 0  ;;  %v9210_v31 = vperm.slane %v9208_v48, 1 }
 0x31e   :  { %v2388_v1 = vpop.permute.xlu1 %2387 }
 0x31f   :  { %v2386_v3 = vpop.permute.xlu0 %2385  ;;  %v2383_v27 = vadd.f32 %v2381_v49, %v2379_v42  ;;  %v2384_v36 = vadd.f32 %v2382_v35, %v2380_v44 }
 0x320   :  { %v2389_v2 = vsel %vm9197_vm7, %v2386_v3, %v2388_v1  ;;  %v2390_v16 = vsel %vm9198_vm13, %v2388_v1, %v2386_v3  ;;  %v2438_v8 = vpop.permute.xlu2 %2437  ;;  %vm9222_vm7 = vcmp.lt.s32.totalorder %v4055_v57, 114 }
 0x321   :  { %v2391_v28 = vmul.f32 %v2389_v2, %v9200_v63  ;;  %v2392_v24 = vmul.f32 %v2390_v16, %v9201_v46  ;;  %v9218_v2 = vld [vmem:[#allocation15_spill] sm:$0xff]  ;;  %vm9223_vm13 = vmmov %vm9222_vm7 }
 0x322   :  { %v9219_v16 = vperm.slane %v9218_v2, 0 }
 0x323   :  { %v2393_v21 = vadd.f32 %v2391_v28, %v2383_v27  ;;  %v2394_v58 = vadd.f32 %v2392_v24, %v2384_v36  ;;  %v9220_v36 = vperm.slane %v9218_v2, 1 }
 0x324   :  { %2615 = vrot.lane.b32.xlu1 %v5813_v47, %s9202_s14  ;;  %2607 = vrot.lane.b32.xlu0 %v5811_v20, %s9196_s6  ;;  %s9215_s6 = smov 50  }
 0x325   :  { %2617 = vrot.lane.b32.xlu2 %v5811_v20, %s9202_s14  ;;  %s9214_s14 = smov 51  }
 0x326   :  { %v2406_v43 = vpop.permute.xlu1 %2405 }
 0x327   :  { %v2398_v4 = vpop.permute.xlu0 %2397  ;;  %v2409_v20 = vsel %vm9206_vm12, %v2406_v43, %v7120_v51  ;;  %v2410_v45 = vsel %vm9207_vm3, %v7120_v51, %v2406_v43  ;;  %vm9234_vm12 = vcmp.lt.s32.totalorder %v4055_v57, 112 }
 0x328   :  { %v2399_v10 = vsel %vm9204_vm8, %v7084_v0, %v2398_v4  ;;  %v2400_v47 = vsel %vm9205_vm9, %v2398_v4, %v7084_v0  ;;  %v2456_v32 = vpop.permute.xlu2 %2455  ;;  %v2411_v14 = vmul.f32 %v2409_v20, %v9212_v18  ;;  %v9213_v0 = vperm.slane %v9211_v50, 1  ;;  %v9226_v4 = vld [vmem:[#allocation42_spill] sm:$0xff]  ;;  %vm9235_vm3 = vmmov %vm9234_vm12 }
 0x329   :  { %v2401_v40 = vmul.f32 %v2399_v10, %v9209_v9  ;;  %v2402_v53 = vmul.f32 %v2400_v47, %v9210_v31  ;;  %vm9224_vm8 = vcmp.lt.s32.totalorder %v4055_v57, 113  ;;  %v9227_v11 = vperm.slane %v9226_v4, 0 }
 0x32a   :  { %v2412_v49 = vmul.f32 %v2410_v45, %v9213_v0  ;;  %vm9225_vm9 = vmmov %vm9224_vm8  ;;  %v9228_v47 = vperm.slane %v9226_v4, 1  ;;  %v9229_v45 = vld [vmem:[#allocation46_spill] sm:$0xff] }
 0x32b   :  { %v2403_v42 = vadd.f32 %v2401_v40, %v2393_v21  ;;  %v2404_v44 = vadd.f32 %v2402_v53, %v2394_v58  ;;  %v9230_v48 = vperm.slane %v9229_v45, 0  ;;  %v9231_v40 = vperm.slane %v9229_v45, 1 }
 0x32c   :  { %2627 = vrot.lane.b32.xlu1 %v7185_v41, %s9214_s14  ;;  %2625 = vrot.lane.b32.xlu0 %v7188_v23, %s9214_s14  ;;  %s9221_s14 = smov 49  }
 0x32d   :  { %v2413_v55 = vadd.f32 %v2411_v14, %v2403_v42  ;;  %v2414_v35 = vadd.f32 %v2412_v49, %v2404_v44  ;;  %2635 = vrot.lane.b32.xlu2 %v7188_v23, %s9215_s6  ;;  %v9236_v44 = vld [vmem:[#allocation128_spill] sm:$0xff] }
 0x32e   :  { %v2418_v51 = vpop.permute.xlu1 %2417 }
 0x32f   :  { %v2416_v1 = vpop.permute.xlu0 %2415 }
 0x330   :  { %v2419_v3 = vsel %vm9216_vm5, %v2416_v1, %v2418_v51  ;;  %v2420_v7 = vsel %vm9217_vm4, %v2418_v51, %v2416_v1  ;;  %v2468_v54 = vpop.permute.xlu2 %2467  ;;  %v9238_v51 = vperm.slane %v9236_v44, 1  ;;  %vm9239_vm5 = vcmp.lt.s32.totalorder %v4055_v57, 111 }
 0x331   :  { %v2421_v27 = vmul.f32 %v2419_v3, %v9219_v16  ;;  %v2422_v25 = vmul.f32 %v2420_v7, %v9220_v36  ;;  %vm9240_vm4 = vmmov %vm9239_vm5 }
 0x333   :  { %v2423_v63 = vadd.f32 %v2421_v27, %v2413_v55  ;;  %v2424_v28 = vadd.f32 %v2422_v25, %v2414_v35  ;;  %v9237_v55 = vperm.slane %v9236_v44, 0 }
 0x334   :  { %2645 = vrot.lane.b32.xlu1 %v7188_v23, %s9221_s14  ;;  %2637 = vrot.lane.b32.xlu0 %v7185_v41, %s9215_s6  ;;  %s9232_s6 = smov 48  }
 0x335   :  { %2647 = vrot.lane.b32.xlu2 %v7185_v41, %s9221_s14  ;;  %s9233_s14 = smov 47  }
 0x336   :  { %v2436_v46 = vpop.permute.xlu1 %2435 }
 0x337   :  { %v2428_v24 = vpop.permute.xlu0 %2427  ;;  %v2439_v26 = vsel %vm9224_vm8, %v2436_v46, %v2438_v8  ;;  %v2440_v30 = vsel %vm9225_vm9, %v2438_v8, %v2436_v46  ;;  %v9243_v46 = vld [vmem:[#allocation37_spill] sm:$0xff]  ;;  %vm9258_vm8 = vcmp.lt.s32.totalorder %v4055_v57, 97 }
 0x338   :  { %v2429_v21 = vsel %vm9222_vm7, %v7148_v6, %v2428_v24  ;;  %v2430_v58 = vsel %vm9223_vm13, %v2428_v24, %v7148_v6  ;;  %v2486_v43 = vpop.permute.xlu2 %2485  ;;  %v2441_v9 = vmul.f32 %v2439_v26, %v9230_v48  ;;  %v2442_v31 = vmul.f32 %v2440_v30, %v9231_v40  ;;  %v9246_v30 = vld [vmem:[#allocation129_spill] sm:$0xff]  ;;  %vm9259_vm9 = vmmov %vm9258_vm8 }
 0x339   :  { %v2431_v10 = vmul.f32 %v2429_v21, %v9227_v11  ;;  %v2432_v20 = vmul.f32 %v2430_v58, %v9228_v47  ;;  %vm9241_vm7 = vcmp.lt.s32.totalorder %v4055_v57, 110  ;;  %v9244_v24 = vperm.slane %v9243_v46, 0 }
 0x33a   :  { %vm9242_vm13 = vmmov %vm9241_vm7  ;;  %v9245_v58 = vperm.slane %v9243_v46, 1  ;;  %v9247_v4 = vperm.slane %v9246_v30, 0 }
 0x33b   :  { %v2433_v6 = vadd.f32 %v2431_v10, %v2423_v63  ;;  %v2434_v53 = vadd.f32 %v2432_v20, %v2424_v28  ;;  %v9248_v10 = vperm.slane %v9246_v30, 1 }
 0x33c   :  { %2657 = vrot.lane.b32.xlu1 %v7185_v41, %s9232_s6  ;;  %2655 = vrot.lane.b32.xlu0 %v7188_v23, %s9232_s6 }
 0x33d   :  { %v2443_v50 = vadd.f32 %v2441_v9, %v2433_v6  ;;  %v2444_v18 = vadd.f32 %v2442_v31, %v2434_v53  ;;  %2665 = vrot.lane.b32.xlu2 %v7188_v23, %s9233_s14  ;;  %v9249_v53 = vld [vmem:[#allocation43_spill] sm:$0xff] }
 0x33e   :  { %v2448_v8 = vpop.permute.xlu1 %2447 }
 0x33f   :  { %v2446_v14 = vpop.permute.xlu0 %2445 }
 0x340   :  { %v2449_v0 = vsel %vm9234_vm12, %v2446_v14, %v2448_v8  ;;  %v2450_v49 = vsel %vm9235_vm3, %v2448_v8, %v2446_v14  ;;  %v2498_v42 = vpop.permute.xlu2 %2497  ;;  %v9251_v8 = vperm.slane %v9249_v53, 1  ;;  %vm9263_vm12 = vcmp.lt.s32.totalorder %v4055_v57, 96 }
 0x341   :  { %v2451_v35 = vmul.f32 %v2449_v0, %v9237_v55  ;;  %v2452_v1 = vmul.f32 %v2450_v49, %v9238_v51  ;;  %vm9264_vm3 = vmmov %vm9263_vm12 }
 0x343   :  { %v2453_v3 = vadd.f32 %v2451_v35, %v2443_v50  ;;  %v2454_v7 = vadd.f32 %v2452_v1, %v2444_v18  ;;  %v9250_v50 = vperm.slane %v9249_v53, 0 }
 0x344   :  { %2675 = vrot.lane.b32.xlu1 %v7188_v23, %s8944_s13  ;;  %2667 = vrot.lane.b32.xlu0 %v7185_v41, %s9233_s14 }
 0x345   :  { %2677 = vrot.lane.b32.xlu2 %v7185_v41, %s8944_s13  ;;  %s9323_s13 = smov 3  }
 0x346   :  { %v2466_v2 = vpop.permute.xlu1 %2465 }
 0x347   :  { %v2458_v16 = vpop.permute.xlu0 %2457  ;;  %v2469_v25 = vsel %vm9241_vm7, %v2466_v2, %v2468_v54  ;;  %v2470_v63 = vsel %vm9242_vm13, %v2468_v54, %v2466_v2  ;;  %v9252_v2 = vld [vmem:[#allocation51_spill] sm:$0xff]  ;;  %vm9274_vm7 = vcmp.lt.s32.totalorder %v4055_v57, 94 }
 0x348   :  { %v2459_v27 = vsel %vm9239_vm5, %v2456_v32, %v2458_v16  ;;  %v2460_v36 = vsel %vm9240_vm4, %v2458_v16, %v2456_v32  ;;  %v2516_v28 = vpop.permute.xlu2 %2515  ;;  %v2471_v11 = vmul.f32 %v2469_v25, %v9247_v4  ;;  %v2472_v47 = vmul.f32 %v2470_v63, %v9248_v10  ;;  %v9255_v63 = vld [vmem:[#allocation132_spill] sm:$0xff]  ;;  %vm9275_vm13 = vmmov %vm9274_vm7 }
 0x349   :  { %v2461_v21 = vmul.f32 %v2459_v27, %v9244_v24  ;;  %v2462_v26 = vmul.f32 %v2460_v36, %v9245_v58  ;;  %v9253_v16 = vperm.slane %v9252_v2, 0  ;;  %v9254_v36 = vperm.slane %v9252_v2, 1 }
 0x34a   :  { %v9256_v46 = vperm.slane %v9255_v63, 0  ;;  %vm9265_vm5 = vcmp.lt.s32.totalorder %v4055_v57, 95 }
 0x34b   :  { %v2463_v32 = vadd.f32 %v2461_v21, %v2453_v3  ;;  %v2464_v20 = vadd.f32 %v2462_v26, %v2454_v7  ;;  %v9257_v21 = vperm.slane %v9255_v63, 1  ;;  %vm9266_vm4 = vmmov %vm9265_vm5 }
 0x34c   :  { %2687 = vrot.lane.b32.xlu1 %v7185_v41, %s8963_s10  ;;  %2685 = vrot.lane.b32.xlu0 %v7188_v23, %s8963_s10  ;;  %s9312_s10 = smov 13  }
 0x34d   :  { %v2473_v45 = vadd.f32 %v2471_v11, %v2463_v32  ;;  %v2474_v48 = vadd.f32 %v2472_v47, %v2464_v20  ;;  %2695 = vrot.lane.b32.xlu2 %v7188_v23, %s8967_s9  ;;  %v9260_v20 = vld [vmem:[#allocation55_spill] sm:$0xff] }
 0x34e   :  { %v2478_v54 = vpop.permute.xlu1 %2477 }
 0x34f   :  { %v2476_v9 = vpop.permute.xlu0 %2475 }
 0x350   :  { %v2479_v40 = vsel %vm1080_vm11, %v2476_v9, %v2478_v54  ;;  %v2480_v31 = vsel %vm1080_vm11, %v2478_v54, %v2476_v9  ;;  %v2528_v6 = vpop.permute.xlu2 %2527  ;;  %v9262_v54 = vperm.slane %v9260_v20, 1 }
 0x351   :  { %v2481_v18 = vmul.f32 %v2479_v40, %v9250_v50  ;;  %v2482_v14 = vmul.f32 %v2480_v31, %v9251_v8 }
 0x353   :  { %v2483_v0 = vadd.f32 %v2481_v18, %v2473_v45  ;;  %v2484_v49 = vadd.f32 %v2482_v14, %v2474_v48  ;;  %v9261_v45 = vperm.slane %v9260_v20, 0 }
 0x354   :  { %2705 = vrot.lane.b32.xlu1 %v7188_v23, %s8976_s2  ;;  %2697 = vrot.lane.b32.xlu0 %v7185_v41, %s8967_s9  ;;  %s9306_s9 = smov 14  }
 0x355   :  { %2707 = vrot.lane.b32.xlu2 %v7185_v41, %s8976_s2  ;;  %s9305_s2 = smov 15  }
 0x356   :  { %v2496_v44 = vpop.permute.xlu1 %2495 }
 0x357   :  { %v2488_v55 = vpop.permute.xlu0 %2487  ;;  %v2499_v1 = vsel %vm1112_vm6, %v2496_v44, %v2498_v42  ;;  %v2500_v3 = vsel %vm1112_vm6, %v2498_v42, %v2496_v44  ;;  %v9267_v44 = vld [vmem:[#allocation47_spill] sm:$0xff] }
 0x358   :  { %v2489_v35 = vsel %vm1096_vm10, %v2486_v43, %v2488_v55  ;;  %v2490_v51 = vsel %vm1096_vm10, %v2488_v55, %v2486_v43  ;;  %v2546_v7 = vpop.permute.xlu2 %2545  ;;  %v2501_v24 = vmul.f32 %v2499_v1, %v9256_v46  ;;  %v2502_v58 = vmul.f32 %v2500_v3, %v9257_v21  ;;  %v9270_v3 = vld [vmem:[#allocation138_spill] sm:$0xff] }
 0x359   :  { %v2491_v27 = vmul.f32 %v2489_v35, %v9253_v16  ;;  %v2492_v25 = vmul.f32 %v2490_v51, %v9254_v36  ;;  %v9268_v55 = vperm.slane %v9267_v44, 0  ;;  %v9269_v51 = vperm.slane %v9267_v44, 1 }
 0x35a   :  { %v9271_v2 = vperm.slane %v9270_v3, 0 }
 0x35b   :  { %v2493_v43 = vadd.f32 %v2491_v27, %v2483_v0  ;;  %v2494_v26 = vadd.f32 %v2492_v25, %v2484_v49  ;;  %v9272_v27 = vperm.slane %v9270_v3, 1 }
 0x35c   :  { %2717 = vrot.lane.b32.xlu1 %v7185_v41, %s8988_s26  ;;  %2715 = vrot.lane.b32.xlu0 %v7188_v23, %s8988_s26  ;;  %s9279_s26 = smov 19  }
 0x35d   :  { %v2503_v30 = vadd.f32 %v2501_v24, %v2493_v43  ;;  %v2504_v4 = vadd.f32 %v2502_v58, %v2494_v26  ;;  %2725 = vrot.lane.b32.xlu2 %v7188_v23, %s8990_s3  ;;  %v9276_v26 = vld [vmem:[#allocation60_spill] sm:$0xff] }
 0x35e   :  { %v2508_v42 = vpop.permute.xlu1 %2507 }
 0x35f   :  { %v2506_v11 = vpop.permute.xlu0 %2505 }
 0x360   :  { %v2509_v10 = vsel %vm9258_vm8, %v2506_v11, %v2508_v42  ;;  %v2510_v47 = vsel %vm9259_vm9, %v2508_v42, %v2506_v11  ;;  %v2558_v32 = vpop.permute.xlu2 %2557  ;;  %v9278_v42 = vperm.slane %v9276_v26, 1  ;;  %vm9280_vm8 = vcmp.lt.s32.totalorder %v4055_v57, 93 }
 0x361   :  { %v2511_v48 = vmul.f32 %v2509_v10, %v9261_v45  ;;  %v2512_v9 = vmul.f32 %v2510_v47, %v9262_v54  ;;  %vm9281_vm9 = vmmov %vm9280_vm8 }
 0x363   :  { %v2513_v40 = vadd.f32 %v2511_v48, %v2503_v30  ;;  %v2514_v31 = vadd.f32 %v2512_v9, %v2504_v4  ;;  %v9277_v30 = vperm.slane %v9276_v26, 0 }
 0x364   :  { %2735 = vrot.lane.b32.xlu1 %v7188_v23, %s9002_s25  ;;  %2727 = vrot.lane.b32.xlu0 %v7185_v41, %s8990_s3  ;;  %s9324_s3 = smov 2  }
 0x365   :  { %2737 = vrot.lane.b32.xlu2 %v7185_v41, %s9002_s25  ;;  %s9273_s25 = smov 30  }
 0x366   :  { %v2526_v53 = vpop.permute.xlu1 %2525 }
 0x367   :  { %v2518_v50 = vpop.permute.xlu0 %2517  ;;  %v2529_v14 = vsel %vm9265_vm5, %v2526_v53, %v2528_v6  ;;  %v2530_v0 = vsel %vm9266_vm4, %v2528_v6, %v2526_v53  ;;  %v9284_v53 = vld [vmem:[#allocation56_spill] sm:$0xff]  ;;  %vm9291_vm5 = vcmp.lt.s32.totalorder %v4055_v57, 82 }
 0x368   :  { %v2519_v18 = vsel %vm9263_vm12, %v2516_v28, %v2518_v50  ;;  %v2520_v8 = vsel %vm9264_vm3, %v2518_v50, %v2516_v28  ;;  %v2576_v49 = vpop.permute.xlu2 %2575  ;;  %v2531_v16 = vmul.f32 %v2529_v14, %v9271_v2  ;;  %v2532_v36 = vmul.f32 %v2530_v0, %v9272_v27  ;;  %v9287_v0 = vld [vmem:[#allocation66_spill] sm:$0xff]  ;;  %vm9292_vm4 = vmmov %vm9291_vm5 }
 0x369   :  { %v2521_v35 = vmul.f32 %v2519_v18, %v9268_v55  ;;  %v2522_v1 = vmul.f32 %v2520_v8, %v9269_v51  ;;  %vm9282_vm12 = vcmp.lt.s32.totalorder %v4055_v57, 83  ;;  %v9285_v50 = vperm.slane %v9284_v53, 0 }
 0x36a   :  { %vm9283_vm3 = vmmov %vm9282_vm12  ;;  %v9286_v8 = vperm.slane %v9284_v53, 1  ;;  %v9288_v44 = vperm.slane %v9287_v0, 0 }
 0x36b   :  { %v2523_v28 = vadd.f32 %v2521_v35, %v2513_v40  ;;  %v2524_v25 = vadd.f32 %v2522_v1, %v2514_v31  ;;  %v9289_v35 = vperm.slane %v9287_v0, 1 }
 0x36c   :  { %2747 = vrot.lane.b32.xlu1 %v7185_v41, %s9273_s25  ;;  %2745 = vrot.lane.b32.xlu0 %v7188_v23, %s9273_s25 }
 0x36d   :  { %v2533_v63 = vadd.f32 %v2531_v16, %v2523_v28  ;;  %v2534_v46 = vadd.f32 %v2532_v36, %v2524_v25  ;;  %2755 = vrot.lane.b32.xlu2 %v7188_v23, %s9019_s4  ;;  %v9293_v25 = vld [vmem:[#allocation67_spill] sm:$0xff] }
 0x36e   :  { %v2538_v6 = vpop.permute.xlu1 %2537 }
 0x36f   :  { %v2536_v24 = vpop.permute.xlu0 %2535 }
 0x370   :  { %v2539_v21 = vsel %vm9274_vm7, %v2536_v24, %v2538_v6  ;;  %v2540_v58 = vsel %vm9275_vm13, %v2538_v6, %v2536_v24  ;;  %v2588_v43 = vpop.permute.xlu2 %2587  ;;  %v9295_v6 = vperm.slane %v9293_v25, 1  ;;  %vm9296_vm7 = vcmp.lt.s32.totalorder %v4055_v57, 81 }
 0x371   :  { %v2541_v4 = vmul.f32 %v2539_v21, %v9277_v30  ;;  %v2542_v11 = vmul.f32 %v2540_v58, %v9278_v42  ;;  %vm9297_vm13 = vmmov %vm9296_vm7 }
 0x373   :  { %v2543_v10 = vadd.f32 %v2541_v4, %v2533_v63  ;;  %v2544_v47 = vadd.f32 %v2542_v11, %v2534_v46  ;;  %v9294_v63 = vperm.slane %v9293_v25, 0 }
 0x374   :  { %2765 = vrot.lane.b32.xlu1 %v7188_v23, %s9279_s26  ;;  %2757 = vrot.lane.b32.xlu0 %v7185_v41, %s9019_s4  ;;  %s9290_s4 = smov 18  }
 0x375   :  { %2767 = vrot.lane.b32.xlu2 %v7185_v41, %s9279_s26 }
 0x376   :  { %v2556_v20 = vpop.permute.xlu1 %2555 }
 0x377   :  { %v2548_v45 = vpop.permute.xlu0 %2547  ;;  %v2559_v9 = vsel %vm9282_vm12, %v2556_v20, %v2558_v32  ;;  %v2560_v40 = vsel %vm9283_vm3, %v2558_v32, %v2556_v20  ;;  %v9300_v20 = vld [vmem:[#allocation59_spill] sm:$0xff]  ;;  %vm9307_vm12 = vcmp.lt.s32.totalorder %v4055_v57, 79 }
 0x378   :  { %v2549_v48 = vsel %vm9280_vm8, %v2546_v7, %v2548_v45  ;;  %v2550_v54 = vsel %vm9281_vm9, %v2548_v45, %v2546_v7  ;;  %v2606_v31 = vpop.permute.xlu2 %2605  ;;  %v2561_v55 = vmul.f32 %v2559_v9, %v9288_v44  ;;  %v2562_v51 = vmul.f32 %v2560_v40, %v9289_v35  ;;  %vm9308_vm3 = vmmov %vm9307_vm12 }
 0x379   :  { %v2551_v18 = vmul.f32 %v2549_v48, %v9285_v50  ;;  %v2552_v14 = vmul.f32 %v2550_v54, %v9286_v8  ;;  %vm9298_vm8 = vcmp.lt.s32.totalorder %v4055_v57, 80  ;;  %v9301_v45 = vperm.slane %v9300_v20, 0 }
 0x37a   :  { %vm9299_vm9 = vmmov %vm9298_vm8  ;;  %v9302_v54 = vperm.slane %v9300_v20, 1  ;;  %v9303_v40 = vperm.slane %v5414_v33, 0  ;;  %v9304_v50 = vperm.slane %v5414_v33, 1 }
 0x37b   :  { %v2553_v7 = vadd.f32 %v2551_v18, %v2543_v10  ;;  %v2554_v1 = vadd.f32 %v2552_v14, %v2544_v47 }
 0x37c   :  { %2777 = vrot.lane.b32.xlu1 %v7185_v41, %s9290_s4  ;;  %2775 = vrot.lane.b32.xlu0 %v7188_v23, %s9290_s4 }
 0x37d   :  { %v2563_v3 = vadd.f32 %v2561_v55, %v2553_v7  ;;  %v2564_v2 = vadd.f32 %v2562_v51, %v2554_v1  ;;  %2785 = vrot.lane.b32.xlu2 %v7188_v23, %s9043_s8  ;;  %v9309_v51 = vld [vmem:[#allocation73_spill] sm:$0xff] }
 0x37e   :  { %v2568_v32 = vpop.permute.xlu1 %2567  ;;  %v9310_v7 = vperm.slane %v9309_v51, 0 }
 0x37f   :  { %v2566_v16 = vpop.permute.xlu0 %2565 }
 0x380   :  { %v2569_v27 = vsel %vm9291_vm5, %v2566_v16, %v2568_v32  ;;  %v2570_v36 = vsel %vm9292_vm4, %v2568_v32, %v2566_v16  ;;  %v2618_v28 = vpop.permute.xlu2 %2617  ;;  %vm9313_vm5 = vcmp.lt.s32.totalorder %v4055_v57, 78 }
 0x381   :  { %v2571_v46 = vmul.f32 %v2569_v27, %v9294_v63  ;;  %v2572_v24 = vmul.f32 %v2570_v36, %v9295_v6  ;;  %vm9314_vm4 = vmmov %vm9313_vm5 }
 0x383   :  { %v2573_v21 = vadd.f32 %v2571_v46, %v2563_v3  ;;  %v2574_v58 = vadd.f32 %v2572_v24, %v2564_v2  ;;  %v9311_v3 = vperm.slane %v9309_v51, 1 }
 0x384   :  { %2795 = vrot.lane.b32.xlu1 %v7188_v23, %s9056_s21  ;;  %2787 = vrot.lane.b32.xlu0 %v7185_v41, %s9043_s8 }
 0x385   :  { %2797 = vrot.lane.b32.xlu2 %v7185_v41, %s9056_s21 }
 0x386   :  { %v2586_v26 = vpop.permute.xlu1 %2585 }
 0x387   :  { %v2578_v30 = vpop.permute.xlu0 %2577  ;;  %v2589_v11 = vsel %vm9298_vm8, %v2586_v26, %v2588_v43  ;;  %v2590_v10 = vsel %vm9299_vm9, %v2588_v43, %v2586_v26  ;;  %vm9344_vm8 = vcmp.lt.s32.totalorder %v4055_v57, 45 }
 0x388   :  { %v2579_v4 = vsel %vm9296_vm7, %v2576_v49, %v2578_v30  ;;  %v2580_v42 = vsel %vm9297_vm13, %v2578_v30, %v2576_v49  ;;  %v2636_v47 = vpop.permute.xlu2 %2635  ;;  %v2591_v53 = vmul.f32 %v2589_v11, %v9303_v40  ;;  %v2592_v18 = vmul.f32 %v2590_v10, %v9304_v50  ;;  %vm9345_vm9 = vmmov %vm9344_vm8 }
 0x389   :  { %v2581_v48 = vmul.f32 %v2579_v4, %v9301_v45  ;;  %v2582_v9 = vmul.f32 %v2580_v42, %v9302_v54  ;;  %vm9315_vm7 = vcmp.lt.s32.totalorder %v4055_v57, 77  ;;  %v9320_v42 = vld [vmem:[#allocation65_spill] sm:$0xff] }
 0x38a   :  { %vm9316_vm13 = vmmov %vm9315_vm7  ;;  %v9321_v11 = vperm.slane %v9320_v42, 0  ;;  %v9322_v20 = vperm.slane %v9320_v42, 1 }
 0x38b   :  { %v2583_v49 = vadd.f32 %v2581_v48, %v2573_v21  ;;  %v2584_v8 = vadd.f32 %v2582_v9, %v2574_v58  ;;  %v9317_v21 = vld [vmem:[#allocation77_spill] sm:$0xff] }
 0x38c   :  { %2807 = vrot.lane.b32.xlu1 %v7185_v41, %s9305_s2  ;;  %2805 = vrot.lane.b32.xlu0 %v7188_v23, %s9305_s2  ;;  %v9318_v58 = vperm.slane %v9317_v21, 0  ;;  %v9319_v30 = vperm.slane %v9317_v21, 1  ;;  %v9332_v21 = vperm.slane %v5565_v52, 1 }
 0x38d   :  { %v2593_v14 = vadd.f32 %v2591_v53, %v2583_v49  ;;  %v2594_v0 = vadd.f32 %v2592_v18, %v2584_v8  ;;  %2815 = vrot.lane.b32.xlu2 %v7188_v23, %s9306_s9  ;;  %v9325_v49 = vld [vmem:[#allocation68_spill] sm:$0xff] }
 0x38e   :  { %v2598_v43 = vpop.permute.xlu1 %2597  ;;  %v9326_v8 = vperm.slane %v9325_v49, 0 }
 0x38f   :  { %v2596_v44 = vpop.permute.xlu0 %2595 }
 0x390   :  { %v2599_v55 = vsel %vm9307_vm12, %v2596_v44, %v2598_v43  ;;  %v2600_v33 = vsel %vm9308_vm3, %v2598_v43, %v2596_v44  ;;  %v2648_v35 = vpop.permute.xlu2 %2647  ;;  %vm9348_vm12 = vcmp.lt.s32.totalorder %v4055_v57, 35 }
 0x391   :  { %v2601_v1 = vmul.f32 %v2599_v55, %v9310_v7  ;;  %v2602_v2 = vmul.f32 %v2600_v33, %v9311_v3  ;;  %vm9349_vm3 = vmmov %vm9348_vm12 }
 0x393   :  { %v2603_v32 = vadd.f32 %v2601_v1, %v2593_v14  ;;  %v2604_v16 = vadd.f32 %v2602_v2, %v2594_v0  ;;  %v9327_v0 = vperm.slane %v9325_v49, 1 }
 0x394   :  { %2825 = vrot.lane.b32.xlu1 %v7188_v23, %s9312_s10  ;;  %2817 = vrot.lane.b32.xlu0 %v7185_v41, %s9306_s9 }
 0x395   :  { %2827 = vrot.lane.b32.xlu2 %v7185_v41, %s9312_s10 }
 0x396   :  { %v2616_v27 = vpop.permute.xlu1 %2615 }
 0x397   :  { %v2608_v36 = vpop.permute.xlu0 %2607  ;;  %v2619_v46 = vsel %vm9315_vm7, %v2616_v27, %v2618_v28  ;;  %v2620_v6 = vsel %vm9316_vm13, %v2618_v28, %v2616_v27  ;;  %vm9357_vm7 = vcmp.lt.s32.totalorder %v4055_v57, 33 }
 0x398   :  { %v2609_v25 = vsel %vm9313_vm5, %v2606_v31, %v2608_v36  ;;  %v2610_v63 = vsel %vm9314_vm4, %v2608_v36, %v2606_v31  ;;  %v2666_v24 = vpop.permute.xlu2 %2665  ;;  %v2621_v10 = vmul.f32 %v2619_v46, %v9321_v11  ;;  %v2622_v45 = vmul.f32 %v2620_v6, %v9322_v20  ;;  %vm9358_vm13 = vmmov %vm9357_vm7 }
 0x399   :  { %v2611_v26 = vmul.f32 %v2609_v25, %v9318_v58  ;;  %v2612_v4 = vmul.f32 %v2610_v63, %v9319_v30  ;;  %v9331_v46 = vperm.slane %v5565_v52, 0  ;;  %v9333_v20 = vperm.slane %v5603_v59, 0 }
 0x39a   :  { %vm9350_vm5 = vcmp.lt.s32.totalorder %v4055_v57, 34 }
 0x39b   :  { %v2613_v31 = vadd.f32 %v2611_v26, %v2603_v32  ;;  %v2614_v48 = vadd.f32 %v2612_v4, %v2604_v16  ;;  %v9328_v16 = vld [vmem:[#allocation76_spill] sm:$0xff]  ;;  %vm9351_vm4 = vmmov %vm9350_vm5 }
 0x39c   :  { %2837 = vrot.lane.b32.xlu1 %v7185_v41, %s9323_s13  ;;  %2835 = vrot.lane.b32.xlu0 %v7188_v23, %s9323_s13  ;;  %v9329_v27 = vperm.slane %v9328_v16, 0  ;;  %v9330_v25 = vperm.slane %v9328_v16, 1 }
 0x39d   :  { %v2623_v54 = vadd.f32 %v2621_v10, %v2613_v31  ;;  %v2624_v9 = vadd.f32 %v2622_v45, %v2614_v48  ;;  %2845 = vrot.lane.b32.xlu2 %v7188_v23, %s9324_s3  ;;  %v9334_v31 = vperm.slane %v5603_v59, 1 }
 0x39e   :  { %v2628_v28 = vpop.permute.xlu1 %2627 }
 0x39f   :  { %v2626_v40 = vpop.permute.xlu0 %2625 }
 0x3a0   :  { %v2629_v53 = vsel %vm543_vm1, %v2626_v40, %v2628_v28  ;;  %v2630_v50 = vsel %vm543_vm1, %v2628_v28, %v2626_v40  ;;  %v2678_v18 = vpop.permute.xlu2 %2677  ;;  %vm9337_vm1 = vcmp.lt.s32.totalorder %v4055_v57, 46 }
 0x3a1   :  { %v2631_v14 = vmul.f32 %v2630_v50, %v9326_v8  ;;  %v2632_v43 = vmul.f32 %v2629_v53, %v9327_v0 }
 0x3a3   :  { %v2633_v44 = vadd.f32 %v2631_v14, %v2623_v54  ;;  %v2634_v55 = vadd.f32 %v2632_v43, %v2624_v9  ;;  %v9339_v14 = vld [vmem:[#allocation86_spill] sm:$0xff] }
 0x3a4   :  { %2855 = vrot.lane.b32.xlu1 %v7188_v23, %s9073_s11  ;;  %2847 = vrot.lane.b32.xlu0 %v7185_v41, %s9324_s3  ;;  %v9340_v0 = vperm.slane %v9339_v14, 0 }
 0x3a5   :  { %2857 = vrot.lane.b32.xlu2 %v7185_v41, %s9073_s11 }
 0x3a6   :  { %v2646_v33 = vpop.permute.xlu1 %2645 }
 0x3a7   :  { %v2638_v51 = vpop.permute.xlu0 %2637  ;;  %v2649_v3 = vsel %vm575_vm14, %v2646_v33, %v2648_v35  ;;  %v2650_v2 = vsel %vm575_vm14, %v2648_v35, %v2646_v33  ;;  %vm9335_vm14 = vcmp.lt.s32.totalorder %v4055_v57, 47  ;;  %v9342_v33 = vperm.slane %v5667_v15, 0 }
 0x3a8   :  { %v2639_v7 = vsel %vm559_vm15, %v2636_v47, %v2638_v51  ;;  %v2640_v1 = vsel %vm559_vm15, %v2638_v51, %v2636_v47  ;;  %v2696_v32 = vpop.permute.xlu2 %2695  ;;  %v2651_v6 = vmul.f32 %v2650_v2, %v9331_v46  ;;  %v2652_v58 = vmul.f32 %v2649_v3, %v9332_v21  ;;  %vm9336_vm15 = vmmov %vm9335_vm14 }
 0x3a9   :  { %v2641_v36 = vmul.f32 %v2640_v1, %v9329_v27  ;;  %v2642_v63 = vmul.f32 %v2639_v7, %v9330_v25  ;;  %v9343_v7 = vperm.slane %v5667_v15, 1 }
 0x3ab   :  { %v2643_v47 = vadd.f32 %v2641_v36, %v2633_v44  ;;  %v2644_v26 = vadd.f32 %v2642_v63, %v2634_v55  ;;  %v9341_v44 = vperm.slane %v9339_v14, 1  ;;  %v9346_v63 = vperm.slane %v5677_v5, 0 }
 0x3ac   :  { %2871 = vrot.lane.b32.xlu1 %v7185_v41, %s9074_s7  ;;  %2869 = vrot.lane.b32.xlu0 %v7188_v23, %s9074_s7 }
 0x3ad   :  { %v2653_v30 = vadd.f32 %v2651_v6, %v2643_v47  ;;  %v2654_v4 = vadd.f32 %v2652_v58, %v2644_v26  ;;  %2879 = vrot.lane.b32.xlu2 %v7188_v23, %s9075_s12  ;;  %v9347_v6 = vperm.slane %v5677_v5, 1 }
 0x3ae   :  { %v2658_v35 = vpop.permute.xlu1 %2657 }
 0x3af   :  { %v2656_v42 = vpop.permute.xlu0 %2655 }
 0x3b0   :  { %v2659_v11 = vsel %vm591_vm2, %v2656_v42, %v2658_v35  ;;  %v2660_v52 = vsel %vm591_vm2, %v2658_v35, %v2656_v42  ;;  %v2708_v10 = vpop.permute.xlu2 %2707  ;;  %vm9338_vm2 = vmmov %vm9337_vm1 }
 0x3b1   :  { %v2661_v45 = vmul.f32 %v2660_v52, %v9333_v20  ;;  %v2662_v48 = vmul.f32 %v2659_v11, %v9334_v31  ;;  %v9352_v52 = vperm.slane %v5714_v12, 0 }
 0x3b3   :  { %v2663_v54 = vadd.f32 %v2661_v45, %v2653_v30  ;;  %v2664_v9 = vadd.f32 %v2662_v48, %v2654_v4  ;;  %v9353_v45 = vperm.slane %v5714_v12, 1  ;;  %v9354_v48 = vld [vmem:[#allocation87_spill] sm:$0xff] }
 0x3b4   :  { %2889 = vrot.lane.b32.xlu1 %v7188_v23, %s8636_s18  ;;  %2881 = vrot.lane.b32.xlu0 %v7185_v41, %s9075_s12 }
 0x3b5   :  { %2891 = vrot.lane.b32.xlu2 %v7185_v41, %s8636_s18  ;;  %s9440_s18 = smov 77  }
 0x3b6   :  { %v2676_v28 = vpop.permute.xlu1 %2675 }
 0x3b7   :  { %v2668_v40 = vpop.permute.xlu0 %2667  ;;  %v2679_v50 = vsel %vm9337_vm1, %v2676_v28, %v2678_v18  ;;  %v2680_v49 = vsel %vm9338_vm2, %v2678_v18, %v2676_v28  ;;  %v9356_v28 = vperm.slane %v9354_v48, 1  ;;  %vm9364_vm1 = vcmp.lt.s32.totalorder %v4055_v57, 31 }
 0x3b8   :  { %v2669_v53 = vsel %vm9335_vm14, %v2666_v24, %v2668_v40  ;;  %v2670_v59 = vsel %vm9336_vm15, %v2668_v40, %v2666_v24  ;;  %v2726_v8 = vpop.permute.xlu2 %2725  ;;  %v2681_v51 = vmul.f32 %v2680_v49, %v9342_v33  ;;  %v2682_v1 = vmul.f32 %v2679_v50, %v9343_v7  ;;  %vm9365_vm2 = vmmov %vm9364_vm1 }
 0x3b9   :  { %v2671_v43 = vmul.f32 %v2670_v59, %v9340_v0  ;;  %v2672_v55 = vmul.f32 %v2669_v53, %v9341_v44  ;;  %vm9362_vm14 = vcmp.lt.s32.totalorder %v4055_v57, 32 }
 0x3ba   :  { %vm9363_vm15 = vmmov %vm9362_vm14 }
 0x3bb   :  { %v2673_v24 = vadd.f32 %v2671_v43, %v2663_v54  ;;  %v2674_v3 = vadd.f32 %v2672_v55, %v2664_v9  ;;  %v9355_v54 = vperm.slane %v9354_v48, 0  ;;  %v9359_v43 = vld [vmem:[#allocation71_spill] sm:$0xff]  ;;  %v9374_v48 = vld [vmem:[#allocation78_spill] sm:$0xff] }
 0x3bc   :  { %2901 = vrot.lane.b32.xlu1 %v7185_v41, %s8655_s19  ;;  %2899 = vrot.lane.b32.xlu0 %v7188_v23, %s8655_s19  ;;  %v9360_v44 = vperm.slane %v9359_v43, 0  ;;  %v9361_v33 = vperm.slane %v9359_v43, 1  ;;  %s3533_s19 = smov [#allocation10]  }
 0x3bd   :  { %v2683_v2 = vadd.f32 %v2681_v51, %v2673_v24  ;;  %v2684_v16 = vadd.f32 %v2682_v1, %v2674_v3  ;;  %2909 = vrot.lane.b32.xlu2 %v7188_v23, %s8657_s5 }
 0x3be   :  { %v2688_v18 = vpop.permute.xlu1 %2687 }
 0x3bf   :  { %v2686_v27 = vpop.permute.xlu0 %2685 }
 0x3c0   :  { %v2689_v36 = vsel %vm9344_vm8, %v2686_v27, %v2688_v18  ;;  %v2690_v15 = vsel %vm9345_vm9, %v2688_v18, %v2686_v27  ;;  %v2738_v25 = vpop.permute.xlu2 %2737  ;;  %vm9372_vm8 = vcmp.lt.s32.totalorder %v4055_v57, 30 }
 0x3c1   :  { %v2691_v46 = vmul.f32 %v2690_v15, %v9346_v63  ;;  %v2692_v21 = vmul.f32 %v2689_v36, %v9347_v6  ;;  %v9366_v15 = vld [vmem:[#allocation74_spill] sm:$0xff]  ;;  %vm9373_vm9 = vmmov %vm9372_vm8 }
 0x3c2   :  { %v9367_v63 = vperm.slane %v9366_v15, 0  ;;  %v9368_v6 = vperm.slane %v9366_v15, 1 }
 0x3c3   :  { %v2693_v58 = vadd.f32 %v2691_v46, %v2683_v2  ;;  %v2694_v47 = vadd.f32 %v2692_v21, %v2684_v16 }
 0x3c4   :  { %2919 = vrot.lane.b32.xlu1 %v7188_v23, %s8678_s30  ;;  %2911 = vrot.lane.b32.xlu0 %v7185_v41, %s8657_s5  ;;  %s9435_s5 = smov 78  }
 0x3c5   :  { %2921 = vrot.lane.b32.xlu2 %v7185_v41, %s8678_s30  ;;  %s9433_s30 = smov 79  }
 0x3c6   :  { %v2706_v26 = vpop.permute.xlu1 %2705 }
 0x3c7   :  { %v2698_v30 = vpop.permute.xlu0 %2697  ;;  %v2709_v35 = vsel %vm9350_vm5, %v2706_v26, %v2708_v10  ;;  %v2710_v42 = vsel %vm9351_vm4, %v2708_v10, %v2706_v26  ;;  %vm9380_vm5 = vcmp.lt.s32.totalorder %v4055_v57, 19 }
 0x3c8   :  { %v2699_v4 = vsel %vm9348_vm12, %v2696_v32, %v2698_v30  ;;  %v2700_v5 = vsel %vm9349_vm3, %v2698_v30, %v2696_v32  ;;  %v2756_v11 = vpop.permute.xlu2 %2755  ;;  %v2711_v9 = vmul.f32 %v2710_v42, %v9355_v54  ;;  %v2712_v40 = vmul.f32 %v2709_v35, %v9356_v28  ;;  %vm9381_vm4 = vmmov %vm9380_vm5 }
 0x3c9   :  { %v2701_v20 = vmul.f32 %v2700_v5, %v9352_v52  ;;  %v2702_v31 = vmul.f32 %v2699_v4, %v9353_v45  ;;  %v9375_v54 = vperm.slane %v9374_v48, 0  ;;  %v9376_v28 = vperm.slane %v9374_v48, 1 }
 0x3ca   :  { %vm9378_vm12 = vcmp.lt.s32.totalorder %v4055_v57, 29 }
 0x3cb   :  { %v2703_v32 = vadd.f32 %v2701_v20, %v2693_v58  ;;  %v2704_v53 = vadd.f32 %v2702_v31, %v2694_v47  ;;  %v9369_v58 = vld [vmem:[#allocation80_spill] sm:$0xff]  ;;  %vm9379_vm3 = vmmov %vm9378_vm12 }
 0x3cc   :  { %2931 = vrot.lane.b32.xlu1 %v7185_v41, %s8698_s16  ;;  %2929 = vrot.lane.b32.xlu0 %v7188_v23, %s8698_s16  ;;  %v9370_v47 = vperm.slane %v9369_v58, 0  ;;  %v9371_v30 = vperm.slane %v9369_v58, 1  ;;  %s3167_s16 = sshll.u32 %s3533_s19, 4  ;;  %s3168_s16 = int_to_ptr.vmem [resolvable:$true] %s3167_s16 }
 0x3cd   :  { %v2713_v59 = vadd.f32 %v2711_v9, %v2703_v32  ;;  %v2714_v50 = vadd.f32 %v2712_v40, %v2704_v53  ;;  %2939 = vrot.lane.b32.xlu2 %v7188_v23, %s8700_s0 }
 0x3ce   :  { %v2718_v12 = vpop.permute.xlu1 %2717 }
 0x3cf   :  { %v2716_v10 = vpop.permute.xlu0 %2715 }
 0x3d0   :  { %v2719_v49 = vsel %vm9357_vm7, %v2716_v10, %v2718_v12  ;;  %v2720_v14 = vsel %vm9358_vm13, %v2718_v12, %v2716_v10  ;;  %v2768_v0 = vpop.permute.xlu2 %2767  ;;  %vm9387_vm7 = vcmp.lt.s32.totalorder %v4055_v57, 18 }
 0x3d1   :  { %v2721_v55 = vmul.f32 %v2720_v14, %v9360_v44  ;;  %v2722_v51 = vmul.f32 %v2719_v49, %v9361_v33  ;;  %v9382_v44 = vld [vmem:[#allocation79_spill] sm:$0xff]  ;;  %vm9388_vm13 = vmmov %vm9387_vm7 }
 0x3d3   :  { %v2723_v7 = vadd.f32 %v2721_v55, %v2713_v59  ;;  %v2724_v1 = vadd.f32 %v2722_v51, %v2714_v50  ;;  %v9383_v55 = vperm.slane %v9382_v44, 0  ;;  %v9384_v51 = vperm.slane %v9382_v44, 1 }
 0x3d4   :  { %2949 = vrot.lane.b32.xlu1 %v7188_v23, %s8717_s27  ;;  %2941 = vrot.lane.b32.xlu0 %v7185_v41, %s8700_s0 }
 0x3d5   :  { %2951 = vrot.lane.b32.xlu2 %v7185_v41, %s8717_s27  ;;  %s9377_s27 = smov 98  }
 0x3d6   :  { %v2736_v24 = vpop.permute.xlu1 %2735 }
 0x3d7   :  { %v2728_v3 = vpop.permute.xlu0 %2727  ;;  %v2739_v18 = vsel %vm9364_vm1, %v2736_v24, %v2738_v25  ;;  %v2740_v27 = vsel %vm9365_vm2, %v2738_v25, %v2736_v24  ;;  %vm9394_vm1 = vcmp.lt.s32.totalorder %v4055_v57, 16 }
 0x3d8   :  { %v2729_v2 = vsel %vm9362_vm14, %v2726_v8, %v2728_v3  ;;  %v2730_v16 = vsel %vm9363_vm15, %v2728_v3, %v2726_v8  ;;  %v2786_v36 = vpop.permute.xlu2 %2785  ;;  %v2741_v26 = vmul.f32 %v2740_v27, %v9370_v47  ;;  %v2742_v4 = vmul.f32 %v2739_v18, %v9371_v30  ;;  %vm9395_vm2 = vmmov %vm9394_vm1 }
 0x3d9   :  { %v2731_v46 = vmul.f32 %v2730_v16, %v9367_v63  ;;  %v2732_v21 = vmul.f32 %v2729_v2, %v9368_v6  ;;  %v9386_v3 = vperm.slane %v5898_v22, 1  ;;  %v9389_v6 = vld [vmem:[#allocation75_spill] sm:$0xff]  ;;  %vm9392_vm14 = vcmp.lt.s32.totalorder %v4055_v57, 17 }
 0x3da   :  { %v9391_v47 = vperm.slane %v9389_v6, 1  ;;  %vm9393_vm15 = vmmov %vm9392_vm14 }
 0x3db   :  { %v2733_v8 = vadd.f32 %v2731_v46, %v2723_v7  ;;  %v2734_v5 = vadd.f32 %v2732_v21, %v2724_v1  ;;  %v9385_v1 = vperm.slane %v5898_v22, 0  ;;  %v9390_v21 = vperm.slane %v9389_v6, 0 }
 0x3dc   :  { %2961 = vrot.lane.b32.xlu1 %v7185_v41, %s8738_s17  ;;  %2959 = vrot.lane.b32.xlu0 %v7188_v23, %s8738_s17  ;;  %v9411_v6 = vperm.slane %v6002_v17, 1 }
 0x3dd   :  { %v2743_v35 = vadd.f32 %v2741_v26, %v2733_v8  ;;  %v2744_v42 = vadd.f32 %v2742_v4, %v2734_v5  ;;  %2969 = vrot.lane.b32.xlu2 %v7188_v23, %s8740_s1 }
 0x3de   :  { %v2748_v25 = vpop.permute.xlu1 %2747 }
 0x3df   :  { %v2746_v52 = vpop.permute.xlu0 %2745 }
 0x3e0   :  { %v2749_v20 = vsel %vm9372_vm8, %v2746_v52, %v2748_v25  ;;  %v2750_v45 = vsel %vm9373_vm9, %v2748_v25, %v2746_v52  ;;  %v2798_v31 = vpop.permute.xlu2 %2797  ;;  %vm9401_vm8 = vcmp.lt.s32.totalorder %v4055_v57, 15 }
 0x3e1   :  { %v2751_v9 = vmul.f32 %v2750_v45, %v9375_v54  ;;  %v2752_v40 = vmul.f32 %v2749_v20, %v9376_v28  ;;  %v9396_v45 = vld [vmem:[#allocation88_spill] sm:$0xff]  ;;  %vm9402_vm9 = vmmov %vm9401_vm8 }
 0x3e2   :  { %v9397_v48 = vperm.slane %v9396_v45, 0 }
 0x3e3   :  { %v2753_v32 = vadd.f32 %v2751_v9, %v2743_v35  ;;  %v2754_v53 = vadd.f32 %v2752_v40, %v2744_v42  ;;  %v9398_v9 = vperm.slane %v9396_v45, 1  ;;  %v9399_v40 = vperm.slane %v5968_v60, 0  ;;  %v9418_v45 = vld [vmem:[#allocation89_spill] sm:$0xff] }
 0x3e4   :  { %2979 = vrot.lane.b32.xlu1 %v7188_v23, %s9377_s27  ;;  %2971 = vrot.lane.b32.xlu0 %v7185_v41, %s8740_s1  ;;  %s9421_s1 = smov 80  }
 0x3e5   :  { %2981 = vrot.lane.b32.xlu2 %v7185_v41, %s9377_s27 }
 0x3e6   :  { %v2766_v59 = vpop.permute.xlu1 %2765 }
 0x3e7   :  { %v2758_v50 = vpop.permute.xlu0 %2757  ;;  %v2769_v49 = vsel %vm9380_vm5, %v2766_v59, %v2768_v0  ;;  %v2770_v14 = vsel %vm9381_vm4, %v2768_v0, %v2766_v59  ;;  %vm9408_vm5 = vcmp.lt.s32.totalorder %v4055_v57, 13 }
 0x3e8   :  { %v2759_v12 = vsel %vm9378_vm12, %v2756_v11, %v2758_v50  ;;  %v2760_v10 = vsel %vm9379_vm3, %v2758_v50, %v2756_v11  ;;  %v2816_v43 = vpop.permute.xlu2 %2815  ;;  %v2771_v24 = vmul.f32 %v2770_v14, %v9385_v1  ;;  %v2772_v2 = vmul.f32 %v2769_v49, %v9386_v3  ;;  %vm9409_vm4 = vmmov %vm9408_vm5 }
 0x3e9   :  { %v2761_v33 = vmul.f32 %v2760_v10, %v9383_v55  ;;  %v2762_v7 = vmul.f32 %v2759_v12, %v9384_v51  ;;  %v9403_v55 = vld [vmem:[#allocation84_spill] sm:$0xff]  ;;  %vm9406_vm12 = vcmp.lt.s32.totalorder %v4055_v57, 14 }
 0x3ea   :  { %vm9407_vm3 = vmmov %vm9406_vm12 }
 0x3eb   :  { %v2763_v11 = vadd.f32 %v2761_v33, %v2753_v32  ;;  %v2764_v16 = vadd.f32 %v2762_v7, %v2754_v53  ;;  %v9400_v53 = vperm.slane %v5968_v60, 1  ;;  %v9404_v33 = vperm.slane %v9403_v55, 0 }
 0x3ec   :  { %2991 = vrot.lane.b32.xlu1 %v7185_v41, %s8776_s24  ;;  %2989 = vrot.lane.b32.xlu0 %v7188_v23, %s8776_s24  ;;  %v9405_v7 = vperm.slane %v9403_v55, 1 }
 0x3ed   :  { %v2773_v18 = vadd.f32 %v2771_v24, %v2763_v11  ;;  %v2774_v27 = vadd.f32 %v2772_v2, %v2764_v16  ;;  %2999 = vrot.lane.b32.xlu2 %v7188_v23, %s9112_s29 }
 0x3ee   :  { %v2778_v0 = vpop.permute.xlu1 %2777 }
 0x3ef   :  { %v2776_v15 = vpop.permute.xlu0 %2775 }
 0x3f0   :  { %v2779_v63 = vsel %vm9387_vm7, %v2776_v15, %v2778_v0  ;;  %v2780_v22 = vsel %vm9388_vm13, %v2778_v0, %v2776_v15  ;;  %v2828_v46 = vpop.permute.xlu2 %2827  ;;  %vm9416_vm7 = vcmp.lt.s32.totalorder %v4055_v57, 3 }
 0x3f1   :  { %v2781_v58 = vmul.f32 %v2780_v22, %v9390_v21  ;;  %v2782_v26 = vmul.f32 %v2779_v63, %v9391_v47  ;;  %v9410_v63 = vperm.slane %v6002_v17, 0  ;;  %vm9417_vm13 = vmmov %vm9416_vm7 }
 0x3f3   :  { %v2783_v30 = vadd.f32 %v2781_v58, %v2773_v18  ;;  %v2784_v4 = vadd.f32 %v2782_v26, %v2774_v27  ;;  %v9412_v58 = vld [vmem:[#allocation85_spill] sm:$0xff] }
 0x3f4   :  { %3009 = vrot.lane.b32.xlu1 %v7188_v23, %s8795_s23  ;;  %3001 = vrot.lane.b32.xlu0 %v7185_v41, %s9112_s29  ;;  %v9413_v47 = vperm.slane %v9412_v58, 0  ;;  %s9542_s29 = sld [smem:[#allocation139_spill]] }
 0x3f5   :  { %3011 = vrot.lane.b32.xlu2 %v7185_v41, %s8795_s23  ;;  %s9543_s23 = smov 8  }
 0x3f6   :  { %v2796_v8 = vpop.permute.xlu1 %2795 }
 0x3f7   :  { %v2788_v5 = vpop.permute.xlu0 %2787  ;;  %v2799_v25 = vsel %vm9394_vm1, %v2796_v8, %v2798_v31  ;;  %v2800_v52 = vsel %vm9395_vm2, %v2798_v31, %v2796_v8  ;;  %vm9424_vm1 = vcmp.lt.s32.totalorder %v4055_v57, 1 }
 0x3f8   :  { %v2789_v35 = vsel %vm9392_vm14, %v2786_v36, %v2788_v5  ;;  %v2790_v42 = vsel %vm9393_vm15, %v2788_v5, %v2786_v36  ;;  %v2846_v20 = vpop.permute.xlu2 %2845  ;;  %v2801_v32 = vmul.f32 %v2800_v52, %v9399_v40  ;;  %v2802_v59 = vmul.f32 %v2799_v25, %v9400_v53  ;;  %vm9425_vm2 = vmmov %vm9424_vm1 }
 0x3f9   :  { %v2791_v54 = vmul.f32 %v2790_v42, %v9397_v48  ;;  %v2792_v28 = vmul.f32 %v2789_v35, %v9398_v9  ;;  %v9419_v48 = vperm.slane %v9418_v45, 0  ;;  %v9420_v9 = vperm.slane %v9418_v45, 1 }
 0x3fa   :  { %vm9422_vm14 = vcmp.lt.s32.totalorder %v4055_v57, 2  ;;  %s3169_s24 = sshll.u32 %s9542_s29, 4  ;;  %s3170_s24 = int_to_ptr.hbm [resolvable:$true] %s3169_s24 }
 0x3fb   :  { %v2793_v36 = vadd.f32 %v2791_v54, %v2783_v30  ;;  %v2794_v50 = vadd.f32 %v2792_v28, %v2784_v4  ;;  %v9414_v30 = vperm.slane %v9412_v58, 1  ;;  %vm9423_vm15 = vmmov %vm9422_vm14 }
 0x3fc   :  { %3021 = vrot.lane.b32.xlu1 %v7185_v41, %s8811_s15  ;;  %3019 = vrot.lane.b32.xlu0 %v7188_v23, %s8811_s15  ;;  %s9544_s15 = smov 128  }
 0x3fd   :  { %v2803_v12 = vadd.f32 %v2801_v32, %v2793_v36  ;;  %v2804_v10 = vadd.f32 %v2802_v59, %v2794_v50  ;;  %3029 = vrot.lane.b32.xlu2 %v7188_v23, %s8813_s20 }
 0x3fe   :  { %v2808_v31 = vpop.permute.xlu1 %2807 }
 0x3ff   :  { %v2806_v49 = vpop.permute.xlu0 %2805 }
 0x400   :  { %v2809_v14 = vsel %vm9401_vm8, %v2806_v49, %v2808_v31  ;;  %v2810_v60 = vsel %vm9402_vm9, %v2808_v31, %v2806_v49  ;;  %v2858_v44 = vpop.permute.xlu2 %2857  ;;  %v9426_v49 = vld [vmem:[#allocation91_spill] sm:$0xff]  ;;  %vm9436_vm8 = vcmp.lt.s32.totalorder %v4055_v57, 127 }
 0x401   :  { %v2811_v51 = vmul.f32 %v2810_v60, %v9404_v33  ;;  %v2812_v1 = vmul.f32 %v2809_v14, %v9405_v7  ;;  %v9427_v14 = vperm.slane %v9426_v49, 0  ;;  %v9428_v55 = vperm.slane %v9426_v49, 1  ;;  %vm9437_vm9 = vmmov %vm9436_vm8 }
 0x402   :  { %v9451_v49 = vperm.slane %v6221_v38, 0 }
 0x403   :  { %v2813_v24 = vadd.f32 %v2811_v51, %v2803_v12  ;;  %v2814_v3 = vadd.f32 %v2812_v1, %v2804_v10  ;;  %v9429_v51 = vperm.slane %v6118_v39, 0  ;;  %v9430_v1 = vperm.slane %v6118_v39, 1 }
 0x404   :  { %3039 = vrot.lane.b32.xlu1 %v7188_v23, %s8829_s28  ;;  %3031 = vrot.lane.b32.xlu0 %v7185_v41, %s8813_s20  ;;  %s9415_s20 = smov 81  }
 0x405   :  { %3041 = vrot.lane.b32.xlu2 %v7185_v41, %s8829_s28 }
 0x406   :  { %v2826_v2 = vpop.permute.xlu1 %2825 }
 0x407   :  { %v2818_v11 = vpop.permute.xlu0 %2817  ;;  %v2829_v27 = vsel %vm9408_vm5, %v2826_v2, %v2828_v46  ;;  %v2830_v0 = vsel %vm9409_vm4, %v2828_v46, %v2826_v2  ;;  %v9431_v2 = vld [vmem:[#allocation96_spill] sm:$0xff]  ;;  %vm9443_vm5 = vcmp.lt.s32.totalorder %v4055_v57, 125 }
 0x408   :  { %v2819_v16 = vsel %vm9406_vm12, %v2816_v43, %v2818_v11  ;;  %v2820_v18 = vsel %vm9407_vm3, %v2818_v11, %v2816_v43  ;;  %v2880_v15 = vpop.permute.xlu2 %2879  ;;  %v2831_v26 = vmul.f32 %v2830_v0, %v9413_v47  ;;  %v2832_v4 = vmul.f32 %v2829_v27, %v9414_v30  ;;  %vm9444_vm4 = vmmov %vm9443_vm5 }
 0x409   :  { %v2821_v22 = vmul.f32 %v2820_v18, %v9410_v63  ;;  %v2822_v21 = vmul.f32 %v2819_v16, %v9411_v6  ;;  %v9432_v11 = vperm.slane %v9431_v2, 0  ;;  %v9434_v27 = vperm.slane %v9431_v2, 1 }
 0x40a   :  { %vm9441_vm12 = vcmp.lt.s32.totalorder %v4055_v57, 126  ;;  %v9456_v2 = vperm.slane %v6240_v13, 1 }
 0x40b   :  { %v2823_v43 = vadd.f32 %v2821_v22, %v2813_v24  ;;  %v2824_v8 = vadd.f32 %v2822_v21, %v2814_v3  ;;  %v2865_v16 = vmul.f32 %v7188_v23, %v9432_v11  ;;  %v2866_v0 = vmul.f32 %v7185_v41, %v9434_v27  ;;  %vm9442_vm3 = vmmov %vm9441_vm12 }
 0x40c   :  { %3051 = vrot.lane.b32.xlu1 %v7185_v41, %s8844_s22  ;;  %3049 = vrot.lane.b32.xlu0 %v7188_v23, %s8844_s22 }
 0x40d   :  { %v2833_v5 = vadd.f32 %v2831_v26, %v2823_v43  ;;  %v2834_v35 = vadd.f32 %v2832_v4, %v2824_v8  ;;  %3059 = vrot.lane.b32.xlu2 %v7188_v23, %s9415_s20  ;;  %v9438_v26 = vperm.slane %v6173_v56, 0  ;;  %v9439_v4 = vperm.slane %v6173_v56, 1 }
 0x40e   :  { %v2838_v17 = vpop.permute.xlu1 %2837 }
 0x40f   :  { %v2836_v46 = vpop.permute.xlu0 %2835 }
 0x410   :  { %v2839_v42 = vsel %vm9416_vm7, %v2836_v46, %v2838_v17  ;;  %v2840_v25 = vsel %vm9417_vm13, %v2838_v17, %v2836_v46  ;;  %v2892_v52 = vpop.permute.xlu2 %2891  ;;  %vm9449_vm7 = vcmp.lt.s32.totalorder %v4055_v57, 115 }
 0x411   :  { %v2841_v54 = vmul.f32 %v2840_v25, %v9419_v48  ;;  %v2842_v28 = vmul.f32 %v2839_v42, %v9420_v9  ;;  %v9447_v9 = vperm.slane %v6206_v62, 0  ;;  %vm9450_vm13 = vmmov %vm9449_vm7 }
 0x413   :  { %v2843_v40 = vadd.f32 %v2841_v54, %v2833_v5  ;;  %v2844_v32 = vadd.f32 %v2842_v28, %v2834_v35 }
 0x414   :  { %3069 = vrot.lane.b32.xlu1 %v7188_v23, %s9421_s1  ;;  %3061 = vrot.lane.b32.xlu0 %v7185_v41, %s9415_s20 }
 0x415   :  { %3071 = vrot.lane.b32.xlu2 %v7185_v41, %s9421_s1 }
 0x416   :  { %v2856_v53 = vpop.permute.xlu1 %2855 }
 0x417   :  { %v2848_v59 = vpop.permute.xlu0 %2847  ;;  %v2859_v12 = vsel %vm9424_vm1, %v2856_v53, %v2858_v44  ;;  %v2860_v10 = vsel %vm9425_vm2, %v2858_v44, %v2856_v53  ;;  %vm9457_vm1 = vcmp.lt.s32.totalorder %v4055_v57, 113 }
 0x418   :  { %v2849_v36 = vsel %vm9422_vm14, %v2846_v20, %v2848_v59  ;;  %v2850_v50 = vsel %vm9423_vm15, %v2848_v59, %v2846_v20  ;;  %v2910_v31 = vpop.permute.xlu2 %2909  ;;  %v2861_v7 = vmul.f32 %v2860_v10, %v9429_v51  ;;  %v2862_v24 = vmul.f32 %v2859_v12, %v9430_v1  ;;  %vm9458_vm2 = vmmov %vm9457_vm1 }
 0x419   :  { %v2851_v60 = vmul.f32 %v2850_v50, %v9427_v14  ;;  %v2852_v33 = vmul.f32 %v2849_v36, %v9428_v55  ;;  %vm9453_vm14 = vcmp.lt.s32.totalorder %v4055_v57, 114 }
 0x41a   :  { %vm9454_vm15 = vmmov %vm9453_vm14 }
 0x41b   :  { %v2853_v20 = vadd.f32 %v2851_v60, %v2843_v40  ;;  %v2854_v3 = vadd.f32 %v2852_v33, %v2844_v32  ;;  %v9448_v40 = vperm.slane %v6206_v62, 1  ;;  %v9452_v60 = vperm.slane %v6221_v38, 1 }
 0x41c   :  { %3081 = vrot.lane.b32.xlu1 %v7185_v41, %s9433_s30  ;;  %3079 = vrot.lane.b32.xlu0 %v7188_v23, %s9433_s30 }
 0x41d   :  { %v2863_v44 = vadd.f32 %v2861_v7, %v2853_v20  ;;  %v2864_v18 = vadd.f32 %v2862_v24, %v2854_v3  ;;  %3089 = vrot.lane.b32.xlu2 %v7188_v23, %s9435_s5  ;;  %v9455_v20 = vperm.slane %v6240_v13, 0 }
 0x41e   :  { %v2872_v39 = vpop.permute.xlu1 %2871 }
 0x41f   :  { %v2870_v63 = vpop.permute.xlu0 %2869  ;;  %v2867_v58 = vadd.f32 %v2865_v16, %v2863_v44  ;;  %v2868_v47 = vadd.f32 %v2866_v0, %v2864_v18 }
 0x420   :  { %v2873_v22 = vsel %vm9436_vm8, %v2870_v63, %v2872_v39  ;;  %v2874_v6 = vsel %vm9437_vm9, %v2872_v39, %v2870_v63  ;;  %v2922_v21 = vpop.permute.xlu2 %2921  ;;  %vm9459_vm8 = vcmp.lt.s32.totalorder %v4055_v57, 112 }
 0x421   :  { %v2875_v30 = vmul.f32 %v2873_v22, %v9438_v26  ;;  %v2876_v43 = vmul.f32 %v2874_v6, %v9439_v4  ;;  %vm9460_vm9 = vmmov %vm9459_vm8 }
 0x423   :  { %v2877_v8 = vadd.f32 %v2875_v30, %v2867_v58  ;;  %v2878_v5 = vadd.f32 %v2876_v43, %v2868_v47 }
 0x424   :  { %3091 = vrot.lane.b32.xlu0 %v7185_v41, %s9435_s5  ;;  %3099 = vrot.lane.b32.xlu1 %v7188_v23, %s9440_s18  ;;  %v9445_v23 = vperm.slane %v6179_v19, 0 }
 0x425   :  { %3101 = vrot.lane.b32.xlu2 %v7185_v41, %s9440_s18  ;;  %v9446_v41 = vperm.slane %v6179_v19, 1 }
 0x426   :  { %v2890_v35 = vpop.permute.xlu1 %2889 }
 0x427   :  { %v2882_v17 = vpop.permute.xlu0 %2881  ;;  %v2893_v42 = vsel %vm9443_vm5, %v2890_v35, %v2892_v52  ;;  %v2894_v25 = vsel %vm9444_vm4, %v2892_v52, %v2890_v35  ;;  %vm9469_vm5 = vcmp.lt.s32.totalorder %v4055_v57, 110 }
 0x428   :  { %v2883_v46 = vsel %vm9441_vm12, %v2880_v15, %v2882_v17  ;;  %v2884_v56 = vsel %vm9442_vm3, %v2882_v17, %v2880_v15  ;;  %v2940_v45 = vpop.permute.xlu2 %2939  ;;  %v2895_v28 = vmul.f32 %v2893_v42, %v9447_v9  ;;  %v2896_v32 = vmul.f32 %v2894_v25, %v9448_v40  ;;  %vm9470_vm4 = vmmov %vm9469_vm5 }
 0x429   :  { %v2885_v48 = vmul.f32 %v2883_v46, %v9445_v23  ;;  %v2886_v54 = vmul.f32 %v2884_v56, %v9446_v41  ;;  %v9461_v56 = vperm.slane %v6278_v37, 0  ;;  %v9462_v25 = vperm.slane %v6278_v37, 1 }
 0x42a   :  { %vm9463_vm12 = vcmp.lt.s32.totalorder %v4055_v57, 111  ;;  %v9465_v41 = vperm.slane %v6294_v34, 0  ;;  %v9466_v9 = vperm.slane %v6294_v34, 1 }
 0x42b   :  { %v2887_v15 = vadd.f32 %v2885_v48, %v2877_v8  ;;  %v2888_v53 = vadd.f32 %v2886_v54, %v2878_v5  ;;  %vm9464_vm3 = vmmov %vm9463_vm12 }
 0x42d   :  { %v2897_v59 = vadd.f32 %v2895_v28, %v2887_v15  ;;  %v2898_v36 = vadd.f32 %v2896_v32, %v2888_v53  ;;  %v9467_v53 = vperm.slane %v6312_v61, 0 }
 0x42e   :  { %v2902_v50 = vpop.permute.xlu1 %2901 }
 0x42f   :  { %v2900_v12 = vpop.permute.xlu0 %2899 }
 0x430   :  { %v2903_v52 = vsel %vm9449_vm7, %v2900_v12, %v2902_v50  ;;  %v2904_v10 = vsel %vm9450_vm13, %v2902_v50, %v2900_v12  ;;  %v2952_v19 = vpop.permute.xlu2 %2951  ;;  %vm9492_vm13 = vcmp.lt.s32.totalorder %v4055_v57, 95 }
 0x431   :  { %v2905_v14 = vmul.f32 %v2903_v52, %v9451_v49  ;;  %v2906_v62 = vmul.f32 %v2904_v10, %v9452_v60 }
 0x433   :  { %v2907_v55 = vadd.f32 %v2905_v14, %v2897_v59  ;;  %v2908_v33 = vadd.f32 %v2906_v62, %v2898_v36  ;;  %v9468_v59 = vperm.slane %v6312_v61, 1  ;;  %v9471_v61 = vperm.slane %v6350_v29, 0 }
 0x436   :  { %v2920_v51 = vpop.permute.xlu1 %2919 }
 0x437   :  { %v2912_v7 = vpop.permute.xlu0 %2911  ;;  %v2923_v13 = vsel %vm9457_vm1, %v2920_v51, %v2922_v21  ;;  %v2924_v8 = vsel %vm9458_vm2, %v2922_v21, %v2920_v51  ;;  %vm9499_vm2 = vcmp.lt.s32.totalorder %v4055_v57, 93 }
 0x438   :  { %v2913_v1 = vsel %vm9453_vm14, %v2910_v31, %v2912_v7  ;;  %v2914_v24 = vsel %vm9454_vm15, %v2912_v7, %v2910_v31  ;;  %v2970_v16 = vpop.permute.xlu2 %2969  ;;  %v2925_v42 = vmul.f32 %v2923_v13, %v9461_v56  ;;  %v2926_v23 = vmul.f32 %v2924_v8, %v9462_v25  ;;  %v9481_v25 = vld [vmem:[#allocation97_spill] sm:$0xff]  ;;  %vm9493_vm14 = vmmov %vm9492_vm13 }
 0x439   :  { %v2915_v3 = vmul.f32 %v2913_v1, %v9455_v20  ;;  %v2916_v11 = vmul.f32 %v2914_v24, %v9456_v2  ;;  %v9473_v1 = vld [vmem:[#allocation22_spill] sm:$0xff]  ;;  %vm9494_vm15 = vcmp.lt.s32.totalorder %v4055_v57, 94 }
 0x43a   :  { %v9474_v24 = vperm.slane %v9473_v1, 0  ;;  %vm9495_vm1 = vmmov %vm9494_vm15 }
 0x43b   :  { %v2917_v44 = vadd.f32 %v2915_v3, %v2907_v55  ;;  %v2918_v38 = vadd.f32 %v2916_v11, %v2908_v33  ;;  %v9472_v33 = vperm.slane %v6350_v29, 1  ;;  %v9475_v3 = vperm.slane %v9473_v1, 1 }
 0x43d   :  { %v2927_v32 = vadd.f32 %v2925_v42, %v2917_v44  ;;  %v2928_v15 = vadd.f32 %v2926_v23, %v2918_v38  ;;  %v9476_v38 = vld [vmem:[#allocation29_spill] sm:$0xff]  ;;  %v9482_v23 = vperm.slane %v9481_v25, 0 }
 0x43e   :  { %v2932_v18 = vpop.permute.xlu1 %2931  ;;  %v9478_v29 = vperm.slane %v9476_v38, 1 }
 0x43f   :  { %v2930_v27 = vpop.permute.xlu0 %2929 }
 0x440   :  { %v2982_v0 = vpop.permute.xlu2 %2981  ;;  %v2933_v17 = vsel %vm9459_vm8, %v2930_v27, %v2932_v18  ;;  %v2934_v46 = vsel %vm9460_vm9, %v2932_v18, %v2930_v27  ;;  %v9477_v18 = vperm.slane %v9476_v38, 0  ;;  %vm9500_vm8 = vmmov %vm9499_vm2  ;;  %vm9507_vm9 = vcmp.lt.s32.totalorder %v4055_v57, 83 }
 0x441   :  { %v2935_v54 = vmul.f32 %v2933_v17, %v9465_v41  ;;  %v2936_v28 = vmul.f32 %v2934_v46, %v9466_v9 }
 0x443   :  { %v2937_v12 = vadd.f32 %v2935_v54, %v2927_v32  ;;  %v2938_v52 = vadd.f32 %v2936_v28, %v2928_v15  ;;  %v9486_v54 = vld [vmem:[#allocation115_spill] sm:$0xff] }
 0x444   :  { %v9487_v9 = vperm.slane %v9486_v54, 0  ;;  %v9488_v32 = vperm.slane %v9486_v54, 1 }
 0x446   :  { %v2950_v39 = vpop.permute.xlu1 %2949 }
 0x447   :  { %v2942_v63 = vpop.permute.xlu0 %2941  ;;  %v2953_v50 = vsel %vm9469_vm5, %v2950_v39, %v2952_v19 }
 0x448   :  { %v3000_v22 = vpop.permute.xlu2 %2999  ;;  %v2943_v48 = vsel %vm9463_vm12, %v2940_v45, %v2942_v63  ;;  %v2944_v21 = vsel %vm9464_vm3, %v2942_v63, %v2940_v45  ;;  %v2954_v45 = vsel %vm9470_vm4, %v2952_v19, %v2950_v39  ;;  %v2955_v55 = vmul.f32 %v2953_v50, %v9471_v61  ;;  %vm9508_vm12 = vmmov %vm9507_vm9 }
 0x449   :  { %v2945_v37 = vmul.f32 %v2943_v48, %v9467_v53  ;;  %v2946_v36 = vmul.f32 %v2944_v21, %v9468_v59  ;;  %v2956_v51 = vmul.f32 %v2954_v45, %v9472_v33  ;;  %v9483_v21 = vperm.slane %v9481_v25, 1  ;;  %v9489_v53 = vld [vmem:[#allocation99_spill] sm:$0xff] }
 0x44a   :  { %vm9509_vm3 = vcmp.lt.s32.totalorder %v4055_v57, 82  ;;  %vm9514_vm4 = vcmp.lt.s32.totalorder %v4055_v57, 81 }
 0x44b   :  { %v2947_v60 = vadd.f32 %v2945_v37, %v2937_v12  ;;  %v2948_v62 = vadd.f32 %v2946_v36, %v2938_v52  ;;  %v9490_v37 = vperm.slane %v9489_v53, 0  ;;  %v9491_v36 = vperm.slane %v9489_v53, 1  ;;  %vm9510_vm5 = vmmov %vm9509_vm3 }
 0x44d   :  { %v2957_v11 = vadd.f32 %v2955_v55, %v2947_v60  ;;  %v2958_v44 = vadd.f32 %v2956_v51, %v2948_v62  ;;  %v9496_v55 = vld [vmem:[#allocation124_spill] sm:$0xff] }
 0x44e   :  { %v2962_v6 = vpop.permute.xlu1 %2961  ;;  %v9497_v33 = vperm.slane %v9496_v55, 0 }
 0x44f   :  { %v2960_v58 = vpop.permute.xlu0 %2959 }
 0x450   :  { %v7810_v31 = vpop.permute.xlu2 %3011  ;;  %v2963_v49 = vsel %vm1080_vm11, %v2960_v58, %v2962_v6  ;;  %v2964_v14 = vsel %vm1080_vm11, %v2962_v6, %v2960_v58 }
 0x451   :  { %v2965_v20 = vmul.f32 %v2963_v49, %v9474_v24  ;;  %v2966_v2 = vmul.f32 %v2964_v14, %v9475_v3  ;;  %v9501_v24 = vld [vmem:[#allocation102_spill] sm:$0xff] }
 0x453   :  { %v2967_v58 = vadd.f32 %v2965_v20, %v2957_v11  ;;  %v9502_v20 = vperm.slane %v9501_v24, 0 }
 0x456   :  { %v2980_v47 = vpop.permute.xlu1 %2979 }
 0x457   :  { %v2972_v26 = vpop.permute.xlu0 %2971  ;;  %v2983_v63 = vsel %vm1112_vm6, %v2980_v47, %v2982_v0 }
 0x458   :  { %v7812_v43 = vpop.permute.xlu2 %3029  ;;  %v2973_v19 = vsel %vm1096_vm10, %v2970_v16, %v2972_v26  ;;  %v2974_v7 = vsel %vm1096_vm10, %v2972_v26, %v2970_v16  ;;  %v2984_v16 = vsel %vm1112_vm6, %v2982_v0, %v2980_v47  ;;  %v2968_v26 = vadd.f32 %v2966_v2, %v2958_v44  ;;  %v9504_v44 = vld [vmem:[#allocation103_spill] sm:$0xff] }
 0x459   :  { %v2975_v27 = vmul.f32 %v2973_v19, %v9477_v18  ;;  %v2976_v39 = vmul.f32 %v2974_v7, %v9478_v29  ;;  %vm9479_vm10 = vcmp.lt.s32.totalorder %v4055_v57, 97  ;;  %v2985_v48 = vmul.f32 %v2983_v63, %v9482_v23 }
 0x45a   :  { %vm9480_vm11 = vmmov %vm9479_vm10  ;;  %v2986_v41 = vmul.f32 %v2984_v16, %v9483_v21  ;;  %vm9484_vm6 = vcmp.lt.s32.totalorder %v4055_v57, 96  ;;  %v9498_v19 = vperm.slane %v9496_v55, 1  ;;  %v9505_v38 = vperm.slane %v9504_v44, 0 }
 0x45b   :  { %v2977_v56 = vadd.f32 %v2975_v27, %v2967_v58  ;;  %v2978_v42 = vadd.f32 %v2976_v39, %v2968_v26  ;;  %vm9485_vm7 = vmmov %vm9484_vm6  ;;  %v9506_v27 = vperm.slane %v9504_v44, 1 }
 0x45d   :  { %v2988_v15 = vadd.f32 %v2986_v41, %v2978_v42  ;;  %v9511_v42 = vld [vmem:[#allocation18_spill] sm:$0xff]  ;;  %v9516_v41 = vld [vmem:[#allocation49_spill] sm:$0xff] }
 0x45e   :  { %v2992_v30 = vpop.permute.xlu1 %2991  ;;  %v9512_v25 = vperm.slane %v9511_v42, 0  ;;  %v9518_v54 = vperm.slane %v9516_v41, 1 }
 0x45f   :  { %v2990_v4 = vpop.permute.xlu0 %2989 }
 0x460   :  { %v7834_v40 = vpop.permute.xlu2 %3041  ;;  %v2993_v17 = vsel %vm9479_vm10, %v2990_v4, %v2992_v30  ;;  %v2994_v46 = vsel %vm9480_vm11, %v2992_v30, %v2990_v4  ;;  %v2987_v4 = vadd.f32 %v2985_v48, %v2977_v56  ;;  %v9513_v48 = vperm.slane %v9511_v42, 1  ;;  %vm9515_vm10 = vmmov %vm9514_vm4 }
 0x461   :  { %v2995_v28 = vmul.f32 %v2993_v17, %v9487_v9  ;;  %v2996_v30 = vmul.f32 %v2994_v46, %v9488_v32  ;;  %vm9522_vm11 = vcmp.lt.s32.totalorder %v4055_v57, 80 }
 0x463   :  { %v2998_v12 = vadd.f32 %v2996_v30, %v2988_v15 }
 0x466   :  { %v3010_v5 = vpop.permute.xlu1 %3009 }
 0x467   :  { %v3002_v35 = vpop.permute.xlu0 %3001  ;;  %v3013_v45 = vsel %vm9492_vm13, %v3010_v5, %v7810_v31 }
 0x468   :  { %v3060_v6 = vpop.permute.xlu2 %3059  ;;  %v3003_v0 = vsel %vm9484_vm6, %v3000_v22, %v3002_v35  ;;  %v3004_v47 = vsel %vm9485_vm7, %v3002_v35, %v3000_v22  ;;  %v3014_v22 = vsel %vm9493_vm14, %v7810_v31, %v3010_v5  ;;  %v2997_v35 = vadd.f32 %v2995_v28, %v2987_v4  ;;  %v9519_v4 = vld [vmem:[#allocation106_spill] sm:$0xff]  ;;  %vm9523_vm6 = vmmov %vm9522_vm11 }
 0x469   :  { %v3005_v59 = vmul.f32 %v3003_v0, %v9490_v37  ;;  %v3006_v50 = vmul.f32 %v3004_v47, %v9491_v36  ;;  %v3015_v51 = vmul.f32 %v3013_v45, %v9497_v33  ;;  %v3016_v7 = vmul.f32 %v3014_v22, %v9498_v19 }
 0x46a   :  { %v9517_v0 = vperm.slane %v9516_v41, 0  ;;  %v9520_v15 = vperm.slane %v9519_v4, 0  ;;  %v9521_v37 = vperm.slane %v9519_v4, 1  ;;  %vm9524_vm7 = vcmp.lt.s32.totalorder %v4055_v57, 79 }
 0x46b   :  { %v3007_v62 = vadd.f32 %v3005_v59, %v2997_v35  ;;  %v3008_v61 = vadd.f32 %v3006_v50, %v2998_v12  ;;  %vm9525_vm13 = vmmov %vm9524_vm7  ;;  %vm9532_vm14 = vcmp.lt.s32.totalorder %v4055_v57, 78 }
 0x46d   :  { %v3017_v2 = vadd.f32 %v3015_v51, %v3007_v62  ;;  %v3018_v11 = vadd.f32 %v3016_v7, %v3008_v61  ;;  %v9529_v51 = vld [vmem:[#allocation125_spill] sm:$0xff] }
 0x46e   :  { %v3022_v34 = vpop.permute.xlu1 %3021  ;;  %v9530_v19 = vperm.slane %v9529_v51, 0 }
 0x46f   :  { %v3020_v10 = vpop.permute.xlu0 %3019 }
 0x470   :  { %v3023_v14 = vsel %vm9494_vm15, %v3020_v10, %v3022_v34  ;;  %v3024_v60 = vsel %vm9495_vm1, %v3022_v34, %v3020_v10  ;;  %v3072_v1 = vpop.permute.xlu2 %3071  ;;  %v9503_v10 = vperm.slane %v9501_v24, 1  ;;  %vm9533_vm15 = vmmov %vm9532_vm14  ;;  %vm9534_vm1 = vcmp.lt.s32.totalorder %v4055_v57, 77 }
 0x471   :  { %v3025_v34 = vmul.f32 %v3023_v14, %v9502_v20 }
 0x472   :  { %v3026_v3 = vmul.f32 %v3024_v60, %v9503_v10  ;;  %v9526_v60 = vld [vmem:[#allocation48_spill] sm:$0xff] }
 0x473   :  { %v3027_v63 = vadd.f32 %v3025_v34, %v3017_v2  ;;  %v9527_v62 = vperm.slane %v9526_v60, 0  ;;  %v9528_v55 = vperm.slane %v9526_v60, 1  ;;  %v3150_v60 = vld.sshfl [vmem:[#allocation1] sm:$0xff pattern:$0x75316420] }
 0x474   :  { %v3028_v16 = vadd.f32 %v3026_v3, %v3018_v11 }
 0x476   :  { %v3040_v13 = vpop.permute.xlu1 %3039 }
 0x477   :  { %v3032_v8 = vpop.permute.xlu0 %3031  ;;  %v3043_v39 = vsel %vm9507_vm9, %v3040_v13, %v7834_v40 }
 0x478   :  { %v3033_v31 = vsel %vm9499_vm2, %v7812_v43, %v3032_v8  ;;  %v3034_v5 = vsel %vm9500_vm8, %v3032_v8, %v7812_v43  ;;  %v3044_v43 = vsel %vm9508_vm12, %v7834_v40, %v3040_v13  ;;  %v3045_v23 = vmul.f32 %v3043_v39, %v9512_v25  ;;  %v3090_v28 = vpop.permute.xlu2 %3089  ;;  %vm9535_vm2 = vmmov %vm9534_vm1 }
 0x479   :  { %v3035_v18 = vmul.f32 %v3033_v31, %v9505_v38  ;;  %v3036_v29 = vmul.f32 %v3034_v5, %v9506_v27  ;;  %v3046_v21 = vmul.f32 %v3044_v43, %v9513_v48  ;;  %v9536_v27 = vld [vmem:[#allocation133_spill] sm:$0xff] }
 0x47a   :  { %v9538_v43 = vperm.slane %v9536_v27, 1 }
 0x47b   :  { %v3037_v46 = vadd.f32 %v3035_v18, %v3027_v63  ;;  %v3038_v56 = vadd.f32 %v3036_v29, %v3028_v16  ;;  %v9537_v29 = vperm.slane %v9536_v27, 0  ;;  %v9539_v16 = vld [vmem:[#allocation107_spill] sm:$0xff] }
 0x47d   :  { %v3047_v32 = vadd.f32 %v3045_v23, %v3037_v46  ;;  %v3048_v30 = vadd.f32 %v3046_v21, %v3038_v56 }
 0x47e   :  { %v3052_v52 = vpop.permute.xlu1 %3051 }
 0x47f   :  { %v3050_v49 = vpop.permute.xlu0 %3049 }
 0x480   :  { %v3053_v8 = vsel %vm9509_vm3, %v3050_v49, %v3052_v52  ;;  %v3054_v17 = vsel %vm9510_vm5, %v3052_v52, %v3050_v49  ;;  %v3102_v20 = vpop.permute.xlu2 %3101 }
 0x481   :  { %v3055_v47 = vmul.f32 %v3053_v8, %v9517_v0  ;;  %v3056_v9 = vmul.f32 %v3054_v17, %v9518_v54  ;;  %v9541_v8 = vperm.slane %v9539_v16, 1 }
 0x483   :  { %v3057_v50 = vadd.f32 %v3055_v47, %v3047_v32  ;;  %v3058_v45 = vadd.f32 %v3056_v9, %v3048_v30 }
 0x486   :  { %v3070_v58 = vpop.permute.xlu1 %3069 }
 0x487   :  { %v3062_v26 = vpop.permute.xlu0 %3061  ;;  %v3073_v36 = vsel %vm9522_vm11, %v3070_v58, %v3072_v1 }
 0x488   :  { %v3063_v40 = vsel %vm9514_vm4, %v3060_v6, %v3062_v26  ;;  %v3064_v13 = vsel %vm9515_vm10, %v3062_v26, %v3060_v6  ;;  %v3074_v6 = vsel %vm9523_vm6, %v3072_v1, %v3070_v58  ;;  %v3075_v61 = vmul.f32 %v3073_v36, %v9527_v62 }
 0x489   :  { %v3065_v53 = vmul.f32 %v3063_v40, %v9520_v15  ;;  %v3066_v59 = vmul.f32 %v3064_v13, %v9521_v37  ;;  %v3076_v33 = vmul.f32 %v3074_v6, %v9528_v55  ;;  %v9531_v1 = vperm.slane %v9529_v51, 1 }
 0x48a   :  { %v9540_v58 = vperm.slane %v9539_v16, 0 }
 0x48b   :  { %v3067_v49 = vadd.f32 %v3065_v53, %v3057_v50  ;;  %v3068_v14 = vadd.f32 %v3066_v59, %v3058_v45 }
 0x48d   :  { %v3077_v5 = vadd.f32 %v3075_v61, %v3067_v49  ;;  %v3078_v24 = vadd.f32 %v3076_v33, %v3068_v14 }
 0x48e   :  { %v3082_v22 = vpop.permute.xlu1 %3081 }
 0x48f   :  { %v3080_v35 = vpop.permute.xlu0 %3079 }
 0x490   :  { %v3083_v12 = vsel %vm9524_vm7, %v3080_v35, %v3082_v22  ;;  %v3084_v52 = vsel %vm9525_vm13, %v3082_v22, %v3080_v35 }
 0x491   :  { %v3085_v7 = vmul.f32 %v3083_v12, %v9530_v19  ;;  %v3086_v31 = vmul.f32 %v3084_v52, %v9531_v1  ;;  %v3151_v52 = vld.sshfl [vmem:[#allocation1 + $0x8] sm:$0xff pattern:$0x75316420] }
 0x493   :  { %v3087_v34 = vadd.f32 %v3085_v7, %v3077_v5  ;;  %v3088_v10 = vadd.f32 %v3086_v31, %v3078_v24 }
 0x496   :  { %v3100_v2 = vpop.permute.xlu1 %3099 }
 0x497   :  { %v3092_v3 = vpop.permute.xlu0 %3091  ;;  %v3103_v38 = vsel %vm9534_vm1, %v3100_v2, %v3102_v20  ;;  %v3104_v18 = vsel %vm9535_vm2, %v3102_v20, %v3100_v2 }
 0x498   :  { %v3093_v11 = vsel %vm9532_vm14, %v3090_v28, %v3092_v3  ;;  %v3094_v44 = vsel %vm9533_vm15, %v3092_v3, %v3090_v28  ;;  %v3105_v26 = vmul.f32 %v3103_v38, %v9540_v58  ;;  %v3106_v17 = vmul.f32 %v3104_v18, %v9541_v8 }
 0x499   :  { %v3095_v39 = vmul.f32 %v3093_v11, %v9537_v29  ;;  %v3096_v63 = vmul.f32 %v3094_v44, %v9538_v43 }
 0x49b   :  { %v3097_v46 = vadd.f32 %v3095_v39, %v3087_v34  ;;  %v3098_v56 = vadd.f32 %v3096_v63, %v3088_v10 }
 0x49d   :  { %v3107_v42 = vadd.f32 %v3105_v26, %v3097_v46  ;;  %v3108_v25 = vadd.f32 %v3106_v17, %v3098_v56 }
 0x49f   :  { %v3283_v23 = vmul.f32 -1.442695, %v3107_v42  ;;  %v3284_v48 = vmul.f32 -1.442695, %v3108_v25 }
 0x4a1   :  { %3352 = vpow2.f32 %v3283_v23 }
 0x4a2   :  { %3354 = vpow2.f32 %v3284_v48 }
 0x4a7   :  { %v3353_v57 = vpop.eup %3352 }
 0x4a8   :  { %v3355_v21 = vpop.eup %3354  ;;  %v3115_v40 = vadd.f32 1.0, %v3353_v57 }
 0x4a9   :  { %v3116_v13 = vadd.f32 1.0, %v3355_v21 }
 0x4aa   :  { %3356 = vrcp.f32 %v3115_v40  ;;  %v3128_v32 = vand.u32 2147483648, %v3115_v40  ;;  %v3126_v4 = vand.u32 2147483647, %v3115_v40  ;;  %vm3122_vm12 = vweird.f32 %v3115_v40 }
 0x4ab   :  { %3358 = vrcp.f32 %v3116_v13  ;;  %v3143_v15 = vand.u32 2147483648, %v3116_v13  ;;  %v3141_v37 = vand.u32 2147483647, %v3116_v13  ;;  %vm3137_vm5 = vweird.f32 %v3116_v13 }
 0x4ac   :  { %v3129_v36 = vor.u32 1.1754944e-38, %v3128_v32  ;;  %vm3127_vm4 = vcmp.eq.f32.partialorder %v3126_v4, 8.507059e+37 }
 0x4ad   :  { %v3144_v45 = vor.u32 1.1754944e-38, %v3143_v15  ;;  %vm3142_vm11 = vcmp.eq.f32.partialorder %v3141_v37, 8.507059e+37 }
 0x4b0   :  { %v3357_v41 = vpop.eup %3356 }
 0x4b1   :  { %v3359_v0 = vpop.eup %3358  ;;  %v3118_v47 = vmul.f32 %v3357_v41, %v3115_v40  ;;  %vm3123_vm8 = vweird.f32 %v3357_v41 }
 0x4b2   :  { %v3133_v54 = vmul.f32 %v3359_v0, %v3116_v13  ;;  %vm3138_vm9 = vweird.f32 %v3359_v0  ;;  %vm3124_vm3 = vmor %vm3122_vm12, %vm3123_vm8 }
 0x4b3   :  { %v3119_v9 = vsub.f32 1.0, %v3118_v47  ;;  %vm3139_vm10 = vmor %vm3137_vm5, %vm3138_vm9 }
 0x4b4   :  { %v3134_v28 = vsub.f32 1.0, %v3133_v54 }
 0x4b5   :  { %v3120_v30 = vmul.f32 %v3357_v41, %v3119_v9 }
 0x4b6   :  { %v3135_v53 = vmul.f32 %v3359_v0, %v3134_v28 }
 0x4b7   :  { %v3121_v59 = vadd.f32 %v3357_v41, %v3120_v30 }
 0x4b8   :  { %v3136_v6 = vadd.f32 %v3359_v0, %v3135_v53 }
 0x4b9   :  { %v3125_v50 = vsel %vm3124_vm3, %v3357_v41, %v3121_v59 }
 0x4ba   :  { %v3130_v22 = vsel %vm3127_vm4, %v3129_v36, %v3125_v50  ;;  %v3140_v35 = vsel %vm3139_vm10, %v3359_v0, %v3136_v6 }
 0x4bb   :  { %v3145_v12 = vsel %vm3142_vm11, %v3144_v45, %v3140_v35  ;;  %v3147_v49 = vperm.slane %v3130_v22, 0 }
 0x4bc   :  { %v3148_v14 = vperm.slane %v3145_v12, 0 }
 0x4bd   :  { %v3154_v61 = vmul.f32 %v3150_v60, %v3147_v49 }
 0x4be   :  { %v3155_v62 = vmul.f32 %v3151_v52, %v3148_v14 }
 0x4c0   :  { %v3158_v55 = vrot.slane %v3155_v62, 4 }
 0x4c2   :  { %v3159_v33 = vsel %vm494_vm0, %v3154_v61, %v3158_v55 }
 0x4c3   :  { %3162 = vst [vmem:[#allocation10 + $0x8] sm:$0xff] %v3159_v33 }
 0x4c4   :  { %3175 = dma.vmem_to_hbm [thread:$0]  %s3168_s16, 256, %s3170_s24, [#allocation4], %s9544_s15, %s9544_s15, %s9543_s23  }
 0x4c5   :  { %3475 = dma.done.wait [#allocation4], 256  }
 0x4c6   :  { %3476 = vsyncadd [#allocation4], 4294967040 }
 0x4c7   :  { %3180 = vsyncpa [#allocation3], 1 }
 0x4c8   :  { %3181 = vsyncpa [#allocation7], 1 }
 0x4c9   :  { %3182 = vsyncpa [#allocation4], 1 }
 0x4ca   :  { %3183 = vsyncpa [#allocation5], 1 }

</bundles_post_ra>
